<compile_context>
chip_gen: v7x
topology: tpu7x:2x2x1
jax: 0.10.0
libtpu: 0.0.40
codegen_flags: <defaults>
</compile_context>

<pallas_src>
import functools
import math

import jax
import jax.numpy as jnp
from jax.experimental import pallas as pl
from jax.experimental.pallas import tpu as pltpu


_STATIC_UNROLL_MAX = 16  # above this, use lax.fori_loop(unroll=8) inside the block


# ----------------------------------------------------------------------------
# Fused bidirectional LSTM layer kernel (both directions, TB time steps / grid step)
# ----------------------------------------------------------------------------
def _bilstm_block_kernel(*refs, nhid, time_block, matmul_dtype, apply_mask):
    if apply_mask:
        (gxf_ref, gxb_ref, whf_ref, whb_ref, mf_ref, mb_ref,
         yf_ref, yb_ref, hf_ref, cf_ref, hb_ref, cb_ref) = refs
    else:
        (gxf_ref, gxb_ref, whf_ref, whb_ref,
         yf_ref, yb_ref, hf_ref, cf_ref, hb_ref, cb_ref) = refs
        mf_ref = mb_ref = None

    @pl.when(pl.program_id(0) == 0)
    def _():
        hf_ref[...] = jnp.zeros_like(hf_ref)
        cf_ref[...] = jnp.zeros_like(cf_ref)
        hb_ref[...] = jnp.zeros_like(hb_ref)
        cb_ref[...] = jnp.zeros_like(cb_ref)

    w_f = whf_ref[...]            # (nhid, 4*nhid) bf16, gate cols permuted [i,f,o,g]
    w_b = whb_ref[...]
    m_f = mf_ref[0] if apply_mask else None   # (batch, nhid) LockedDropout halves
    m_b = mb_ref[0] if apply_mask else None

    three_h = 3 * nhid

    def cell(gx, h, c, w):
        # gx already holds x @ W_ih + b (hoisted GEMM, bf16); only h @ W_hh runs here.
        gates = gx.astype(jnp.float32) + jnp.dot(
            h.astype(matmul_dtype), w, preferred_element_type=jnp.float32)
        # Permuted layout [i, f, o | g]: one wide sigmoid + one tanh (2 EUP pushes).
        ifo = jax.nn.sigmoid(gates[:, :three_h])
        g_g = jnp.tanh(gates[:, three_h:])
        i_g = ifo[:, 0 * nhid:1 * nhid]
        f_g = ifo[:, 1 * nhid:2 * nhid]
        o_g = ifo[:, 2 * nhid:3 * nhid]
        c_new = f_g * c + i_g * g_g
        h_new = o_g * jnp.tanh(c_new)
        return h_new, c_new

    def emit(y_ref, idx, h, m):
        v = h * m if apply_mask else h
        y_ref[idx] = v.astype(y_ref.dtype)

    # SSA carries: single scratch read before the loop, single write-back after it.
    h_f = hf_ref[...]
    c_f = cf_ref[...]
    h_b = hb_ref[...]
    c_b = cb_ref[...]

    if time_block <= _STATIC_UNROLL_MAX:
        for i in range(time_block):
            # forward direction: within-block time i (global time = block*TB + i)
            h_f, c_f = cell(gxf_ref[i], h_f, c_f, w_f)
            emit(yf_ref, i, h_f, m_f)
            # backward direction: block index_map reversed the block order, so we walk
            # this block back-to-front; stores land in natural time order.
            j = time_block - 1 - i
            h_b, c_b = cell(gxb_ref[j], h_b, c_b, w_b)
            emit(yb_ref, j, h_b, m_b)
    else:
        def body(i, carry):
            hf, cf, hb, cb = carry
            hf, cf = cell(gxf_ref[i], hf, cf, w_f)
            emit(yf_ref, i, hf, m_f)
            j = time_block - 1 - i
            hb, cb = cell(gxb_ref[j], hb, cb, w_b)
            emit(yb_ref, j, hb, m_b)
            return hf, cf, hb, cb

        h_f, c_f, h_b, c_b = jax.lax.fori_loop(
            0, time_block, body, (h_f, c_f, h_b, c_b), unroll=8)

    hf_ref[...] = h_f
    cf_ref[...] = c_f
    hb_ref[...] = h_b
    cb_ref[...] = c_b


def _round_up(x, m):
    return -(-x // m) * m


def _derive_vmem_limit(*, time_block, batch, nhid, apply_mask):
    """Estimate double-buffered VMEM footprint of one grid step, with headroom."""
    pad_b8 = _round_up(batch, 8)       # f32 sublane padding
    pad_b16 = _round_up(batch, 16)     # bf16 sublane padding
    pad_h = _round_up(nhid, 128)
    pad_4h = _round_up(4 * nhid, 128)
    gx = time_block * pad_b16 * pad_4h * 2          # bf16 input-gate block
    y = time_block * pad_b8 * pad_h * 4             # f32 output block
    w_hh = _round_up(nhid, 16) * pad_4h * 2         # bf16 recurrent weights
    mask = pad_b8 * pad_h * 4 if apply_mask else 0  # f32 dropout half
    scratch = 4 * pad_b8 * pad_h * 4                # h/c carries (f32)
    per_dir = 2 * (gx + y + w_hh + mask)            # x2: pipeline double buffering
    est = 2 * per_dir + scratch                     # x2: both directions
    # Clamp to a v7x-safe ceiling (64 MiB/TC physical); plenty for v5e/v6e.
    return int(min(max(2 * est, 16 * 1024 * 1024), 48 * 1024 * 1024))


def bilstm_layer(gx_f, gx_b, w_hh_f, w_hh_b, mask_f, mask_b,
                 *, nhid, time_block, matmul_dtype, apply_mask):
    """One fused bidirectional LSTM layer.

    gx_f, gx_b: (seq, batch, 4*nhid) bf16 precomputed input gates (x@W_ih + b),
                gate columns permuted to [i,f,o,g].
    w_hh_*:     (nhid, 4*nhid) bf16, same column permutation.
    mask_*:     (1, batch, nhid) f32 LockedDropout halves (only when apply_mask).
    Returns (y_f, y_b), each (seq, batch, nhid) f32, in natural time order.
    """
    seq, batch, four_h = gx_f.shape
    assert four_h == 4 * nhid and seq % time_block == 0
    nblocks = seq // time_block

    kernel = functools.partial(_bilstm_block_kernel, nhid=nhid,
                               time_block=time_block, matmul_dtype=matmul_dtype,
                               apply_mask=apply_mask)
    fwd_idx = lambda t: (t, 0, 0)
    bwd_idx = lambda t: (nblocks - 1 - t, 0, 0)
    const3 = lambda t: (0, 0, 0)
    const2 = lambda t: (0, 0)

    in_specs = [
        pl.BlockSpec((time_block, batch, 4 * nhid), fwd_idx),   # gx forward (bf16)
        pl.BlockSpec((time_block, batch, 4 * nhid), bwd_idx),   # gx backward (bf16)
        pl.BlockSpec((nhid, 4 * nhid), const2),                 # W_hh fwd (bf16)
        pl.BlockSpec((nhid, 4 * nhid), const2),                 # W_hh bwd (bf16)
    ]
    operands = [gx_f, gx_b, w_hh_f, w_hh_b]
    if apply_mask:
        in_specs += [pl.BlockSpec((1, batch, nhid), const3),    # dropout mask fwd half
                     pl.BlockSpec((1, batch, nhid), const3)]    # dropout mask bwd half
        operands += [mask_f, mask_b]

    vmem_limit = _derive_vmem_limit(time_block=time_block, batch=batch,
                                    nhid=nhid, apply_mask=apply_mask)

    return pl.pallas_call(
        kernel,
        out_shape=(jax.ShapeDtypeStruct((seq, batch, nhid), jnp.float32),
                   jax.ShapeDtypeStruct((seq, batch, nhid), jnp.float32)),
        grid_spec=pltpu.PrefetchScalarGridSpec(
            num_scalar_prefetch=0,
            grid=(nblocks,),
            in_specs=in_specs,
            out_specs=[
                pl.BlockSpec((time_block, batch, nhid), fwd_idx),
                pl.BlockSpec((time_block, batch, nhid), bwd_idx),
            ],
            scratch_shapes=[pltpu.VMEM((batch, nhid), jnp.float32)  # h_f, c_f, h_b, c_b
                            for _ in range(4)],
        ),
        compiler_params=pltpu.CompilerParams(
            dimension_semantics=("arbitrary",),        # recurrent carry -> sequential grid
            vmem_limit_bytes=vmem_limit,
        ),
    )(*operands)


# ----------------------------------------------------------------------------
# Hoisted input projection: one big GEMM per (layer, direction), done in XLA.
# Consumes the previous layer's two direction halves directly (no concat).
# Returns bf16 (bias added in f32, then cast) to halve the HBM intermediate.
# ----------------------------------------------------------------------------
def _input_gates(parts, w_ih, b, matmul_dtype):
    seq, batch = parts[0].shape[:2]
    acc = None
    off = 0
    for p in parts:
        k = p.shape[-1]
        w = w_ih[off:off + k].astype(matmul_dtype)
        x = p.reshape(seq * batch, k).astype(matmul_dtype)
        t = jnp.dot(x, w, preferred_element_type=jnp.float32)
        acc = t if acc is None else acc + t
        off += k
    assert off == w_ih.shape[0]
    return (acc + b).astype(matmul_dtype).reshape(seq, batch, -1)


def _pick_time_block(seq, want):
    tb = max(1, min(want, seq))
    while seq % tb:
        tb -= 1
    return tb


# ----------------------------------------------------------------------------
# Parameter init (deterministic, mirrors nn.LSTM uniform(-1/sqrt(nhid), 1/sqrt(nhid)))
# in PyTorch gate layout [i, f, g, o]; prepare_params() permutes to [i, f, o, g].
# ----------------------------------------------------------------------------
def init_lstm_params(key, ninp, nhid, nlayers):
    params = {}
    bound = 1.0 / math.sqrt(nhid)
    for layer in range(nlayers):
        in_size = ninp if layer == 0 else 2 * nhid
        for d in range(2):  # 0 = forward, 1 = backward
            key, k1, k2, k3, k4 = jax.random.split(key, 5)
            w_ih = jax.random.uniform(k1, (in_size, 4 * nhid), jnp.float32, -bound, bound)
            w_hh = jax.random.uniform(k2, (nhid, 4 * nhid), jnp.float32, -bound, bound)
            b_ih = jax.random.uniform(k3, (4 * nhid,), jnp.float32, -bound, bound)
            b_hh = jax.random.uniform(k4, (4 * nhid,), jnp.float32, -bound, bound)
            params[(layer, d)] = dict(w_ih=w_ih, w_hh=w_hh, b=b_ih + b_hh)
    return params


def prepare_params(params, nhid, matmul_dtype):
    """One-time re-layout: permute gate columns [i,f,g,o] -> [i,f,o,g], cast W_hh."""
    def perm(w):
        return jnp.concatenate([w[..., 0 * nhid:1 * nhid],
                                w[..., 1 * nhid:2 * nhid],
                                w[..., 3 * nhid:4 * nhid],
                                w[..., 2 * nhid:3 * nhid]], axis=-1)
    out = {}
    for k, p in params.items():
        out[k] = dict(w_ih=perm(p["w_ih"]),
                      w_hh=perm(p["w_hh"]).astype(matmul_dtype),
                      b=perm(p["b"]))
    return out


# ----------------------------------------------------------------------------
# Full RNN_encoder forward (Pallas)
# ----------------------------------------------------------------------------
def rnn_encoder_forward(emb, params, dropout_mask, *, nhid, nlayers,
                        time_block=8, matmul_dtype=jnp.bfloat16):
    seq, batch, _ = emb.shape
    tb = _pick_time_block(seq, time_block)
    parts = [emb]
    for layer in range(nlayers):
        pf, pb = params[(layer, 0)], params[(layer, 1)]
        gx_f = _input_gates(parts, pf["w_ih"], pf["b"], matmul_dtype)
        gx_b = _input_gates(parts, pb["w_ih"], pb["b"], matmul_dtype)
        last = layer == nlayers - 1
        m_f = dropout_mask[:, :, :nhid] if last else None
        m_b = dropout_mask[:, :, nhid:] if last else None
        y_f, y_b = bilstm_layer(
            gx_f, gx_b, pf["w_hh"], pb["w_hh"], m_f, m_b,
            nhid=nhid, time_block=tb, matmul_dtype=matmul_dtype, apply_mask=last)
        parts = [y_f, y_b]
    # Single concat at the very end (dropout already fused into the final layer's stores).
    return jnp.concatenate(parts, axis=-1)


# ----------------------------------------------------------------------------
# Pure-JAX reference (lax.scan) mirroring the same hoisting / casting / layout
# ----------------------------------------------------------------------------
def _ref_lstm_scan(gx, w_hh_m, nhid, reverse, matmul_dtype):
    xs = gx[::-1] if reverse else gx
    three_h = 3 * nhid

    def step(carry, g):
        h, c = carry
        gates = g.astype(jnp.float32) + jnp.dot(
            h.astype(matmul_dtype), w_hh_m, preferred_element_type=jnp.float32)
        ifo = jax.nn.sigmoid(gates[:, :three_h])
        gg = jnp.tanh(gates[:, three_h:])
        i = ifo[:, 0 * nhid:1 * nhid]
        f = ifo[:, 1 * nhid:2 * nhid]
        o = ifo[:, 2 * nhid:3 * nhid]
        c = f * c + i * gg
        h = o * jnp.tanh(c)
        return (h, c), h

    batch = gx.shape[1]
    h0 = jnp.zeros((batch, nhid), jnp.float32)
    c0 = jnp.zeros((batch, nhid), jnp.float32)
    _, ys = jax.lax.scan(step, (h0, c0), xs)
    return ys[::-1] if reverse else ys


def rnn_encoder_ref(emb, params, dropout_mask, *, nhid, nlayers,
                    matmul_dtype=jnp.bfloat16):
    parts = [emb]
    for layer in range(nlayers):
        pf, pb = params[(layer, 0)], params[(layer, 1)]
        gx_f = _input_gates(parts, pf["w_ih"], pf["b"], matmul_dtype)
        gx_b = _input_gates(parts, pb["w_ih"], pb["b"], matmul_dtype)
        y_f = _ref_lstm_scan(gx_f, pf["w_hh"], nhid, False, matmul_dtype)
        y_b = _ref_lstm_scan(gx_b, pb["w_hh"], nhid, True, matmul_dtype)
        parts = [y_f, y_b]
    return jnp.concatenate(parts, axis=-1) * dropout_mask


# ----------------------------------------------------------------------------
if __name__ == "__main__":
    # Lane/sublane-dense small shapes: batch=8 (f32 sublanes), nhid=128, 4*nhid=512.
    # For production throughput, raise batch to 32-128+ (MXU row utilization).
    seq_len, batch, ninp, nhid, nlayers = 16, 8, 64, 128, 2
    dropout_p = 0.5
    matmul_dtype = jnp.bfloat16

    key = jax.random.PRNGKey(0)
    k_emb, k_params, k_drop = jax.random.split(key, 3)

    emb = jax.random.normal(k_emb, (seq_len, batch, ninp), jnp.float32)
    params = prepare_params(init_lstm_params(k_params, ninp, nhid, nlayers),
                            nhid, matmul_dtype)

    # LockedDropout mask: (1, batch, 2*nhid), bernoulli(1-p)/(1-p), broadcast over time.
    keep = jax.random.bernoulli(k_drop, 1.0 - dropout_p, (1, batch, 2 * nhid))
    dropout_mask = keep.astype(jnp.float32) / (1.0 - dropout_p)

    fwd = jax.jit(functools.partial(
        rnn_encoder_forward, nhid=nhid, nlayers=nlayers,
        time_block=8, matmul_dtype=matmul_dtype))
    out = jax.block_until_ready(fwd(emb, params, dropout_mask))

    ref = jax.block_until_ready(
        rnn_encoder_ref(emb, params, dropout_mask, nhid=nhid, nlayers=nlayers,
                        matmul_dtype=matmul_dtype))

    assert out.shape == (seq_len, batch, 2 * nhid)
    assert jnp.allclose(out, ref, rtol=5e-3, atol=5e-3), (
        "mismatch vs pure-JAX reference; max abs diff = "
        f"{float(jnp.max(jnp.abs(out - ref)))}")

    print("KERNEL_OK")
</pallas_src>

<mosaic_0001>
module attributes {stable_mosaic.version = 11 : i64} {
  func.func @_bilstm_block_kernel(%arg0: i32, %arg1: memref<8x8x512xbf16, #tpu.memory_space<vmem>>, %arg2: memref<8x8x512xbf16, #tpu.memory_space<vmem>>, %arg3: memref<128x512xbf16, #tpu.memory_space<vmem>>, %arg4: memref<128x512xbf16, #tpu.memory_space<vmem>>, %arg5: memref<8x8x128xf32, #tpu.memory_space<vmem>>, %arg6: memref<8x8x128xf32, #tpu.memory_space<vmem>>, %arg7: memref<8x128xf32, #tpu.memory_space<vmem>>, %arg8: memref<8x128xf32, #tpu.memory_space<vmem>>, %arg9: memref<8x128xf32, #tpu.memory_space<vmem>>, %arg10: memref<8x128xf32, #tpu.memory_space<vmem>>) attributes {dimension_semantics = [#tpu.dimension_semantics<arbitrary>], iteration_bounds = array<i64: 2>, scalar_prefetch = 0 : i64, scratch_operands = 4 : i64, tpu.core_type = #tpu.core_type<tc>, window_params = [{transform_indices = @transform_0, window_bounds = array<i64: 8, 8, 512>}, {transform_indices = @transform_1, window_bounds = array<i64: 8, 8, 512>}, {pipeline_mode = #tpu.pipeline_mode<synchronous>, transform_indices = @transform_2, window_bounds = array<i64: 128, 512>}, {pipeline_mode = #tpu.pipeline_mode<synchronous>, transform_indices = @transform_3, window_bounds = array<i64: 128, 512>}, {transform_indices = @transform_4, window_bounds = array<i64: 8, 8, 128>}, {transform_indices = @transform_5, window_bounds = array<i64: 8, 8, 128>}]} {
    %c0_i32 = arith.constant 0 : i32
    %0 = arith.cmpi eq, %arg0, %c0_i32 : i32
    %1 = arith.extui %0 : i1 to i32
    %c0_i32_0 = arith.constant 0 : i32
    %2 = arith.cmpi ne, %1, %c0_i32_0 : i32
    scf.if %2 {
      %cst_140 = arith.constant 0.000000e+00 : f32
      %413 = vector.broadcast %cst_140 : f32 to vector<8x128xf32>
      %c0_141 = arith.constant 0 : index
      %c0_142 = arith.constant 0 : index
      %414 = vector.load %arg7[%c0_141, %c0_142] : memref<8x128xf32, #tpu.memory_space<vmem>>, vector<8x128xf32>
      tpu.vector_store %arg7[%c0_141, %c0_142], %413 {strides = array<i32>} : memref<8x128xf32, #tpu.memory_space<vmem>>, vector<8x128xf32>,
      %cst_143 = arith.constant 0.000000e+00 : f32
      %415 = vector.broadcast %cst_143 : f32 to vector<8x128xf32>
      %c0_144 = arith.constant 0 : index
      %c0_145 = arith.constant 0 : index
      %416 = vector.load %arg8[%c0_144, %c0_145] : memref<8x128xf32, #tpu.memory_space<vmem>>, vector<8x128xf32>
      tpu.vector_store %arg8[%c0_144, %c0_145], %415 {strides = array<i32>} : memref<8x128xf32, #tpu.memory_space<vmem>>, vector<8x128xf32>,
      %cst_146 = arith.constant 0.000000e+00 : f32
      %417 = vector.broadcast %cst_146 : f32 to vector<8x128xf32>
      %c0_147 = arith.constant 0 : index
      %c0_148 = arith.constant 0 : index
      %418 = vector.load %arg9[%c0_147, %c0_148] : memref<8x128xf32, #tpu.memory_space<vmem>>, vector<8x128xf32>
      tpu.vector_store %arg9[%c0_147, %c0_148], %417 {strides = array<i32>} : memref<8x128xf32, #tpu.memory_space<vmem>>, vector<8x128xf32>,
      %cst_149 = arith.constant 0.000000e+00 : f32
      %419 = vector.broadcast %cst_149 : f32 to vector<8x128xf32>
      %c0_150 = arith.constant 0 : index
      %c0_151 = arith.constant 0 : index
      %420 = vector.load %arg10[%c0_150, %c0_151] : memref<8x128xf32, #tpu.memory_space<vmem>>, vector<8x128xf32>
      tpu.vector_store %arg10[%c0_150, %c0_151], %419 {strides = array<i32>} : memref<8x128xf32, #tpu.memory_space<vmem>>, vector<8x128xf32>,
    } else {
    }
    %c0 = arith.constant 0 : index
    %c0_1 = arith.constant 0 : index
    %3 = vector.load %arg3[%c0, %c0_1] : memref<128x512xbf16, #tpu.memory_space<vmem>>, vector<128x512xbf16>
    %c0_2 = arith.constant 0 : index
    %c0_3 = arith.constant 0 : index
    %4 = vector.load %arg4[%c0_2, %c0_3] : memref<128x512xbf16, #tpu.memory_space<vmem>>, vector<128x512xbf16>
    %c0_4 = arith.constant 0 : index
    %c0_5 = arith.constant 0 : index
    %5 = vector.load %arg7[%c0_4, %c0_5] : memref<8x128xf32, #tpu.memory_space<vmem>>, vector<8x128xf32>
    %c0_6 = arith.constant 0 : index
    %c0_7 = arith.constant 0 : index
    %6 = vector.load %arg8[%c0_6, %c0_7] : memref<8x128xf32, #tpu.memory_space<vmem>>, vector<8x128xf32>
    %c0_8 = arith.constant 0 : index
    %c0_9 = arith.constant 0 : index
    %7 = vector.load %arg9[%c0_8, %c0_9] : memref<8x128xf32, #tpu.memory_space<vmem>>, vector<8x128xf32>
    %c0_10 = arith.constant 0 : index
    %c0_11 = arith.constant 0 : index
    %8 = vector.load %arg10[%c0_10, %c0_11] : memref<8x128xf32, #tpu.memory_space<vmem>>, vector<8x128xf32>
    %c0_12 = arith.constant 0 : index
    %c0_13 = arith.constant 0 : index
    %c0_14 = arith.constant 0 : index
    %9 = vector.load %arg1[%c0_12, %c0_13, %c0_14] : memref<8x8x512xbf16, #tpu.memory_space<vmem>>, vector<1x8x512xbf16>
    %10 = vector.shape_cast %9 : vector<1x8x512xbf16> to vector<8x512xbf16>
    %11 = arith.extf %10 : vector<8x512xbf16> to vector<8x512xf32>
    %12 = arith.truncf %5 : vector<8x128xf32> to vector<8x128xbf16>
    %cst = arith.constant dense<0.000000e+00> : vector<8x512xf32>
    %13 = tpu.matmul %12, %3, %cst {dimension_numbers = #tpu.dot_dimension_numbers<[1], [0], [0], [1], [0, 0, 1, 1], [], []>} : vector<8x128xbf16>, vector<128x512xbf16>, vector<8x512xf32> -> vector<8x512xf32>
    %14 = arith.addf %11, %13 : vector<8x512xf32>
    %15 = vector.extract_strided_slice %14 {offsets = [0, 0], sizes = [8, 384], strides = [1, 1]} : vector<8x512xf32> to vector<8x384xf32>
    %16 = arith.negf %15 : vector<8x384xf32>
    %17 = math.exp %16 : vector<8x384xf32>
    %cst_15 = arith.constant 1.000000e+00 : f32
    %18 = vector.broadcast %cst_15 : f32 to vector<8x384xf32>
    %19 = arith.addf %18, %17 : vector<8x384xf32>
    %20 = arith.divf %18, %19 : vector<8x384xf32>
    %21 = vector.extract_strided_slice %14 {offsets = [0, 384], sizes = [8, 128], strides = [1, 1]} : vector<8x512xf32> to vector<8x128xf32>
    %22 = math.tanh %21 : vector<8x128xf32>
    %23 = vector.extract_strided_slice %20 {offsets = [0, 0], sizes = [8, 128], strides = [1, 1]} : vector<8x384xf32> to vector<8x128xf32>
    %24 = vector.extract_strided_slice %20 {offsets = [0, 128], sizes = [8, 128], strides = [1, 1]} : vector<8x384xf32> to vector<8x128xf32>
    %25 = vector.extract_strided_slice %20 {offsets = [0, 256], sizes = [8, 128], strides = [1, 1]} : vector<8x384xf32> to vector<8x128xf32>
    %26 = arith.mulf %24, %6 : vector<8x128xf32>
    %27 = arith.mulf %23, %22 : vector<8x128xf32>
    %28 = arith.addf %26, %27 : vector<8x128xf32>
    %29 = math.tanh %28 : vector<8x128xf32>
    %30 = arith.mulf %25, %29 : vector<8x128xf32>
    %c0_16 = arith.constant 0 : index
    %c0_17 = arith.constant 0 : index
    %c0_18 = arith.constant 0 : index
    %31 = vector.load %arg5[%c0_16, %c0_17, %c0_18] : memref<8x8x128xf32, #tpu.memory_space<vmem>>, vector<1x8x128xf32>
    %32 = vector.shape_cast %31 : vector<1x8x128xf32> to vector<8x128xf32>
    %33 = vector.shape_cast %30 : vector<8x128xf32> to vector<1x8x128xf32>
    tpu.vector_store %arg5[%c0_16, %c0_17, %c0_18], %33 {strides = array<i32>} : memref<8x8x128xf32, #tpu.memory_space<vmem>>, vector<1x8x128xf32>,
    %c7 = arith.constant 7 : index
    %c0_19 = arith.constant 0 : index
    %c0_20 = arith.constant 0 : index
    %34 = vector.load %arg2[%c7, %c0_19, %c0_20] : memref<8x8x512xbf16, #tpu.memory_space<vmem>>, vector<1x8x512xbf16>
    %35 = vector.shape_cast %34 : vector<1x8x512xbf16> to vector<8x512xbf16>
    %36 = arith.extf %35 : vector<8x512xbf16> to vector<8x512xf32>
    %37 = arith.truncf %7 : vector<8x128xf32> to vector<8x128xbf16>
    %cst_21 = arith.constant dense<0.000000e+00> : vector<8x512xf32>
    %38 = tpu.matmul %37, %4, %cst_21 {dimension_numbers = #tpu.dot_dimension_numbers<[1], [0], [0], [1], [0, 0, 1, 1], [], []>} : vector<8x128xbf16>, vector<128x512xbf16>, vector<8x512xf32> -> vector<8x512xf32>
    %39 = arith.addf %36, %38 : vector<8x512xf32>
    %40 = vector.extract_strided_slice %39 {offsets = [0, 0], sizes = [8, 384], strides = [1, 1]} : vector<8x512xf32> to vector<8x384xf32>
    %41 = arith.negf %40 : vector<8x384xf32>
    %42 = math.exp %41 : vector<8x384xf32>
    %cst_22 = arith.constant 1.000000e+00 : f32
    %43 = vector.broadcast %cst_22 : f32 to vector<8x384xf32>
    %44 = arith.addf %43, %42 : vector<8x384xf32>
    %45 = arith.divf %43, %44 : vector<8x384xf32>
    %46 = vector.extract_strided_slice %39 {offsets = [0, 384], sizes = [8, 128], strides = [1, 1]} : vector<8x512xf32> to vector<8x128xf32>
    %47 = math.tanh %46 : vector<8x128xf32>
    %48 = vector.extract_strided_slice %45 {offsets = [0, 0], sizes = [8, 128], strides = [1, 1]} : vector<8x384xf32> to vector<8x128xf32>
    %49 = vector.extract_strided_slice %45 {offsets = [0, 128], sizes = [8, 128], strides = [1, 1]} : vector<8x384xf32> to vector<8x128xf32>
    %50 = vector.extract_strided_slice %45 {offsets = [0, 256], sizes = [8, 128], strides = [1, 1]} : vector<8x384xf32> to vector<8x128xf32>
    %51 = arith.mulf %49, %8 : vector<8x128xf32>
    %52 = arith.mulf %48, %47 : vector<8x128xf32>
    %53 = arith.addf %51, %52 : vector<8x128xf32>
    %54 = math.tanh %53 : vector<8x128xf32>
    %55 = arith.mulf %50, %54 : vector<8x128xf32>
    %c7_23 = arith.constant 7 : index
    %c0_24 = arith.constant 0 : index
    %c0_25 = arith.constant 0 : index
    %56 = vector.load %arg6[%c7_23, %c0_24, %c0_25] : memref<8x8x128xf32, #tpu.memory_space<vmem>>, vector<1x8x128xf32>
    %57 = vector.shape_cast %56 : vector<1x8x128xf32> to vector<8x128xf32>
    %58 = vector.shape_cast %55 : vector<8x128xf32> to vector<1x8x128xf32>
    tpu.vector_store %arg6[%c7_23, %c0_24, %c0_25], %58 {strides = array<i32>} : memref<8x8x128xf32, #tpu.memory_space<vmem>>, vector<1x8x128xf32>,
    %c1 = arith.constant 1 : index
    %c0_26 = arith.constant 0 : index
    %c0_27 = arith.constant 0 : index
    %59 = vector.load %arg1[%c1, %c0_26, %c0_27] : memref<8x8x512xbf16, #tpu.memory_space<vmem>>, vector<1x8x512xbf16>
    %60 = vector.shape_cast %59 : vector<1x8x512xbf16> to vector<8x512xbf16>
    %61 = arith.extf %60 : vector<8x512xbf16> to vector<8x512xf32>
    %62 = arith.truncf %30 : vector<8x128xf32> to vector<8x128xbf16>
    %cst_28 = arith.constant dense<0.000000e+00> : vector<8x512xf32>
    %63 = tpu.matmul %62, %3, %cst_28 {dimension_numbers = #tpu.dot_dimension_numbers<[1], [0], [0], [1], [0, 0, 1, 1], [], []>} : vector<8x128xbf16>, vector<128x512xbf16>, vector<8x512xf32> -> vector<8x512xf32>
    %64 = arith.addf %61, %63 : vector<8x512xf32>
    %65 = vector.extract_strided_slice %64 {offsets = [0, 0], sizes = [8, 384], strides = [1, 1]} : vector<8x512xf32> to vector<8x384xf32>
    %66 = arith.negf %65 : vector<8x384xf32>
    %67 = math.exp %66 : vector<8x384xf32>
    %cst_29 = arith.constant 1.000000e+00 : f32
    %68 = vector.broadcast %cst_29 : f32 to vector<8x384xf32>
    %69 = arith.addf %68, %67 : vector<8x384xf32>
    %70 = arith.divf %68, %69 : vector<8x384xf32>
    %71 = vector.extract_strided_slice %64 {offsets = [0, 384], sizes = [8, 128], strides = [1, 1]} : vector<8x512xf32> to vector<8x128xf32>
    %72 = math.tanh %71 : vector<8x128xf32>
    %73 = vector.extract_strided_slice %70 {offsets = [0, 0], sizes = [8, 128], strides = [1, 1]} : vector<8x384xf32> to vector<8x128xf32>
    %74 = vector.extract_strided_slice %70 {offsets = [0, 128], sizes = [8, 128], strides = [1, 1]} : vector<8x384xf32> to vector<8x128xf32>
    %75 = vector.extract_strided_slice %70 {offsets = [0, 256], sizes = [8, 128], strides = [1, 1]} : vector<8x384xf32> to vector<8x128xf32>
    %76 = arith.mulf %74, %28 : vector<8x128xf32>
    %77 = arith.mulf %73, %72 : vector<8x128xf32>
    %78 = arith.addf %76, %77 : vector<8x128xf32>
    %79 = math.tanh %78 : vector<8x128xf32>
    %80 = arith.mulf %75, %79 : vector<8x128xf32>
    %c1_30 = arith.constant 1 : index
    %c0_31 = arith.constant 0 : index
    %c0_32 = arith.constant 0 : index
    %81 = vector.load %arg5[%c1_30, %c0_31, %c0_32] : memref<8x8x128xf32, #tpu.memory_space<vmem>>, vector<1x8x128xf32>
    %82 = vector.shape_cast %81 : vector<1x8x128xf32> to vector<8x128xf32>
    %83 = vector.shape_cast %80 : vector<8x128xf32> to vector<1x8x128xf32>
    tpu.vector_store %arg5[%c1_30, %c0_31, %c0_32], %83 {strides = array<i32>} : memref<8x8x128xf32, #tpu.memory_space<vmem>>, vector<1x8x128xf32>,
    %c6 = arith.constant 6 : index
    %c0_33 = arith.constant 0 : index
    %c0_34 = arith.constant 0 : index
    %84 = vector.load %arg2[%c6, %c0_33, %c0_34] : memref<8x8x512xbf16, #tpu.memory_space<vmem>>, vector<1x8x512xbf16>
    %85 = vector.shape_cast %84 : vector<1x8x512xbf16> to vector<8x512xbf16>
    %86 = arith.extf %85 : vector<8x512xbf16> to vector<8x512xf32>
    %87 = arith.truncf %55 : vector<8x128xf32> to vector<8x128xbf16>
    %cst_35 = arith.constant dense<0.000000e+00> : vector<8x512xf32>
    %88 = tpu.matmul %87, %4, %cst_35 {dimension_numbers = #tpu.dot_dimension_numbers<[1], [0], [0], [1], [0, 0, 1, 1], [], []>} : vector<8x128xbf16>, vector<128x512xbf16>, vector<8x512xf32> -> vector<8x512xf32>
    %89 = arith.addf %86, %88 : vector<8x512xf32>
    %90 = vector.extract_strided_slice %89 {offsets = [0, 0], sizes = [8, 384], strides = [1, 1]} : vector<8x512xf32> to vector<8x384xf32>
    %91 = arith.negf %90 : vector<8x384xf32>
    %92 = math.exp %91 : vector<8x384xf32>
    %cst_36 = arith.constant 1.000000e+00 : f32
    %93 = vector.broadcast %cst_36 : f32 to vector<8x384xf32>
    %94 = arith.addf %93, %92 : vector<8x384xf32>
    %95 = arith.divf %93, %94 : vector<8x384xf32>
    %96 = vector.extract_strided_slice %89 {offsets = [0, 384], sizes = [8, 128], strides = [1, 1]} : vector<8x512xf32> to vector<8x128xf32>
    %97 = math.tanh %96 : vector<8x128xf32>
    %98 = vector.extract_strided_slice %95 {offsets = [0, 0], sizes = [8, 128], strides = [1, 1]} : vector<8x384xf32> to vector<8x128xf32>
    %99 = vector.extract_strided_slice %95 {offsets = [0, 128], sizes = [8, 128], strides = [1, 1]} : vector<8x384xf32> to vector<8x128xf32>
    %100 = vector.extract_strided_slice %95 {offsets = [0, 256], sizes = [8, 128], strides = [1, 1]} : vector<8x384xf32> to vector<8x128xf32>
    %101 = arith.mulf %99, %53 : vector<8x128xf32>
    %102 = arith.mulf %98, %97 : vector<8x128xf32>
    %103 = arith.addf %101, %102 : vector<8x128xf32>
    %104 = math.tanh %103 : vector<8x128xf32>
    %105 = arith.mulf %100, %104 : vector<8x128xf32>
    %c6_37 = arith.constant 6 : index
    %c0_38 = arith.constant 0 : index
    %c0_39 = arith.constant 0 : index
    %106 = vector.load %arg6[%c6_37, %c0_38, %c0_39] : memref<8x8x128xf32, #tpu.memory_space<vmem>>, vector<1x8x128xf32>
    %107 = vector.shape_cast %106 : vector<1x8x128xf32> to vector<8x128xf32>
    %108 = vector.shape_cast %105 : vector<8x128xf32> to vector<1x8x128xf32>
    tpu.vector_store %arg6[%c6_37, %c0_38, %c0_39], %108 {strides = array<i32>} : memref<8x8x128xf32, #tpu.memory_space<vmem>>, vector<1x8x128xf32>,
    %c2 = arith.constant 2 : index
    %c0_40 = arith.constant 0 : index
    %c0_41 = arith.constant 0 : index
    %109 = vector.load %arg1[%c2, %c0_40, %c0_41] : memref<8x8x512xbf16, #tpu.memory_space<vmem>>, vector<1x8x512xbf16>
    %110 = vector.shape_cast %109 : vector<1x8x512xbf16> to vector<8x512xbf16>
    %111 = arith.extf %110 : vector<8x512xbf16> to vector<8x512xf32>
    %112 = arith.truncf %80 : vector<8x128xf32> to vector<8x128xbf16>
    %cst_42 = arith.constant dense<0.000000e+00> : vector<8x512xf32>
    %113 = tpu.matmul %112, %3, %cst_42 {dimension_numbers = #tpu.dot_dimension_numbers<[1], [0], [0], [1], [0, 0, 1, 1], [], []>} : vector<8x128xbf16>, vector<128x512xbf16>, vector<8x512xf32> -> vector<8x512xf32>
    %114 = arith.addf %111, %113 : vector<8x512xf32>
    %115 = vector.extract_strided_slice %114 {offsets = [0, 0], sizes = [8, 384], strides = [1, 1]} : vector<8x512xf32> to vector<8x384xf32>
    %116 = arith.negf %115 : vector<8x384xf32>
    %117 = math.exp %116 : vector<8x384xf32>
    %cst_43 = arith.constant 1.000000e+00 : f32
    %118 = vector.broadcast %cst_43 : f32 to vector<8x384xf32>
    %119 = arith.addf %118, %117 : vector<8x384xf32>
    %120 = arith.divf %118, %119 : vector<8x384xf32>
    %121 = vector.extract_strided_slice %114 {offsets = [0, 384], sizes = [8, 128], strides = [1, 1]} : vector<8x512xf32> to vector<8x128xf32>
    %122 = math.tanh %121 : vector<8x128xf32>
    %123 = vector.extract_strided_slice %120 {offsets = [0, 0], sizes = [8, 128], strides = [1, 1]} : vector<8x384xf32> to vector<8x128xf32>
    %124 = vector.extract_strided_slice %120 {offsets = [0, 128], sizes = [8, 128], strides = [1, 1]} : vector<8x384xf32> to vector<8x128xf32>
    %125 = vector.extract_strided_slice %120 {offsets = [0, 256], sizes = [8, 128], strides = [1, 1]} : vector<8x384xf32> to vector<8x128xf32>
    %126 = arith.mulf %124, %78 : vector<8x128xf32>
    %127 = arith.mulf %123, %122 : vector<8x128xf32>
    %128 = arith.addf %126, %127 : vector<8x128xf32>
    %129 = math.tanh %128 : vector<8x128xf32>
    %130 = arith.mulf %125, %129 : vector<8x128xf32>
    %c2_44 = arith.constant 2 : index
    %c0_45 = arith.constant 0 : index
    %c0_46 = arith.constant 0 : index
    %131 = vector.load %arg5[%c2_44, %c0_45, %c0_46] : memref<8x8x128xf32, #tpu.memory_space<vmem>>, vector<1x8x128xf32>
    %132 = vector.shape_cast %131 : vector<1x8x128xf32> to vector<8x128xf32>
    %133 = vector.shape_cast %130 : vector<8x128xf32> to vector<1x8x128xf32>
    tpu.vector_store %arg5[%c2_44, %c0_45, %c0_46], %133 {strides = array<i32>} : memref<8x8x128xf32, #tpu.memory_space<vmem>>, vector<1x8x128xf32>,
    %c5 = arith.constant 5 : index
    %c0_47 = arith.constant 0 : index
    %c0_48 = arith.constant 0 : index
    %134 = vector.load %arg2[%c5, %c0_47, %c0_48] : memref<8x8x512xbf16, #tpu.memory_space<vmem>>, vector<1x8x512xbf16>
    %135 = vector.shape_cast %134 : vector<1x8x512xbf16> to vector<8x512xbf16>
    %136 = arith.extf %135 : vector<8x512xbf16> to vector<8x512xf32>
    %137 = arith.truncf %105 : vector<8x128xf32> to vector<8x128xbf16>
    %cst_49 = arith.constant dense<0.000000e+00> : vector<8x512xf32>
    %138 = tpu.matmul %137, %4, %cst_49 {dimension_numbers = #tpu.dot_dimension_numbers<[1], [0], [0], [1], [0, 0, 1, 1], [], []>} : vector<8x128xbf16>, vector<128x512xbf16>, vector<8x512xf32> -> vector<8x512xf32>
    %139 = arith.addf %136, %138 : vector<8x512xf32>
    %140 = vector.extract_strided_slice %139 {offsets = [0, 0], sizes = [8, 384], strides = [1, 1]} : vector<8x512xf32> to vector<8x384xf32>
    %141 = arith.negf %140 : vector<8x384xf32>
    %142 = math.exp %141 : vector<8x384xf32>
    %cst_50 = arith.constant 1.000000e+00 : f32
    %143 = vector.broadcast %cst_50 : f32 to vector<8x384xf32>
    %144 = arith.addf %143, %142 : vector<8x384xf32>
    %145 = arith.divf %143, %144 : vector<8x384xf32>
    %146 = vector.extract_strided_slice %139 {offsets = [0, 384], sizes = [8, 128], strides = [1, 1]} : vector<8x512xf32> to vector<8x128xf32>
    %147 = math.tanh %146 : vector<8x128xf32>
    %148 = vector.extract_strided_slice %145 {offsets = [0, 0], sizes = [8, 128], strides = [1, 1]} : vector<8x384xf32> to vector<8x128xf32>
    %149 = vector.extract_strided_slice %145 {offsets = [0, 128], sizes = [8, 128], strides = [1, 1]} : vector<8x384xf32> to vector<8x128xf32>
    %150 = vector.extract_strided_slice %145 {offsets = [0, 256], sizes = [8, 128], strides = [1, 1]} : vector<8x384xf32> to vector<8x128xf32>
    %151 = arith.mulf %149, %103 : vector<8x128xf32>
    %152 = arith.mulf %148, %147 : vector<8x128xf32>
    %153 = arith.addf %151, %152 : vector<8x128xf32>
    %154 = math.tanh %153 : vector<8x128xf32>
    %155 = arith.mulf %150, %154 : vector<8x128xf32>
    %c5_51 = arith.constant 5 : index
    %c0_52 = arith.constant 0 : index
    %c0_53 = arith.constant 0 : index
    %156 = vector.load %arg6[%c5_51, %c0_52, %c0_53] : memref<8x8x128xf32, #tpu.memory_space<vmem>>, vector<1x8x128xf32>
    %157 = vector.shape_cast %156 : vector<1x8x128xf32> to vector<8x128xf32>
    %158 = vector.shape_cast %155 : vector<8x128xf32> to vector<1x8x128xf32>
    tpu.vector_store %arg6[%c5_51, %c0_52, %c0_53], %158 {strides = array<i32>} : memref<8x8x128xf32, #tpu.memory_space<vmem>>, vector<1x8x128xf32>,
    %c3 = arith.constant 3 : index
    %c0_54 = arith.constant 0 : index
    %c0_55 = arith.constant 0 : index
    %159 = vector.load %arg1[%c3, %c0_54, %c0_55] : memref<8x8x512xbf16, #tpu.memory_space<vmem>>, vector<1x8x512xbf16>
    %160 = vector.shape_cast %159 : vector<1x8x512xbf16> to vector<8x512xbf16>
    %161 = arith.extf %160 : vector<8x512xbf16> to vector<8x512xf32>
    %162 = arith.truncf %130 : vector<8x128xf32> to vector<8x128xbf16>
    %cst_56 = arith.constant dense<0.000000e+00> : vector<8x512xf32>
    %163 = tpu.matmul %162, %3, %cst_56 {dimension_numbers = #tpu.dot_dimension_numbers<[1], [0], [0], [1], [0, 0, 1, 1], [], []>} : vector<8x128xbf16>, vector<128x512xbf16>, vector<8x512xf32> -> vector<8x512xf32>
    %164 = arith.addf %161, %163 : vector<8x512xf32>
    %165 = vector.extract_strided_slice %164 {offsets = [0, 0], sizes = [8, 384], strides = [1, 1]} : vector<8x512xf32> to vector<8x384xf32>
    %166 = arith.negf %165 : vector<8x384xf32>
    %167 = math.exp %166 : vector<8x384xf32>
    %cst_57 = arith.constant 1.000000e+00 : f32
    %168 = vector.broadcast %cst_57 : f32 to vector<8x384xf32>
    %169 = arith.addf %168, %167 : vector<8x384xf32>
    %170 = arith.divf %168, %169 : vector<8x384xf32>
    %171 = vector.extract_strided_slice %164 {offsets = [0, 384], sizes = [8, 128], strides = [1, 1]} : vector<8x512xf32> to vector<8x128xf32>
    %172 = math.tanh %171 : vector<8x128xf32>
    %173 = vector.extract_strided_slice %170 {offsets = [0, 0], sizes = [8, 128], strides = [1, 1]} : vector<8x384xf32> to vector<8x128xf32>
    %174 = vector.extract_strided_slice %170 {offsets = [0, 128], sizes = [8, 128], strides = [1, 1]} : vector<8x384xf32> to vector<8x128xf32>
    %175 = vector.extract_strided_slice %170 {offsets = [0, 256], sizes = [8, 128], strides = [1, 1]} : vector<8x384xf32> to vector<8x128xf32>
    %176 = arith.mulf %174, %128 : vector<8x128xf32>
    %177 = arith.mulf %173, %172 : vector<8x128xf32>
    %178 = arith.addf %176, %177 : vector<8x128xf32>
    %179 = math.tanh %178 : vector<8x128xf32>
    %180 = arith.mulf %175, %179 : vector<8x128xf32>
    %c3_58 = arith.constant 3 : index
    %c0_59 = arith.constant 0 : index
    %c0_60 = arith.constant 0 : index
    %181 = vector.load %arg5[%c3_58, %c0_59, %c0_60] : memref<8x8x128xf32, #tpu.memory_space<vmem>>, vector<1x8x128xf32>
    %182 = vector.shape_cast %181 : vector<1x8x128xf32> to vector<8x128xf32>
    %183 = vector.shape_cast %180 : vector<8x128xf32> to vector<1x8x128xf32>
    tpu.vector_store %arg5[%c3_58, %c0_59, %c0_60], %183 {strides = array<i32>} : memref<8x8x128xf32, #tpu.memory_space<vmem>>, vector<1x8x128xf32>,
    %c4 = arith.constant 4 : index
    %c0_61 = arith.constant 0 : index
    %c0_62 = arith.constant 0 : index
    %184 = vector.load %arg2[%c4, %c0_61, %c0_62] : memref<8x8x512xbf16, #tpu.memory_space<vmem>>, vector<1x8x512xbf16>
    %185 = vector.shape_cast %184 : vector<1x8x512xbf16> to vector<8x512xbf16>
    %186 = arith.extf %185 : vector<8x512xbf16> to vector<8x512xf32>
    %187 = arith.truncf %155 : vector<8x128xf32> to vector<8x128xbf16>
    %cst_63 = arith.constant dense<0.000000e+00> : vector<8x512xf32>
    %188 = tpu.matmul %187, %4, %cst_63 {dimension_numbers = #tpu.dot_dimension_numbers<[1], [0], [0], [1], [0, 0, 1, 1], [], []>} : vector<8x128xbf16>, vector<128x512xbf16>, vector<8x512xf32> -> vector<8x512xf32>
    %189 = arith.addf %186, %188 : vector<8x512xf32>
    %190 = vector.extract_strided_slice %189 {offsets = [0, 0], sizes = [8, 384], strides = [1, 1]} : vector<8x512xf32> to vector<8x384xf32>
    %191 = arith.negf %190 : vector<8x384xf32>
    %192 = math.exp %191 : vector<8x384xf32>
    %cst_64 = arith.constant 1.000000e+00 : f32
    %193 = vector.broadcast %cst_64 : f32 to vector<8x384xf32>
    %194 = arith.addf %193, %192 : vector<8x384xf32>
    %195 = arith.divf %193, %194 : vector<8x384xf32>
    %196 = vector.extract_strided_slice %189 {offsets = [0, 384], sizes = [8, 128], strides = [1, 1]} : vector<8x512xf32> to vector<8x128xf32>
    %197 = math.tanh %196 : vector<8x128xf32>
    %198 = vector.extract_strided_slice %195 {offsets = [0, 0], sizes = [8, 128], strides = [1, 1]} : vector<8x384xf32> to vector<8x128xf32>
    %199 = vector.extract_strided_slice %195 {offsets = [0, 128], sizes = [8, 128], strides = [1, 1]} : vector<8x384xf32> to vector<8x128xf32>
    %200 = vector.extract_strided_slice %195 {offsets = [0, 256], sizes = [8, 128], strides = [1, 1]} : vector<8x384xf32> to vector<8x128xf32>
    %201 = arith.mulf %199, %153 : vector<8x128xf32>
    %202 = arith.mulf %198, %197 : vector<8x128xf32>
    %203 = arith.addf %201, %202 : vector<8x128xf32>
    %204 = math.tanh %203 : vector<8x128xf32>
    %205 = arith.mulf %200, %204 : vector<8x128xf32>
    %c4_65 = arith.constant 4 : index
    %c0_66 = arith.constant 0 : index
    %c0_67 = arith.constant 0 : index
    %206 = vector.load %arg6[%c4_65, %c0_66, %c0_67] : memref<8x8x128xf32, #tpu.memory_space<vmem>>, vector<1x8x128xf32>
    %207 = vector.shape_cast %206 : vector<1x8x128xf32> to vector<8x128xf32>
    %208 = vector.shape_cast %205 : vector<8x128xf32> to vector<1x8x128xf32>
    tpu.vector_store %arg6[%c4_65, %c0_66, %c0_67], %208 {strides = array<i32>} : memref<8x8x128xf32, #tpu.memory_space<vmem>>, vector<1x8x128xf32>,
    %c4_68 = arith.constant 4 : index
    %c0_69 = arith.constant 0 : index
    %c0_70 = arith.constant 0 : index
    %209 = vector.load %arg1[%c4_68, %c0_69, %c0_70] : memref<8x8x512xbf16, #tpu.memory_space<vmem>>, vector<1x8x512xbf16>
    %210 = vector.shape_cast %209 : vector<1x8x512xbf16> to vector<8x512xbf16>
    %211 = arith.extf %210 : vector<8x512xbf16> to vector<8x512xf32>
    %212 = arith.truncf %180 : vector<8x128xf32> to vector<8x128xbf16>
    %cst_71 = arith.constant dense<0.000000e+00> : vector<8x512xf32>
    %213 = tpu.matmul %212, %3, %cst_71 {dimension_numbers = #tpu.dot_dimension_numbers<[1], [0], [0], [1], [0, 0, 1, 1], [], []>} : vector<8x128xbf16>, vector<128x512xbf16>, vector<8x512xf32> -> vector<8x512xf32>
    %214 = arith.addf %211, %213 : vector<8x512xf32>
    %215 = vector.extract_strided_slice %214 {offsets = [0, 0], sizes = [8, 384], strides = [1, 1]} : vector<8x512xf32> to vector<8x384xf32>
    %216 = arith.negf %215 : vector<8x384xf32>
    %217 = math.exp %216 : vector<8x384xf32>
    %cst_72 = arith.constant 1.000000e+00 : f32
    %218 = vector.broadcast %cst_72 : f32 to vector<8x384xf32>
    %219 = arith.addf %218, %217 : vector<8x384xf32>
    %220 = arith.divf %218, %219 : vector<8x384xf32>
    %221 = vector.extract_strided_slice %214 {offsets = [0, 384], sizes = [8, 128], strides = [1, 1]} : vector<8x512xf32> to vector<8x128xf32>
    %222 = math.tanh %221 : vector<8x128xf32>
    %223 = vector.extract_strided_slice %220 {offsets = [0, 0], sizes = [8, 128], strides = [1, 1]} : vector<8x384xf32> to vector<8x128xf32>
    %224 = vector.extract_strided_slice %220 {offsets = [0, 128], sizes = [8, 128], strides = [1, 1]} : vector<8x384xf32> to vector<8x128xf32>
    %225 = vector.extract_strided_slice %220 {offsets = [0, 256], sizes = [8, 128], strides = [1, 1]} : vector<8x384xf32> to vector<8x128xf32>
    %226 = arith.mulf %224, %178 : vector<8x128xf32>
    %227 = arith.mulf %223, %222 : vector<8x128xf32>
    %228 = arith.addf %226, %227 : vector<8x128xf32>
    %229 = math.tanh %228 : vector<8x128xf32>
    %230 = arith.mulf %225, %229 : vector<8x128xf32>
    %c4_73 = arith.constant 4 : index
    %c0_74 = arith.constant 0 : index
    %c0_75 = arith.constant 0 : index
    %231 = vector.load %arg5[%c4_73, %c0_74, %c0_75] : memref<8x8x128xf32, #tpu.memory_space<vmem>>, vector<1x8x128xf32>
    %232 = vector.shape_cast %231 : vector<1x8x128xf32> to vector<8x128xf32>
    %233 = vector.shape_cast %230 : vector<8x128xf32> to vector<1x8x128xf32>
    tpu.vector_store %arg5[%c4_73, %c0_74, %c0_75], %233 {strides = array<i32>} : memref<8x8x128xf32, #tpu.memory_space<vmem>>, vector<1x8x128xf32>,
    %c3_76 = arith.constant 3 : index
    %c0_77 = arith.constant 0 : index
    %c0_78 = arith.constant 0 : index
    %234 = vector.load %arg2[%c3_76, %c0_77, %c0_78] : memref<8x8x512xbf16, #tpu.memory_space<vmem>>, vector<1x8x512xbf16>
    %235 = vector.shape_cast %234 : vector<1x8x512xbf16> to vector<8x512xbf16>
    %236 = arith.extf %235 : vector<8x512xbf16> to vector<8x512xf32>
    %237 = arith.truncf %205 : vector<8x128xf32> to vector<8x128xbf16>
    %cst_79 = arith.constant dense<0.000000e+00> : vector<8x512xf32>
    %238 = tpu.matmul %237, %4, %cst_79 {dimension_numbers = #tpu.dot_dimension_numbers<[1], [0], [0], [1], [0, 0, 1, 1], [], []>} : vector<8x128xbf16>, vector<128x512xbf16>, vector<8x512xf32> -> vector<8x512xf32>
    %239 = arith.addf %236, %238 : vector<8x512xf32>
    %240 = vector.extract_strided_slice %239 {offsets = [0, 0], sizes = [8, 384], strides = [1, 1]} : vector<8x512xf32> to vector<8x384xf32>
    %241 = arith.negf %240 : vector<8x384xf32>
    %242 = math.exp %241 : vector<8x384xf32>
    %cst_80 = arith.constant 1.000000e+00 : f32
    %243 = vector.broadcast %cst_80 : f32 to vector<8x384xf32>
    %244 = arith.addf %243, %242 : vector<8x384xf32>
    %245 = arith.divf %243, %244 : vector<8x384xf32>
    %246 = vector.extract_strided_slice %239 {offsets = [0, 384], sizes = [8, 128], strides = [1, 1]} : vector<8x512xf32> to vector<8x128xf32>
    %247 = math.tanh %246 : vector<8x128xf32>
    %248 = vector.extract_strided_slice %245 {offsets = [0, 0], sizes = [8, 128], strides = [1, 1]} : vector<8x384xf32> to vector<8x128xf32>
    %249 = vector.extract_strided_slice %245 {offsets = [0, 128], sizes = [8, 128], strides = [1, 1]} : vector<8x384xf32> to vector<8x128xf32>
    %250 = vector.extract_strided_slice %245 {offsets = [0, 256], sizes = [8, 128], strides = [1, 1]} : vector<8x384xf32> to vector<8x128xf32>
    %251 = arith.mulf %249, %203 : vector<8x128xf32>
    %252 = arith.mulf %248, %247 : vector<8x128xf32>
    %253 = arith.addf %251, %252 : vector<8x128xf32>
    %254 = math.tanh %253 : vector<8x128xf32>
    %255 = arith.mulf %250, %254 : vector<8x128xf32>
    %c3_81 = arith.constant 3 : index
    %c0_82 = arith.constant 0 : index
    %c0_83 = arith.constant 0 : index
    %256 = vector.load %arg6[%c3_81, %c0_82, %c0_83] : memref<8x8x128xf32, #tpu.memory_space<vmem>>, vector<1x8x128xf32>
    %257 = vector.shape_cast %256 : vector<1x8x128xf32> to vector<8x128xf32>
    %258 = vector.shape_cast %255 : vector<8x128xf32> to vector<1x8x128xf32>
    tpu.vector_store %arg6[%c3_81, %c0_82, %c0_83], %258 {strides = array<i32>} : memref<8x8x128xf32, #tpu.memory_space<vmem>>, vector<1x8x128xf32>,
    %c5_84 = arith.constant 5 : index
    %c0_85 = arith.constant 0 : index
    %c0_86 = arith.constant 0 : index
    %259 = vector.load %arg1[%c5_84, %c0_85, %c0_86] : memref<8x8x512xbf16, #tpu.memory_space<vmem>>, vector<1x8x512xbf16>
    %260 = vector.shape_cast %259 : vector<1x8x512xbf16> to vector<8x512xbf16>
    %261 = arith.extf %260 : vector<8x512xbf16> to vector<8x512xf32>
    %262 = arith.truncf %230 : vector<8x128xf32> to vector<8x128xbf16>
    %cst_87 = arith.constant dense<0.000000e+00> : vector<8x512xf32>
    %263 = tpu.matmul %262, %3, %cst_87 {dimension_numbers = #tpu.dot_dimension_numbers<[1], [0], [0], [1], [0, 0, 1, 1], [], []>} : vector<8x128xbf16>, vector<128x512xbf16>, vector<8x512xf32> -> vector<8x512xf32>
    %264 = arith.addf %261, %263 : vector<8x512xf32>
    %265 = vector.extract_strided_slice %264 {offsets = [0, 0], sizes = [8, 384], strides = [1, 1]} : vector<8x512xf32> to vector<8x384xf32>
    %266 = arith.negf %265 : vector<8x384xf32>
    %267 = math.exp %266 : vector<8x384xf32>
    %cst_88 = arith.constant 1.000000e+00 : f32
    %268 = vector.broadcast %cst_88 : f32 to vector<8x384xf32>
    %269 = arith.addf %268, %267 : vector<8x384xf32>
    %270 = arith.divf %268, %269 : vector<8x384xf32>
    %271 = vector.extract_strided_slice %264 {offsets = [0, 384], sizes = [8, 128], strides = [1, 1]} : vector<8x512xf32> to vector<8x128xf32>
    %272 = math.tanh %271 : vector<8x128xf32>
    %273 = vector.extract_strided_slice %270 {offsets = [0, 0], sizes = [8, 128], strides = [1, 1]} : vector<8x384xf32> to vector<8x128xf32>
    %274 = vector.extract_strided_slice %270 {offsets = [0, 128], sizes = [8, 128], strides = [1, 1]} : vector<8x384xf32> to vector<8x128xf32>
    %275 = vector.extract_strided_slice %270 {offsets = [0, 256], sizes = [8, 128], strides = [1, 1]} : vector<8x384xf32> to vector<8x128xf32>
    %276 = arith.mulf %274, %228 : vector<8x128xf32>
    %277 = arith.mulf %273, %272 : vector<8x128xf32>
    %278 = arith.addf %276, %277 : vector<8x128xf32>
    %279 = math.tanh %278 : vector<8x128xf32>
    %280 = arith.mulf %275, %279 : vector<8x128xf32>
    %c5_89 = arith.constant 5 : index
    %c0_90 = arith.constant 0 : index
    %c0_91 = arith.constant 0 : index
    %281 = vector.load %arg5[%c5_89, %c0_90, %c0_91] : memref<8x8x128xf32, #tpu.memory_space<vmem>>, vector<1x8x128xf32>
    %282 = vector.shape_cast %281 : vector<1x8x128xf32> to vector<8x128xf32>
    %283 = vector.shape_cast %280 : vector<8x128xf32> to vector<1x8x128xf32>
    tpu.vector_store %arg5[%c5_89, %c0_90, %c0_91], %283 {strides = array<i32>} : memref<8x8x128xf32, #tpu.memory_space<vmem>>, vector<1x8x128xf32>,
    %c2_92 = arith.constant 2 : index
    %c0_93 = arith.constant 0 : index
    %c0_94 = arith.constant 0 : index
    %284 = vector.load %arg2[%c2_92, %c0_93, %c0_94] : memref<8x8x512xbf16, #tpu.memory_space<vmem>>, vector<1x8x512xbf16>
    %285 = vector.shape_cast %284 : vector<1x8x512xbf16> to vector<8x512xbf16>
    %286 = arith.extf %285 : vector<8x512xbf16> to vector<8x512xf32>
    %287 = arith.truncf %255 : vector<8x128xf32> to vector<8x128xbf16>
    %cst_95 = arith.constant dense<0.000000e+00> : vector<8x512xf32>
    %288 = tpu.matmul %287, %4, %cst_95 {dimension_numbers = #tpu.dot_dimension_numbers<[1], [0], [0], [1], [0, 0, 1, 1], [], []>} : vector<8x128xbf16>, vector<128x512xbf16>, vector<8x512xf32> -> vector<8x512xf32>
    %289 = arith.addf %286, %288 : vector<8x512xf32>
    %290 = vector.extract_strided_slice %289 {offsets = [0, 0], sizes = [8, 384], strides = [1, 1]} : vector<8x512xf32> to vector<8x384xf32>
    %291 = arith.negf %290 : vector<8x384xf32>
    %292 = math.exp %291 : vector<8x384xf32>
    %cst_96 = arith.constant 1.000000e+00 : f32
    %293 = vector.broadcast %cst_96 : f32 to vector<8x384xf32>
    %294 = arith.addf %293, %292 : vector<8x384xf32>
    %295 = arith.divf %293, %294 : vector<8x384xf32>
    %296 = vector.extract_strided_slice %289 {offsets = [0, 384], sizes = [8, 128], strides = [1, 1]} : vector<8x512xf32> to vector<8x128xf32>
    %297 = math.tanh %296 : vector<8x128xf32>
    %298 = vector.extract_strided_slice %295 {offsets = [0, 0], sizes = [8, 128], strides = [1, 1]} : vector<8x384xf32> to vector<8x128xf32>
    %299 = vector.extract_strided_slice %295 {offsets = [0, 128], sizes = [8, 128], strides = [1, 1]} : vector<8x384xf32> to vector<8x128xf32>
    %300 = vector.extract_strided_slice %295 {offsets = [0, 256], sizes = [8, 128], strides = [1, 1]} : vector<8x384xf32> to vector<8x128xf32>
    %301 = arith.mulf %299, %253 : vector<8x128xf32>
    %302 = arith.mulf %298, %297 : vector<8x128xf32>
    %303 = arith.addf %301, %302 : vector<8x128xf32>
    %304 = math.tanh %303 : vector<8x128xf32>
    %305 = arith.mulf %300, %304 : vector<8x128xf32>
    %c2_97 = arith.constant 2 : index
    %c0_98 = arith.constant 0 : index
    %c0_99 = arith.constant 0 : index
    %306 = vector.load %arg6[%c2_97, %c0_98, %c0_99] : memref<8x8x128xf32, #tpu.memory_space<vmem>>, vector<1x8x128xf32>
    %307 = vector.shape_cast %306 : vector<1x8x128xf32> to vector<8x128xf32>
    %308 = vector.shape_cast %305 : vector<8x128xf32> to vector<1x8x128xf32>
    tpu.vector_store %arg6[%c2_97, %c0_98, %c0_99], %308 {strides = array<i32>} : memref<8x8x128xf32, #tpu.memory_space<vmem>>, vector<1x8x128xf32>,
    %c6_100 = arith.constant 6 : index
    %c0_101 = arith.constant 0 : index
    %c0_102 = arith.constant 0 : index
    %309 = vector.load %arg1[%c6_100, %c0_101, %c0_102] : memref<8x8x512xbf16, #tpu.memory_space<vmem>>, vector<1x8x512xbf16>
    %310 = vector.shape_cast %309 : vector<1x8x512xbf16> to vector<8x512xbf16>
    %311 = arith.extf %310 : vector<8x512xbf16> to vector<8x512xf32>
    %312 = arith.truncf %280 : vector<8x128xf32> to vector<8x128xbf16>
    %cst_103 = arith.constant dense<0.000000e+00> : vector<8x512xf32>
    %313 = tpu.matmul %312, %3, %cst_103 {dimension_numbers = #tpu.dot_dimension_numbers<[1], [0], [0], [1], [0, 0, 1, 1], [], []>} : vector<8x128xbf16>, vector<128x512xbf16>, vector<8x512xf32> -> vector<8x512xf32>
    %314 = arith.addf %311, %313 : vector<8x512xf32>
    %315 = vector.extract_strided_slice %314 {offsets = [0, 0], sizes = [8, 384], strides = [1, 1]} : vector<8x512xf32> to vector<8x384xf32>
    %316 = arith.negf %315 : vector<8x384xf32>
    %317 = math.exp %316 : vector<8x384xf32>
    %cst_104 = arith.constant 1.000000e+00 : f32
    %318 = vector.broadcast %cst_104 : f32 to vector<8x384xf32>
    %319 = arith.addf %318, %317 : vector<8x384xf32>
    %320 = arith.divf %318, %319 : vector<8x384xf32>
    %321 = vector.extract_strided_slice %314 {offsets = [0, 384], sizes = [8, 128], strides = [1, 1]} : vector<8x512xf32> to vector<8x128xf32>
    %322 = math.tanh %321 : vector<8x128xf32>
    %323 = vector.extract_strided_slice %320 {offsets = [0, 0], sizes = [8, 128], strides = [1, 1]} : vector<8x384xf32> to vector<8x128xf32>
    %324 = vector.extract_strided_slice %320 {offsets = [0, 128], sizes = [8, 128], strides = [1, 1]} : vector<8x384xf32> to vector<8x128xf32>
    %325 = vector.extract_strided_slice %320 {offsets = [0, 256], sizes = [8, 128], strides = [1, 1]} : vector<8x384xf32> to vector<8x128xf32>
    %326 = arith.mulf %324, %278 : vector<8x128xf32>
    %327 = arith.mulf %323, %322 : vector<8x128xf32>
    %328 = arith.addf %326, %327 : vector<8x128xf32>
    %329 = math.tanh %328 : vector<8x128xf32>
    %330 = arith.mulf %325, %329 : vector<8x128xf32>
    %c6_105 = arith.constant 6 : index
    %c0_106 = arith.constant 0 : index
    %c0_107 = arith.constant 0 : index
    %331 = vector.load %arg5[%c6_105, %c0_106, %c0_107] : memref<8x8x128xf32, #tpu.memory_space<vmem>>, vector<1x8x128xf32>
    %332 = vector.shape_cast %331 : vector<1x8x128xf32> to vector<8x128xf32>
    %333 = vector.shape_cast %330 : vector<8x128xf32> to vector<1x8x128xf32>
    tpu.vector_store %arg5[%c6_105, %c0_106, %c0_107], %333 {strides = array<i32>} : memref<8x8x128xf32, #tpu.memory_space<vmem>>, vector<1x8x128xf32>,
    %c1_108 = arith.constant 1 : index
    %c0_109 = arith.constant 0 : index
    %c0_110 = arith.constant 0 : index
    %334 = vector.load %arg2[%c1_108, %c0_109, %c0_110] : memref<8x8x512xbf16, #tpu.memory_space<vmem>>, vector<1x8x512xbf16>
    %335 = vector.shape_cast %334 : vector<1x8x512xbf16> to vector<8x512xbf16>
    %336 = arith.extf %335 : vector<8x512xbf16> to vector<8x512xf32>
    %337 = arith.truncf %305 : vector<8x128xf32> to vector<8x128xbf16>
    %cst_111 = arith.constant dense<0.000000e+00> : vector<8x512xf32>
    %338 = tpu.matmul %337, %4, %cst_111 {dimension_numbers = #tpu.dot_dimension_numbers<[1], [0], [0], [1], [0, 0, 1, 1], [], []>} : vector<8x128xbf16>, vector<128x512xbf16>, vector<8x512xf32> -> vector<8x512xf32>
    %339 = arith.addf %336, %338 : vector<8x512xf32>
    %340 = vector.extract_strided_slice %339 {offsets = [0, 0], sizes = [8, 384], strides = [1, 1]} : vector<8x512xf32> to vector<8x384xf32>
    %341 = arith.negf %340 : vector<8x384xf32>
    %342 = math.exp %341 : vector<8x384xf32>
    %cst_112 = arith.constant 1.000000e+00 : f32
    %343 = vector.broadcast %cst_112 : f32 to vector<8x384xf32>
    %344 = arith.addf %343, %342 : vector<8x384xf32>
    %345 = arith.divf %343, %344 : vector<8x384xf32>
    %346 = vector.extract_strided_slice %339 {offsets = [0, 384], sizes = [8, 128], strides = [1, 1]} : vector<8x512xf32> to vector<8x128xf32>
    %347 = math.tanh %346 : vector<8x128xf32>
    %348 = vector.extract_strided_slice %345 {offsets = [0, 0], sizes = [8, 128], strides = [1, 1]} : vector<8x384xf32> to vector<8x128xf32>
    %349 = vector.extract_strided_slice %345 {offsets = [0, 128], sizes = [8, 128], strides = [1, 1]} : vector<8x384xf32> to vector<8x128xf32>
    %350 = vector.extract_strided_slice %345 {offsets = [0, 256], sizes = [8, 128], strides = [1, 1]} : vector<8x384xf32> to vector<8x128xf32>
    %351 = arith.mulf %349, %303 : vector<8x128xf32>
    %352 = arith.mulf %348, %347 : vector<8x128xf32>
    %353 = arith.addf %351, %352 : vector<8x128xf32>
    %354 = math.tanh %353 : vector<8x128xf32>
    %355 = arith.mulf %350, %354 : vector<8x128xf32>
    %c1_113 = arith.constant 1 : index
    %c0_114 = arith.constant 0 : index
    %c0_115 = arith.constant 0 : index
    %356 = vector.load %arg6[%c1_113, %c0_114, %c0_115] : memref<8x8x128xf32, #tpu.memory_space<vmem>>, vector<1x8x128xf32>
    %357 = vector.shape_cast %356 : vector<1x8x128xf32> to vector<8x128xf32>
    %358 = vector.shape_cast %355 : vector<8x128xf32> to vector<1x8x128xf32>
    tpu.vector_store %arg6[%c1_113, %c0_114, %c0_115], %358 {strides = array<i32>} : memref<8x8x128xf32, #tpu.memory_space<vmem>>, vector<1x8x128xf32>,
    %c7_116 = arith.constant 7 : index
    %c0_117 = arith.constant 0 : index
    %c0_118 = arith.constant 0 : index
    %359 = vector.load %arg1[%c7_116, %c0_117, %c0_118] : memref<8x8x512xbf16, #tpu.memory_space<vmem>>, vector<1x8x512xbf16>
    %360 = vector.shape_cast %359 : vector<1x8x512xbf16> to vector<8x512xbf16>
    %361 = arith.extf %360 : vector<8x512xbf16> to vector<8x512xf32>
    %362 = arith.truncf %330 : vector<8x128xf32> to vector<8x128xbf16>
    %cst_119 = arith.constant dense<0.000000e+00> : vector<8x512xf32>
    %363 = tpu.matmul %362, %3, %cst_119 {dimension_numbers = #tpu.dot_dimension_numbers<[1], [0], [0], [1], [0, 0, 1, 1], [], []>} : vector<8x128xbf16>, vector<128x512xbf16>, vector<8x512xf32> -> vector<8x512xf32>
    %364 = arith.addf %361, %363 : vector<8x512xf32>
    %365 = vector.extract_strided_slice %364 {offsets = [0, 0], sizes = [8, 384], strides = [1, 1]} : vector<8x512xf32> to vector<8x384xf32>
    %366 = arith.negf %365 : vector<8x384xf32>
    %367 = math.exp %366 : vector<8x384xf32>
    %cst_120 = arith.constant 1.000000e+00 : f32
    %368 = vector.broadcast %cst_120 : f32 to vector<8x384xf32>
    %369 = arith.addf %368, %367 : vector<8x384xf32>
    %370 = arith.divf %368, %369 : vector<8x384xf32>
    %371 = vector.extract_strided_slice %364 {offsets = [0, 384], sizes = [8, 128], strides = [1, 1]} : vector<8x512xf32> to vector<8x128xf32>
    %372 = math.tanh %371 : vector<8x128xf32>
    %373 = vector.extract_strided_slice %370 {offsets = [0, 0], sizes = [8, 128], strides = [1, 1]} : vector<8x384xf32> to vector<8x128xf32>
    %374 = vector.extract_strided_slice %370 {offsets = [0, 128], sizes = [8, 128], strides = [1, 1]} : vector<8x384xf32> to vector<8x128xf32>
    %375 = vector.extract_strided_slice %370 {offsets = [0, 256], sizes = [8, 128], strides = [1, 1]} : vector<8x384xf32> to vector<8x128xf32>
    %376 = arith.mulf %374, %328 : vector<8x128xf32>
    %377 = arith.mulf %373, %372 : vector<8x128xf32>
    %378 = arith.addf %376, %377 : vector<8x128xf32>
    %379 = math.tanh %378 : vector<8x128xf32>
    %380 = arith.mulf %375, %379 : vector<8x128xf32>
    %c7_121 = arith.constant 7 : index
    %c0_122 = arith.constant 0 : index
    %c0_123 = arith.constant 0 : index
    %381 = vector.load %arg5[%c7_121, %c0_122, %c0_123] : memref<8x8x128xf32, #tpu.memory_space<vmem>>, vector<1x8x128xf32>
    %382 = vector.shape_cast %381 : vector<1x8x128xf32> to vector<8x128xf32>
    %383 = vector.shape_cast %380 : vector<8x128xf32> to vector<1x8x128xf32>
    tpu.vector_store %arg5[%c7_121, %c0_122, %c0_123], %383 {strides = array<i32>} : memref<8x8x128xf32, #tpu.memory_space<vmem>>, vector<1x8x128xf32>,
    %c0_124 = arith.constant 0 : index
    %c0_125 = arith.constant 0 : index
    %c0_126 = arith.constant 0 : index
    %384 = vector.load %arg2[%c0_124, %c0_125, %c0_126] : memref<8x8x512xbf16, #tpu.memory_space<vmem>>, vector<1x8x512xbf16>
    %385 = vector.shape_cast %384 : vector<1x8x512xbf16> to vector<8x512xbf16>
    %386 = arith.extf %385 : vector<8x512xbf16> to vector<8x512xf32>
    %387 = arith.truncf %355 : vector<8x128xf32> to vector<8x128xbf16>
    %cst_127 = arith.constant dense<0.000000e+00> : vector<8x512xf32>
    %388 = tpu.matmul %387, %4, %cst_127 {dimension_numbers = #tpu.dot_dimension_numbers<[1], [0], [0], [1], [0, 0, 1, 1], [], []>} : vector<8x128xbf16>, vector<128x512xbf16>, vector<8x512xf32> -> vector<8x512xf32>
    %389 = arith.addf %386, %388 : vector<8x512xf32>
    %390 = vector.extract_strided_slice %389 {offsets = [0, 0], sizes = [8, 384], strides = [1, 1]} : vector<8x512xf32> to vector<8x384xf32>
    %391 = arith.negf %390 : vector<8x384xf32>
    %392 = math.exp %391 : vector<8x384xf32>
    %cst_128 = arith.constant 1.000000e+00 : f32
    %393 = vector.broadcast %cst_128 : f32 to vector<8x384xf32>
    %394 = arith.addf %393, %392 : vector<8x384xf32>
    %395 = arith.divf %393, %394 : vector<8x384xf32>
    %396 = vector.extract_strided_slice %389 {offsets = [0, 384], sizes = [8, 128], strides = [1, 1]} : vector<8x512xf32> to vector<8x128xf32>
    %397 = math.tanh %396 : vector<8x128xf32>
    %398 = vector.extract_strided_slice %395 {offsets = [0, 0], sizes = [8, 128], strides = [1, 1]} : vector<8x384xf32> to vector<8x128xf32>
    %399 = vector.extract_strided_slice %395 {offsets = [0, 128], sizes = [8, 128], strides = [1, 1]} : vector<8x384xf32> to vector<8x128xf32>
    %400 = vector.extract_strided_slice %395 {offsets = [0, 256], sizes = [8, 128], strides = [1, 1]} : vector<8x384xf32> to vector<8x128xf32>
    %401 = arith.mulf %399, %353 : vector<8x128xf32>
    %402 = arith.mulf %398, %397 : vector<8x128xf32>
    %403 = arith.addf %401, %402 : vector<8x128xf32>
    %404 = math.tanh %403 : vector<8x128xf32>
    %405 = arith.mulf %400, %404 : vector<8x128xf32>
    %c0_129 = arith.constant 0 : index
    %c0_130 = arith.constant 0 : index
    %c0_131 = arith.constant 0 : index
    %406 = vector.load %arg6[%c0_129, %c0_130, %c0_131] : memref<8x8x128xf32, #tpu.memory_space<vmem>>, vector<1x8x128xf32>
    %407 = vector.shape_cast %406 : vector<1x8x128xf32> to vector<8x128xf32>
    %408 = vector.shape_cast %405 : vector<8x128xf32> to vector<1x8x128xf32>
    tpu.vector_store %arg6[%c0_129, %c0_130, %c0_131], %408 {strides = array<i32>} : memref<8x8x128xf32, #tpu.memory_space<vmem>>, vector<1x8x128xf32>,
    %c0_132 = arith.constant 0 : index
    %c0_133 = arith.constant 0 : index
    %409 = vector.load %arg7[%c0_132, %c0_133] : memref<8x128xf32, #tpu.memory_space<vmem>>, vector<8x128xf32>
    tpu.vector_store %arg7[%c0_132, %c0_133], %380 {strides = array<i32>} : memref<8x128xf32, #tpu.memory_space<vmem>>, vector<8x128xf32>,
    %c0_134 = arith.constant 0 : index
    %c0_135 = arith.constant 0 : index
    %410 = vector.load %arg8[%c0_134, %c0_135] : memref<8x128xf32, #tpu.memory_space<vmem>>, vector<8x128xf32>
    tpu.vector_store %arg8[%c0_134, %c0_135], %378 {strides = array<i32>} : memref<8x128xf32, #tpu.memory_space<vmem>>, vector<8x128xf32>,
    %c0_136 = arith.constant 0 : index
    %c0_137 = arith.constant 0 : index
    %411 = vector.load %arg9[%c0_136, %c0_137] : memref<8x128xf32, #tpu.memory_space<vmem>>, vector<8x128xf32>
    tpu.vector_store %arg9[%c0_136, %c0_137], %405 {strides = array<i32>} : memref<8x128xf32, #tpu.memory_space<vmem>>, vector<8x128xf32>,
    %c0_138 = arith.constant 0 : index
    %c0_139 = arith.constant 0 : index
    %412 = vector.load %arg10[%c0_138, %c0_139] : memref<8x128xf32, #tpu.memory_space<vmem>>, vector<8x128xf32>
    tpu.vector_store %arg10[%c0_138, %c0_139], %403 {strides = array<i32>} : memref<8x128xf32, #tpu.memory_space<vmem>>, vector<8x128xf32>,
    return
  }
  func.func @transform_0(%arg0: i32) -> (i32, i32, i32) {
    %c0_i32 = arith.constant 0 : i32
    %c0_i32_0 = arith.constant 0 : i32
    %c0_i32_1 = arith.constant 0 : i32
    return %arg0, %c0_i32, %c0_i32_0 : i32, i32, i32
  }
  func.func @transform_1(%arg0: i32) -> (i32, i32, i32) {
    %c1_i32 = arith.constant 1 : i32
    %0 = arith.subi %c1_i32, %arg0 : i32
    %c0_i32 = arith.constant 0 : i32
    %c0_i32_0 = arith.constant 0 : i32
    %c0_i32_1 = arith.constant 0 : i32
    return %0, %c0_i32, %c0_i32_0 : i32, i32, i32
  }
  func.func @transform_2(%arg0: i32) -> (i32, i32) {
    %c0_i32 = arith.constant 0 : i32
    %c0_i32_0 = arith.constant 0 : i32
    %c0_i32_1 = arith.constant 0 : i32
    return %c0_i32, %c0_i32_0 : i32, i32
  }
  func.func @transform_3(%arg0: i32) -> (i32, i32) {
    %c0_i32 = arith.constant 0 : i32
    %c0_i32_0 = arith.constant 0 : i32
    %c0_i32_1 = arith.constant 0 : i32
    return %c0_i32, %c0_i32_0 : i32, i32
  }
  func.func @transform_4(%arg0: i32) -> (i32, i32, i32) {
    %c0_i32 = arith.constant 0 : i32
    %c0_i32_0 = arith.constant 0 : i32
    %c0_i32_1 = arith.constant 0 : i32
    return %arg0, %c0_i32, %c0_i32_0 : i32, i32, i32
  }
  func.func @transform_5(%arg0: i32) -> (i32, i32, i32) {
    %c1_i32 = arith.constant 1 : i32
    %0 = arith.subi %c1_i32, %arg0 : i32
    %c0_i32 = arith.constant 0 : i32
    %c0_i32_0 = arith.constant 0 : i32
    %c0_i32_1 = arith.constant 0 : i32
    return %0, %c0_i32, %c0_i32_0 : i32, i32, i32
  }
}

module attributes {stable_mosaic.version = 11 : i64} {
  func.func @_bilstm_block_kernel(%arg0: i32, %arg1: memref<8x8x512xbf16, #tpu.memory_space<vmem>>, %arg2: memref<8x8x512xbf16, #tpu.memory_space<vmem>>, %arg3: memref<128x512xbf16, #tpu.memory_space<vmem>>, %arg4: memref<128x512xbf16, #tpu.memory_space<vmem>>, %arg5: memref<1x8x128xf32, #tpu.memory_space<vmem>>, %arg6: memref<1x8x128xf32, #tpu.memory_space<vmem>>, %arg7: memref<8x8x128xf32, #tpu.memory_space<vmem>>, %arg8: memref<8x8x128xf32, #tpu.memory_space<vmem>>, %arg9: memref<8x128xf32, #tpu.memory_space<vmem>>, %arg10: memref<8x128xf32, #tpu.memory_space<vmem>>, %arg11: memref<8x128xf32, #tpu.memory_space<vmem>>, %arg12: memref<8x128xf32, #tpu.memory_space<vmem>>) attributes {dimension_semantics = [#tpu.dimension_semantics<arbitrary>], iteration_bounds = array<i64: 2>, scalar_prefetch = 0 : i64, scratch_operands = 4 : i64, tpu.core_type = #tpu.core_type<tc>, window_params = [{transform_indices = @transform_0, window_bounds = array<i64: 8, 8, 512>}, {transform_indices = @transform_1, window_bounds = array<i64: 8, 8, 512>}, {pipeline_mode = #tpu.pipeline_mode<synchronous>, transform_indices = @transform_2, window_bounds = array<i64: 128, 512>}, {pipeline_mode = #tpu.pipeline_mode<synchronous>, transform_indices = @transform_3, window_bounds = array<i64: 128, 512>}, {pipeline_mode = #tpu.pipeline_mode<synchronous>, transform_indices = @transform_4, window_bounds = array<i64: 1, 8, 128>}, {pipeline_mode = #tpu.pipeline_mode<synchronous>, transform_indices = @transform_5, window_bounds = array<i64: 1, 8, 128>}, {transform_indices = @transform_6, window_bounds = array<i64: 8, 8, 128>}, {transform_indices = @transform_7, window_bounds = array<i64: 8, 8, 128>}]} {
    %c0_i32 = arith.constant 0 : i32
    %0 = arith.cmpi eq, %arg0, %c0_i32 : i32
    %1 = arith.extui %0 : i1 to i32
    %c0_i32_0 = arith.constant 0 : i32
    %2 = arith.cmpi ne, %1, %c0_i32_0 : i32
    scf.if %2 {
      %cst_146 = arith.constant 0.000000e+00 : f32
      %433 = vector.broadcast %cst_146 : f32 to vector<8x128xf32>
      %c0_147 = arith.constant 0 : index
      %c0_148 = arith.constant 0 : index
      %434 = vector.load %arg9[%c0_147, %c0_148] : memref<8x128xf32, #tpu.memory_space<vmem>>, vector<8x128xf32>
      tpu.vector_store %arg9[%c0_147, %c0_148], %433 {strides = array<i32>} : memref<8x128xf32, #tpu.memory_space<vmem>>, vector<8x128xf32>,
      %cst_149 = arith.constant 0.000000e+00 : f32
      %435 = vector.broadcast %cst_149 : f32 to vector<8x128xf32>
      %c0_150 = arith.constant 0 : index
      %c0_151 = arith.constant 0 : index
      %436 = vector.load %arg10[%c0_150, %c0_151] : memref<8x128xf32, #tpu.memory_space<vmem>>, vector<8x128xf32>
      tpu.vector_store %arg10[%c0_150, %c0_151], %435 {strides = array<i32>} : memref<8x128xf32, #tpu.memory_space<vmem>>, vector<8x128xf32>,
      %cst_152 = arith.constant 0.000000e+00 : f32
      %437 = vector.broadcast %cst_152 : f32 to vector<8x128xf32>
      %c0_153 = arith.constant 0 : index
      %c0_154 = arith.constant 0 : index
      %438 = vector.load %arg11[%c0_153, %c0_154] : memref<8x128xf32, #tpu.memory_space<vmem>>, vector<8x128xf32>
      tpu.vector_store %arg11[%c0_153, %c0_154], %437 {strides = array<i32>} : memref<8x128xf32, #tpu.memory_space<vmem>>, vector<8x128xf32>,
      %cst_155 = arith.constant 0.000000e+00 : f32
      %439 = vector.broadcast %cst_155 : f32 to vector<8x128xf32>
      %c0_156 = arith.constant 0 : index
      %c0_157 = arith.constant 0 : index
      %440 = vector.load %arg12[%c0_156, %c0_157] : memref<8x128xf32, #tpu.memory_space<vmem>>, vector<8x128xf32>
      tpu.vector_store %arg12[%c0_156, %c0_157], %439 {strides = array<i32>} : memref<8x128xf32, #tpu.memory_space<vmem>>, vector<8x128xf32>,
    } else {
    }
    %c0 = arith.constant 0 : index
    %c0_1 = arith.constant 0 : index
    %3 = vector.load %arg3[%c0, %c0_1] : memref<128x512xbf16, #tpu.memory_space<vmem>>, vector<128x512xbf16>
    %c0_2 = arith.constant 0 : index
    %c0_3 = arith.constant 0 : index
    %4 = vector.load %arg4[%c0_2, %c0_3] : memref<128x512xbf16, #tpu.memory_space<vmem>>, vector<128x512xbf16>
    %c0_4 = arith.constant 0 : index
    %c0_5 = arith.constant 0 : index
    %c0_6 = arith.constant 0 : index
    %5 = vector.load %arg5[%c0_4, %c0_5, %c0_6] : memref<1x8x128xf32, #tpu.memory_space<vmem>>, vector<1x8x128xf32>
    %6 = vector.shape_cast %5 : vector<1x8x128xf32> to vector<8x128xf32>
    %c0_7 = arith.constant 0 : index
    %c0_8 = arith.constant 0 : index
    %c0_9 = arith.constant 0 : index
    %7 = vector.load %arg6[%c0_7, %c0_8, %c0_9] : memref<1x8x128xf32, #tpu.memory_space<vmem>>, vector<1x8x128xf32>
    %8 = vector.shape_cast %7 : vector<1x8x128xf32> to vector<8x128xf32>
    %c0_10 = arith.constant 0 : index
    %c0_11 = arith.constant 0 : index
    %9 = vector.load %arg9[%c0_10, %c0_11] : memref<8x128xf32, #tpu.memory_space<vmem>>, vector<8x128xf32>
    %c0_12 = arith.constant 0 : index
    %c0_13 = arith.constant 0 : index
    %10 = vector.load %arg10[%c0_12, %c0_13] : memref<8x128xf32, #tpu.memory_space<vmem>>, vector<8x128xf32>
    %c0_14 = arith.constant 0 : index
    %c0_15 = arith.constant 0 : index
    %11 = vector.load %arg11[%c0_14, %c0_15] : memref<8x128xf32, #tpu.memory_space<vmem>>, vector<8x128xf32>
    %c0_16 = arith.constant 0 : index
    %c0_17 = arith.constant 0 : index
    %12 = vector.load %arg12[%c0_16, %c0_17] : memref<8x128xf32, #tpu.memory_space<vmem>>, vector<8x128xf32>
    %c0_18 = arith.constant 0 : index
    %c0_19 = arith.constant 0 : index
    %c0_20 = arith.constant 0 : index
    %13 = vector.load %arg1[%c0_18, %c0_19, %c0_20] : memref<8x8x512xbf16, #tpu.memory_space<vmem>>, vector<1x8x512xbf16>
    %14 = vector.shape_cast %13 : vector<1x8x512xbf16> to vector<8x512xbf16>
    %15 = arith.extf %14 : vector<8x512xbf16> to vector<8x512xf32>
    %16 = arith.truncf %9 : vector<8x128xf32> to vector<8x128xbf16>
    %cst = arith.constant dense<0.000000e+00> : vector<8x512xf32>
    %17 = tpu.matmul %16, %3, %cst {dimension_numbers = #tpu.dot_dimension_numbers<[1], [0], [0], [1], [0, 0, 1, 1], [], []>} : vector<8x128xbf16>, vector<128x512xbf16>, vector<8x512xf32> -> vector<8x512xf32>
    %18 = arith.addf %15, %17 : vector<8x512xf32>
    %19 = vector.extract_strided_slice %18 {offsets = [0, 0], sizes = [8, 384], strides = [1, 1]} : vector<8x512xf32> to vector<8x384xf32>
    %20 = arith.negf %19 : vector<8x384xf32>
    %21 = math.exp %20 : vector<8x384xf32>
    %cst_21 = arith.constant 1.000000e+00 : f32
    %22 = vector.broadcast %cst_21 : f32 to vector<8x384xf32>
    %23 = arith.addf %22, %21 : vector<8x384xf32>
    %24 = arith.divf %22, %23 : vector<8x384xf32>
    %25 = vector.extract_strided_slice %18 {offsets = [0, 384], sizes = [8, 128], strides = [1, 1]} : vector<8x512xf32> to vector<8x128xf32>
    %26 = math.tanh %25 : vector<8x128xf32>
    %27 = vector.extract_strided_slice %24 {offsets = [0, 0], sizes = [8, 128], strides = [1, 1]} : vector<8x384xf32> to vector<8x128xf32>
    %28 = vector.extract_strided_slice %24 {offsets = [0, 128], sizes = [8, 128], strides = [1, 1]} : vector<8x384xf32> to vector<8x128xf32>
    %29 = vector.extract_strided_slice %24 {offsets = [0, 256], sizes = [8, 128], strides = [1, 1]} : vector<8x384xf32> to vector<8x128xf32>
    %30 = arith.mulf %28, %10 : vector<8x128xf32>
    %31 = arith.mulf %27, %26 : vector<8x128xf32>
    %32 = arith.addf %30, %31 : vector<8x128xf32>
    %33 = math.tanh %32 : vector<8x128xf32>
    %34 = arith.mulf %29, %33 : vector<8x128xf32>
    %35 = arith.mulf %34, %6 : vector<8x128xf32>
    %c0_22 = arith.constant 0 : index
    %c0_23 = arith.constant 0 : index
    %c0_24 = arith.constant 0 : index
    %36 = vector.load %arg7[%c0_22, %c0_23, %c0_24] : memref<8x8x128xf32, #tpu.memory_space<vmem>>, vector<1x8x128xf32>
    %37 = vector.shape_cast %36 : vector<1x8x128xf32> to vector<8x128xf32>
    %38 = vector.shape_cast %35 : vector<8x128xf32> to vector<1x8x128xf32>
    tpu.vector_store %arg7[%c0_22, %c0_23, %c0_24], %38 {strides = array<i32>} : memref<8x8x128xf32, #tpu.memory_space<vmem>>, vector<1x8x128xf32>,
    %c7 = arith.constant 7 : index
    %c0_25 = arith.constant 0 : index
    %c0_26 = arith.constant 0 : index
    %39 = vector.load %arg2[%c7, %c0_25, %c0_26] : memref<8x8x512xbf16, #tpu.memory_space<vmem>>, vector<1x8x512xbf16>
    %40 = vector.shape_cast %39 : vector<1x8x512xbf16> to vector<8x512xbf16>
    %41 = arith.extf %40 : vector<8x512xbf16> to vector<8x512xf32>
    %42 = arith.truncf %11 : vector<8x128xf32> to vector<8x128xbf16>
    %cst_27 = arith.constant dense<0.000000e+00> : vector<8x512xf32>
    %43 = tpu.matmul %42, %4, %cst_27 {dimension_numbers = #tpu.dot_dimension_numbers<[1], [0], [0], [1], [0, 0, 1, 1], [], []>} : vector<8x128xbf16>, vector<128x512xbf16>, vector<8x512xf32> -> vector<8x512xf32>
    %44 = arith.addf %41, %43 : vector<8x512xf32>
    %45 = vector.extract_strided_slice %44 {offsets = [0, 0], sizes = [8, 384], strides = [1, 1]} : vector<8x512xf32> to vector<8x384xf32>
    %46 = arith.negf %45 : vector<8x384xf32>
    %47 = math.exp %46 : vector<8x384xf32>
    %cst_28 = arith.constant 1.000000e+00 : f32
    %48 = vector.broadcast %cst_28 : f32 to vector<8x384xf32>
    %49 = arith.addf %48, %47 : vector<8x384xf32>
    %50 = arith.divf %48, %49 : vector<8x384xf32>
    %51 = vector.extract_strided_slice %44 {offsets = [0, 384], sizes = [8, 128], strides = [1, 1]} : vector<8x512xf32> to vector<8x128xf32>
    %52 = math.tanh %51 : vector<8x128xf32>
    %53 = vector.extract_strided_slice %50 {offsets = [0, 0], sizes = [8, 128], strides = [1, 1]} : vector<8x384xf32> to vector<8x128xf32>
    %54 = vector.extract_strided_slice %50 {offsets = [0, 128], sizes = [8, 128], strides = [1, 1]} : vector<8x384xf32> to vector<8x128xf32>
    %55 = vector.extract_strided_slice %50 {offsets = [0, 256], sizes = [8, 128], strides = [1, 1]} : vector<8x384xf32> to vector<8x128xf32>
    %56 = arith.mulf %54, %12 : vector<8x128xf32>
    %57 = arith.mulf %53, %52 : vector<8x128xf32>
    %58 = arith.addf %56, %57 : vector<8x128xf32>
    %59 = math.tanh %58 : vector<8x128xf32>
    %60 = arith.mulf %55, %59 : vector<8x128xf32>
    %61 = arith.mulf %60, %8 : vector<8x128xf32>
    %c7_29 = arith.constant 7 : index
    %c0_30 = arith.constant 0 : index
    %c0_31 = arith.constant 0 : index
    %62 = vector.load %arg8[%c7_29, %c0_30, %c0_31] : memref<8x8x128xf32, #tpu.memory_space<vmem>>, vector<1x8x128xf32>
    %63 = vector.shape_cast %62 : vector<1x8x128xf32> to vector<8x128xf32>
    %64 = vector.shape_cast %61 : vector<8x128xf32> to vector<1x8x128xf32>
    tpu.vector_store %arg8[%c7_29, %c0_30, %c0_31], %64 {strides = array<i32>} : memref<8x8x128xf32, #tpu.memory_space<vmem>>, vector<1x8x128xf32>,
    %c1 = arith.constant 1 : index
    %c0_32 = arith.constant 0 : index
    %c0_33 = arith.constant 0 : index
    %65 = vector.load %arg1[%c1, %c0_32, %c0_33] : memref<8x8x512xbf16, #tpu.memory_space<vmem>>, vector<1x8x512xbf16>
    %66 = vector.shape_cast %65 : vector<1x8x512xbf16> to vector<8x512xbf16>
    %67 = arith.extf %66 : vector<8x512xbf16> to vector<8x512xf32>
    %68 = arith.truncf %34 : vector<8x128xf32> to vector<8x128xbf16>
    %cst_34 = arith.constant dense<0.000000e+00> : vector<8x512xf32>
    %69 = tpu.matmul %68, %3, %cst_34 {dimension_numbers = #tpu.dot_dimension_numbers<[1], [0], [0], [1], [0, 0, 1, 1], [], []>} : vector<8x128xbf16>, vector<128x512xbf16>, vector<8x512xf32> -> vector<8x512xf32>
    %70 = arith.addf %67, %69 : vector<8x512xf32>
    %71 = vector.extract_strided_slice %70 {offsets = [0, 0], sizes = [8, 384], strides = [1, 1]} : vector<8x512xf32> to vector<8x384xf32>
    %72 = arith.negf %71 : vector<8x384xf32>
    %73 = math.exp %72 : vector<8x384xf32>
    %cst_35 = arith.constant 1.000000e+00 : f32
    %74 = vector.broadcast %cst_35 : f32 to vector<8x384xf32>
    %75 = arith.addf %74, %73 : vector<8x384xf32>
    %76 = arith.divf %74, %75 : vector<8x384xf32>
    %77 = vector.extract_strided_slice %70 {offsets = [0, 384], sizes = [8, 128], strides = [1, 1]} : vector<8x512xf32> to vector<8x128xf32>
    %78 = math.tanh %77 : vector<8x128xf32>
    %79 = vector.extract_strided_slice %76 {offsets = [0, 0], sizes = [8, 128], strides = [1, 1]} : vector<8x384xf32> to vector<8x128xf32>
    %80 = vector.extract_strided_slice %76 {offsets = [0, 128], sizes = [8, 128], strides = [1, 1]} : vector<8x384xf32> to vector<8x128xf32>
    %81 = vector.extract_strided_slice %76 {offsets = [0, 256], sizes = [8, 128], strides = [1, 1]} : vector<8x384xf32> to vector<8x128xf32>
    %82 = arith.mulf %80, %32 : vector<8x128xf32>
    %83 = arith.mulf %79, %78 : vector<8x128xf32>
    %84 = arith.addf %82, %83 : vector<8x128xf32>
    %85 = math.tanh %84 : vector<8x128xf32>
    %86 = arith.mulf %81, %85 : vector<8x128xf32>
    %87 = arith.mulf %86, %6 : vector<8x128xf32>
    %c1_36 = arith.constant 1 : index
    %c0_37 = arith.constant 0 : index
    %c0_38 = arith.constant 0 : index
    %88 = vector.load %arg7[%c1_36, %c0_37, %c0_38] : memref<8x8x128xf32, #tpu.memory_space<vmem>>, vector<1x8x128xf32>
    %89 = vector.shape_cast %88 : vector<1x8x128xf32> to vector<8x128xf32>
    %90 = vector.shape_cast %87 : vector<8x128xf32> to vector<1x8x128xf32>
    tpu.vector_store %arg7[%c1_36, %c0_37, %c0_38], %90 {strides = array<i32>} : memref<8x8x128xf32, #tpu.memory_space<vmem>>, vector<1x8x128xf32>,
    %c6 = arith.constant 6 : index
    %c0_39 = arith.constant 0 : index
    %c0_40 = arith.constant 0 : index
    %91 = vector.load %arg2[%c6, %c0_39, %c0_40] : memref<8x8x512xbf16, #tpu.memory_space<vmem>>, vector<1x8x512xbf16>
    %92 = vector.shape_cast %91 : vector<1x8x512xbf16> to vector<8x512xbf16>
    %93 = arith.extf %92 : vector<8x512xbf16> to vector<8x512xf32>
    %94 = arith.truncf %60 : vector<8x128xf32> to vector<8x128xbf16>
    %cst_41 = arith.constant dense<0.000000e+00> : vector<8x512xf32>
    %95 = tpu.matmul %94, %4, %cst_41 {dimension_numbers = #tpu.dot_dimension_numbers<[1], [0], [0], [1], [0, 0, 1, 1], [], []>} : vector<8x128xbf16>, vector<128x512xbf16>, vector<8x512xf32> -> vector<8x512xf32>
    %96 = arith.addf %93, %95 : vector<8x512xf32>
    %97 = vector.extract_strided_slice %96 {offsets = [0, 0], sizes = [8, 384], strides = [1, 1]} : vector<8x512xf32> to vector<8x384xf32>
    %98 = arith.negf %97 : vector<8x384xf32>
    %99 = math.exp %98 : vector<8x384xf32>
    %cst_42 = arith.constant 1.000000e+00 : f32
    %100 = vector.broadcast %cst_42 : f32 to vector<8x384xf32>
    %101 = arith.addf %100, %99 : vector<8x384xf32>
    %102 = arith.divf %100, %101 : vector<8x384xf32>
    %103 = vector.extract_strided_slice %96 {offsets = [0, 384], sizes = [8, 128], strides = [1, 1]} : vector<8x512xf32> to vector<8x128xf32>
    %104 = math.tanh %103 : vector<8x128xf32>
    %105 = vector.extract_strided_slice %102 {offsets = [0, 0], sizes = [8, 128], strides = [1, 1]} : vector<8x384xf32> to vector<8x128xf32>
    %106 = vector.extract_strided_slice %102 {offsets = [0, 128], sizes = [8, 128], strides = [1, 1]} : vector<8x384xf32> to vector<8x128xf32>
    %107 = vector.extract_strided_slice %102 {offsets = [0, 256], sizes = [8, 128], strides = [1, 1]} : vector<8x384xf32> to vector<8x128xf32>
    %108 = arith.mulf %106, %58 : vector<8x128xf32>
    %109 = arith.mulf %105, %104 : vector<8x128xf32>
    %110 = arith.addf %108, %109 : vector<8x128xf32>
    %111 = math.tanh %110 : vector<8x128xf32>
    %112 = arith.mulf %107, %111 : vector<8x128xf32>
    %113 = arith.mulf %112, %8 : vector<8x128xf32>
    %c6_43 = arith.constant 6 : index
    %c0_44 = arith.constant 0 : index
    %c0_45 = arith.constant 0 : index
    %114 = vector.load %arg8[%c6_43, %c0_44, %c0_45] : memref<8x8x128xf32, #tpu.memory_space<vmem>>, vector<1x8x128xf32>
    %115 = vector.shape_cast %114 : vector<1x8x128xf32> to vector<8x128xf32>
    %116 = vector.shape_cast %113 : vector<8x128xf32> to vector<1x8x128xf32>
    tpu.vector_store %arg8[%c6_43, %c0_44, %c0_45], %116 {strides = array<i32>} : memref<8x8x128xf32, #tpu.memory_space<vmem>>, vector<1x8x128xf32>,
    %c2 = arith.constant 2 : index
    %c0_46 = arith.constant 0 : index
    %c0_47 = arith.constant 0 : index
    %117 = vector.load %arg1[%c2, %c0_46, %c0_47] : memref<8x8x512xbf16, #tpu.memory_space<vmem>>, vector<1x8x512xbf16>
    %118 = vector.shape_cast %117 : vector<1x8x512xbf16> to vector<8x512xbf16>
    %119 = arith.extf %118 : vector<8x512xbf16> to vector<8x512xf32>
    %120 = arith.truncf %86 : vector<8x128xf32> to vector<8x128xbf16>
    %cst_48 = arith.constant dense<0.000000e+00> : vector<8x512xf32>
    %121 = tpu.matmul %120, %3, %cst_48 {dimension_numbers = #tpu.dot_dimension_numbers<[1], [0], [0], [1], [0, 0, 1, 1], [], []>} : vector<8x128xbf16>, vector<128x512xbf16>, vector<8x512xf32> -> vector<8x512xf32>
    %122 = arith.addf %119, %121 : vector<8x512xf32>
    %123 = vector.extract_strided_slice %122 {offsets = [0, 0], sizes = [8, 384], strides = [1, 1]} : vector<8x512xf32> to vector<8x384xf32>
    %124 = arith.negf %123 : vector<8x384xf32>
    %125 = math.exp %124 : vector<8x384xf32>
    %cst_49 = arith.constant 1.000000e+00 : f32
    %126 = vector.broadcast %cst_49 : f32 to vector<8x384xf32>
    %127 = arith.addf %126, %125 : vector<8x384xf32>
    %128 = arith.divf %126, %127 : vector<8x384xf32>
    %129 = vector.extract_strided_slice %122 {offsets = [0, 384], sizes = [8, 128], strides = [1, 1]} : vector<8x512xf32> to vector<8x128xf32>
    %130 = math.tanh %129 : vector<8x128xf32>
    %131 = vector.extract_strided_slice %128 {offsets = [0, 0], sizes = [8, 128], strides = [1, 1]} : vector<8x384xf32> to vector<8x128xf32>
    %132 = vector.extract_strided_slice %128 {offsets = [0, 128], sizes = [8, 128], strides = [1, 1]} : vector<8x384xf32> to vector<8x128xf32>
    %133 = vector.extract_strided_slice %128 {offsets = [0, 256], sizes = [8, 128], strides = [1, 1]} : vector<8x384xf32> to vector<8x128xf32>
    %134 = arith.mulf %132, %84 : vector<8x128xf32>
    %135 = arith.mulf %131, %130 : vector<8x128xf32>
    %136 = arith.addf %134, %135 : vector<8x128xf32>
    %137 = math.tanh %136 : vector<8x128xf32>
    %138 = arith.mulf %133, %137 : vector<8x128xf32>
    %139 = arith.mulf %138, %6 : vector<8x128xf32>
    %c2_50 = arith.constant 2 : index
    %c0_51 = arith.constant 0 : index
    %c0_52 = arith.constant 0 : index
    %140 = vector.load %arg7[%c2_50, %c0_51, %c0_52] : memref<8x8x128xf32, #tpu.memory_space<vmem>>, vector<1x8x128xf32>
    %141 = vector.shape_cast %140 : vector<1x8x128xf32> to vector<8x128xf32>
    %142 = vector.shape_cast %139 : vector<8x128xf32> to vector<1x8x128xf32>
    tpu.vector_store %arg7[%c2_50, %c0_51, %c0_52], %142 {strides = array<i32>} : memref<8x8x128xf32, #tpu.memory_space<vmem>>, vector<1x8x128xf32>,
    %c5 = arith.constant 5 : index
    %c0_53 = arith.constant 0 : index
    %c0_54 = arith.constant 0 : index
    %143 = vector.load %arg2[%c5, %c0_53, %c0_54] : memref<8x8x512xbf16, #tpu.memory_space<vmem>>, vector<1x8x512xbf16>
    %144 = vector.shape_cast %143 : vector<1x8x512xbf16> to vector<8x512xbf16>
    %145 = arith.extf %144 : vector<8x512xbf16> to vector<8x512xf32>
    %146 = arith.truncf %112 : vector<8x128xf32> to vector<8x128xbf16>
    %cst_55 = arith.constant dense<0.000000e+00> : vector<8x512xf32>
    %147 = tpu.matmul %146, %4, %cst_55 {dimension_numbers = #tpu.dot_dimension_numbers<[1], [0], [0], [1], [0, 0, 1, 1], [], []>} : vector<8x128xbf16>, vector<128x512xbf16>, vector<8x512xf32> -> vector<8x512xf32>
    %148 = arith.addf %145, %147 : vector<8x512xf32>
    %149 = vector.extract_strided_slice %148 {offsets = [0, 0], sizes = [8, 384], strides = [1, 1]} : vector<8x512xf32> to vector<8x384xf32>
    %150 = arith.negf %149 : vector<8x384xf32>
    %151 = math.exp %150 : vector<8x384xf32>
    %cst_56 = arith.constant 1.000000e+00 : f32
    %152 = vector.broadcast %cst_56 : f32 to vector<8x384xf32>
    %153 = arith.addf %152, %151 : vector<8x384xf32>
    %154 = arith.divf %152, %153 : vector<8x384xf32>
    %155 = vector.extract_strided_slice %148 {offsets = [0, 384], sizes = [8, 128], strides = [1, 1]} : vector<8x512xf32> to vector<8x128xf32>
    %156 = math.tanh %155 : vector<8x128xf32>
    %157 = vector.extract_strided_slice %154 {offsets = [0, 0], sizes = [8, 128], strides = [1, 1]} : vector<8x384xf32> to vector<8x128xf32>
    %158 = vector.extract_strided_slice %154 {offsets = [0, 128], sizes = [8, 128], strides = [1, 1]} : vector<8x384xf32> to vector<8x128xf32>
    %159 = vector.extract_strided_slice %154 {offsets = [0, 256], sizes = [8, 128], strides = [1, 1]} : vector<8x384xf32> to vector<8x128xf32>
    %160 = arith.mulf %158, %110 : vector<8x128xf32>
    %161 = arith.mulf %157, %156 : vector<8x128xf32>
    %162 = arith.addf %160, %161 : vector<8x128xf32>
    %163 = math.tanh %162 : vector<8x128xf32>
    %164 = arith.mulf %159, %163 : vector<8x128xf32>
    %165 = arith.mulf %164, %8 : vector<8x128xf32>
    %c5_57 = arith.constant 5 : index
    %c0_58 = arith.constant 0 : index
    %c0_59 = arith.constant 0 : index
    %166 = vector.load %arg8[%c5_57, %c0_58, %c0_59] : memref<8x8x128xf32, #tpu.memory_space<vmem>>, vector<1x8x128xf32>
    %167 = vector.shape_cast %166 : vector<1x8x128xf32> to vector<8x128xf32>
    %168 = vector.shape_cast %165 : vector<8x128xf32> to vector<1x8x128xf32>
    tpu.vector_store %arg8[%c5_57, %c0_58, %c0_59], %168 {strides = array<i32>} : memref<8x8x128xf32, #tpu.memory_space<vmem>>, vector<1x8x128xf32>,
    %c3 = arith.constant 3 : index
    %c0_60 = arith.constant 0 : index
    %c0_61 = arith.constant 0 : index
    %169 = vector.load %arg1[%c3, %c0_60, %c0_61] : memref<8x8x512xbf16, #tpu.memory_space<vmem>>, vector<1x8x512xbf16>
    %170 = vector.shape_cast %169 : vector<1x8x512xbf16> to vector<8x512xbf16>
    %171 = arith.extf %170 : vector<8x512xbf16> to vector<8x512xf32>
    %172 = arith.truncf %138 : vector<8x128xf32> to vector<8x128xbf16>
    %cst_62 = arith.constant dense<0.000000e+00> : vector<8x512xf32>
    %173 = tpu.matmul %172, %3, %cst_62 {dimension_numbers = #tpu.dot_dimension_numbers<[1], [0], [0], [1], [0, 0, 1, 1], [], []>} : vector<8x128xbf16>, vector<128x512xbf16>, vector<8x512xf32> -> vector<8x512xf32>
    %174 = arith.addf %171, %173 : vector<8x512xf32>
    %175 = vector.extract_strided_slice %174 {offsets = [0, 0], sizes = [8, 384], strides = [1, 1]} : vector<8x512xf32> to vector<8x384xf32>
    %176 = arith.negf %175 : vector<8x384xf32>
    %177 = math.exp %176 : vector<8x384xf32>
    %cst_63 = arith.constant 1.000000e+00 : f32
    %178 = vector.broadcast %cst_63 : f32 to vector<8x384xf32>
    %179 = arith.addf %178, %177 : vector<8x384xf32>
    %180 = arith.divf %178, %179 : vector<8x384xf32>
    %181 = vector.extract_strided_slice %174 {offsets = [0, 384], sizes = [8, 128], strides = [1, 1]} : vector<8x512xf32> to vector<8x128xf32>
    %182 = math.tanh %181 : vector<8x128xf32>
    %183 = vector.extract_strided_slice %180 {offsets = [0, 0], sizes = [8, 128], strides = [1, 1]} : vector<8x384xf32> to vector<8x128xf32>
    %184 = vector.extract_strided_slice %180 {offsets = [0, 128], sizes = [8, 128], strides = [1, 1]} : vector<8x384xf32> to vector<8x128xf32>
    %185 = vector.extract_strided_slice %180 {offsets = [0, 256], sizes = [8, 128], strides = [1, 1]} : vector<8x384xf32> to vector<8x128xf32>
    %186 = arith.mulf %184, %136 : vector<8x128xf32>
    %187 = arith.mulf %183, %182 : vector<8x128xf32>
    %188 = arith.addf %186, %187 : vector<8x128xf32>
    %189 = math.tanh %188 : vector<8x128xf32>
    %190 = arith.mulf %185, %189 : vector<8x128xf32>
    %191 = arith.mulf %190, %6 : vector<8x128xf32>
    %c3_64 = arith.constant 3 : index
    %c0_65 = arith.constant 0 : index
    %c0_66 = arith.constant 0 : index
    %192 = vector.load %arg7[%c3_64, %c0_65, %c0_66] : memref<8x8x128xf32, #tpu.memory_space<vmem>>, vector<1x8x128xf32>
    %193 = vector.shape_cast %192 : vector<1x8x128xf32> to vector<8x128xf32>
    %194 = vector.shape_cast %191 : vector<8x128xf32> to vector<1x8x128xf32>
    tpu.vector_store %arg7[%c3_64, %c0_65, %c0_66], %194 {strides = array<i32>} : memref<8x8x128xf32, #tpu.memory_space<vmem>>, vector<1x8x128xf32>,
    %c4 = arith.constant 4 : index
    %c0_67 = arith.constant 0 : index
    %c0_68 = arith.constant 0 : index
    %195 = vector.load %arg2[%c4, %c0_67, %c0_68] : memref<8x8x512xbf16, #tpu.memory_space<vmem>>, vector<1x8x512xbf16>
    %196 = vector.shape_cast %195 : vector<1x8x512xbf16> to vector<8x512xbf16>
    %197 = arith.extf %196 : vector<8x512xbf16> to vector<8x512xf32>
    %198 = arith.truncf %164 : vector<8x128xf32> to vector<8x128xbf16>
    %cst_69 = arith.constant dense<0.000000e+00> : vector<8x512xf32>
    %199 = tpu.matmul %198, %4, %cst_69 {dimension_numbers = #tpu.dot_dimension_numbers<[1], [0], [0], [1], [0, 0, 1, 1], [], []>} : vector<8x128xbf16>, vector<128x512xbf16>, vector<8x512xf32> -> vector<8x512xf32>
    %200 = arith.addf %197, %199 : vector<8x512xf32>
    %201 = vector.extract_strided_slice %200 {offsets = [0, 0], sizes = [8, 384], strides = [1, 1]} : vector<8x512xf32> to vector<8x384xf32>
    %202 = arith.negf %201 : vector<8x384xf32>
    %203 = math.exp %202 : vector<8x384xf32>
    %cst_70 = arith.constant 1.000000e+00 : f32
    %204 = vector.broadcast %cst_70 : f32 to vector<8x384xf32>
    %205 = arith.addf %204, %203 : vector<8x384xf32>
    %206 = arith.divf %204, %205 : vector<8x384xf32>
    %207 = vector.extract_strided_slice %200 {offsets = [0, 384], sizes = [8, 128], strides = [1, 1]} : vector<8x512xf32> to vector<8x128xf32>
    %208 = math.tanh %207 : vector<8x128xf32>
    %209 = vector.extract_strided_slice %206 {offsets = [0, 0], sizes = [8, 128], strides = [1, 1]} : vector<8x384xf32> to vector<8x128xf32>
    %210 = vector.extract_strided_slice %206 {offsets = [0, 128], sizes = [8, 128], strides = [1, 1]} : vector<8x384xf32> to vector<8x128xf32>
    %211 = vector.extract_strided_slice %206 {offsets = [0, 256], sizes = [8, 128], strides = [1, 1]} : vector<8x384xf32> to vector<8x128xf32>
    %212 = arith.mulf %210, %162 : vector<8x128xf32>
    %213 = arith.mulf %209, %208 : vector<8x128xf32>
    %214 = arith.addf %212, %213 : vector<8x128xf32>
    %215 = math.tanh %214 : vector<8x128xf32>
    %216 = arith.mulf %211, %215 : vector<8x128xf32>
    %217 = arith.mulf %216, %8 : vector<8x128xf32>
    %c4_71 = arith.constant 4 : index
    %c0_72 = arith.constant 0 : index
    %c0_73 = arith.constant 0 : index
    %218 = vector.load %arg8[%c4_71, %c0_72, %c0_73] : memref<8x8x128xf32, #tpu.memory_space<vmem>>, vector<1x8x128xf32>
    %219 = vector.shape_cast %218 : vector<1x8x128xf32> to vector<8x128xf32>
    %220 = vector.shape_cast %217 : vector<8x128xf32> to vector<1x8x128xf32>
    tpu.vector_store %arg8[%c4_71, %c0_72, %c0_73], %220 {strides = array<i32>} : memref<8x8x128xf32, #tpu.memory_space<vmem>>, vector<1x8x128xf32>,
    %c4_74 = arith.constant 4 : index
    %c0_75 = arith.constant 0 : index
    %c0_76 = arith.constant 0 : index
    %221 = vector.load %arg1[%c4_74, %c0_75, %c0_76] : memref<8x8x512xbf16, #tpu.memory_space<vmem>>, vector<1x8x512xbf16>
    %222 = vector.shape_cast %221 : vector<1x8x512xbf16> to vector<8x512xbf16>
    %223 = arith.extf %222 : vector<8x512xbf16> to vector<8x512xf32>
    %224 = arith.truncf %190 : vector<8x128xf32> to vector<8x128xbf16>
    %cst_77 = arith.constant dense<0.000000e+00> : vector<8x512xf32>
    %225 = tpu.matmul %224, %3, %cst_77 {dimension_numbers = #tpu.dot_dimension_numbers<[1], [0], [0], [1], [0, 0, 1, 1], [], []>} : vector<8x128xbf16>, vector<128x512xbf16>, vector<8x512xf32> -> vector<8x512xf32>
    %226 = arith.addf %223, %225 : vector<8x512xf32>
    %227 = vector.extract_strided_slice %226 {offsets = [0, 0], sizes = [8, 384], strides = [1, 1]} : vector<8x512xf32> to vector<8x384xf32>
    %228 = arith.negf %227 : vector<8x384xf32>
    %229 = math.exp %228 : vector<8x384xf32>
    %cst_78 = arith.constant 1.000000e+00 : f32
    %230 = vector.broadcast %cst_78 : f32 to vector<8x384xf32>
    %231 = arith.addf %230, %229 : vector<8x384xf32>
    %232 = arith.divf %230, %231 : vector<8x384xf32>
    %233 = vector.extract_strided_slice %226 {offsets = [0, 384], sizes = [8, 128], strides = [1, 1]} : vector<8x512xf32> to vector<8x128xf32>
    %234 = math.tanh %233 : vector<8x128xf32>
    %235 = vector.extract_strided_slice %232 {offsets = [0, 0], sizes = [8, 128], strides = [1, 1]} : vector<8x384xf32> to vector<8x128xf32>
    %236 = vector.extract_strided_slice %232 {offsets = [0, 128], sizes = [8, 128], strides = [1, 1]} : vector<8x384xf32> to vector<8x128xf32>
    %237 = vector.extract_strided_slice %232 {offsets = [0, 256], sizes = [8, 128], strides = [1, 1]} : vector<8x384xf32> to vector<8x128xf32>
    %238 = arith.mulf %236, %188 : vector<8x128xf32>
    %239 = arith.mulf %235, %234 : vector<8x128xf32>
    %240 = arith.addf %238, %239 : vector<8x128xf32>
    %241 = math.tanh %240 : vector<8x128xf32>
    %242 = arith.mulf %237, %241 : vector<8x128xf32>
    %243 = arith.mulf %242, %6 : vector<8x128xf32>
    %c4_79 = arith.constant 4 : index
    %c0_80 = arith.constant 0 : index
    %c0_81 = arith.constant 0 : index
    %244 = vector.load %arg7[%c4_79, %c0_80, %c0_81] : memref<8x8x128xf32, #tpu.memory_space<vmem>>, vector<1x8x128xf32>
    %245 = vector.shape_cast %244 : vector<1x8x128xf32> to vector<8x128xf32>
    %246 = vector.shape_cast %243 : vector<8x128xf32> to vector<1x8x128xf32>
    tpu.vector_store %arg7[%c4_79, %c0_80, %c0_81], %246 {strides = array<i32>} : memref<8x8x128xf32, #tpu.memory_space<vmem>>, vector<1x8x128xf32>,
    %c3_82 = arith.constant 3 : index
    %c0_83 = arith.constant 0 : index
    %c0_84 = arith.constant 0 : index
    %247 = vector.load %arg2[%c3_82, %c0_83, %c0_84] : memref<8x8x512xbf16, #tpu.memory_space<vmem>>, vector<1x8x512xbf16>
    %248 = vector.shape_cast %247 : vector<1x8x512xbf16> to vector<8x512xbf16>
    %249 = arith.extf %248 : vector<8x512xbf16> to vector<8x512xf32>
    %250 = arith.truncf %216 : vector<8x128xf32> to vector<8x128xbf16>
    %cst_85 = arith.constant dense<0.000000e+00> : vector<8x512xf32>
    %251 = tpu.matmul %250, %4, %cst_85 {dimension_numbers = #tpu.dot_dimension_numbers<[1], [0], [0], [1], [0, 0, 1, 1], [], []>} : vector<8x128xbf16>, vector<128x512xbf16>, vector<8x512xf32> -> vector<8x512xf32>
    %252 = arith.addf %249, %251 : vector<8x512xf32>
    %253 = vector.extract_strided_slice %252 {offsets = [0, 0], sizes = [8, 384], strides = [1, 1]} : vector<8x512xf32> to vector<8x384xf32>
    %254 = arith.negf %253 : vector<8x384xf32>
    %255 = math.exp %254 : vector<8x384xf32>
    %cst_86 = arith.constant 1.000000e+00 : f32
    %256 = vector.broadcast %cst_86 : f32 to vector<8x384xf32>
    %257 = arith.addf %256, %255 : vector<8x384xf32>
    %258 = arith.divf %256, %257 : vector<8x384xf32>
    %259 = vector.extract_strided_slice %252 {offsets = [0, 384], sizes = [8, 128], strides = [1, 1]} : vector<8x512xf32> to vector<8x128xf32>
    %260 = math.tanh %259 : vector<8x128xf32>
    %261 = vector.extract_strided_slice %258 {offsets = [0, 0], sizes = [8, 128], strides = [1, 1]} : vector<8x384xf32> to vector<8x128xf32>
    %262 = vector.extract_strided_slice %258 {offsets = [0, 128], sizes = [8, 128], strides = [1, 1]} : vector<8x384xf32> to vector<8x128xf32>
    %263 = vector.extract_strided_slice %258 {offsets = [0, 256], sizes = [8, 128], strides = [1, 1]} : vector<8x384xf32> to vector<8x128xf32>
    %264 = arith.mulf %262, %214 : vector<8x128xf32>
    %265 = arith.mulf %261, %260 : vector<8x128xf32>
    %266 = arith.addf %264, %265 : vector<8x128xf32>
    %267 = math.tanh %266 : vector<8x128xf32>
    %268 = arith.mulf %263, %267 : vector<8x128xf32>
    %269 = arith.mulf %268, %8 : vector<8x128xf32>
    %c3_87 = arith.constant 3 : index
    %c0_88 = arith.constant 0 : index
    %c0_89 = arith.constant 0 : index
    %270 = vector.load %arg8[%c3_87, %c0_88, %c0_89] : memref<8x8x128xf32, #tpu.memory_space<vmem>>, vector<1x8x128xf32>
    %271 = vector.shape_cast %270 : vector<1x8x128xf32> to vector<8x128xf32>
    %272 = vector.shape_cast %269 : vector<8x128xf32> to vector<1x8x128xf32>
    tpu.vector_store %arg8[%c3_87, %c0_88, %c0_89], %272 {strides = array<i32>} : memref<8x8x128xf32, #tpu.memory_space<vmem>>, vector<1x8x128xf32>,
    %c5_90 = arith.constant 5 : index
    %c0_91 = arith.constant 0 : index
    %c0_92 = arith.constant 0 : index
    %273 = vector.load %arg1[%c5_90, %c0_91, %c0_92] : memref<8x8x512xbf16, #tpu.memory_space<vmem>>, vector<1x8x512xbf16>
    %274 = vector.shape_cast %273 : vector<1x8x512xbf16> to vector<8x512xbf16>
    %275 = arith.extf %274 : vector<8x512xbf16> to vector<8x512xf32>
    %276 = arith.truncf %242 : vector<8x128xf32> to vector<8x128xbf16>
    %cst_93 = arith.constant dense<0.000000e+00> : vector<8x512xf32>
    %277 = tpu.matmul %276, %3, %cst_93 {dimension_numbers = #tpu.dot_dimension_numbers<[1], [0], [0], [1], [0, 0, 1, 1], [], []>} : vector<8x128xbf16>, vector<128x512xbf16>, vector<8x512xf32> -> vector<8x512xf32>
    %278 = arith.addf %275, %277 : vector<8x512xf32>
    %279 = vector.extract_strided_slice %278 {offsets = [0, 0], sizes = [8, 384], strides = [1, 1]} : vector<8x512xf32> to vector<8x384xf32>
    %280 = arith.negf %279 : vector<8x384xf32>
    %281 = math.exp %280 : vector<8x384xf32>
    %cst_94 = arith.constant 1.000000e+00 : f32
    %282 = vector.broadcast %cst_94 : f32 to vector<8x384xf32>
    %283 = arith.addf %282, %281 : vector<8x384xf32>
    %284 = arith.divf %282, %283 : vector<8x384xf32>
    %285 = vector.extract_strided_slice %278 {offsets = [0, 384], sizes = [8, 128], strides = [1, 1]} : vector<8x512xf32> to vector<8x128xf32>
    %286 = math.tanh %285 : vector<8x128xf32>
    %287 = vector.extract_strided_slice %284 {offsets = [0, 0], sizes = [8, 128], strides = [1, 1]} : vector<8x384xf32> to vector<8x128xf32>
    %288 = vector.extract_strided_slice %284 {offsets = [0, 128], sizes = [8, 128], strides = [1, 1]} : vector<8x384xf32> to vector<8x128xf32>
    %289 = vector.extract_strided_slice %284 {offsets = [0, 256], sizes = [8, 128], strides = [1, 1]} : vector<8x384xf32> to vector<8x128xf32>
    %290 = arith.mulf %288, %240 : vector<8x128xf32>
    %291 = arith.mulf %287, %286 : vector<8x128xf32>
    %292 = arith.addf %290, %291 : vector<8x128xf32>
    %293 = math.tanh %292 : vector<8x128xf32>
    %294 = arith.mulf %289, %293 : vector<8x128xf32>
    %295 = arith.mulf %294, %6 : vector<8x128xf32>
    %c5_95 = arith.constant 5 : index
    %c0_96 = arith.constant 0 : index
    %c0_97 = arith.constant 0 : index
    %296 = vector.load %arg7[%c5_95, %c0_96, %c0_97] : memref<8x8x128xf32, #tpu.memory_space<vmem>>, vector<1x8x128xf32>
    %297 = vector.shape_cast %296 : vector<1x8x128xf32> to vector<8x128xf32>
    %298 = vector.shape_cast %295 : vector<8x128xf32> to vector<1x8x128xf32>
    tpu.vector_store %arg7[%c5_95, %c0_96, %c0_97], %298 {strides = array<i32>} : memref<8x8x128xf32, #tpu.memory_space<vmem>>, vector<1x8x128xf32>,
    %c2_98 = arith.constant 2 : index
    %c0_99 = arith.constant 0 : index
    %c0_100 = arith.constant 0 : index
    %299 = vector.load %arg2[%c2_98, %c0_99, %c0_100] : memref<8x8x512xbf16, #tpu.memory_space<vmem>>, vector<1x8x512xbf16>
    %300 = vector.shape_cast %299 : vector<1x8x512xbf16> to vector<8x512xbf16>
    %301 = arith.extf %300 : vector<8x512xbf16> to vector<8x512xf32>
    %302 = arith.truncf %268 : vector<8x128xf32> to vector<8x128xbf16>
    %cst_101 = arith.constant dense<0.000000e+00> : vector<8x512xf32>
    %303 = tpu.matmul %302, %4, %cst_101 {dimension_numbers = #tpu.dot_dimension_numbers<[1], [0], [0], [1], [0, 0, 1, 1], [], []>} : vector<8x128xbf16>, vector<128x512xbf16>, vector<8x512xf32> -> vector<8x512xf32>
    %304 = arith.addf %301, %303 : vector<8x512xf32>
    %305 = vector.extract_strided_slice %304 {offsets = [0, 0], sizes = [8, 384], strides = [1, 1]} : vector<8x512xf32> to vector<8x384xf32>
    %306 = arith.negf %305 : vector<8x384xf32>
    %307 = math.exp %306 : vector<8x384xf32>
    %cst_102 = arith.constant 1.000000e+00 : f32
    %308 = vector.broadcast %cst_102 : f32 to vector<8x384xf32>
    %309 = arith.addf %308, %307 : vector<8x384xf32>
    %310 = arith.divf %308, %309 : vector<8x384xf32>
    %311 = vector.extract_strided_slice %304 {offsets = [0, 384], sizes = [8, 128], strides = [1, 1]} : vector<8x512xf32> to vector<8x128xf32>
    %312 = math.tanh %311 : vector<8x128xf32>
    %313 = vector.extract_strided_slice %310 {offsets = [0, 0], sizes = [8, 128], strides = [1, 1]} : vector<8x384xf32> to vector<8x128xf32>
    %314 = vector.extract_strided_slice %310 {offsets = [0, 128], sizes = [8, 128], strides = [1, 1]} : vector<8x384xf32> to vector<8x128xf32>
    %315 = vector.extract_strided_slice %310 {offsets = [0, 256], sizes = [8, 128], strides = [1, 1]} : vector<8x384xf32> to vector<8x128xf32>
    %316 = arith.mulf %314, %266 : vector<8x128xf32>
    %317 = arith.mulf %313, %312 : vector<8x128xf32>
    %318 = arith.addf %316, %317 : vector<8x128xf32>
    %319 = math.tanh %318 : vector<8x128xf32>
    %320 = arith.mulf %315, %319 : vector<8x128xf32>
    %321 = arith.mulf %320, %8 : vector<8x128xf32>
    %c2_103 = arith.constant 2 : index
    %c0_104 = arith.constant 0 : index
    %c0_105 = arith.constant 0 : index
    %322 = vector.load %arg8[%c2_103, %c0_104, %c0_105] : memref<8x8x128xf32, #tpu.memory_space<vmem>>, vector<1x8x128xf32>
    %323 = vector.shape_cast %322 : vector<1x8x128xf32> to vector<8x128xf32>
    %324 = vector.shape_cast %321 : vector<8x128xf32> to vector<1x8x128xf32>
    tpu.vector_store %arg8[%c2_103, %c0_104, %c0_105], %324 {strides = array<i32>} : memref<8x8x128xf32, #tpu.memory_space<vmem>>, vector<1x8x128xf32>,
    %c6_106 = arith.constant 6 : index
    %c0_107 = arith.constant 0 : index
    %c0_108 = arith.constant 0 : index
    %325 = vector.load %arg1[%c6_106, %c0_107, %c0_108] : memref<8x8x512xbf16, #tpu.memory_space<vmem>>, vector<1x8x512xbf16>
    %326 = vector.shape_cast %325 : vector<1x8x512xbf16> to vector<8x512xbf16>
    %327 = arith.extf %326 : vector<8x512xbf16> to vector<8x512xf32>
    %328 = arith.truncf %294 : vector<8x128xf32> to vector<8x128xbf16>
    %cst_109 = arith.constant dense<0.000000e+00> : vector<8x512xf32>
    %329 = tpu.matmul %328, %3, %cst_109 {dimension_numbers = #tpu.dot_dimension_numbers<[1], [0], [0], [1], [0, 0, 1, 1], [], []>} : vector<8x128xbf16>, vector<128x512xbf16>, vector<8x512xf32> -> vector<8x512xf32>
    %330 = arith.addf %327, %329 : vector<8x512xf32>
    %331 = vector.extract_strided_slice %330 {offsets = [0, 0], sizes = [8, 384], strides = [1, 1]} : vector<8x512xf32> to vector<8x384xf32>
    %332 = arith.negf %331 : vector<8x384xf32>
    %333 = math.exp %332 : vector<8x384xf32>
    %cst_110 = arith.constant 1.000000e+00 : f32
    %334 = vector.broadcast %cst_110 : f32 to vector<8x384xf32>
    %335 = arith.addf %334, %333 : vector<8x384xf32>
    %336 = arith.divf %334, %335 : vector<8x384xf32>
    %337 = vector.extract_strided_slice %330 {offsets = [0, 384], sizes = [8, 128], strides = [1, 1]} : vector<8x512xf32> to vector<8x128xf32>
    %338 = math.tanh %337 : vector<8x128xf32>
    %339 = vector.extract_strided_slice %336 {offsets = [0, 0], sizes = [8, 128], strides = [1, 1]} : vector<8x384xf32> to vector<8x128xf32>
    %340 = vector.extract_strided_slice %336 {offsets = [0, 128], sizes = [8, 128], strides = [1, 1]} : vector<8x384xf32> to vector<8x128xf32>
    %341 = vector.extract_strided_slice %336 {offsets = [0, 256], sizes = [8, 128], strides = [1, 1]} : vector<8x384xf32> to vector<8x128xf32>
    %342 = arith.mulf %340, %292 : vector<8x128xf32>
    %343 = arith.mulf %339, %338 : vector<8x128xf32>
    %344 = arith.addf %342, %343 : vector<8x128xf32>
    %345 = math.tanh %344 : vector<8x128xf32>
    %346 = arith.mulf %341, %345 : vector<8x128xf32>
    %347 = arith.mulf %346, %6 : vector<8x128xf32>
    %c6_111 = arith.constant 6 : index
    %c0_112 = arith.constant 0 : index
    %c0_113 = arith.constant 0 : index
    %348 = vector.load %arg7[%c6_111, %c0_112, %c0_113] : memref<8x8x128xf32, #tpu.memory_space<vmem>>, vector<1x8x128xf32>
    %349 = vector.shape_cast %348 : vector<1x8x128xf32> to vector<8x128xf32>
    %350 = vector.shape_cast %347 : vector<8x128xf32> to vector<1x8x128xf32>
    tpu.vector_store %arg7[%c6_111, %c0_112, %c0_113], %350 {strides = array<i32>} : memref<8x8x128xf32, #tpu.memory_space<vmem>>, vector<1x8x128xf32>,
    %c1_114 = arith.constant 1 : index
    %c0_115 = arith.constant 0 : index
    %c0_116 = arith.constant 0 : index
    %351 = vector.load %arg2[%c1_114, %c0_115, %c0_116] : memref<8x8x512xbf16, #tpu.memory_space<vmem>>, vector<1x8x512xbf16>
    %352 = vector.shape_cast %351 : vector<1x8x512xbf16> to vector<8x512xbf16>
    %353 = arith.extf %352 : vector<8x512xbf16> to vector<8x512xf32>
    %354 = arith.truncf %320 : vector<8x128xf32> to vector<8x128xbf16>
    %cst_117 = arith.constant dense<0.000000e+00> : vector<8x512xf32>
    %355 = tpu.matmul %354, %4, %cst_117 {dimension_numbers = #tpu.dot_dimension_numbers<[1], [0], [0], [1], [0, 0, 1, 1], [], []>} : vector<8x128xbf16>, vector<128x512xbf16>, vector<8x512xf32> -> vector<8x512xf32>
    %356 = arith.addf %353, %355 : vector<8x512xf32>
    %357 = vector.extract_strided_slice %356 {offsets = [0, 0], sizes = [8, 384], strides = [1, 1]} : vector<8x512xf32> to vector<8x384xf32>
    %358 = arith.negf %357 : vector<8x384xf32>
    %359 = math.exp %358 : vector<8x384xf32>
    %cst_118 = arith.constant 1.000000e+00 : f32
    %360 = vector.broadcast %cst_118 : f32 to vector<8x384xf32>
    %361 = arith.addf %360, %359 : vector<8x384xf32>
    %362 = arith.divf %360, %361 : vector<8x384xf32>
    %363 = vector.extract_strided_slice %356 {offsets = [0, 384], sizes = [8, 128], strides = [1, 1]} : vector<8x512xf32> to vector<8x128xf32>
    %364 = math.tanh %363 : vector<8x128xf32>
    %365 = vector.extract_strided_slice %362 {offsets = [0, 0], sizes = [8, 128], strides = [1, 1]} : vector<8x384xf32> to vector<8x128xf32>
    %366 = vector.extract_strided_slice %362 {offsets = [0, 128], sizes = [8, 128], strides = [1, 1]} : vector<8x384xf32> to vector<8x128xf32>
    %367 = vector.extract_strided_slice %362 {offsets = [0, 256], sizes = [8, 128], strides = [1, 1]} : vector<8x384xf32> to vector<8x128xf32>
    %368 = arith.mulf %366, %318 : vector<8x128xf32>
    %369 = arith.mulf %365, %364 : vector<8x128xf32>
    %370 = arith.addf %368, %369 : vector<8x128xf32>
    %371 = math.tanh %370 : vector<8x128xf32>
    %372 = arith.mulf %367, %371 : vector<8x128xf32>
    %373 = arith.mulf %372, %8 : vector<8x128xf32>
    %c1_119 = arith.constant 1 : index
    %c0_120 = arith.constant 0 : index
    %c0_121 = arith.constant 0 : index
    %374 = vector.load %arg8[%c1_119, %c0_120, %c0_121] : memref<8x8x128xf32, #tpu.memory_space<vmem>>, vector<1x8x128xf32>
    %375 = vector.shape_cast %374 : vector<1x8x128xf32> to vector<8x128xf32>
    %376 = vector.shape_cast %373 : vector<8x128xf32> to vector<1x8x128xf32>
    tpu.vector_store %arg8[%c1_119, %c0_120, %c0_121], %376 {strides = array<i32>} : memref<8x8x128xf32, #tpu.memory_space<vmem>>, vector<1x8x128xf32>,
    %c7_122 = arith.constant 7 : index
    %c0_123 = arith.constant 0 : index
    %c0_124 = arith.constant 0 : index
    %377 = vector.load %arg1[%c7_122, %c0_123, %c0_124] : memref<8x8x512xbf16, #tpu.memory_space<vmem>>, vector<1x8x512xbf16>
    %378 = vector.shape_cast %377 : vector<1x8x512xbf16> to vector<8x512xbf16>
    %379 = arith.extf %378 : vector<8x512xbf16> to vector<8x512xf32>
    %380 = arith.truncf %346 : vector<8x128xf32> to vector<8x128xbf16>
    %cst_125 = arith.constant dense<0.000000e+00> : vector<8x512xf32>
    %381 = tpu.matmul %380, %3, %cst_125 {dimension_numbers = #tpu.dot_dimension_numbers<[1], [0], [0], [1], [0, 0, 1, 1], [], []>} : vector<8x128xbf16>, vector<128x512xbf16>, vector<8x512xf32> -> vector<8x512xf32>
    %382 = arith.addf %379, %381 : vector<8x512xf32>
    %383 = vector.extract_strided_slice %382 {offsets = [0, 0], sizes = [8, 384], strides = [1, 1]} : vector<8x512xf32> to vector<8x384xf32>
    %384 = arith.negf %383 : vector<8x384xf32>
    %385 = math.exp %384 : vector<8x384xf32>
    %cst_126 = arith.constant 1.000000e+00 : f32
    %386 = vector.broadcast %cst_126 : f32 to vector<8x384xf32>
    %387 = arith.addf %386, %385 : vector<8x384xf32>
    %388 = arith.divf %386, %387 : vector<8x384xf32>
    %389 = vector.extract_strided_slice %382 {offsets = [0, 384], sizes = [8, 128], strides = [1, 1]} : vector<8x512xf32> to vector<8x128xf32>
    %390 = math.tanh %389 : vector<8x128xf32>
    %391 = vector.extract_strided_slice %388 {offsets = [0, 0], sizes = [8, 128], strides = [1, 1]} : vector<8x384xf32> to vector<8x128xf32>
    %392 = vector.extract_strided_slice %388 {offsets = [0, 128], sizes = [8, 128], strides = [1, 1]} : vector<8x384xf32> to vector<8x128xf32>
    %393 = vector.extract_strided_slice %388 {offsets = [0, 256], sizes = [8, 128], strides = [1, 1]} : vector<8x384xf32> to vector<8x128xf32>
    %394 = arith.mulf %392, %344 : vector<8x128xf32>
    %395 = arith.mulf %391, %390 : vector<8x128xf32>
    %396 = arith.addf %394, %395 : vector<8x128xf32>
    %397 = math.tanh %396 : vector<8x128xf32>
    %398 = arith.mulf %393, %397 : vector<8x128xf32>
    %399 = arith.mulf %398, %6 : vector<8x128xf32>
    %c7_127 = arith.constant 7 : index
    %c0_128 = arith.constant 0 : index
    %c0_129 = arith.constant 0 : index
    %400 = vector.load %arg7[%c7_127, %c0_128, %c0_129] : memref<8x8x128xf32, #tpu.memory_space<vmem>>, vector<1x8x128xf32>
    %401 = vector.shape_cast %400 : vector<1x8x128xf32> to vector<8x128xf32>
    %402 = vector.shape_cast %399 : vector<8x128xf32> to vector<1x8x128xf32>
    tpu.vector_store %arg7[%c7_127, %c0_128, %c0_129], %402 {strides = array<i32>} : memref<8x8x128xf32, #tpu.memory_space<vmem>>, vector<1x8x128xf32>,
    %c0_130 = arith.constant 0 : index
    %c0_131 = arith.constant 0 : index
    %c0_132 = arith.constant 0 : index
    %403 = vector.load %arg2[%c0_130, %c0_131, %c0_132] : memref<8x8x512xbf16, #tpu.memory_space<vmem>>, vector<1x8x512xbf16>
    %404 = vector.shape_cast %403 : vector<1x8x512xbf16> to vector<8x512xbf16>
    %405 = arith.extf %404 : vector<8x512xbf16> to vector<8x512xf32>
    %406 = arith.truncf %372 : vector<8x128xf32> to vector<8x128xbf16>
    %cst_133 = arith.constant dense<0.000000e+00> : vector<8x512xf32>
    %407 = tpu.matmul %406, %4, %cst_133 {dimension_numbers = #tpu.dot_dimension_numbers<[1], [0], [0], [1], [0, 0, 1, 1], [], []>} : vector<8x128xbf16>, vector<128x512xbf16>, vector<8x512xf32> -> vector<8x512xf32>
    %408 = arith.addf %405, %407 : vector<8x512xf32>
    %409 = vector.extract_strided_slice %408 {offsets = [0, 0], sizes = [8, 384], strides = [1, 1]} : vector<8x512xf32> to vector<8x384xf32>
    %410 = arith.negf %409 : vector<8x384xf32>
    %411 = math.exp %410 : vector<8x384xf32>
    %cst_134 = arith.constant 1.000000e+00 : f32
    %412 = vector.broadcast %cst_134 : f32 to vector<8x384xf32>
    %413 = arith.addf %412, %411 : vector<8x384xf32>
    %414 = arith.divf %412, %413 : vector<8x384xf32>
    %415 = vector.extract_strided_slice %408 {offsets = [0, 384], sizes = [8, 128], strides = [1, 1]} : vector<8x512xf32> to vector<8x128xf32>
    %416 = math.tanh %415 : vector<8x128xf32>
    %417 = vector.extract_strided_slice %414 {offsets = [0, 0], sizes = [8, 128], strides = [1, 1]} : vector<8x384xf32> to vector<8x128xf32>
    %418 = vector.extract_strided_slice %414 {offsets = [0, 128], sizes = [8, 128], strides = [1, 1]} : vector<8x384xf32> to vector<8x128xf32>
    %419 = vector.extract_strided_slice %414 {offsets = [0, 256], sizes = [8, 128], strides = [1, 1]} : vector<8x384xf32> to vector<8x128xf32>
    %420 = arith.mulf %418, %370 : vector<8x128xf32>
    %421 = arith.mulf %417, %416 : vector<8x128xf32>
    %422 = arith.addf %420, %421 : vector<8x128xf32>
    %423 = math.tanh %422 : vector<8x128xf32>
    %424 = arith.mulf %419, %423 : vector<8x128xf32>
    %425 = arith.mulf %424, %8 : vector<8x128xf32>
    %c0_135 = arith.constant 0 : index
    %c0_136 = arith.constant 0 : index
    %c0_137 = arith.constant 0 : index
    %426 = vector.load %arg8[%c0_135, %c0_136, %c0_137] : memref<8x8x128xf32, #tpu.memory_space<vmem>>, vector<1x8x128xf32>
    %427 = vector.shape_cast %426 : vector<1x8x128xf32> to vector<8x128xf32>
    %428 = vector.shape_cast %425 : vector<8x128xf32> to vector<1x8x128xf32>
    tpu.vector_store %arg8[%c0_135, %c0_136, %c0_137], %428 {strides = array<i32>} : memref<8x8x128xf32, #tpu.memory_space<vmem>>, vector<1x8x128xf32>,
    %c0_138 = arith.constant 0 : index
    %c0_139 = arith.constant 0 : index
    %429 = vector.load %arg9[%c0_138, %c0_139] : memref<8x128xf32, #tpu.memory_space<vmem>>, vector<8x128xf32>
    tpu.vector_store %arg9[%c0_138, %c0_139], %398 {strides = array<i32>} : memref<8x128xf32, #tpu.memory_space<vmem>>, vector<8x128xf32>,
    %c0_140 = arith.constant 0 : index
    %c0_141 = arith.constant 0 : index
    %430 = vector.load %arg10[%c0_140, %c0_141] : memref<8x128xf32, #tpu.memory_space<vmem>>, vector<8x128xf32>
    tpu.vector_store %arg10[%c0_140, %c0_141], %396 {strides = array<i32>} : memref<8x128xf32, #tpu.memory_space<vmem>>, vector<8x128xf32>,
    %c0_142 = arith.constant 0 : index
    %c0_143 = arith.constant 0 : index
    %431 = vector.load %arg11[%c0_142, %c0_143] : memref<8x128xf32, #tpu.memory_space<vmem>>, vector<8x128xf32>
    tpu.vector_store %arg11[%c0_142, %c0_143], %424 {strides = array<i32>} : memref<8x128xf32, #tpu.memory_space<vmem>>, vector<8x128xf32>,
    %c0_144 = arith.constant 0 : index
    %c0_145 = arith.constant 0 : index
    %432 = vector.load %arg12[%c0_144, %c0_145] : memref<8x128xf32, #tpu.memory_space<vmem>>, vector<8x128xf32>
    tpu.vector_store %arg12[%c0_144, %c0_145], %422 {strides = array<i32>} : memref<8x128xf32, #tpu.memory_space<vmem>>, vector<8x128xf32>,
    return
  }
  func.func @transform_0(%arg0: i32) -> (i32, i32, i32) {
    %c0_i32 = arith.constant 0 : i32
    %c0_i32_0 = arith.constant 0 : i32
    %c0_i32_1 = arith.constant 0 : i32
    return %arg0, %c0_i32, %c0_i32_0 : i32, i32, i32
  }
  func.func @transform_1(%arg0: i32) -> (i32, i32, i32) {
    %c1_i32 = arith.constant 1 : i32
    %0 = arith.subi %c1_i32, %arg0 : i32
    %c0_i32 = arith.constant 0 : i32
    %c0_i32_0 = arith.constant 0 : i32
    %c0_i32_1 = arith.constant 0 : i32
    return %0, %c0_i32, %c0_i32_0 : i32, i32, i32
  }
  func.func @transform_2(%arg0: i32) -> (i32, i32) {
    %c0_i32 = arith.constant 0 : i32
    %c0_i32_0 = arith.constant 0 : i32
    %c0_i32_1 = arith.constant 0 : i32
    return %c0_i32, %c0_i32_0 : i32, i32
  }
  func.func @transform_3(%arg0: i32) -> (i32, i32) {
    %c0_i32 = arith.constant 0 : i32
    %c0_i32_0 = arith.constant 0 : i32
    %c0_i32_1 = arith.constant 0 : i32
    return %c0_i32, %c0_i32_0 : i32, i32
  }
  func.func @transform_4(%arg0: i32) -> (i32, i32, i32) {
    %c0_i32 = arith.constant 0 : i32
    %c0_i32_0 = arith.constant 0 : i32
    %c0_i32_1 = arith.constant 0 : i32
    %c0_i32_2 = arith.constant 0 : i32
    return %c0_i32, %c0_i32_0, %c0_i32_1 : i32, i32, i32
  }
  func.func @transform_5(%arg0: i32) -> (i32, i32, i32) {
    %c0_i32 = arith.constant 0 : i32
    %c0_i32_0 = arith.constant 0 : i32
    %c0_i32_1 = arith.constant 0 : i32
    %c0_i32_2 = arith.constant 0 : i32
    return %c0_i32, %c0_i32_0, %c0_i32_1 : i32, i32, i32
  }
  func.func @transform_6(%arg0: i32) -> (i32, i32, i32) {
    %c0_i32 = arith.constant 0 : i32
    %c0_i32_0 = arith.constant 0 : i32
    %c0_i32_1 = arith.constant 0 : i32
    return %arg0, %c0_i32, %c0_i32_0 : i32, i32, i32
  }
  func.func @transform_7(%arg0: i32) -> (i32, i32, i32) {
    %c1_i32 = arith.constant 1 : i32
    %0 = arith.subi %c1_i32, %arg0 : i32
    %c0_i32 = arith.constant 0 : i32
    %c0_i32_0 = arith.constant 0 : i32
    %c0_i32_1 = arith.constant 0 : i32
    return %0, %c0_i32, %c0_i32_0 : i32, i32, i32
  }
}

</mosaic_0001>

<bundles_post_ra>
// kernel: rnn_encoder_forward.2
= control target key start
LH: loop header
LB: loop body
LE: loop exit
PB: predicated region body
PF: predicated region fallthrough
CT: control target
= control target key end

     0   :  { %11 = vsyncpa [#allocation7], 0  ;;  %s3442_s18 = smov 0   ;;  %s4617_s0 = inlined_call_operand.vmem [shape: bf16[16,8,512], index: 0, kind: input, shape index: {}]   ;;  %s4618_s1 = inlined_call_operand.vmem [shape: bf16[16,8,512], index: 1, kind: input, shape index: {}]   ;;  %s4619_s2 = inlined_call_operand.vmem [shape: bf16[128,512], index: 2, kind: input, shape index: {}]   ;;  %s4620_s3 = inlined_call_operand.hbm [shape: bf16[128,512], index: 3, kind: input, shape index: {}]   ;;  %s4621_s4 = inlined_call_operand.vmem [shape: f32[16,8,128], index: 4, kind: output, shape index: {0}]   ;;  %s4622_s5 = inlined_call_operand.vmem [shape: f32[16,8,128], index: 5, kind: output, shape index: {1}]  }
   0x1 LB: > { %s3448_s19 = sadd.s32 4294967295, %s3405_s18   ;;  %p2733_p0 = scmp.ge.s32.totalorder %s3405_s18, 1  ;;  %s3405_s18 = sphi %s3442_s18, %s17_s18  }
   0x2   : > { %p172_p1 = scmp.lt.s32.totalorder %s3405_s18, 3  ;;  %s3407_s20 = smov [#allocation6]  }
   0x3   : > { %s187_s21 = sshll.u32 %s3407_s20, 4  ;;  %p4623_p4 = scmp.eq.s32.totalorder %s3448_s19, 0  ;;  %s188_s21 = int_to_ptr.vmem [resolvable:$true] %s187_s21 }
   0x4   : > { %p3453_p3 = pnand %p2733_p0, %p172_p1  ;;  %s3367_s26 = scalar_lea.hbm %s4620_s3, 4096 }
   0x5   : > { %p3368_p7 = scmp.ne.s32.totalorder %s4620_s3, %s3367_s26  ;;  %p3374_p11 = scmp.lt.u32.totalorder %s3367_s26, %s4620_s3 }
   0x6   : > { %s4719_s22 = scalar_select %p3453_p3, 1, 0 }
   0x7   : > { %p2911_p5 = pneg %p3453_p3 }
   0x9   : > { %p3462_p6 = pnand %p4623_p4, %p2911_p5 }
   0xb   : > { %p3369_p8 = pneg %p3462_p6 }
   0xd   : > { %p3370_p9 = pnand %p3369_p8, %p3368_p7 }
   0xf   : > { %p3371_p10 = pneg %p3370_p9 }
  0x11   : > { %p3376_p12 = pnand %p3374_p11, %p3371_p10 }
  0x13   : > { %3379 = shalt.err (!%p3376_p12)
}
  0x14   : > { %s3380_s6 = scalar_lea.vmem %s188_s21, 4096  ;;  %p3388_p5 = scmp.lt.s32.totalorder %s188_s21, %s188_s21 }
  0x15   : > { %p3381_p13 = scmp.ne.s32.totalorder %s188_s21, %s3380_s6  ;;  %p3389_p2 = scmp.lt.s32.totalorder %s3380_s6, %s3380_s6 }
  0x17   : > { %p3383_p0 = pnand %p3381_p13, %p3369_p8  ;;  %p3390_p4 = por %p3389_p2, %p3388_p5 }
  0x19   : > { %p3384_p1 = pneg %p3383_p0 }
  0x1b   : > { %p3391_p3 = pnand %p3390_p4, %p3384_p1 }
  0x1d   : > { %3394 = shalt.err (!%p3391_p3)
}
  0x1e   : > { %s3408_s7 = smov 256   ;;  %s3409_s8 = smov 16  }
  0x1f   : > { %2914 = dma.hbm_to_vmem [thread:$0]  (!%p3462_p6), %s4620_s3, 4096, %s188_s21, [#allocation7], %s3408_s7, %s3408_s7, %s3409_s8  }
  0x20   : > { %p4721_p7 = scmp.ne.s32.totalorder %s4719_s22, 0 }
  0x22   : > { %225 = sbr.rel (%p4721_p7) target bundleno = 2204 (0x89c), region = 36 }
  0x29   : > { %p4722_p9 = scmp.eq.s32.totalorder %s3448_s19, 0 }
  0x2b   : > { %3400 = dma.done.wait (%p4722_p9), [#allocation7], 4096   ;;  %p4723_p8 = pmov %p4722_p9 }
  0x2c   : > { %s2738_s11 = sshll.u32 %s3448_s19, 3  ;;  %s274_s12 = ssub.s32 1, %s3448_s19 }
  0x2d   : > { %3402 = vsyncadd (%p4723_p8), [#allocation7], 4294963200  ;;  %p268_p2 = scmp.lt.s32.totalorder %s2738_s11, 15  ;;  %s2741_s13 = sshll.u32 %s274_s12, 3 }
  0x2e   : > { %p276_p3 = scmp.lt.s32.totalorder %s2741_s13, 15  ;;  %p4724_p4 = scmp.ne.s32.totalorder %s3448_s19, 0 }
  0x2f   : > { %s4857_s11 = smov (!%p268_p2, %s2738_s11), 15  ;;  %v3410_v0 = vmov (!%p4724_p4), 0.0  }
  0x30   : > { %s4859_s13 = smov (!%p276_p3, %s2741_s13), 15  ;;  %s2905_s14 = sshll.u32 %s4857_s11, 4  ;;  %302 = vst [vmem:[#allocation2] sm:$0xff] (!%p4724_p4), %v3410_v0  ;;  %303 = vst [vmem:[#allocation3] sm:$0xff] (!%p4724_p4), %v3410_v0 }
  0x31   : > { %s2745_s15 = sshll.u32 %s4857_s11, 3  ;;  %s3493_s20 = scalar_lea.vmem %s4617_s0, %s2905_s14  ;;  %304 = vst [vmem:[#allocation4] sm:$0xff] (!%p4724_p4), %v3410_v0  ;;  %305 = vst [vmem:[#allocation5] sm:$0xff] (!%p4724_p4), %v3410_v0 }
  0x32   : > { %s2906_s21 = sshll.u32 %s4859_s13, 4  ;;  %s3503_s27 = scalar_lea.vmem %s4621_s4, %s2745_s15 }
  0x33   : > { %s3498_s24 = scalar_lea.vmem %s4618_s1, %s2906_s21  ;;  %s2747_s28 = sshll.u32 %s4859_s13, 3 }
  0x34   : > { %s3508_s6 = scalar_lea.vmem %s4622_s5, %s2747_s28  ;;  %301 = sbr.rel (%p4724_p4) target bundleno = 59 (0x3b), region = 44 }
  0x3b PF: > { %v3515_v1 = vld [vmem:[%s4619_s2 + $0x4] ss:$16 sps:$4 sm:$0xff]   ;;  %v3520_v2 = vld [vmem:[%s4619_s2] ss:$16 sps:$4 sm:$0xff]   ;;  %v4625_v3 = vmov 0  }
  0x3c   : > { %573 = vmatprep.mubr.bf16.mxu0 %v4625_v3  ;;  %614 = vmatprep.mubr.bf16.mxu1 %v4625_v3  ;;  %v3528_v4 = vld [vmem:[%s4619_s2 + $0x24] ss:$16 sps:$4 sm:$0xff]   ;;  %v3534_v5 = vld [vmem:[%s4619_s2 + $0x20] ss:$16 sps:$4 sm:$0xff]   ;;  %v3545_v7 = vld [vmem:[%s4619_s2 + $0xc] ss:$16 sps:$4 sm:$0xff]  }
  0x3d   : > { %541 = vmatprep.subr.bf16.mxu0 %v3515_v1  ;;  %v3540_v6 = vld [vmem:[%s4619_s2 + $0x44] ss:$16 sps:$4 sm:$0xff]   ;;  %v3550_v8 = vld [vmem:[%s4619_s2 + $0x8] ss:$16 sps:$4 sm:$0xff]   ;;  %v3556_v9 = vld [vmem:[%s4619_s2 + $0x40] ss:$16 sps:$4 sm:$0xff]   ;;  %582 = vmatprep.subr.bf16.mxu1 %v3545_v7 }
  0x3e   : > { %542 = vmatpush1.bf16.msra.mxu0 %v3520_v2  ;;  %v3563_v10 = vld [vmem:[%s4619_s2 + $0x64] ss:$16 sps:$4 sm:$0xff]   ;;  %583 = vmatpush1.bf16.msra.mxu1 %v3550_v8  ;;  %v3569_v11 = vld [vmem:[%s4619_s2 + $0x2c] ss:$16 sps:$4 sm:$0xff]   ;;  %v3574_v12 = vld [vmem:[%s4619_s2 + $0x28] ss:$16 sps:$4 sm:$0xff]  }
  0x3f   : > { %543 = vmatprep.subr.bf16.mxu0 %v3528_v4  ;;  %584 = vmatprep.subr.bf16.mxu1 %v3569_v11  ;;  %v3581_v13 = vld [vmem:[%s4619_s2 + $0x60] ss:$16 sps:$4 sm:$0xff]   ;;  %v3586_v14 = vld [vmem:[%s4619_s2 + $0x84] ss:$16 sps:$4 sm:$0xff]   ;;  %v3591_v15 = vld [vmem:[%s4619_s2 + $0x4c] ss:$16 sps:$4 sm:$0xff]  }
  0x40   : > { %4725 = vst [vmem:[#allocation9_spill] sm:$0xff] %v3586_v14  ;;  %v3598_v16 = vld [vmem:[%s4619_s2 + $0x48] ss:$16 sps:$4 sm:$0xff]   ;;  %v3604_v17 = vld [vmem:[%s4619_s2 + $0x6c] ss:$16 sps:$4 sm:$0xff]   ;;  %v370_v31 = vld [vmem:[#allocation2] sm:$0xff] }
  0x41   : > { %v3610_v18 = vld [vmem:[%s4619_s2 + $0x80] ss:$16 sps:$4 sm:$0xff]   ;;  %v3616_v19 = vld [vmem:[%s4619_s2 + $0xa4] ss:$16 sps:$4 sm:$0xff]   ;;  %v3622_v20 = vld [vmem:[%s4619_s2 + $0x68] ss:$16 sps:$4 sm:$0xff]   ;;  %v380_v35 = vpack.c.bf16 %v370_v31, %v370_v31 }
  0x42   : > { %544 = vmatpush1.bf16.msra.mxu0 %v3534_v5  ;;  %585 = vmatpush1.bf16.msra.mxu1 %v3574_v12  ;;  %4726 = vst [vmem:[#allocation10_spill] sm:$0xff] %v3610_v18  ;;  %4727 = vst [vmem:[#allocation11_spill] sm:$0xff] %v3616_v19  ;;  %v3628_v21 = vld [vmem:[%s4619_s2 + $0x8c] ss:$16 sps:$4 sm:$0xff]   ;;  %v3634_v22 = vld [vmem:[%s4619_s2 + $0xa0] ss:$16 sps:$4 sm:$0xff]  }
  0x43   : > { %545 = vmatprep.subr.bf16.mxu0 %v3540_v6  ;;  %586 = vmatprep.subr.bf16.mxu1 %v3591_v15  ;;  %4728 = vst [vmem:[#allocation12_spill] sm:$0xff] %v3622_v20  ;;  %4729 = vst [vmem:[#allocation13_spill] sm:$0xff] %v3628_v21  ;;  %v3639_v23 = vld [vmem:[%s4619_s2 + $0xc4] ss:$16 sps:$4 sm:$0xff]   ;;  %v3646_v24 = vld [vmem:[%s4619_s2 + $0x88] ss:$16 sps:$4 sm:$0xff]  }
  0x44   : > { %4730 = vst [vmem:[#allocation14_spill] sm:$0xff] %v3634_v22  ;;  %4731 = vst [vmem:[#allocation15_spill] sm:$0xff] %v3639_v23  ;;  %v3652_v25 = vld [vmem:[%s4619_s2 + $0xac] ss:$16 sps:$4 sm:$0xff]   ;;  %v3657_v26 = vld [vmem:[%s4619_s2 + $0xc0] ss:$16 sps:$4 sm:$0xff]  }
  0x45   : > { %4732 = vst [vmem:[#allocation16_spill] sm:$0xff] %v3646_v24  ;;  %4733 = vst [vmem:[#allocation17_spill] sm:$0xff] %v3652_v25  ;;  %v3663_v27 = vld [vmem:[%s4619_s2 + $0xe4] ss:$16 sps:$4 sm:$0xff]   ;;  %v3670_v28 = vld [vmem:[%s4619_s2 + $0xa8] ss:$16 sps:$4 sm:$0xff]  }
  0x46   : > { %546 = vmatpush1.bf16.msra.mxu0 %v3556_v9  ;;  %587 = vmatpush1.bf16.msra.mxu1 %v3598_v16  ;;  %4734 = vst [vmem:[#allocation18_spill] sm:$0xff] %v3657_v26  ;;  %4735 = vst [vmem:[#allocation19_spill] sm:$0xff] %v3663_v27  ;;  %v3676_v29 = vld [vmem:[%s4619_s2 + $0xcc] ss:$16 sps:$4 sm:$0xff]   ;;  %v3681_v30 = vld [vmem:[%s4619_s2 + $0xe0] ss:$16 sps:$4 sm:$0xff]  }
  0x47   : > { %547 = vmatprep.subr.bf16.mxu0 %v3563_v10  ;;  %588 = vmatprep.subr.bf16.mxu1 %v3604_v17  ;;  %4736 = vst [vmem:[#allocation20_spill] sm:$0xff] %v3670_v28  ;;  %4737 = vst [vmem:[#allocation21_spill] sm:$0xff] %v3676_v29  ;;  %v3684_v32 = vld [vmem:[#allocation6 + $0x4] ss:$16 sps:$4 sm:$0xff]   ;;  %v3691_v33 = vld [vmem:[%s4619_s2 + $0xc8] ss:$16 sps:$4 sm:$0xff]  }
  0x48   : > { %4738 = vst [vmem:[#allocation22_spill] sm:$0xff] %v3681_v30  ;;  %4739 = vst [vmem:[#allocation23_spill] sm:$0xff] %v3684_v32  ;;  %v3697_v34 = vld [vmem:[%s4619_s2 + $0xec] ss:$16 sps:$4 sm:$0xff]   ;;  %v3699_v36 = vld [vmem:[#allocation6] ss:$16 sps:$4 sm:$0xff]  }
  0x49   : > { %4740 = vst [vmem:[#allocation24_spill] sm:$0xff] %v3691_v33  ;;  %4741 = vst [vmem:[#allocation25_spill] sm:$0xff] %v3697_v34  ;;  %v3702_v37 = vld [vmem:[#allocation6 + $0x24] ss:$16 sps:$4 sm:$0xff]   ;;  %v3709_v38 = vld [vmem:[%s4619_s2 + $0xe8] ss:$16 sps:$4 sm:$0xff]  }
  0x4a   : > { %548 = vmatpush1.bf16.msra.mxu0 %v3581_v13  ;;  %589 = vmatpush1.bf16.msra.mxu1 %v3622_v20  ;;  %4742 = vst [vmem:[#allocation26_spill] sm:$0xff] %v3709_v38  ;;  %v3712_v39 = vld [vmem:[#allocation6 + $0xc] ss:$16 sps:$4 sm:$0xff]   ;;  %v3715_v40 = vld [vmem:[#allocation6 + $0x20] ss:$16 sps:$4 sm:$0xff]  }
  0x4b   : > { %549 = vmatprep.subr.bf16.mxu0 %v3586_v14  ;;  %590 = vmatprep.subr.bf16.mxu1 %v3628_v21  ;;  %4743 = vst [vmem:[#allocation27_spill] sm:$0xff] %v3712_v39  ;;  %v3717_v41 = vld [vmem:[#allocation6 + $0x44] ss:$16 sps:$4 sm:$0xff]   ;;  %v3722_v42 = vld [vmem:[#allocation6 + $0x8] ss:$16 sps:$4 sm:$0xff]  }
  0x4c   : > { %v3725_v43 = vld [vmem:[#allocation6 + $0x2c] ss:$16 sps:$4 sm:$0xff]   ;;  %v3728_v44 = vld [vmem:[#allocation6 + $0x40] ss:$16 sps:$4 sm:$0xff]   ;;  %v3731_v45 = vld [vmem:[#allocation6 + $0x64] ss:$16 sps:$4 sm:$0xff]  }
  0x4d   : > { %v3734_v46 = vld [vmem:[#allocation6 + $0x28] ss:$16 sps:$4 sm:$0xff]   ;;  %v3737_v47 = vld [vmem:[#allocation6 + $0x4c] ss:$16 sps:$4 sm:$0xff]   ;;  %v3741_v48 = vld [vmem:[#allocation6 + $0x60] ss:$16 sps:$4 sm:$0xff]  }
  0x4e   : > { %550 = vmatpush1.bf16.msra.mxu0 %v3610_v18  ;;  %591 = vmatpush1.bf16.msra.mxu1 %v3646_v24  ;;  %v3744_v49 = vld [vmem:[#allocation6 + $0x84] ss:$16 sps:$4 sm:$0xff]   ;;  %v3747_v50 = vld [vmem:[#allocation6 + $0x48] ss:$16 sps:$4 sm:$0xff]   ;;  %v3750_v51 = vld [vmem:[#allocation6 + $0x6c] ss:$16 sps:$4 sm:$0xff]  }
  0x4f   : > { %551 = vmatprep.subr.bf16.mxu0 %v3616_v19  ;;  %592 = vmatprep.subr.bf16.mxu1 %v3652_v25  ;;  %v3753_v52 = vld [vmem:[#allocation6 + $0x80] ss:$16 sps:$4 sm:$0xff]   ;;  %v3756_v53 = vld [vmem:[#allocation6 + $0xa4] ss:$16 sps:$4 sm:$0xff]   ;;  %v3759_v54 = vld [vmem:[#allocation6 + $0x68] ss:$16 sps:$4 sm:$0xff]  }
  0x50   : > { %v3762_v55 = vld [vmem:[#allocation6 + $0x8c] ss:$16 sps:$4 sm:$0xff]   ;;  %v3765_v56 = vld [vmem:[#allocation6 + $0xa0] ss:$16 sps:$4 sm:$0xff]   ;;  %v3768_v57 = vld [vmem:[#allocation6 + $0xc4] ss:$16 sps:$4 sm:$0xff]  }
  0x51   : > { %4744 = vst [vmem:[#allocation28_spill] sm:$0xff] %v3765_v56  ;;  %4745 = vst [vmem:[#allocation29_spill] sm:$0xff] %v3768_v57  ;;  %v3771_v58 = vld [vmem:[#allocation6 + $0x88] ss:$16 sps:$4 sm:$0xff]   ;;  %v3774_v59 = vld [vmem:[#allocation6 + $0xac] ss:$16 sps:$4 sm:$0xff]  }
  0x52   : > { %552 = vmatpush1.bf16.msra.mxu0 %v3634_v22  ;;  %593 = vmatpush1.bf16.msra.mxu1 %v3670_v28  ;;  %v3777_v60 = vld [vmem:[#allocation6 + $0xc0] ss:$16 sps:$4 sm:$0xff]   ;;  %v3780_v61 = vld [vmem:[#allocation6 + $0xe4] ss:$16 sps:$4 sm:$0xff]   ;;  %v3783_v62 = vld [vmem:[#allocation6 + $0xa8] ss:$16 sps:$4 sm:$0xff]  }
  0x53   : > { %553 = vmatprep.subr.bf16.mxu0 %v3639_v23  ;;  %594 = vmatprep.subr.bf16.mxu1 %v3676_v29  ;;  %4746 = vst [vmem:[#allocation30_spill] sm:$0xff] %v3780_v61  ;;  %v3786_v63 = vld [vmem:[#allocation6 + $0xcc] ss:$16 sps:$4 sm:$0xff]   ;;  %v3789_v0 = vld [vmem:[#allocation6 + $0xe0] ss:$16 sps:$4 sm:$0xff]  }
  0x54   : > { %v372_v31 = vld [vmem:[#allocation4] sm:$0xff] }
  0x56   : > { %554 = vmatpush1.bf16.msra.mxu0 %v3657_v26  ;;  %595 = vmatpush1.bf16.msra.mxu1 %v3691_v33 }
  0x57   : > { %555 = vmatprep.subr.bf16.mxu0 %v3663_v27  ;;  %596 = vmatprep.subr.bf16.mxu1 %v3697_v34 }
  0x5a   : > { %556 = vmatpush1.bf16.msra.mxu0 %v3681_v30  ;;  %597 = vmatpush1.bf16.msra.mxu1 %v3709_v38 }
  0x5b   : > { %820 = vmatprep.subr.bf16.mxu0 %v3684_v32  ;;  %861 = vmatprep.subr.bf16.mxu1 %v3712_v39 }
  0x5d   : > { %574 = vmatmul.mubr.bf16.vlgmr.msra.gmra.mrb[0].mxu0 %v380_v35  ;;  %615 = vmatmul.mubr.bf16.vlgmr.msra.gmra.mrb[0].mxu1 %v380_v35  ;;  %v3793_v35 = vld [vmem:[#allocation6 + $0xc8] ss:$16 sps:$4 sm:$0xff]  }
  0x5e   : > { %821 = vmatpush1.bf16.msra.mxu0 %v3699_v36  ;;  %852 = vmatprep.mubr.bf16.mxu0 %v4625_v3 }
  0x5f   : > { %822 = vmatprep.subr.bf16.mxu0 %v3702_v37  ;;  %862 = vmatpush1.bf16.msra.mxu1 %v3722_v42 }
  0x60   : > { %863 = vmatprep.subr.bf16.mxu1 %v3725_v43  ;;  %893 = vmatprep.mubr.bf16.mxu1 %v4625_v3  ;;  %v3796_v3 = vld [vmem:[#allocation6 + $0xec] ss:$16 sps:$4 sm:$0xff]  }
  0x62   : > { %823 = vmatpush1.bf16.msra.mxu0 %v3715_v40 }
  0x63   : > { %824 = vmatprep.subr.bf16.mxu0 %v3717_v41  ;;  %864 = vmatpush1.bf16.msra.mxu1 %v3734_v46 }
  0x64   : > { %865 = vmatprep.subr.bf16.mxu1 %v3737_v47 }
  0x66   : > { %825 = vmatpush1.bf16.msra.mxu0 %v3728_v44 }
  0x67   : > { %826 = vmatprep.subr.bf16.mxu0 %v3731_v45  ;;  %866 = vmatpush1.bf16.msra.mxu1 %v3747_v50 }
  0x68   : > { %867 = vmatprep.subr.bf16.mxu1 %v3750_v51 }
  0x6a   : > { %827 = vmatpush1.bf16.msra.mxu0 %v3741_v48 }
  0x6b   : > { %828 = vmatprep.subr.bf16.mxu0 %v3744_v49  ;;  %868 = vmatpush1.bf16.msra.mxu1 %v3759_v54 }
  0x6c   : > { %869 = vmatprep.subr.bf16.mxu1 %v3762_v55 }
  0x6e   : > { %829 = vmatpush1.bf16.msra.mxu0 %v3753_v52 }
  0x6f   : > { %830 = vmatprep.subr.bf16.mxu0 %v3756_v53  ;;  %870 = vmatpush1.bf16.msra.mxu1 %v3771_v58 }
  0x70   : > { %871 = vmatprep.subr.bf16.mxu1 %v3774_v59 }
  0x72   : > { %831 = vmatpush1.bf16.msra.mxu0 %v3765_v56  ;;  %v3800_v56 = vld [vmem:[#allocation6 + $0xe8] ss:$16 sps:$4 sm:$0xff]  }
  0x73   : > { %832 = vmatprep.subr.bf16.mxu0 %v3768_v57  ;;  %872 = vmatpush1.bf16.msra.mxu1 %v3783_v62  ;;  %v659_v57 = vpack.c.bf16 %v372_v31, %v372_v31 }
  0x74   : > { %873 = vmatprep.subr.bf16.mxu1 %v3786_v63 }
  0x76   : > { %833 = vmatpush1.bf16.msra.mxu0 %v3777_v60 }
  0x77   : > { %834 = vmatprep.subr.bf16.mxu0 %v3780_v61  ;;  %874 = vmatpush1.bf16.msra.mxu1 %v3793_v35  ;;  %v4747_v61 = vmov 0  }
  0x78   : > { %875 = vmatprep.subr.bf16.mxu1 %v3796_v3 }
  0x7a   : > { %835 = vmatpush1.bf16.msra.mxu0 %v3789_v0 }
  0x7b   : > { %940 = vmatprep.subr.bf16.mxu0 %v3515_v1  ;;  %876 = vmatpush1.bf16.msra.mxu1 %v3800_v56 }
  0x7c   : > { %981 = vmatprep.subr.bf16.mxu1 %v3545_v7 }
  0x7d   : > { %853 = vmatmul.mubr.bf16.vlgmr.msra.gmra.mrb[4].mxu0 %v659_v57 }
  0x7e   : > { %941 = vmatpush1.bf16.msra.mxu0 %v3520_v2  ;;  %972 = vmatprep.mubr.bf16.mxu0 %v4747_v61 }
  0x7f   : > { %942 = vmatprep.subr.bf16.mxu0 %v3528_v4  ;;  %894 = vmatmul.mubr.bf16.vlgmr.msra.gmra.mrb[4].mxu1 %v659_v57  ;;  %v374_v57 = vld [vmem:[%s3493_s20] sm:$0xff] }
  0x80   : > { %982 = vmatpush1.bf16.msra.mxu1 %v3550_v8  ;;  %1013 = vmatprep.mubr.bf16.mxu1 %v4747_v61  ;;  %v376_v31 = vunpack.c.l.bf16 %v374_v57 }
  0x81   : > { %983 = vmatprep.subr.bf16.mxu1 %v3569_v11 }
  0x82   : > { %943 = vmatpush1.bf16.msra.mxu0 %v3534_v5 }
  0x83   : > { %944 = vmatprep.subr.bf16.mxu0 %v3540_v6 }
  0x84   : > { %984 = vmatpush1.bf16.msra.mxu1 %v3574_v12 }
  0x85   : > { %985 = vmatprep.subr.bf16.mxu1 %v3591_v15 }
  0x86   : > { %945 = vmatpush1.bf16.msra.mxu0 %v3556_v9 }
  0x87   : > { %946 = vmatprep.subr.bf16.mxu0 %v3563_v10 }
  0x88   : > { %986 = vmatpush1.bf16.msra.mxu1 %v3598_v16 }
  0x89   : > { %987 = vmatprep.subr.bf16.mxu1 %v3604_v17 }
  0x8a   : > { %947 = vmatpush1.bf16.msra.mxu0 %v3581_v13 }
  0x8b   : > { %948 = vmatprep.subr.bf16.mxu0 %v3586_v14 }
  0x8c   : > { %988 = vmatpush1.bf16.msra.mxu1 %v3622_v20 }
  0x8d   : > { %989 = vmatprep.subr.bf16.mxu1 %v3628_v21 }
  0x8e   : > { %949 = vmatpush1.bf16.msra.mxu0 %v3610_v18 }
  0x8f   : > { %950 = vmatprep.subr.bf16.mxu0 %v3616_v19 }
  0x90   : > { %990 = vmatpush1.bf16.msra.mxu1 %v3646_v24 }
  0x91   : > { %991 = vmatprep.subr.bf16.mxu1 %v3652_v25 }
  0x92   : > { %951 = vmatpush1.bf16.msra.mxu0 %v3634_v22 }
  0x93   : > { %952 = vmatprep.subr.bf16.mxu0 %v3639_v23 }
  0x94   : > { %992 = vmatpush1.bf16.msra.mxu1 %v3670_v28  ;;  %v375_v28 = vld [vmem:[%s3493_s20 + $0x8] sm:$0xff] }
  0x95   : > { %993 = vmatprep.subr.bf16.mxu1 %v3676_v29  ;;  %v379_v18 = vunpack.c.h.bf16 %v375_v28 }
  0x96   : > { %953 = vmatpush1.bf16.msra.mxu0 %v3657_v26  ;;  %v377_v26 = vunpack.c.h.bf16 %v374_v57 }
  0x97   : > { %954 = vmatprep.subr.bf16.mxu0 %v3663_v27 }
  0x98   : > { %994 = vmatpush1.bf16.msra.mxu1 %v3691_v33  ;;  %v378_v33 = vunpack.c.l.bf16 %v375_v28 }
  0x99   : > { %995 = vmatprep.subr.bf16.mxu1 %v3697_v34 }
  0x9a   : > { %955 = vmatpush1.bf16.msra.mxu0 %v3681_v30 }
  0x9b   : > { %1060 = vmatprep.subr.bf16.mxu0 %v3684_v32 }
  0x9c   : > { %996 = vmatpush1.bf16.msra.mxu1 %v3709_v38 }
  0x9d   : > { %1101 = vmatprep.subr.bf16.mxu1 %v3712_v39 }
 0x130   : > { %v575_v23 = vpop.f32.mrb[0].mxu0  ;;  %v616_v32 = vpop.f32.mrb[0].mxu1 }
 0x131   : > { %v623_v27 = vadd.f32 %v575_v23, %v376_v31  ;;  %v577_v22 = vpop.f32.mrb[1].mxu0  ;;  %v618_v34 = vpop.f32.mrb[1].mxu1  ;;  %v625_v38 = vadd.f32 %v616_v32, %v378_v33 }
 0x132   : > { %v624_v29 = vadd.f32 %v577_v22, %v377_v26  ;;  %v579_v25 = vpop.f32.mrb[2].mxu0  ;;  %v620_v39 = vpop.f32.mrb[2].mxu1  ;;  %v626_v14 = vadd.f32 %v618_v34, %v379_v18 }
 0x133   : > { %v2781_v30 = vmul.f32 -1.442695, %v623_v27  ;;  %v580_v19 = vpop.f32.mrb[3].mxu0  ;;  %v621_v21 = vpop.f32.mrb[3].mxu1  ;;  %v2783_v57 = vmul.f32 -1.442695, %v625_v38 }
 0x134   : > { %v2782_v24 = vmul.f32 -1.442695, %v624_v29  ;;  %v371_v27 = vld [vmem:[#allocation3] sm:$0xff] }
 0x135   : > { %3026 = vpow2.f32 %v2781_v30 }
 0x136   : > { %3028 = vpow2.f32 %v2782_v24  ;;  %v2784_v24 = vld [vmem:[%s3498_s24 + $0x70] sm:$0xff] }
 0x137   : > { %3030 = vpow2.f32 %v2783_v57  ;;  %v655_v21 = vunpack.c.l.bf16 %v2784_v24  ;;  %v656_v18 = vunpack.c.h.bf16 %v2784_v24 }
 0x138   : > { %3032 = vtanh.f32 %v626_v14  ;;  %v2785_v14 = vld [vmem:[%s3498_s24 + $0x78] sm:$0xff] }
 0x13f   : > { %v3027_v20 = vpop.eup %3026 }
 0x140   : > { %v3029_v23 = vpop.eup %3028  ;;  %v636_v22 = vadd.f32 1.0, %v3027_v20 }
 0x141   : > { %v637_v25 = vadd.f32 1.0, %v3029_v23  ;;  %v3031_v19 = vpop.eup %3030 }
 0x142   : > { %3034 = vrcp.f32 %v636_v22  ;;  %v3033_v26 = vpop.eup %3032  ;;  %v638_v30 = vadd.f32 1.0, %v3031_v19 }
 0x143   : > { %3036 = vrcp.f32 %v637_v25  ;;  %v657_v25 = vunpack.c.l.bf16 %v2785_v14 }
 0x144   : > { %3038 = vrcp.f32 %v638_v30  ;;  %v658_v30 = vunpack.c.h.bf16 %v2785_v14 }
 0x14c   : > { %v3035_v29 = vpop.eup %3034 }
 0x14d   : > { %v3037_v32 = vpop.eup %3036  ;;  %v647_v28 = vmul.f32 %v3035_v29, %v3033_v26 }
 0x14e   : > { %v646_v33 = vmul.f32 %v3037_v32, %v371_v27 }
 0x150   : > { %v3843_v34 = vadd.f32 %v647_v28, %v646_v33  ;;  %v854_v20 = vpop.f32.mrb[4].mxu0  ;;  %v3039_v28 = vpop.eup %3038 }
 0x151   : > { %v902_v38 = vadd.f32 %v854_v20, %v655_v21  ;;  %v856_v39 = vpop.f32.mrb[5].mxu0 }
 0x152   : > { %4748 = vst [vmem:[#allocation31_spill] sm:$0xff] %v3843_v34  ;;  %3040 = vtanh.f32 %v3843_v34  ;;  %v903_v31 = vadd.f32 %v856_v39, %v656_v18  ;;  %v858_v57 = vpop.f32.mrb[6].mxu0  ;;  %v895_v26 = vpop.f32.mrb[4].mxu1 }
 0x153   : > { %v2818_v23 = vmul.f32 -1.442695, %v902_v38  ;;  %v859_v22 = vpop.f32.mrb[7].mxu0  ;;  %v897_v24 = vpop.f32.mrb[5].mxu1  ;;  %v904_v27 = vadd.f32 %v895_v26, %v657_v25 }
 0x154   : > { %v2819_v19 = vmul.f32 -1.442695, %v903_v31  ;;  %v899_v29 = vpop.f32.mrb[6].mxu1  ;;  %v905_v20 = vadd.f32 %v897_v24, %v658_v30  ;;  %v4750_v30 = vld [vmem:[#allocation29_spill] sm:$0xff] }
 0x155   : > { %3042 = vpow2.f32 %v2818_v23  ;;  %v900_v32 = vpop.f32.mrb[7].mxu1  ;;  %v2820_v21 = vmul.f32 -1.442695, %v904_v27  ;;  %v373_v23 = vld [vmem:[#allocation5] sm:$0xff] }
 0x156   : > { %3044 = vpow2.f32 %v2819_v19  ;;  %v4749_v29 = vld [vmem:[#allocation28_spill] sm:$0xff] }
 0x157   : > { %3046 = vpow2.f32 %v2820_v21 }
 0x158   : > { %3048 = vtanh.f32 %v905_v20 }
 0x15c   : > { %v3041_v33 = vpop.eup %3040 }
 0x15d   : > { %v650_v34 = vmul.f32 %v3041_v33, %v3039_v28  ;;  %v4751_v28 = vld [vmem:[#allocation30_spill] sm:$0xff] }
 0x15f   : > { %v3043_v18 = vpop.eup %3042  ;;  %651 = vst [vmem:[%s3503_s27] sm:$0xff] %v650_v34  ;;  %v939_v38 = vpack.c.bf16 %v650_v34, %v650_v34 }
 0x160   : > { %v3045_v39 = vpop.eup %3044  ;;  %v915_v31 = vadd.f32 1.0, %v3043_v18  ;;  %v4761_v18 = vld [vmem:[#allocation15_spill] sm:$0xff] }
 0x161   : > { %v916_v57 = vadd.f32 1.0, %v3045_v39  ;;  %973 = vmatmul.mubr.bf16.vlgmr.msra.gmra.mrb[8].mxu0 %v939_v38  ;;  %1014 = vmatmul.mubr.bf16.vlgmr.msra.gmra.mrb[8].mxu1 %v939_v38  ;;  %v3047_v34 = vpop.eup %3046  ;;  %v4762_v38 = vld [vmem:[#allocation21_spill] sm:$0xff]  ;;  %v4763_v39 = vld [vmem:[#allocation18_spill] sm:$0xff] }
 0x162   : > { %3050 = vrcp.f32 %v915_v31  ;;  %1061 = vmatpush1.bf16.msra.mxu0 %v3699_v36  ;;  %1102 = vmatpush1.bf16.msra.mxu1 %v3722_v42  ;;  %v3049_v14 = vpop.eup %3048  ;;  %v917_v25 = vadd.f32 1.0, %v3047_v34  ;;  %v4764_v31 = vld [vmem:[#allocation24_spill] sm:$0xff]  ;;  %v4766_v34 = vld [vmem:[#allocation25_spill] sm:$0xff] }
 0x163   : > { %3052 = vrcp.f32 %v916_v57  ;;  %1062 = vmatprep.subr.bf16.mxu0 %v3702_v37  ;;  %1103 = vmatprep.subr.bf16.mxu1 %v3725_v43  ;;  %v4765_v57 = vld [vmem:[#allocation19_spill] sm:$0xff] }
 0x164   : > { %1092 = vmatprep.mubr.bf16.mxu0 %v4747_v61  ;;  %1133 = vmatprep.mubr.bf16.mxu1 %v4747_v61  ;;  %3054 = vrcp.f32 %v917_v25  ;;  %v4770_v25 = vld [vmem:[#allocation27_spill] sm:$0xff] }
 0x166   : > { %1063 = vmatpush1.bf16.msra.mxu0 %v3715_v40  ;;  %1104 = vmatpush1.bf16.msra.mxu1 %v3734_v46 }
 0x167   : > { %1064 = vmatprep.subr.bf16.mxu0 %v3717_v41  ;;  %1105 = vmatprep.subr.bf16.mxu1 %v3737_v47 }
 0x16a   : > { %1065 = vmatpush1.bf16.msra.mxu0 %v3728_v44  ;;  %1106 = vmatpush1.bf16.msra.mxu1 %v3747_v50 }
 0x16b   : > { %1066 = vmatprep.subr.bf16.mxu0 %v3731_v45  ;;  %1107 = vmatprep.subr.bf16.mxu1 %v3750_v51 }
 0x16c   : > { %v3051_v22 = vpop.eup %3050 }
 0x16d   : > { %v3053_v19 = vpop.eup %3052  ;;  %v926_v26 = vmul.f32 %v3051_v22, %v3049_v14  ;;  %v4767_v14 = vld [vmem:[#allocation22_spill] sm:$0xff]  ;;  %v4769_v22 = vld [vmem:[#allocation23_spill] sm:$0xff] }
 0x16e   : > { %v925_v24 = vmul.f32 %v3053_v19, %v373_v23  ;;  %1067 = vmatpush1.bf16.msra.mxu0 %v3741_v48  ;;  %1108 = vmatpush1.bf16.msra.mxu1 %v3759_v54  ;;  %v3055_v32 = vpop.eup %3054  ;;  %v4768_v23 = vld [vmem:[#allocation26_spill] sm:$0xff]  ;;  %v2822_v19 = vld [vmem:[%s3493_s20 + $0x10] sm:$0xff] }
 0x16f   : > { %1068 = vmatprep.subr.bf16.mxu0 %v3744_v49  ;;  %1109 = vmatprep.subr.bf16.mxu1 %v3762_v55 }
 0x170   : > { %v3866_v27 = vadd.f32 %v926_v26, %v925_v24  ;;  %v935_v26 = vunpack.c.l.bf16 %v2822_v19  ;;  %v936_v24 = vunpack.c.h.bf16 %v2822_v19 }
 0x172   : > { %3056 = vtanh.f32 %v3866_v27  ;;  %1069 = vmatpush1.bf16.msra.mxu0 %v3753_v52  ;;  %1110 = vmatpush1.bf16.msra.mxu1 %v3771_v58 }
 0x173   : > { %1070 = vmatprep.subr.bf16.mxu0 %v3756_v53  ;;  %1111 = vmatprep.subr.bf16.mxu1 %v3774_v59 }
 0x176   : > { %1071 = vmatpush1.bf16.msra.mxu0 %v4749_v29  ;;  %1112 = vmatpush1.bf16.msra.mxu1 %v3783_v62 }
 0x177   : > { %1072 = vmatprep.subr.bf16.mxu0 %v4750_v30  ;;  %1113 = vmatprep.subr.bf16.mxu1 %v3786_v63 }
 0x17a   : > { %1073 = vmatpush1.bf16.msra.mxu0 %v3777_v60  ;;  %1114 = vmatpush1.bf16.msra.mxu1 %v3793_v35 }
 0x17b   : > { %1074 = vmatprep.subr.bf16.mxu0 %v4751_v28  ;;  %1115 = vmatprep.subr.bf16.mxu1 %v3796_v3 }
 0x17c   : > { %v3057_v21 = vpop.eup %3056 }
 0x17d   : > { %v929_v33 = vmul.f32 %v3057_v21, %v3055_v32 }
 0x17e   : > { %1075 = vmatpush1.bf16.msra.mxu0 %v3789_v0  ;;  %1116 = vmatpush1.bf16.msra.mxu1 %v3800_v56 }
 0x17f   : > { %2821 = vst [vmem:[%s3508_s6 + $0x38] sm:$0xff] %v929_v33  ;;  %v1059_v20 = vpack.c.bf16 %v929_v33, %v929_v33  ;;  %1180 = vmatprep.subr.bf16.mxu0 %v3515_v1  ;;  %1221 = vmatprep.subr.bf16.mxu1 %v3545_v7  ;;  %v4752_v1 = vld [vmem:[#allocation12_spill] sm:$0xff]  ;;  %v4757_v7 = vld [vmem:[#allocation11_spill] sm:$0xff] }
 0x181   : > { %1093 = vmatmul.mubr.bf16.vlgmr.msra.gmra.mrb[12].mxu0 %v1059_v20  ;;  %1134 = vmatmul.mubr.bf16.vlgmr.msra.gmra.mrb[12].mxu1 %v1059_v20 }
 0x182   : > { %1181 = vmatpush1.bf16.msra.mxu0 %v3520_v2  ;;  %1222 = vmatpush1.bf16.msra.mxu1 %v3550_v8  ;;  %v4753_v2 = vld [vmem:[#allocation9_spill] sm:$0xff] }
 0x183   : > { %1182 = vmatprep.subr.bf16.mxu0 %v3528_v4  ;;  %1223 = vmatprep.subr.bf16.mxu1 %v3569_v11  ;;  %v4754_v4 = vld [vmem:[#allocation13_spill] sm:$0xff] }
 0x184   : > { %1212 = vmatprep.mubr.bf16.mxu0 %v4747_v61  ;;  %1253 = vmatprep.mubr.bf16.mxu1 %v4747_v61  ;;  %v4758_v8 = vld [vmem:[#allocation17_spill] sm:$0xff] }
 0x186   : > { %1183 = vmatpush1.bf16.msra.mxu0 %v3534_v5  ;;  %1224 = vmatpush1.bf16.msra.mxu1 %v3574_v12  ;;  %v4755_v5 = vld [vmem:[#allocation10_spill] sm:$0xff] }
 0x187   : > { %1184 = vmatprep.subr.bf16.mxu0 %v3540_v6  ;;  %1225 = vmatprep.subr.bf16.mxu1 %v3591_v15  ;;  %v4756_v6 = vld [vmem:[#allocation16_spill] sm:$0xff] }
 0x18a   : > { %1185 = vmatpush1.bf16.msra.mxu0 %v3556_v9  ;;  %1226 = vmatpush1.bf16.msra.mxu1 %v3598_v16  ;;  %v4759_v9 = vld [vmem:[#allocation14_spill] sm:$0xff] }
 0x18b   : > { %1186 = vmatprep.subr.bf16.mxu0 %v3563_v10  ;;  %1227 = vmatprep.subr.bf16.mxu1 %v3604_v17  ;;  %v4760_v10 = vld [vmem:[#allocation20_spill] sm:$0xff] }
 0x18e   : > { %1187 = vmatpush1.bf16.msra.mxu0 %v3581_v13  ;;  %1228 = vmatpush1.bf16.msra.mxu1 %v4752_v1 }
 0x18f   : > { %1188 = vmatprep.subr.bf16.mxu0 %v4753_v2  ;;  %1229 = vmatprep.subr.bf16.mxu1 %v4754_v4 }
 0x192   : > { %1189 = vmatpush1.bf16.msra.mxu0 %v4755_v5  ;;  %1230 = vmatpush1.bf16.msra.mxu1 %v4756_v6 }
 0x193   : > { %1190 = vmatprep.subr.bf16.mxu0 %v4757_v7  ;;  %1231 = vmatprep.subr.bf16.mxu1 %v4758_v8 }
 0x196   : > { %1191 = vmatpush1.bf16.msra.mxu0 %v4759_v9  ;;  %1232 = vmatpush1.bf16.msra.mxu1 %v4760_v10 }
 0x197   : > { %1192 = vmatprep.subr.bf16.mxu0 %v4761_v18  ;;  %1233 = vmatprep.subr.bf16.mxu1 %v4762_v38 }
 0x19a   : > { %1193 = vmatpush1.bf16.msra.mxu0 %v4763_v39  ;;  %1234 = vmatpush1.bf16.msra.mxu1 %v4764_v31  ;;  %v2823_v39 = vld [vmem:[%s3493_s20 + $0x18] sm:$0xff] }
 0x19b   : > { %1194 = vmatprep.subr.bf16.mxu0 %v4765_v57  ;;  %1235 = vmatprep.subr.bf16.mxu1 %v4766_v34 }
 0x19e   : > { %1195 = vmatpush1.bf16.msra.mxu0 %v4767_v14  ;;  %1236 = vmatpush1.bf16.msra.mxu1 %v4768_v23 }
 0x19f   : > { %1300 = vmatprep.subr.bf16.mxu0 %v4769_v22  ;;  %1341 = vmatprep.subr.bf16.mxu1 %v4770_v25  ;;  %v937_v22 = vunpack.c.l.bf16 %v2823_v39  ;;  %v938_v25 = vunpack.c.h.bf16 %v2823_v39 }
 0x234   : > { %v974_v32 = vpop.f32.mrb[8].mxu0  ;;  %v1015_v21 = vpop.f32.mrb[8].mxu1 }
 0x235   : > { %v1022_v33 = vadd.f32 %v974_v32, %v935_v26  ;;  %v976_v20 = vpop.f32.mrb[9].mxu0  ;;  %v1017_v31 = vpop.f32.mrb[9].mxu1  ;;  %v1024_v9 = vadd.f32 %v1015_v21, %v937_v22 }
 0x236   : > { %v1023_v57 = vadd.f32 %v976_v20, %v936_v24  ;;  %v978_v38 = vpop.f32.mrb[10].mxu0  ;;  %v1019_v34 = vpop.f32.mrb[10].mxu1  ;;  %v1025_v19 = vadd.f32 %v1017_v31, %v938_v25  ;;  %v4771_v31 = vld [vmem:[#allocation31_spill] sm:$0xff] }
 0x237   : > { %v2824_v18 = vmul.f32 -1.442695, %v1022_v33  ;;  %v979_v14 = vpop.f32.mrb[11].mxu0  ;;  %v1020_v10 = vpop.f32.mrb[11].mxu1  ;;  %v2826_v8 = vmul.f32 -1.442695, %v1024_v9 }
 0x238   : > { %v2825_v23 = vmul.f32 -1.442695, %v1023_v57  ;;  %v2828_v14 = vld [vmem:[%s3498_s24 + $0x60] sm:$0xff] }
 0x239   : > { %3058 = vpow2.f32 %v2824_v18  ;;  %v1055_v24 = vunpack.c.l.bf16 %v2828_v14  ;;  %v1056_v22 = vunpack.c.h.bf16 %v2828_v14 }
 0x23a   : > { %3060 = vpow2.f32 %v2825_v23 }
 0x23b   : > { %3062 = vtanh.f32 %v1025_v19  ;;  %v2829_v19 = vld [vmem:[%s3498_s24 + $0x68] sm:$0xff] }
 0x23c   : > { %3064 = vpow2.f32 %v2826_v8 }
 0x243   : > { %v3059_v7 = vpop.eup %3058 }
 0x244   : > { %v1035_v26 = vadd.f32 1.0, %v3059_v7  ;;  %v3061_v32 = vpop.eup %3060 }
 0x245   : > { %v1036_v38 = vadd.f32 1.0, %v3061_v32  ;;  %v3063_v34 = vpop.eup %3062 }
 0x246   : > { %3066 = vrcp.f32 %v1035_v26  ;;  %v3065_v10 = vpop.eup %3064 }
 0x247   : > { %3068 = vrcp.f32 %v1036_v38  ;;  %v1037_v39 = vadd.f32 1.0, %v3065_v10 }
 0x249   : > { %3070 = vrcp.f32 %v1037_v39 }
 0x250   : > { %v3067_v18 = vpop.eup %3066 }
 0x251   : > { %v1046_v57 = vmul.f32 %v3067_v18, %v3063_v34  ;;  %v3069_v23 = vpop.eup %3068 }
 0x252   : > { %v1045_v9 = vmul.f32 %v3069_v23, %v4771_v31  ;;  %v1057_v23 = vunpack.c.l.bf16 %v2829_v19 }
 0x254   : > { %v1094_v25 = vpop.f32.mrb[12].mxu0  ;;  %v1135_v7 = vpop.f32.mrb[12].mxu1  ;;  %v3924_v21 = vadd.f32 %v1046_v57, %v1045_v9  ;;  %v1058_v57 = vunpack.c.h.bf16 %v2829_v19  ;;  %v3993_v19 = vld [vmem:[%s4619_s2 + $0x24] ss:$16 sps:$4 sm:$0xff]  }
 0x255   : > { %v1142_v8 = vadd.f32 %v1094_v25, %v1055_v24  ;;  %v1096_v33 = vpop.f32.mrb[13].mxu0  ;;  %v1137_v20 = vpop.f32.mrb[13].mxu1  ;;  %v1144_v31 = vadd.f32 %v1135_v7, %v1057_v23  ;;  %v4784_v23 = vld [vmem:[#allocation22_spill] sm:$0xff] }
 0x256   : > { %v1143_v26 = vadd.f32 %v1096_v33, %v1056_v22  ;;  %v1098_v32 = vpop.f32.mrb[14].mxu0  ;;  %v1139_v38 = vpop.f32.mrb[14].mxu1  ;;  %3072 = vtanh.f32 %v3924_v21  ;;  %v1145_v9 = vadd.f32 %v1137_v20, %v1058_v57  ;;  %v3987_v20 = vld [vmem:[%s4619_s2 + $0x8] ss:$16 sps:$4 sm:$0xff]  }
 0x257   : > { %v2830_v34 = vmul.f32 -1.442695, %v1142_v8  ;;  %v1099_v18 = vpop.f32.mrb[15].mxu0  ;;  %v1140_v14 = vpop.f32.mrb[15].mxu1  ;;  %v2832_v39 = vmul.f32 -1.442695, %v1144_v31 }
 0x258   : > { %v2831_v10 = vmul.f32 -1.442695, %v1143_v26  ;;  %v3071_v24 = vpop.eup %3070  ;;  %v4002_v26 = vld [vmem:[%s4619_s2 + $0x20] ss:$16 sps:$4 sm:$0xff]   ;;  %v4776_v14 = vld [vmem:[#allocation14_spill] sm:$0xff] }
 0x259   : > { %3074 = vpow2.f32 %v2830_v34  ;;  %v4009_v34 = vld [vmem:[%s4619_s2 + $0x44] ss:$16 sps:$4 sm:$0xff]   ;;  %v4785_v57 = vld [vmem:[#allocation26_spill] sm:$0xff] }
 0x25a   : > { %3076 = vpow2.f32 %v2831_v10  ;;  %v4775_v18 = vld [vmem:[#allocation17_spill] sm:$0xff]  ;;  %v4786_v31 = vld [vmem:[#allocation23_spill] sm:$0xff] }
 0x25b   : > { %3078 = vtanh.f32 %v1145_v9  ;;  %v4783_v10 = vld [vmem:[#allocation25_spill] sm:$0xff] }
 0x25c   : > { %3080 = vpow2.f32 %v2832_v39  ;;  %v2834_v9 = vld [vmem:[%s3493_s20 + $0x20] sm:$0xff] }
 0x25d   : > { %v1176_v39 = vunpack.c.h.bf16 %v2834_v9 }
 0x260   : > { %v3073_v25 = vpop.eup %3072 }
 0x261   : > { %v1049_v6 = vmul.f32 %v3073_v25, %v3071_v24  ;;  %v4787_v24 = vld [vmem:[#allocation27_spill] sm:$0xff]  ;;  %v1175_v25 = vunpack.c.l.bf16 %v2834_v9 }
 0x263   : > { %v3075_v22 = vpop.eup %3074  ;;  %2827 = vst [vmem:[%s3503_s27 + $0x8] sm:$0xff] %v1049_v6  ;;  %v1179_v32 = vpack.c.bf16 %v1049_v6, %v1049_v6 }
 0x264   : > { %v1155_v33 = vadd.f32 1.0, %v3075_v22  ;;  %v3077_v8 = vpop.eup %3076 }
 0x265   : > { %v1156_v38 = vadd.f32 1.0, %v3077_v8  ;;  %1213 = vmatmul.mubr.bf16.vlgmr.msra.gmra.mrb[16].mxu0 %v1179_v32  ;;  %1254 = vmatmul.mubr.bf16.vlgmr.msra.gmra.mrb[16].mxu1 %v1179_v32 }
 0x266   : > { %3082 = vrcp.f32 %v1155_v33  ;;  %1301 = vmatpush1.bf16.msra.mxu0 %v3699_v36  ;;  %1342 = vmatpush1.bf16.msra.mxu1 %v3722_v42  ;;  %v3079_v36 = vpop.eup %3078 }
 0x267   : > { %3084 = vrcp.f32 %v1156_v38  ;;  %1302 = vmatprep.subr.bf16.mxu0 %v3702_v37  ;;  %1343 = vmatprep.subr.bf16.mxu1 %v3725_v43  ;;  %v3081_v6 = vpop.eup %3080 }
 0x268   : > { %1332 = vmatprep.mubr.bf16.mxu0 %v4747_v61  ;;  %1373 = vmatprep.mubr.bf16.mxu1 %v4747_v61 }
 0x26a   : > { %1303 = vmatpush1.bf16.msra.mxu0 %v3715_v40  ;;  %1344 = vmatpush1.bf16.msra.mxu1 %v3734_v46  ;;  %v1157_v40 = vadd.f32 1.0, %v3081_v6 }
 0x26b   : > { %1304 = vmatprep.subr.bf16.mxu0 %v3717_v41  ;;  %1345 = vmatprep.subr.bf16.mxu1 %v3737_v47 }
 0x26c   : > { %3086 = vrcp.f32 %v1157_v40 }
 0x26e   : > { %1305 = vmatpush1.bf16.msra.mxu0 %v3728_v44  ;;  %1346 = vmatpush1.bf16.msra.mxu1 %v3747_v50 }
 0x26f   : > { %1306 = vmatprep.subr.bf16.mxu0 %v3731_v45  ;;  %1347 = vmatprep.subr.bf16.mxu1 %v3750_v51 }
 0x270   : > { %v3083_v37 = vpop.eup %3082 }
 0x271   : > { %v1166_v42 = vmul.f32 %v3083_v37, %v3079_v36  ;;  %v3085_v43 = vpop.eup %3084  ;;  %v2835_v36 = vld [vmem:[%s3493_s20 + $0x28] sm:$0xff] }
 0x272   : > { %v1165_v7 = vmul.f32 %v3085_v43, %v3866_v27  ;;  %1307 = vmatpush1.bf16.msra.mxu0 %v3741_v48  ;;  %1348 = vmatpush1.bf16.msra.mxu1 %v3759_v54  ;;  %v3981_v27 = vld [vmem:[%s4619_s2] ss:$16 sps:$4 sm:$0xff]  }
 0x273   : > { %1308 = vmatprep.subr.bf16.mxu0 %v3744_v49  ;;  %1349 = vmatprep.subr.bf16.mxu1 %v3762_v55 }
 0x274   : > { %v3948_v41 = vadd.f32 %v1166_v42, %v1165_v7 }
 0x276   : > { %3088 = vtanh.f32 %v3948_v41  ;;  %1309 = vmatpush1.bf16.msra.mxu0 %v3753_v52  ;;  %1350 = vmatpush1.bf16.msra.mxu1 %v3771_v58  ;;  %v3087_v44 = vpop.eup %3086  ;;  %v3969_v52 = vld [vmem:[%s4619_s2 + $0x4] ss:$16 sps:$4 sm:$0xff]  }
 0x277   : > { %1310 = vmatprep.subr.bf16.mxu0 %v3756_v53  ;;  %1351 = vmatprep.subr.bf16.mxu1 %v3774_v59  ;;  %v3975_v53 = vld [vmem:[%s4619_s2 + $0xc] ss:$16 sps:$4 sm:$0xff]  }
 0x27a   : > { %1311 = vmatpush1.bf16.msra.mxu0 %v4749_v29  ;;  %1352 = vmatpush1.bf16.msra.mxu1 %v3783_v62 }
 0x27b   : > { %1312 = vmatprep.subr.bf16.mxu0 %v4750_v30  ;;  %1353 = vmatprep.subr.bf16.mxu1 %v3786_v63 }
 0x27e   : > { %1313 = vmatpush1.bf16.msra.mxu0 %v3777_v60  ;;  %1354 = vmatpush1.bf16.msra.mxu1 %v3793_v35 }
 0x27f   : > { %1314 = vmatprep.subr.bf16.mxu0 %v4751_v28  ;;  %1355 = vmatprep.subr.bf16.mxu1 %v3796_v3 }
 0x280   : > { %v3089_v45 = vpop.eup %3088 }
 0x281   : > { %v1169_v48 = vmul.f32 %v3089_v45, %v3087_v44  ;;  %v1177_v45 = vunpack.c.l.bf16 %v2835_v36 }
 0x282   : > { %1315 = vmatpush1.bf16.msra.mxu0 %v3789_v0  ;;  %1356 = vmatpush1.bf16.msra.mxu1 %v3800_v56 }
 0x283   : > { %2833 = vst [vmem:[%s3508_s6 + $0x30] sm:$0xff] %v1169_v48  ;;  %v1299_v49 = vpack.c.bf16 %v1169_v48, %v1169_v48  ;;  %1420 = vmatprep.subr.bf16.mxu0 %v3969_v52  ;;  %1461 = vmatprep.subr.bf16.mxu1 %v3975_v53  ;;  %v1178_v48 = vunpack.c.h.bf16 %v2835_v36 }
 0x285   : > { %1333 = vmatmul.mubr.bf16.vlgmr.msra.gmra.mrb[20].mxu0 %v1299_v49  ;;  %1374 = vmatmul.mubr.bf16.vlgmr.msra.gmra.mrb[20].mxu1 %v1299_v49 }
 0x286   : > { %1421 = vmatpush1.bf16.msra.mxu0 %v3981_v27  ;;  %1462 = vmatpush1.bf16.msra.mxu1 %v3987_v20 }
 0x287   : > { %1422 = vmatprep.subr.bf16.mxu0 %v3993_v19  ;;  %1463 = vmatprep.subr.bf16.mxu1 %v3569_v11  ;;  %v4016_v11 = vld [vmem:[%s4619_s2 + $0x40] ss:$16 sps:$4 sm:$0xff]  }
 0x288   : > { %1452 = vmatprep.mubr.bf16.mxu0 %v4747_v61  ;;  %1493 = vmatprep.mubr.bf16.mxu1 %v4747_v61 }
 0x28a   : > { %1423 = vmatpush1.bf16.msra.mxu0 %v4002_v26  ;;  %1464 = vmatpush1.bf16.msra.mxu1 %v3574_v12  ;;  %v4023_v12 = vld [vmem:[%s4619_s2 + $0x64] ss:$16 sps:$4 sm:$0xff]  }
 0x28b   : > { %1424 = vmatprep.subr.bf16.mxu0 %v4009_v34  ;;  %1465 = vmatprep.subr.bf16.mxu1 %v3591_v15  ;;  %4772 = vst [vmem:[#allocation28_spill] sm:$0xff] %v4023_v12  ;;  %v4773_v15 = vld [vmem:[#allocation16_spill] sm:$0xff] }
 0x28e   : > { %1425 = vmatpush1.bf16.msra.mxu0 %v4016_v11  ;;  %1466 = vmatpush1.bf16.msra.mxu1 %v3598_v16  ;;  %v4774_v16 = vld [vmem:[#allocation11_spill] sm:$0xff] }
 0x28f   : > { %1426 = vmatprep.subr.bf16.mxu0 %v4023_v12  ;;  %1467 = vmatprep.subr.bf16.mxu1 %v3604_v17  ;;  %v4777_v17 = vld [vmem:[#allocation20_spill] sm:$0xff] }
 0x292   : > { %1427 = vmatpush1.bf16.msra.mxu0 %v3581_v13  ;;  %1468 = vmatpush1.bf16.msra.mxu1 %v4752_v1  ;;  %v4778_v13 = vld [vmem:[#allocation15_spill] sm:$0xff]  ;;  %v4779_v1 = vld [vmem:[#allocation21_spill] sm:$0xff] }
 0x293   : > { %1428 = vmatprep.subr.bf16.mxu0 %v4753_v2  ;;  %1469 = vmatprep.subr.bf16.mxu1 %v4754_v4  ;;  %v4780_v2 = vld [vmem:[#allocation18_spill] sm:$0xff]  ;;  %v4781_v4 = vld [vmem:[#allocation24_spill] sm:$0xff] }
 0x296   : > { %1429 = vmatpush1.bf16.msra.mxu0 %v4755_v5  ;;  %1470 = vmatpush1.bf16.msra.mxu1 %v4773_v15  ;;  %v4782_v5 = vld [vmem:[#allocation19_spill] sm:$0xff] }
 0x297   : > { %1430 = vmatprep.subr.bf16.mxu0 %v4774_v16  ;;  %1471 = vmatprep.subr.bf16.mxu1 %v4775_v18 }
 0x29a   : > { %1431 = vmatpush1.bf16.msra.mxu0 %v4776_v14  ;;  %1472 = vmatpush1.bf16.msra.mxu1 %v4777_v17 }
 0x29b   : > { %1432 = vmatprep.subr.bf16.mxu0 %v4778_v13  ;;  %1473 = vmatprep.subr.bf16.mxu1 %v4779_v1 }
 0x29e   : > { %1433 = vmatpush1.bf16.msra.mxu0 %v4780_v2  ;;  %1474 = vmatpush1.bf16.msra.mxu1 %v4781_v4  ;;  %v2840_v2 = vld [vmem:[%s3498_s24 + $0x50] sm:$0xff] }
 0x29f   : > { %1434 = vmatprep.subr.bf16.mxu0 %v4782_v5  ;;  %1475 = vmatprep.subr.bf16.mxu1 %v4783_v10 }
 0x2a2   : > { %1435 = vmatpush1.bf16.msra.mxu0 %v4784_v23  ;;  %1476 = vmatpush1.bf16.msra.mxu1 %v4785_v57  ;;  %v1295_v23 = vunpack.c.l.bf16 %v2840_v2 }
 0x2a3   : > { %1540 = vmatprep.subr.bf16.mxu0 %v4786_v31  ;;  %1581 = vmatprep.subr.bf16.mxu1 %v4787_v24  ;;  %v1296_v24 = vunpack.c.h.bf16 %v2840_v2 }
 0x338   : > { %v1214_v22 = vpop.f32.mrb[16].mxu0  ;;  %v1255_v33 = vpop.f32.mrb[16].mxu1 }
 0x339   : > { %v1262_v32 = vadd.f32 %v1214_v22, %v1175_v25  ;;  %v1216_v8 = vpop.f32.mrb[17].mxu0  ;;  %v1257_v38 = vpop.f32.mrb[17].mxu1  ;;  %v1264_v49 = vadd.f32 %v1255_v33, %v1177_v45 }
 0x33a   : > { %v1263_v6 = vadd.f32 %v1216_v8, %v1176_v39  ;;  %v1218_v37 = vpop.f32.mrb[18].mxu0  ;;  %v1259_v42 = vpop.f32.mrb[18].mxu1  ;;  %v1265_v15 = vadd.f32 %v1257_v38, %v1178_v48  ;;  %v2841_v38 = vld [vmem:[%s3498_s24 + $0x58] sm:$0xff] }
 0x33b   : > { %v2836_v43 = vmul.f32 -1.442695, %v1262_v32  ;;  %v1219_v40 = vpop.f32.mrb[19].mxu0  ;;  %v1260_v7 = vpop.f32.mrb[19].mxu1  ;;  %v2838_v16 = vmul.f32 -1.442695, %v1264_v49 }
 0x33c   : > { %v2837_v44 = vmul.f32 -1.442695, %v1263_v6 }
 0x33d   : > { %3090 = vpow2.f32 %v2836_v43 }
 0x33e   : > { %3092 = vpow2.f32 %v2837_v44  ;;  %v1298_v44 = vunpack.c.h.bf16 %v2841_v38 }
 0x33f   : > { %3094 = vtanh.f32 %v1265_v15 }
 0x340   : > { %3096 = vpow2.f32 %v2838_v16 }
 0x347   : > { %v3091_v18 = vpop.eup %3090 }
 0x348   : > { %v1275_v14 = vadd.f32 1.0, %v3091_v18  ;;  %v3093_v17 = vpop.eup %3092 }
 0x349   : > { %v1276_v13 = vadd.f32 1.0, %v3093_v17  ;;  %v3095_v1 = vpop.eup %3094 }
 0x34a   : > { %3098 = vrcp.f32 %v1275_v14  ;;  %v3097_v4 = vpop.eup %3096 }
 0x34b   : > { %3100 = vrcp.f32 %v1276_v13  ;;  %v1277_v31 = vadd.f32 1.0, %v3097_v4  ;;  %v4056_v4 = vld [vmem:[#allocation6] ss:$16 sps:$4 sm:$0xff]  }
 0x34d   : > { %3102 = vrcp.f32 %v1277_v31  ;;  %v4074_v31 = vld [vmem:[#allocation6 + $0x44] ss:$16 sps:$4 sm:$0xff]  }
 0x354   : > { %v3099_v5 = vpop.eup %3098 }
 0x355   : > { %v1286_v10 = vmul.f32 %v3099_v5, %v3095_v1  ;;  %v3101_v57 = vpop.eup %3100  ;;  %v4059_v5 = vld [vmem:[#allocation6 + $0x8] ss:$16 sps:$4 sm:$0xff]  }
 0x356   : > { %v1285_v9 = vmul.f32 %v3101_v57, %v3924_v21  ;;  %v1297_v21 = vunpack.c.l.bf16 %v2841_v38  ;;  %v4070_v57 = vld [vmem:[#allocation6 + $0x20] ss:$16 sps:$4 sm:$0xff]  }
 0x357   : > { %v3103_v48 = vpop.eup %3102  ;;  %v4087_v38 = vld [vmem:[#allocation6 + $0x60] ss:$16 sps:$4 sm:$0xff]  }
 0x358   : > { %v1334_v25 = vpop.f32.mrb[20].mxu0  ;;  %v1375_v39 = vpop.f32.mrb[20].mxu1  ;;  %v4051_v22 = vadd.f32 %v1286_v10, %v1285_v9  ;;  %v4062_v10 = vld [vmem:[#allocation6 + $0x24] ss:$16 sps:$4 sm:$0xff]  }
 0x359   : > { %v1382_v33 = vadd.f32 %v1334_v25, %v1295_v23  ;;  %v1336_v32 = vpop.f32.mrb[21].mxu0  ;;  %v1377_v8 = vpop.f32.mrb[21].mxu1  ;;  %v1384_v45 = vadd.f32 %v1375_v39, %v1297_v21  ;;  %v4065_v23 = vld [vmem:[#allocation6 + $0x2c] ss:$16 sps:$4 sm:$0xff]   ;;  %v4078_v25 = vld [vmem:[#allocation6 + $0x40] ss:$16 sps:$4 sm:$0xff]  }
 0x35a   : > { %v1383_v36 = vadd.f32 %v1336_v32, %v1296_v24  ;;  %v1338_v6 = vpop.f32.mrb[22].mxu0  ;;  %v1379_v37 = vpop.f32.mrb[22].mxu1  ;;  %3104 = vtanh.f32 %v4051_v22  ;;  %v1385_v49 = vadd.f32 %v1377_v8, %v1298_v44  ;;  %v4227_v21 = vld [vmem:[%s4619_s2 + $0xcc] ss:$16 sps:$4 sm:$0xff]   ;;  %v4233_v44 = vld [vmem:[%s4619_s2 + $0xc0] ss:$16 sps:$4 sm:$0xff]  }
 0x35b   : > { %v2842_v42 = vmul.f32 -1.442695, %v1382_v33  ;;  %v1339_v43 = vpop.f32.mrb[23].mxu0  ;;  %v1380_v40 = vpop.f32.mrb[23].mxu1  ;;  %v2844_v16 = vmul.f32 -1.442695, %v1384_v45 }
 0x35c   : > { %v2843_v7 = vmul.f32 -1.442695, %v1383_v36  ;;  %v4082_v33 = vld [vmem:[#allocation6 + $0x64] ss:$16 sps:$4 sm:$0xff]   ;;  %v4191_v6 = vld [vmem:[%s4619_s2 + $0x88] ss:$16 sps:$4 sm:$0xff]  }
 0x35d   : > { %3106 = vpow2.f32 %v2842_v42  ;;  %v4091_v36 = vld [vmem:[#allocation6 + $0x84] ss:$16 sps:$4 sm:$0xff]   ;;  %4795 = vst [vmem:[#allocation16_spill] sm:$0xff] %v4191_v6  ;;  %v4203_v42 = vld [vmem:[%s4619_s2 + $0xac] ss:$16 sps:$4 sm:$0xff]   ;;  %4801 = vst [vmem:[#allocation21_spill] sm:$0xff] %v4227_v21 }
 0x35e   : > { %3108 = vpow2.f32 %v2843_v7  ;;  %v4197_v37 = vld [vmem:[%s4619_s2 + $0xa4] ss:$16 sps:$4 sm:$0xff]   ;;  %4797 = vst [vmem:[#allocation17_spill] sm:$0xff] %v4203_v42  ;;  %v4209_v43 = vld [vmem:[%s4619_s2 + $0xa0] ss:$16 sps:$4 sm:$0xff]   ;;  %4802 = vst [vmem:[#allocation18_spill] sm:$0xff] %v4233_v44 }
 0x35f   : > { %3110 = vtanh.f32 %v1385_v49  ;;  %4796 = vst [vmem:[#allocation11_spill] sm:$0xff] %v4197_v37  ;;  %4798 = vst [vmem:[#allocation14_spill] sm:$0xff] %v4209_v43  ;;  %v4215_v40 = vld [vmem:[%s4619_s2 + $0xa8] ss:$16 sps:$4 sm:$0xff]   ;;  %v4221_v7 = vld [vmem:[%s4619_s2 + $0xc4] ss:$16 sps:$4 sm:$0xff]  }
 0x360   : > { %3112 = vpow2.f32 %v2844_v16  ;;  %4799 = vst [vmem:[#allocation20_spill] sm:$0xff] %v4215_v40  ;;  %4800 = vst [vmem:[#allocation15_spill] sm:$0xff] %v4221_v7  ;;  %v4239_v45 = vld [vmem:[%s4619_s2 + $0xc8] ss:$16 sps:$4 sm:$0xff]   ;;  %v4251_v49 = vld [vmem:[%s4619_s2 + $0xec] ss:$16 sps:$4 sm:$0xff]  }
 0x361   : > { %4803 = vst [vmem:[#allocation24_spill] sm:$0xff] %v4239_v45  ;;  %4805 = vst [vmem:[#allocation25_spill] sm:$0xff] %v4251_v49  ;;  %v4263_v16 = vld [vmem:[%s4619_s2 + $0xe8] ss:$16 sps:$4 sm:$0xff]  }
 0x362   : > { %4807 = vst [vmem:[#allocation26_spill] sm:$0xff] %v4263_v16 }
 0x364   : > { %v3105_v15 = vpop.eup %3104 }
 0x365   : > { %v1289_v18 = vmul.f32 %v3105_v15, %v3103_v48  ;;  %v4245_v48 = vld [vmem:[%s4619_s2 + $0xe4] ss:$16 sps:$4 sm:$0xff]   ;;  %v4257_v15 = vld [vmem:[%s4619_s2 + $0xe0] ss:$16 sps:$4 sm:$0xff]  }
 0x366   : > { %4804 = vst [vmem:[#allocation19_spill] sm:$0xff] %v4245_v48  ;;  %4806 = vst [vmem:[#allocation22_spill] sm:$0xff] %v4257_v15 }
 0x367   : > { %v3107_v14 = vpop.eup %3106  ;;  %2839 = vst [vmem:[%s3503_s27 + $0x10] sm:$0xff] %v1289_v18  ;;  %v1419_v13 = vpack.c.bf16 %v1289_v18, %v1289_v18  ;;  %v4266_v18 = vld [vmem:[#allocation6 + $0x4] ss:$16 sps:$4 sm:$0xff]  }
 0x368   : > { %v1395_v17 = vadd.f32 1.0, %v3107_v14  ;;  %v3109_v1 = vpop.eup %3108  ;;  %4808 = vst [vmem:[#allocation23_spill] sm:$0xff] %v4266_v18  ;;  %v4269_v14 = vld [vmem:[#allocation6 + $0xc] ss:$16 sps:$4 sm:$0xff]  }
 0x369   : > { %v1396_v2 = vadd.f32 1.0, %v3109_v1  ;;  %1453 = vmatmul.mubr.bf16.vlgmr.msra.gmra.mrb[24].mxu0 %v1419_v13  ;;  %1494 = vmatmul.mubr.bf16.vlgmr.msra.gmra.mrb[24].mxu1 %v1419_v13  ;;  %v3111_v24 = vpop.eup %3110  ;;  %4809 = vst [vmem:[#allocation27_spill] sm:$0xff] %v4269_v14 }
 0x36a   : > { %3114 = vrcp.f32 %v1395_v17  ;;  %1541 = vmatpush1.bf16.msra.mxu0 %v4056_v4  ;;  %1582 = vmatpush1.bf16.msra.mxu1 %v4059_v5  ;;  %v3113_v9 = vpop.eup %3112  ;;  %v2846_v17 = vld [vmem:[%s3493_s20 + $0x30] sm:$0xff] }
 0x36b   : > { %3116 = vrcp.f32 %v1396_v2  ;;  %1542 = vmatprep.subr.bf16.mxu0 %v4062_v10  ;;  %1583 = vmatprep.subr.bf16.mxu1 %v4065_v23  ;;  %v1397_v8 = vadd.f32 1.0, %v3113_v9  ;;  %v1415_v13 = vunpack.c.l.bf16 %v2846_v17  ;;  %v1416_v1 = vunpack.c.h.bf16 %v2846_v17 }
 0x36c   : > { %1572 = vmatprep.mubr.bf16.mxu0 %v4747_v61  ;;  %1613 = vmatprep.mubr.bf16.mxu1 %v4747_v61 }
 0x36d   : > { %3118 = vrcp.f32 %v1397_v8 }
 0x36e   : > { %1543 = vmatpush1.bf16.msra.mxu0 %v4070_v57  ;;  %1584 = vmatpush1.bf16.msra.mxu1 %v3734_v46 }
 0x36f   : > { %1544 = vmatprep.subr.bf16.mxu0 %v4074_v31  ;;  %1585 = vmatprep.subr.bf16.mxu1 %v3737_v47 }
 0x372   : > { %1545 = vmatpush1.bf16.msra.mxu0 %v4078_v25  ;;  %1586 = vmatpush1.bf16.msra.mxu1 %v3747_v50 }
 0x373   : > { %1546 = vmatprep.subr.bf16.mxu0 %v4082_v33  ;;  %1587 = vmatprep.subr.bf16.mxu1 %v3750_v51  ;;  %v4098_v51 = vld [vmem:[#allocation6 + $0x80] ss:$16 sps:$4 sm:$0xff]  }
 0x374   : > { %v3115_v39 = vpop.eup %3114 }
 0x375   : > { %v1406_v46 = vmul.f32 %v3115_v39, %v3111_v24  ;;  %v3117_v32 = vpop.eup %3116 }
 0x376   : > { %v1405_v47 = vmul.f32 %v3117_v32, %v3948_v41  ;;  %1547 = vmatpush1.bf16.msra.mxu0 %v4087_v38  ;;  %1588 = vmatpush1.bf16.msra.mxu1 %v3759_v54  ;;  %v4102_v41 = vld [vmem:[#allocation6 + $0xa4] ss:$16 sps:$4 sm:$0xff]   ;;  %v2847_v32 = vld [vmem:[%s3493_s20 + $0x38] sm:$0xff] }
 0x377   : > { %1548 = vmatprep.subr.bf16.mxu0 %v4091_v36  ;;  %1589 = vmatprep.subr.bf16.mxu1 %v3762_v55  ;;  %v3119_v54 = vpop.eup %3118 }
 0x378   : > { %v4095_v50 = vadd.f32 %v1406_v46, %v1405_v47 }
 0x37a   : > { %3120 = vtanh.f32 %v4095_v50  ;;  %1549 = vmatpush1.bf16.msra.mxu0 %v4098_v51  ;;  %1590 = vmatpush1.bf16.msra.mxu1 %v3771_v58 }
 0x37b   : > { %1550 = vmatprep.subr.bf16.mxu0 %v4102_v41  ;;  %1591 = vmatprep.subr.bf16.mxu1 %v3774_v59 }
 0x37e   : > { %1551 = vmatpush1.bf16.msra.mxu0 %v4749_v29  ;;  %1592 = vmatpush1.bf16.msra.mxu1 %v3783_v62  ;;  %v4148_v62 = vld [vmem:[%s4619_s2 + $0x48] ss:$16 sps:$4 sm:$0xff]   ;;  %v4173_v29 = vld [vmem:[%s4619_s2 + $0x84] ss:$16 sps:$4 sm:$0xff]  }
 0x37f   : > { %1552 = vmatprep.subr.bf16.mxu0 %v4750_v30  ;;  %1593 = vmatprep.subr.bf16.mxu1 %v3786_v63  ;;  %4788 = vst [vmem:[#allocation29_spill] sm:$0xff] %v4148_v62  ;;  %v4155_v63 = vld [vmem:[%s4619_s2 + $0x6c] ss:$16 sps:$4 sm:$0xff]   ;;  %4792 = vst [vmem:[#allocation13_spill] sm:$0xff] %v4173_v29 }
 0x380   : > { %4789 = vst [vmem:[#allocation30_spill] sm:$0xff] %v4155_v63  ;;  %v4179_v30 = vld [vmem:[%s4619_s2 + $0x8c] ss:$16 sps:$4 sm:$0xff]  }
 0x381   : > { %4793 = vst [vmem:[#allocation10_spill] sm:$0xff] %v4179_v30 }
 0x382   : > { %1553 = vmatpush1.bf16.msra.mxu0 %v3777_v60  ;;  %1594 = vmatpush1.bf16.msra.mxu1 %v3793_v35  ;;  %v4141_v60 = vld [vmem:[%s4619_s2 + $0x4c] ss:$16 sps:$4 sm:$0xff]   ;;  %v4167_v35 = vld [vmem:[%s4619_s2 + $0x68] ss:$16 sps:$4 sm:$0xff]  }
 0x383   : > { %1554 = vmatprep.subr.bf16.mxu0 %v4751_v28  ;;  %1595 = vmatprep.subr.bf16.mxu1 %v3796_v3  ;;  %v4125_v3 = vld [vmem:[%s4619_s2 + $0x2c] ss:$16 sps:$4 sm:$0xff]   ;;  %4791 = vst [vmem:[#allocation9_spill] sm:$0xff] %v4167_v35  ;;  %v4185_v28 = vld [vmem:[%s4619_s2 + $0x80] ss:$16 sps:$4 sm:$0xff]  }
 0x384   : > { %v3121_v55 = vpop.eup %3120  ;;  %4794 = vst [vmem:[#allocation31_spill] sm:$0xff] %v4185_v28 }
 0x385   : > { %v1409_v58 = vmul.f32 %v3121_v55, %v3119_v54 }
 0x386   : > { %1555 = vmatpush1.bf16.msra.mxu0 %v3789_v0  ;;  %1596 = vmatpush1.bf16.msra.mxu1 %v3800_v56  ;;  %v4134_v56 = vld [vmem:[%s4619_s2 + $0x28] ss:$16 sps:$4 sm:$0xff]   ;;  %v4161_v0 = vld [vmem:[%s4619_s2 + $0x60] ss:$16 sps:$4 sm:$0xff]  }
 0x387   : > { %2845 = vst [vmem:[%s3508_s6 + $0x28] sm:$0xff] %v1409_v58  ;;  %v1539_v59 = vpack.c.bf16 %v1409_v58, %v1409_v58  ;;  %1660 = vmatprep.subr.bf16.mxu0 %v3969_v52  ;;  %1701 = vmatprep.subr.bf16.mxu1 %v3975_v53  ;;  %4790 = vst [vmem:[#allocation12_spill] sm:$0xff] %v4161_v0 }
 0x389   : > { %1573 = vmatmul.mubr.bf16.vlgmr.msra.gmra.mrb[28].mxu0 %v1539_v59  ;;  %1614 = vmatmul.mubr.bf16.vlgmr.msra.gmra.mrb[28].mxu1 %v1539_v59 }
 0x38a   : > { %1661 = vmatpush1.bf16.msra.mxu0 %v3981_v27  ;;  %1702 = vmatpush1.bf16.msra.mxu1 %v3987_v20 }
 0x38b   : > { %1662 = vmatprep.subr.bf16.mxu0 %v3993_v19  ;;  %1703 = vmatprep.subr.bf16.mxu1 %v4125_v3 }
 0x38c   : > { %1692 = vmatprep.mubr.bf16.mxu0 %v4747_v61  ;;  %1733 = vmatprep.mubr.bf16.mxu1 %v4747_v61 }
 0x38e   : > { %1663 = vmatpush1.bf16.msra.mxu0 %v4002_v26  ;;  %1704 = vmatpush1.bf16.msra.mxu1 %v4134_v56 }
 0x38f   : > { %1664 = vmatprep.subr.bf16.mxu0 %v4009_v34  ;;  %1705 = vmatprep.subr.bf16.mxu1 %v4141_v60 }
 0x392   : > { %1665 = vmatpush1.bf16.msra.mxu0 %v4016_v11  ;;  %1706 = vmatpush1.bf16.msra.mxu1 %v4148_v62 }
 0x393   : > { %1666 = vmatprep.subr.bf16.mxu0 %v4023_v12  ;;  %1707 = vmatprep.subr.bf16.mxu1 %v4155_v63 }
 0x396   : > { %1667 = vmatpush1.bf16.msra.mxu0 %v4161_v0  ;;  %1708 = vmatpush1.bf16.msra.mxu1 %v4167_v35 }
 0x397   : > { %1668 = vmatprep.subr.bf16.mxu0 %v4173_v29  ;;  %1709 = vmatprep.subr.bf16.mxu1 %v4179_v30 }
 0x39a   : > { %1669 = vmatpush1.bf16.msra.mxu0 %v4185_v28  ;;  %1710 = vmatpush1.bf16.msra.mxu1 %v4191_v6 }
 0x39b   : > { %1670 = vmatprep.subr.bf16.mxu0 %v4197_v37  ;;  %1711 = vmatprep.subr.bf16.mxu1 %v4203_v42 }
 0x39e   : > { %1671 = vmatpush1.bf16.msra.mxu0 %v4209_v43  ;;  %1712 = vmatpush1.bf16.msra.mxu1 %v4215_v40 }
 0x39f   : > { %1672 = vmatprep.subr.bf16.mxu0 %v4221_v7  ;;  %1713 = vmatprep.subr.bf16.mxu1 %v4227_v21 }
 0x3a2   : > { %1673 = vmatpush1.bf16.msra.mxu0 %v4233_v44  ;;  %1714 = vmatpush1.bf16.msra.mxu1 %v4239_v45 }
 0x3a3   : > { %1674 = vmatprep.subr.bf16.mxu0 %v4245_v48  ;;  %1715 = vmatprep.subr.bf16.mxu1 %v4251_v49 }
 0x3a6   : > { %1675 = vmatpush1.bf16.msra.mxu0 %v4257_v15  ;;  %1716 = vmatpush1.bf16.msra.mxu1 %v4263_v16  ;;  %v1417_v16 = vunpack.c.l.bf16 %v2847_v32 }
 0x3a7   : > { %1780 = vmatprep.subr.bf16.mxu0 %v4266_v18  ;;  %1821 = vmatprep.subr.bf16.mxu1 %v4269_v14  ;;  %v1418_v14 = vunpack.c.h.bf16 %v2847_v32 }
 0x43c   : > { %v1454_v2 = vpop.f32.mrb[24].mxu0  ;;  %v1495_v24 = vpop.f32.mrb[24].mxu1 }
 0x43d   : > { %v1502_v9 = vadd.f32 %v1454_v2, %v1415_v13  ;;  %v1456_v39 = vpop.f32.mrb[25].mxu0  ;;  %v1497_v46 = vpop.f32.mrb[25].mxu1  ;;  %v1504_v15 = vadd.f32 %v1495_v24, %v1417_v16 }
 0x43e   : > { %v1503_v8 = vadd.f32 %v1456_v39, %v1416_v1  ;;  %v1458_v47 = vpop.f32.mrb[26].mxu0  ;;  %v1499_v54 = vpop.f32.mrb[26].mxu1  ;;  %v1505_v17 = vadd.f32 %v1497_v46, %v1418_v14  ;;  %v2852_v39 = vld [vmem:[%s3498_s24 + $0x40] sm:$0xff] }
 0x43f   : > { %v2848_v55 = vmul.f32 -1.442695, %v1502_v9  ;;  %v1459_v58 = vpop.f32.mrb[27].mxu0  ;;  %v1500_v59 = vpop.f32.mrb[27].mxu1  ;;  %v2850_v49 = vmul.f32 -1.442695, %v1504_v15  ;;  %v1536_v16 = vunpack.c.h.bf16 %v2852_v39 }
 0x440   : > { %v2849_v18 = vmul.f32 -1.442695, %v1503_v8  ;;  %v2853_v59 = vld [vmem:[%s3498_s24 + $0x48] sm:$0xff] }
 0x441   : > { %3122 = vpow2.f32 %v2848_v55  ;;  %v1535_v55 = vunpack.c.l.bf16 %v2852_v39 }
 0x442   : > { %3124 = vpow2.f32 %v2849_v18 }
 0x443   : > { %3126 = vtanh.f32 %v1505_v17 }
 0x444   : > { %3128 = vpow2.f32 %v2850_v49 }
 0x44b   : > { %v3123_v48 = vpop.eup %3122 }
 0x44c   : > { %v1515_v13 = vadd.f32 1.0, %v3123_v48  ;;  %v3125_v2 = vpop.eup %3124 }
 0x44d   : > { %v1516_v1 = vadd.f32 1.0, %v3125_v2  ;;  %v3127_v9 = vpop.eup %3126 }
 0x44e   : > { %3130 = vrcp.f32 %v1515_v13  ;;  %v3129_v8 = vpop.eup %3128 }
 0x44f   : > { %3132 = vrcp.f32 %v1516_v1  ;;  %v1517_v32 = vadd.f32 1.0, %v3129_v8 }
 0x451   : > { %3134 = vrcp.f32 %v1517_v32 }
 0x458   : > { %v3131_v47 = vpop.eup %3130 }
 0x459   : > { %v1526_v54 = vmul.f32 %v3131_v47, %v3127_v9  ;;  %v3133_v18 = vpop.eup %3132  ;;  %v1538_v47 = vunpack.c.h.bf16 %v2853_v59 }
 0x45a   : > { %v1525_v15 = vmul.f32 %v3133_v18, %v4051_v22  ;;  %v1537_v22 = vunpack.c.l.bf16 %v2853_v59 }
 0x45c   : > { %v1574_v14 = vpop.f32.mrb[28].mxu0  ;;  %v1615_v48 = vpop.f32.mrb[28].mxu1  ;;  %v4276_v24 = vadd.f32 %v1526_v54, %v1525_v15 }
 0x45d   : > { %v1622_v49 = vadd.f32 %v1574_v14, %v1535_v55  ;;  %v1576_v46 = vpop.f32.mrb[29].mxu0  ;;  %v1617_v58 = vpop.f32.mrb[29].mxu1  ;;  %v1624_v54 = vadd.f32 %v1615_v48, %v1537_v22  ;;  %v4288_v48 = vld [vmem:[#allocation6 + $0x28] ss:$16 sps:$4 sm:$0xff]  }
 0x45e   : > { %v1623_v17 = vadd.f32 %v1576_v46, %v1536_v16  ;;  %v1578_v13 = vpop.f32.mrb[30].mxu0  ;;  %v1619_v2 = vpop.f32.mrb[30].mxu1  ;;  %3136 = vtanh.f32 %v4276_v24  ;;  %v1625_v18 = vadd.f32 %v1617_v58, %v1538_v47  ;;  %v4292_v58 = vld [vmem:[#allocation6 + $0x4c] ss:$16 sps:$4 sm:$0xff]  }
 0x45f   : > { %v2854_v1 = vmul.f32 -1.442695, %v1622_v49  ;;  %v1579_v9 = vpop.f32.mrb[31].mxu0  ;;  %v1620_v39 = vpop.f32.mrb[31].mxu1  ;;  %v2856_v32 = vmul.f32 -1.442695, %v1624_v54 }
 0x460   : > { %v2855_v8 = vmul.f32 -1.442695, %v1623_v17  ;;  %v3135_v55 = vpop.eup %3134  ;;  %v4300_v39 = vld [vmem:[#allocation6 + $0x6c] ss:$16 sps:$4 sm:$0xff]  }
 0x461   : > { %3138 = vpow2.f32 %v2854_v1  ;;  %v4296_v1 = vld [vmem:[#allocation6 + $0x48] ss:$16 sps:$4 sm:$0xff]  }
 0x462   : > { %3140 = vpow2.f32 %v2855_v8 }
 0x463   : > { %3142 = vtanh.f32 %v1625_v18  ;;  %v4309_v18 = vld [vmem:[#allocation6 + $0x8c] ss:$16 sps:$4 sm:$0xff]  }
 0x464   : > { %3144 = vpow2.f32 %v2856_v32  ;;  %v4320_v32 = vld [vmem:[#allocation6 + $0xac] ss:$16 sps:$4 sm:$0xff]  }
 0x468   : > { %v3137_v15 = vpop.eup %3136 }
 0x469   : > { %v1529_v14 = vmul.f32 %v3137_v15, %v3135_v55  ;;  %v4305_v55 = vld [vmem:[#allocation6 + $0x68] ss:$16 sps:$4 sm:$0xff]  }
 0x46b   : > { %v3139_v16 = vpop.eup %3138  ;;  %2851 = vst [vmem:[%s3503_s27 + $0x18] sm:$0xff] %v1529_v14  ;;  %v1659_v13 = vpack.c.bf16 %v1529_v14, %v1529_v14  ;;  %v4323_v14 = vld [vmem:[#allocation6 + $0xa0] ss:$16 sps:$4 sm:$0xff]  }
 0x46c   : > { %v1635_v46 = vadd.f32 1.0, %v3139_v16  ;;  %v3141_v49 = vpop.eup %3140  ;;  %v4326_v16 = vld [vmem:[#allocation6 + $0xa8] ss:$16 sps:$4 sm:$0xff]  }
 0x46d   : > { %v1636_v2 = vadd.f32 1.0, %v3141_v49  ;;  %1693 = vmatmul.mubr.bf16.vlgmr.msra.gmra.mrb[32].mxu0 %v1659_v13  ;;  %1734 = vmatmul.mubr.bf16.vlgmr.msra.gmra.mrb[32].mxu1 %v1659_v13  ;;  %v3143_v59 = vpop.eup %3142  ;;  %v4332_v13 = vld [vmem:[#allocation6 + $0xcc] ss:$16 sps:$4 sm:$0xff]   ;;  %v4335_v49 = vld [vmem:[#allocation6 + $0xc0] ss:$16 sps:$4 sm:$0xff]  }
 0x46e   : > { %3146 = vrcp.f32 %v1635_v46  ;;  %1781 = vmatpush1.bf16.msra.mxu0 %v4056_v4  ;;  %1822 = vmatpush1.bf16.msra.mxu1 %v4059_v5  ;;  %v3145_v17 = vpop.eup %3144  ;;  %v4329_v46 = vld [vmem:[#allocation6 + $0xc4] ss:$16 sps:$4 sm:$0xff]  }
 0x46f   : > { %3148 = vrcp.f32 %v1636_v2  ;;  %1782 = vmatprep.subr.bf16.mxu0 %v4062_v10  ;;  %1823 = vmatprep.subr.bf16.mxu1 %v4065_v23  ;;  %v1637_v47 = vadd.f32 1.0, %v3145_v17  ;;  %v4338_v2 = vld [vmem:[#allocation6 + $0xc8] ss:$16 sps:$4 sm:$0xff]   ;;  %v4341_v17 = vld [vmem:[#allocation6 + $0xe4] ss:$16 sps:$4 sm:$0xff]  }
 0x470   : > { %1812 = vmatprep.mubr.bf16.mxu0 %v4747_v61  ;;  %1853 = vmatprep.mubr.bf16.mxu1 %v4747_v61  ;;  %4810 = vst [vmem:[#allocation32_spill] sm:$0xff] %v4338_v2 }
 0x471   : > { %3150 = vrcp.f32 %v1637_v47  ;;  %v4347_v47 = vld [vmem:[#allocation6 + $0xe0] ss:$16 sps:$4 sm:$0xff]  }
 0x472   : > { %1783 = vmatpush1.bf16.msra.mxu0 %v4070_v57  ;;  %1824 = vmatpush1.bf16.msra.mxu1 %v4288_v48 }
 0x473   : > { %1784 = vmatprep.subr.bf16.mxu0 %v4074_v31  ;;  %1825 = vmatprep.subr.bf16.mxu1 %v4292_v58 }
 0x476   : > { %1785 = vmatpush1.bf16.msra.mxu0 %v4078_v25  ;;  %1826 = vmatpush1.bf16.msra.mxu1 %v4296_v1 }
 0x477   : > { %1786 = vmatprep.subr.bf16.mxu0 %v4082_v33  ;;  %1827 = vmatprep.subr.bf16.mxu1 %v4300_v39 }
 0x478   : > { %v3147_v9 = vpop.eup %3146 }
 0x479   : > { %v1646_v8 = vmul.f32 %v3147_v9, %v3143_v59  ;;  %v3149_v22 = vpop.eup %3148  ;;  %v4344_v9 = vld [vmem:[#allocation6 + $0xec] ss:$16 sps:$4 sm:$0xff]  }
 0x47a   : > { %v1645_v54 = vmul.f32 %v3149_v22, %v4095_v50  ;;  %1787 = vmatpush1.bf16.msra.mxu0 %v4087_v38  ;;  %1828 = vmatpush1.bf16.msra.mxu1 %v4305_v55  ;;  %v4316_v50 = vld [vmem:[#allocation6 + $0x88] ss:$16 sps:$4 sm:$0xff]  }
 0x47b   : > { %1788 = vmatprep.subr.bf16.mxu0 %v4091_v36  ;;  %1829 = vmatprep.subr.bf16.mxu1 %v4309_v18  ;;  %v3151_v59 = vpop.eup %3150 }
 0x47c   : > { %v4312_v15 = vadd.f32 %v1646_v8, %v1645_v54  ;;  %v4350_v54 = vld [vmem:[#allocation6 + $0xe8] ss:$16 sps:$4 sm:$0xff]  }
 0x47e   : > { %3152 = vtanh.f32 %v4312_v15  ;;  %1789 = vmatpush1.bf16.msra.mxu0 %v4098_v51  ;;  %1830 = vmatpush1.bf16.msra.mxu1 %v4316_v50 }
 0x47f   : > { %1790 = vmatprep.subr.bf16.mxu0 %v4102_v41  ;;  %1831 = vmatprep.subr.bf16.mxu1 %v4320_v32 }
 0x482   : > { %1791 = vmatpush1.bf16.msra.mxu0 %v4323_v14  ;;  %1832 = vmatpush1.bf16.msra.mxu1 %v4326_v16 }
 0x483   : > { %1792 = vmatprep.subr.bf16.mxu0 %v4329_v46  ;;  %1833 = vmatprep.subr.bf16.mxu1 %v4332_v13 }
 0x486   : > { %1793 = vmatpush1.bf16.msra.mxu0 %v4335_v49  ;;  %1834 = vmatpush1.bf16.msra.mxu1 %v4338_v2 }
 0x487   : > { %1794 = vmatprep.subr.bf16.mxu0 %v4341_v17  ;;  %1835 = vmatprep.subr.bf16.mxu1 %v4344_v9 }
 0x488   : > { %v3153_v8 = vpop.eup %3152 }
 0x489   : > { %v1649_v22 = vmul.f32 %v3153_v8, %v3151_v59  ;;  %v4812_v59 = vld [vmem:[#allocation25_spill] sm:$0xff]  ;;  %v4813_v8 = vld [vmem:[#allocation22_spill] sm:$0xff] }
 0x48a   : > { %1795 = vmatpush1.bf16.msra.mxu0 %v4347_v47  ;;  %1836 = vmatpush1.bf16.msra.mxu1 %v4350_v54 }
 0x48b   : > { %2857 = vst [vmem:[%s3508_s6 + $0x20] sm:$0xff] %v1649_v22  ;;  %v1779_v2 = vpack.c.bf16 %v1649_v22, %v1649_v22  ;;  %1900 = vmatprep.subr.bf16.mxu0 %v3969_v52  ;;  %1941 = vmatprep.subr.bf16.mxu1 %v3975_v53  ;;  %v4814_v22 = vld [vmem:[#allocation26_spill] sm:$0xff] }
 0x48d   : > { %1813 = vmatmul.mubr.bf16.vlgmr.msra.gmra.mrb[36].mxu0 %v1779_v2  ;;  %1854 = vmatmul.mubr.bf16.vlgmr.msra.gmra.mrb[36].mxu1 %v1779_v2  ;;  %v4811_v2 = vld [vmem:[#allocation19_spill] sm:$0xff] }
 0x48e   : > { %1901 = vmatpush1.bf16.msra.mxu0 %v3981_v27  ;;  %1942 = vmatpush1.bf16.msra.mxu1 %v3987_v20 }
 0x48f   : > { %1902 = vmatprep.subr.bf16.mxu0 %v3993_v19  ;;  %1943 = vmatprep.subr.bf16.mxu1 %v4125_v3 }
 0x490   : > { %1932 = vmatprep.mubr.bf16.mxu0 %v4747_v61  ;;  %1973 = vmatprep.mubr.bf16.mxu1 %v4747_v61 }
 0x492   : > { %1903 = vmatpush1.bf16.msra.mxu0 %v4002_v26  ;;  %1944 = vmatpush1.bf16.msra.mxu1 %v4134_v56 }
 0x493   : > { %1904 = vmatprep.subr.bf16.mxu0 %v4009_v34  ;;  %1945 = vmatprep.subr.bf16.mxu1 %v4141_v60 }
 0x496   : > { %1905 = vmatpush1.bf16.msra.mxu0 %v4016_v11  ;;  %1946 = vmatpush1.bf16.msra.mxu1 %v4148_v62 }
 0x497   : > { %1906 = vmatprep.subr.bf16.mxu0 %v4023_v12  ;;  %1947 = vmatprep.subr.bf16.mxu1 %v4155_v63 }
 0x49a   : > { %1907 = vmatpush1.bf16.msra.mxu0 %v4161_v0  ;;  %1948 = vmatpush1.bf16.msra.mxu1 %v4167_v35 }
 0x49b   : > { %1908 = vmatprep.subr.bf16.mxu0 %v4173_v29  ;;  %1949 = vmatprep.subr.bf16.mxu1 %v4179_v30  ;;  %v2859_v30 = vld [vmem:[%s3493_s20 + $0x48] sm:$0xff] }
 0x49e   : > { %1909 = vmatpush1.bf16.msra.mxu0 %v4185_v28  ;;  %1950 = vmatpush1.bf16.msra.mxu1 %v4191_v6 }
 0x49f   : > { %1910 = vmatprep.subr.bf16.mxu0 %v4197_v37  ;;  %1951 = vmatprep.subr.bf16.mxu1 %v4203_v42 }
 0x4a2   : > { %1911 = vmatpush1.bf16.msra.mxu0 %v4209_v43  ;;  %1952 = vmatpush1.bf16.msra.mxu1 %v4215_v40  ;;  %v4815_v43 = vld [vmem:[#allocation23_spill] sm:$0xff] }
 0x4a3   : > { %1912 = vmatprep.subr.bf16.mxu0 %v4221_v7  ;;  %1953 = vmatprep.subr.bf16.mxu1 %v4227_v21  ;;  %v4816_v40 = vld [vmem:[#allocation27_spill] sm:$0xff]  ;;  %v2858_v7 = vld [vmem:[%s3493_s20 + $0x40] sm:$0xff] }
 0x4a4   : > { %v1655_v42 = vunpack.c.l.bf16 %v2858_v7  ;;  %v1656_v21 = vunpack.c.h.bf16 %v2858_v7 }
 0x4a6   : > { %1913 = vmatpush1.bf16.msra.mxu0 %v4233_v44  ;;  %1954 = vmatpush1.bf16.msra.mxu1 %v4239_v45 }
 0x4a7   : > { %1914 = vmatprep.subr.bf16.mxu0 %v4811_v2  ;;  %1955 = vmatprep.subr.bf16.mxu1 %v4812_v59 }
 0x4aa   : > { %1915 = vmatpush1.bf16.msra.mxu0 %v4813_v8  ;;  %1956 = vmatpush1.bf16.msra.mxu1 %v4814_v22 }
 0x4ab   : > { %2020 = vmatprep.subr.bf16.mxu0 %v4815_v43  ;;  %2061 = vmatprep.subr.bf16.mxu1 %v4816_v40  ;;  %v1657_v43 = vunpack.c.l.bf16 %v2859_v30  ;;  %v1658_v40 = vunpack.c.h.bf16 %v2859_v30 }
 0x540   : > { %v1694_v37 = vpop.f32.mrb[32].mxu0  ;;  %v1735_v44 = vpop.f32.mrb[32].mxu1 }
 0x541   : > { %v1742_v6 = vadd.f32 %v1694_v37, %v1655_v42  ;;  %v1696_v28 = vpop.f32.mrb[33].mxu0  ;;  %v1737_v45 = vpop.f32.mrb[33].mxu1  ;;  %v1744_v63 = vadd.f32 %v1735_v44, %v1657_v43 }
 0x542   : > { %v1743_v2 = vadd.f32 %v1696_v28, %v1656_v21  ;;  %v1698_v29 = vpop.f32.mrb[34].mxu0  ;;  %v1739_v59 = vpop.f32.mrb[34].mxu1  ;;  %v1745_v7 = vadd.f32 %v1737_v45, %v1658_v40 }
 0x543   : > { %v2860_v35 = vmul.f32 -1.442695, %v1742_v6  ;;  %v1699_v8 = vpop.f32.mrb[35].mxu0  ;;  %v1740_v0 = vpop.f32.mrb[35].mxu1  ;;  %v2862_v12 = vmul.f32 -1.442695, %v1744_v63 }
 0x544   : > { %v2861_v22 = vmul.f32 -1.442695, %v1743_v2  ;;  %v2864_v6 = vld [vmem:[%s3498_s24 + $0x30] sm:$0xff] }
 0x545   : > { %3154 = vpow2.f32 %v2860_v35  ;;  %v1775_v2 = vunpack.c.l.bf16 %v2864_v6  ;;  %v1776_v43 = vunpack.c.h.bf16 %v2864_v6 }
 0x546   : > { %3156 = vpow2.f32 %v2861_v22  ;;  %v2865_v22 = vld [vmem:[%s3498_s24 + $0x38] sm:$0xff] }
 0x547   : > { %3158 = vtanh.f32 %v1745_v7 }
 0x548   : > { %3160 = vpow2.f32 %v2862_v12 }
 0x54f   : > { %v3155_v62 = vpop.eup %3154 }
 0x550   : > { %v1755_v37 = vadd.f32 1.0, %v3155_v62  ;;  %v3157_v42 = vpop.eup %3156 }
 0x551   : > { %v1756_v29 = vadd.f32 1.0, %v3157_v42  ;;  %v3159_v28 = vpop.eup %3158 }
 0x552   : > { %3162 = vrcp.f32 %v1755_v37  ;;  %v3161_v0 = vpop.eup %3160 }
 0x553   : > { %3164 = vrcp.f32 %v1756_v29  ;;  %v1757_v30 = vadd.f32 1.0, %v3161_v0 }
 0x555   : > { %3166 = vrcp.f32 %v1757_v30 }
 0x55c   : > { %v3163_v35 = vpop.eup %3162 }
 0x55d   : > { %v1766_v21 = vmul.f32 %v3163_v35, %v3159_v28  ;;  %v3165_v59 = vpop.eup %3164  ;;  %v1778_v35 = vunpack.c.h.bf16 %v2865_v22 }
 0x55e   : > { %v1765_v63 = vmul.f32 %v3165_v59, %v4276_v24  ;;  %v1777_v24 = vunpack.c.l.bf16 %v2865_v22 }
 0x560   : > { %v1814_v40 = vpop.f32.mrb[36].mxu0  ;;  %v1855_v62 = vpop.f32.mrb[36].mxu1  ;;  %v4394_v44 = vadd.f32 %v1766_v21, %v1765_v63 }
 0x561   : > { %v1862_v12 = vadd.f32 %v1814_v40, %v1775_v2  ;;  %v1816_v45 = vpop.f32.mrb[37].mxu0  ;;  %v1857_v8 = vpop.f32.mrb[37].mxu1  ;;  %v1864_v21 = vadd.f32 %v1855_v62, %v1777_v24 }
 0x562   : > { %v1863_v7 = vadd.f32 %v1816_v45, %v1776_v43  ;;  %v1818_v37 = vpop.f32.mrb[38].mxu0  ;;  %v1859_v42 = vpop.f32.mrb[38].mxu1  ;;  %3168 = vtanh.f32 %v4394_v44  ;;  %v1865_v59 = vadd.f32 %v1857_v8, %v1778_v35 }
 0x563   : > { %v2866_v29 = vmul.f32 -1.442695, %v1862_v12  ;;  %v1819_v28 = vpop.f32.mrb[39].mxu0  ;;  %v1860_v6 = vpop.f32.mrb[39].mxu1  ;;  %v2868_v30 = vmul.f32 -1.442695, %v1864_v21 }
 0x564   : > { %v2867_v0 = vmul.f32 -1.442695, %v1863_v7  ;;  %v3167_v2 = vpop.eup %3166 }
 0x565   : > { %3170 = vpow2.f32 %v2866_v29 }
 0x566   : > { %3172 = vpow2.f32 %v2867_v0 }
 0x567   : > { %3174 = vtanh.f32 %v1865_v59  ;;  %v4823_v59 = vld [vmem:[#allocation13_spill] sm:$0xff] }
 0x568   : > { %3176 = vpow2.f32 %v2868_v30  ;;  %v4828_v30 = vld [vmem:[#allocation17_spill] sm:$0xff] }
 0x56c   : > { %v3169_v63 = vpop.eup %3168 }
 0x56d   : > { %v1769_v40 = vmul.f32 %v3169_v63, %v3167_v2  ;;  %v4825_v63 = vld [vmem:[#allocation31_spill] sm:$0xff] }
 0x56f   : > { %v3171_v43 = vpop.eup %3170  ;;  %2863 = vst [vmem:[%s3503_s27 + $0x20] sm:$0xff] %v1769_v40  ;;  %v1899_v37 = vpack.c.bf16 %v1769_v40, %v1769_v40  ;;  %v4829_v40 = vld [vmem:[#allocation14_spill] sm:$0xff] }
 0x570   : > { %v1875_v45 = vadd.f32 1.0, %v3171_v43  ;;  %v3173_v12 = vpop.eup %3172  ;;  %v4830_v43 = vld [vmem:[#allocation20_spill] sm:$0xff] }
 0x571   : > { %v1876_v42 = vadd.f32 1.0, %v3173_v12  ;;  %1933 = vmatmul.mubr.bf16.vlgmr.msra.gmra.mrb[40].mxu0 %v1899_v37  ;;  %1974 = vmatmul.mubr.bf16.vlgmr.msra.gmra.mrb[40].mxu1 %v1899_v37  ;;  %v3175_v62 = vpop.eup %3174  ;;  %v4832_v37 = vld [vmem:[#allocation21_spill] sm:$0xff]  ;;  %v4833_v12 = vld [vmem:[#allocation18_spill] sm:$0xff] }
 0x572   : > { %3178 = vrcp.f32 %v1875_v45  ;;  %2021 = vmatpush1.bf16.msra.mxu0 %v4056_v4  ;;  %2062 = vmatpush1.bf16.msra.mxu1 %v4059_v5  ;;  %v3177_v8 = vpop.eup %3176  ;;  %v4831_v45 = vld [vmem:[#allocation15_spill] sm:$0xff] }
 0x573   : > { %3180 = vrcp.f32 %v1876_v42  ;;  %2022 = vmatprep.subr.bf16.mxu0 %v4062_v10  ;;  %2063 = vmatprep.subr.bf16.mxu1 %v4065_v23  ;;  %v1877_v28 = vadd.f32 1.0, %v3177_v8  ;;  %v4834_v42 = vld [vmem:[#allocation24_spill] sm:$0xff]  ;;  %v4836_v8 = vld [vmem:[#allocation25_spill] sm:$0xff] }
 0x574   : > { %2052 = vmatprep.mubr.bf16.mxu0 %v4747_v61  ;;  %2093 = vmatprep.mubr.bf16.mxu1 %v4747_v61 }
 0x575   : > { %3182 = vrcp.f32 %v1877_v28  ;;  %v4840_v28 = vld [vmem:[#allocation27_spill] sm:$0xff] }
 0x576   : > { %2023 = vmatpush1.bf16.msra.mxu0 %v4070_v57  ;;  %2064 = vmatpush1.bf16.msra.mxu1 %v4288_v48 }
 0x577   : > { %2024 = vmatprep.subr.bf16.mxu0 %v4074_v31  ;;  %2065 = vmatprep.subr.bf16.mxu1 %v4292_v58 }
 0x57a   : > { %2025 = vmatpush1.bf16.msra.mxu0 %v4078_v25  ;;  %2066 = vmatpush1.bf16.msra.mxu1 %v4296_v1 }
 0x57b   : > { %2026 = vmatprep.subr.bf16.mxu0 %v4082_v33  ;;  %2067 = vmatprep.subr.bf16.mxu1 %v4300_v39 }
 0x57c   : > { %v3179_v22 = vpop.eup %3178 }
 0x57d   : > { %v1886_v7 = vmul.f32 %v3179_v22, %v3175_v62  ;;  %v3181_v29 = vpop.eup %3180  ;;  %v4835_v62 = vld [vmem:[#allocation19_spill] sm:$0xff]  ;;  %v4837_v22 = vld [vmem:[#allocation22_spill] sm:$0xff] }
 0x57e   : > { %v1885_v6 = vmul.f32 %v3181_v29, %v4312_v15  ;;  %2027 = vmatpush1.bf16.msra.mxu0 %v4087_v38  ;;  %2068 = vmatpush1.bf16.msra.mxu1 %v4305_v55  ;;  %v4817_v15 = vld [vmem:[#allocation32_spill] sm:$0xff]  ;;  %v4839_v29 = vld [vmem:[#allocation23_spill] sm:$0xff] }
 0x57f   : > { %2028 = vmatprep.subr.bf16.mxu0 %v4091_v36  ;;  %2069 = vmatprep.subr.bf16.mxu1 %v4309_v18  ;;  %v3183_v24 = vpop.eup %3182 }
 0x580   : > { %v4418_v0 = vadd.f32 %v1886_v7, %v1885_v6  ;;  %v4838_v7 = vld [vmem:[#allocation26_spill] sm:$0xff]  ;;  %v2870_v6 = vld [vmem:[%s3493_s20 + $0x50] sm:$0xff] }
 0x582   : > { %3184 = vtanh.f32 %v4418_v0  ;;  %2029 = vmatpush1.bf16.msra.mxu0 %v4098_v51  ;;  %2070 = vmatpush1.bf16.msra.mxu1 %v4316_v50 }
 0x583   : > { %2030 = vmatprep.subr.bf16.mxu0 %v4102_v41  ;;  %2071 = vmatprep.subr.bf16.mxu1 %v4320_v32 }
 0x586   : > { %2031 = vmatpush1.bf16.msra.mxu0 %v4323_v14  ;;  %2072 = vmatpush1.bf16.msra.mxu1 %v4326_v16 }
 0x587   : > { %2032 = vmatprep.subr.bf16.mxu0 %v4329_v46  ;;  %2073 = vmatprep.subr.bf16.mxu1 %v4332_v13 }
 0x58a   : > { %2033 = vmatpush1.bf16.msra.mxu0 %v4335_v49  ;;  %2074 = vmatpush1.bf16.msra.mxu1 %v4817_v15 }
 0x58b   : > { %2034 = vmatprep.subr.bf16.mxu0 %v4341_v17  ;;  %2075 = vmatprep.subr.bf16.mxu1 %v4344_v9 }
 0x58c   : > { %v3185_v35 = vpop.eup %3184 }
 0x58d   : > { %v1889_v21 = vmul.f32 %v3185_v35, %v3183_v24  ;;  %v1895_v24 = vunpack.c.l.bf16 %v2870_v6  ;;  %v1896_v35 = vunpack.c.h.bf16 %v2870_v6 }
 0x58e   : > { %2035 = vmatpush1.bf16.msra.mxu0 %v4347_v47  ;;  %2076 = vmatpush1.bf16.msra.mxu1 %v4350_v54 }
 0x58f   : > { %2869 = vst [vmem:[%s3508_s6 + $0x18] sm:$0xff] %v1889_v21  ;;  %v2019_v2 = vpack.c.bf16 %v1889_v21, %v1889_v21  ;;  %2140 = vmatprep.subr.bf16.mxu0 %v3969_v52  ;;  %2181 = vmatprep.subr.bf16.mxu1 %v3975_v53  ;;  %v4818_v52 = vld [vmem:[#allocation29_spill] sm:$0xff]  ;;  %v4819_v53 = vld [vmem:[#allocation28_spill] sm:$0xff] }
 0x591   : > { %2053 = vmatmul.mubr.bf16.vlgmr.msra.gmra.mrb[44].mxu0 %v2019_v2  ;;  %2094 = vmatmul.mubr.bf16.vlgmr.msra.gmra.mrb[44].mxu1 %v2019_v2 }
 0x592   : > { %2141 = vmatpush1.bf16.msra.mxu0 %v3981_v27  ;;  %2182 = vmatpush1.bf16.msra.mxu1 %v3987_v20  ;;  %v4820_v27 = vld [vmem:[#allocation30_spill] sm:$0xff]  ;;  %v4821_v20 = vld [vmem:[#allocation12_spill] sm:$0xff] }
 0x593   : > { %2142 = vmatprep.subr.bf16.mxu0 %v3993_v19  ;;  %2183 = vmatprep.subr.bf16.mxu1 %v4125_v3  ;;  %v4822_v19 = vld [vmem:[#allocation9_spill] sm:$0xff] }
 0x594   : > { %2172 = vmatprep.mubr.bf16.mxu0 %v4747_v61  ;;  %2213 = vmatprep.mubr.bf16.mxu1 %v4747_v61 }
 0x596   : > { %2143 = vmatpush1.bf16.msra.mxu0 %v4002_v26  ;;  %2184 = vmatpush1.bf16.msra.mxu1 %v4134_v56  ;;  %v4824_v26 = vld [vmem:[#allocation10_spill] sm:$0xff] }
 0x597   : > { %2144 = vmatprep.subr.bf16.mxu0 %v4009_v34  ;;  %2185 = vmatprep.subr.bf16.mxu1 %v4141_v60  ;;  %v4826_v34 = vld [vmem:[#allocation16_spill] sm:$0xff] }
 0x59a   : > { %2145 = vmatpush1.bf16.msra.mxu0 %v4016_v11  ;;  %2186 = vmatpush1.bf16.msra.mxu1 %v4818_v52  ;;  %v4827_v11 = vld [vmem:[#allocation11_spill] sm:$0xff] }
 0x59b   : > { %2146 = vmatprep.subr.bf16.mxu0 %v4819_v53  ;;  %2187 = vmatprep.subr.bf16.mxu1 %v4820_v27 }
 0x59e   : > { %2147 = vmatpush1.bf16.msra.mxu0 %v4821_v20  ;;  %2188 = vmatpush1.bf16.msra.mxu1 %v4822_v19 }
 0x59f   : > { %2148 = vmatprep.subr.bf16.mxu0 %v4823_v59  ;;  %2189 = vmatprep.subr.bf16.mxu1 %v4824_v26 }
 0x5a2   : > { %2149 = vmatpush1.bf16.msra.mxu0 %v4825_v63  ;;  %2190 = vmatpush1.bf16.msra.mxu1 %v4826_v34 }
 0x5a3   : > { %2150 = vmatprep.subr.bf16.mxu0 %v4827_v11  ;;  %2191 = vmatprep.subr.bf16.mxu1 %v4828_v30 }
 0x5a6   : > { %2151 = vmatpush1.bf16.msra.mxu0 %v4829_v40  ;;  %2192 = vmatpush1.bf16.msra.mxu1 %v4830_v43 }
 0x5a7   : > { %2152 = vmatprep.subr.bf16.mxu0 %v4831_v45  ;;  %2193 = vmatprep.subr.bf16.mxu1 %v4832_v37  ;;  %v2871_v37 = vld [vmem:[%s3493_s20 + $0x58] sm:$0xff] }
 0x5aa   : > { %2153 = vmatpush1.bf16.msra.mxu0 %v4833_v12  ;;  %2194 = vmatpush1.bf16.msra.mxu1 %v4834_v42 }
 0x5ab   : > { %2154 = vmatprep.subr.bf16.mxu0 %v4835_v62  ;;  %2195 = vmatprep.subr.bf16.mxu1 %v4836_v8 }
 0x5ae   : > { %2155 = vmatpush1.bf16.msra.mxu0 %v4837_v22  ;;  %2196 = vmatpush1.bf16.msra.mxu1 %v4838_v7 }
 0x5af   : > { %2260 = vmatprep.subr.bf16.mxu0 %v4839_v29  ;;  %2301 = vmatprep.subr.bf16.mxu1 %v4840_v28  ;;  %v1897_v29 = vunpack.c.l.bf16 %v2871_v37  ;;  %v1898_v28 = vunpack.c.h.bf16 %v2871_v37 }
 0x644   : > { %v1934_v21 = vpop.f32.mrb[40].mxu0  ;;  %v1975_v2 = vpop.f32.mrb[40].mxu1 }
 0x645   : > { %v1982_v53 = vadd.f32 %v1934_v21, %v1895_v24  ;;  %v1936_v12 = vpop.f32.mrb[41].mxu0  ;;  %v1977_v42 = vpop.f32.mrb[41].mxu1  ;;  %v1984_v30 = vadd.f32 %v1975_v2, %v1897_v29 }
 0x646   : > { %v1983_v62 = vadd.f32 %v1936_v12, %v1896_v35  ;;  %v1938_v45 = vpop.f32.mrb[42].mxu0  ;;  %v1979_v8 = vpop.f32.mrb[42].mxu1  ;;  %v1985_v6 = vadd.f32 %v1977_v42, %v1898_v28 }
 0x647   : > { %v2872_v43 = vmul.f32 -1.442695, %v1982_v53  ;;  %v1939_v22 = vpop.f32.mrb[43].mxu0  ;;  %v1980_v40 = vpop.f32.mrb[43].mxu1  ;;  %v2874_v11 = vmul.f32 -1.442695, %v1984_v30 }
 0x648   : > { %v2873_v7 = vmul.f32 -1.442695, %v1983_v62  ;;  %v2876_v8 = vld [vmem:[%s3498_s24 + $0x20] sm:$0xff]  ;;  %v2877_v53 = vld [vmem:[%s3498_s24 + $0x28] sm:$0xff] }
 0x649   : > { %3186 = vpow2.f32 %v2872_v43  ;;  %v2015_v22 = vunpack.c.l.bf16 %v2876_v8  ;;  %v2016_v29 = vunpack.c.h.bf16 %v2876_v8 }
 0x64a   : > { %3188 = vpow2.f32 %v2873_v7 }
 0x64b   : > { %3190 = vtanh.f32 %v1985_v6 }
 0x64c   : > { %3192 = vpow2.f32 %v2874_v11 }
 0x653   : > { %v3187_v34 = vpop.eup %3186 }
 0x654   : > { %v1995_v24 = vadd.f32 1.0, %v3187_v34  ;;  %v3189_v21 = vpop.eup %3188 }
 0x655   : > { %v1996_v45 = vadd.f32 1.0, %v3189_v21  ;;  %v3191_v12 = vpop.eup %3190 }
 0x656   : > { %3194 = vrcp.f32 %v1995_v24  ;;  %v3193_v40 = vpop.eup %3192 }
 0x657   : > { %3196 = vrcp.f32 %v1996_v45  ;;  %v1997_v37 = vadd.f32 1.0, %v3193_v40 }
 0x659   : > { %3198 = vrcp.f32 %v1997_v37 }
 0x660   : > { %v3195_v43 = vpop.eup %3194 }
 0x661   : > { %v2006_v62 = vmul.f32 %v3195_v43, %v3191_v12  ;;  %v3197_v7 = vpop.eup %3196  ;;  %v2018_v43 = vunpack.c.h.bf16 %v2877_v53 }
 0x662   : > { %v2005_v30 = vmul.f32 %v3197_v7, %v4394_v44  ;;  %v2017_v44 = vunpack.c.l.bf16 %v2877_v53  ;;  %v3349_v53 = vld [vmem:[%s4619_s2 + $0x8] ss:$16 sps:$4 sm:$0xff]  }
 0x664   : > { %v2054_v42 = vpop.f32.mrb[44].mxu0  ;;  %v2095_v34 = vpop.f32.mrb[44].mxu1  ;;  %v4476_v28 = vadd.f32 %v2006_v62, %v2005_v30 }
 0x665   : > { %v2102_v11 = vadd.f32 %v2054_v42, %v2015_v22  ;;  %v2056_v35 = vpop.f32.mrb[45].mxu0  ;;  %v2097_v2 = vpop.f32.mrb[45].mxu1  ;;  %v2104_v62 = vadd.f32 %v2095_v34, %v2017_v44  ;;  %v4851_v44 = vld [vmem:[#allocation25_spill] sm:$0xff] }
 0x666   : > { %v2103_v6 = vadd.f32 %v2056_v35, %v2016_v29  ;;  %v2058_v24 = vpop.f32.mrb[46].mxu0  ;;  %v2099_v21 = vpop.f32.mrb[46].mxu1  ;;  %3200 = vtanh.f32 %v4476_v28  ;;  %v2105_v7 = vadd.f32 %v2097_v2, %v2018_v43  ;;  %v4852_v43 = vld [vmem:[#allocation22_spill] sm:$0xff] }
 0x667   : > { %v2878_v45 = vmul.f32 -1.442695, %v2102_v11  ;;  %v2059_v12 = vpop.f32.mrb[47].mxu0  ;;  %v2100_v8 = vpop.f32.mrb[47].mxu1  ;;  %v2880_v37 = vmul.f32 -1.442695, %v2104_v62 }
 0x668   : > { %v2879_v40 = vmul.f32 -1.442695, %v2103_v6  ;;  %v3199_v22 = vpop.eup %3198  ;;  %v3350_v6 = vld [vmem:[%s4619_s2 + $0x24] ss:$16 sps:$4 sm:$0xff]   ;;  %v4853_v62 = vld [vmem:[#allocation26_spill] sm:$0xff] }
 0x669   : > { %3202 = vpow2.f32 %v2878_v45  ;;  %v3351_v45 = vld [vmem:[%s4619_s2 + $0x20] ss:$16 sps:$4 sm:$0xff]   ;;  %v3352_v12 = vld [vmem:[%s4619_s2 + $0x44] ss:$16 sps:$4 sm:$0xff]  }
 0x66a   : > { %3204 = vpow2.f32 %v2879_v40  ;;  %v3354_v8 = vld [vmem:[%s4619_s2 + $0x64] ss:$16 sps:$4 sm:$0xff]   ;;  %v4844_v40 = vld [vmem:[#allocation14_spill] sm:$0xff] }
 0x66b   : > { %3206 = vtanh.f32 %v2105_v7  ;;  %v4855_v7 = vld [vmem:[#allocation27_spill] sm:$0xff] }
 0x66c   : > { %3208 = vpow2.f32 %v2880_v37 }
 0x670   : > { %v3201_v30 = vpop.eup %3200 }
 0x671   : > { %v2009_v42 = vmul.f32 %v3201_v30, %v3199_v22  ;;  %v4854_v22 = vld [vmem:[#allocation23_spill] sm:$0xff]  ;;  %v2882_v30 = vld [vmem:[%s3493_s20 + $0x60] sm:$0xff] }
 0x672   : > { %v2135_v37 = vunpack.c.l.bf16 %v2882_v30 }
 0x673   : > { %v3203_v29 = vpop.eup %3202  ;;  %2875 = vst [vmem:[%s3503_s27 + $0x28] sm:$0xff] %v2009_v42  ;;  %v2139_v24 = vpack.c.bf16 %v2009_v42, %v2009_v42  ;;  %v2136_v42 = vunpack.c.h.bf16 %v2882_v30 }
 0x674   : > { %v2115_v35 = vadd.f32 1.0, %v3203_v29  ;;  %v3205_v11 = vpop.eup %3204 }
 0x675   : > { %v2116_v21 = vadd.f32 1.0, %v3205_v11  ;;  %2173 = vmatmul.mubr.bf16.vlgmr.msra.gmra.mrb[48].mxu0 %v2139_v24  ;;  %2214 = vmatmul.mubr.bf16.vlgmr.msra.gmra.mrb[48].mxu1 %v2139_v24 }
 0x676   : > { %3210 = vrcp.f32 %v2115_v35  ;;  %2261 = vmatpush1.bf16.msra.mxu0 %v4056_v4  ;;  %2302 = vmatpush1.bf16.msra.mxu1 %v4059_v5  ;;  %v3207_v4 = vpop.eup %3206 }
 0x677   : > { %3212 = vrcp.f32 %v2116_v21  ;;  %2262 = vmatprep.subr.bf16.mxu0 %v4062_v10  ;;  %2303 = vmatprep.subr.bf16.mxu1 %v4065_v23  ;;  %v3209_v34 = vpop.eup %3208 }
 0x678   : > { %2292 = vmatprep.mubr.bf16.mxu0 %v4747_v61  ;;  %2333 = vmatprep.mubr.bf16.mxu1 %v4747_v61 }
 0x67a   : > { %2263 = vmatpush1.bf16.msra.mxu0 %v4070_v57  ;;  %2304 = vmatpush1.bf16.msra.mxu1 %v4288_v48  ;;  %v2117_v57 = vadd.f32 1.0, %v3209_v34 }
 0x67b   : > { %2264 = vmatprep.subr.bf16.mxu0 %v4074_v31  ;;  %2305 = vmatprep.subr.bf16.mxu1 %v4292_v58 }
 0x67c   : > { %3214 = vrcp.f32 %v2117_v57 }
 0x67e   : > { %2265 = vmatpush1.bf16.msra.mxu0 %v4078_v25  ;;  %2306 = vmatpush1.bf16.msra.mxu1 %v4296_v1 }
 0x67f   : > { %2266 = vmatprep.subr.bf16.mxu0 %v4082_v33  ;;  %2307 = vmatprep.subr.bf16.mxu1 %v4300_v39 }
 0x680   : > { %v3211_v5 = vpop.eup %3210 }
 0x681   : > { %v2126_v10 = vmul.f32 %v3211_v5, %v3207_v4  ;;  %v3213_v23 = vpop.eup %3212  ;;  %v2883_v4 = vld [vmem:[%s3493_s20 + $0x68] sm:$0xff] }
 0x682   : > { %v2125_v2 = vmul.f32 %v3213_v23, %v4418_v0  ;;  %2267 = vmatpush1.bf16.msra.mxu0 %v4087_v38  ;;  %2308 = vmatpush1.bf16.msra.mxu1 %v4305_v55  ;;  %v3348_v0 = vld [vmem:[%s4619_s2] ss:$16 sps:$4 sm:$0xff]  }
 0x683   : > { %2268 = vmatprep.subr.bf16.mxu0 %v4091_v36  ;;  %2309 = vmatprep.subr.bf16.mxu1 %v4309_v18 }
 0x684   : > { %v4500_v31 = vadd.f32 %v2126_v10, %v2125_v2 }
 0x686   : > { %3216 = vtanh.f32 %v4500_v31  ;;  %2269 = vmatpush1.bf16.msra.mxu0 %v4098_v51  ;;  %2310 = vmatpush1.bf16.msra.mxu1 %v4316_v50  ;;  %v3215_v25 = vpop.eup %3214  ;;  %v3346_v51 = vld [vmem:[%s4619_s2 + $0x4] ss:$16 sps:$4 sm:$0xff]  }
 0x687   : > { %2270 = vmatprep.subr.bf16.mxu0 %v4102_v41  ;;  %2311 = vmatprep.subr.bf16.mxu1 %v4320_v32  ;;  %v3347_v41 = vld [vmem:[%s4619_s2 + $0xc] ss:$16 sps:$4 sm:$0xff]  }
 0x68a   : > { %2271 = vmatpush1.bf16.msra.mxu0 %v4323_v14  ;;  %2312 = vmatpush1.bf16.msra.mxu1 %v4326_v16 }
 0x68b   : > { %2272 = vmatprep.subr.bf16.mxu0 %v4329_v46  ;;  %2313 = vmatprep.subr.bf16.mxu1 %v4332_v13 }
 0x68e   : > { %2273 = vmatpush1.bf16.msra.mxu0 %v4335_v49  ;;  %2314 = vmatpush1.bf16.msra.mxu1 %v4817_v15 }
 0x68f   : > { %2274 = vmatprep.subr.bf16.mxu0 %v4341_v17  ;;  %2315 = vmatprep.subr.bf16.mxu1 %v4344_v9 }
 0x690   : > { %v3217_v33 = vpop.eup %3216 }
 0x691   : > { %v2129_v38 = vmul.f32 %v3217_v33, %v3215_v25  ;;  %v2137_v33 = vunpack.c.l.bf16 %v2883_v4 }
 0x692   : > { %2275 = vmatpush1.bf16.msra.mxu0 %v4347_v47  ;;  %2316 = vmatpush1.bf16.msra.mxu1 %v4350_v54 }
 0x693   : > { %2881 = vst [vmem:[%s3508_s6 + $0x10] sm:$0xff] %v2129_v38  ;;  %v2259_v36 = vpack.c.bf16 %v2129_v38, %v2129_v38  ;;  %2380 = vmatprep.subr.bf16.mxu0 %v3346_v51  ;;  %2421 = vmatprep.subr.bf16.mxu1 %v3347_v41  ;;  %v2138_v38 = vunpack.c.h.bf16 %v2883_v4 }
 0x695   : > { %2293 = vmatmul.mubr.bf16.vlgmr.msra.gmra.mrb[52].mxu0 %v2259_v36  ;;  %2334 = vmatmul.mubr.bf16.vlgmr.msra.gmra.mrb[52].mxu1 %v2259_v36 }
 0x696   : > { %2381 = vmatpush1.bf16.msra.mxu0 %v3348_v0  ;;  %2422 = vmatpush1.bf16.msra.mxu1 %v3349_v53 }
 0x697   : > { %2382 = vmatprep.subr.bf16.mxu0 %v3350_v6  ;;  %2423 = vmatprep.subr.bf16.mxu1 %v4125_v3  ;;  %v3353_v3 = vld [vmem:[%s4619_s2 + $0x40] ss:$16 sps:$4 sm:$0xff]  }
 0x698   : > { %2412 = vmatprep.mubr.bf16.mxu0 %v4747_v61  ;;  %2453 = vmatprep.mubr.bf16.mxu1 %v4747_v61 }
 0x69a   : > { %2383 = vmatpush1.bf16.msra.mxu0 %v3351_v45  ;;  %2424 = vmatpush1.bf16.msra.mxu1 %v4134_v56  ;;  %v4841_v56 = vld [vmem:[#allocation16_spill] sm:$0xff] }
 0x69b   : > { %2384 = vmatprep.subr.bf16.mxu0 %v3352_v12  ;;  %2425 = vmatprep.subr.bf16.mxu1 %v4141_v60  ;;  %v4842_v60 = vld [vmem:[#allocation11_spill] sm:$0xff] }
 0x69e   : > { %2385 = vmatpush1.bf16.msra.mxu0 %v3353_v3  ;;  %2426 = vmatpush1.bf16.msra.mxu1 %v4818_v52  ;;  %v4843_v52 = vld [vmem:[#allocation17_spill] sm:$0xff]  ;;  %v2888_v3 = vld [vmem:[%s3498_s24 + $0x10] sm:$0xff] }
 0x69f   : > { %2386 = vmatprep.subr.bf16.mxu0 %v3354_v8  ;;  %2427 = vmatprep.subr.bf16.mxu1 %v4820_v27  ;;  %v4845_v27 = vld [vmem:[#allocation20_spill] sm:$0xff] }
 0x6a2   : > { %2387 = vmatpush1.bf16.msra.mxu0 %v4821_v20  ;;  %2428 = vmatpush1.bf16.msra.mxu1 %v4822_v19  ;;  %v4846_v20 = vld [vmem:[#allocation15_spill] sm:$0xff]  ;;  %v4847_v19 = vld [vmem:[#allocation21_spill] sm:$0xff] }
 0x6a3   : > { %2388 = vmatprep.subr.bf16.mxu0 %v4823_v59  ;;  %2429 = vmatprep.subr.bf16.mxu1 %v4824_v26  ;;  %v4848_v59 = vld [vmem:[#allocation18_spill] sm:$0xff]  ;;  %v4849_v26 = vld [vmem:[#allocation24_spill] sm:$0xff] }
 0x6a6   : > { %2389 = vmatpush1.bf16.msra.mxu0 %v4825_v63  ;;  %2430 = vmatpush1.bf16.msra.mxu1 %v4841_v56  ;;  %v4850_v63 = vld [vmem:[#allocation19_spill] sm:$0xff] }
 0x6a7   : > { %2390 = vmatprep.subr.bf16.mxu0 %v4842_v60  ;;  %2431 = vmatprep.subr.bf16.mxu1 %v4843_v52  ;;  %v2255_v52 = vunpack.c.l.bf16 %v2888_v3 }
 0x6aa   : > { %2391 = vmatpush1.bf16.msra.mxu0 %v4844_v40  ;;  %2432 = vmatpush1.bf16.msra.mxu1 %v4845_v27 }
 0x6ab   : > { %2392 = vmatprep.subr.bf16.mxu0 %v4846_v20  ;;  %2433 = vmatprep.subr.bf16.mxu1 %v4847_v19  ;;  %v2256_v20 = vunpack.c.h.bf16 %v2888_v3  ;;  %v3361_v3 = vld [vmem:[#allocation6 + $0x40] ss:$16 sps:$4 sm:$0xff]  }
 0x6ae   : > { %2393 = vmatpush1.bf16.msra.mxu0 %v4848_v59  ;;  %2434 = vmatpush1.bf16.msra.mxu1 %v4849_v26 }
 0x6af   : > { %2394 = vmatprep.subr.bf16.mxu0 %v4850_v63  ;;  %2435 = vmatprep.subr.bf16.mxu1 %v4851_v44 }
 0x6b2   : > { %2395 = vmatpush1.bf16.msra.mxu0 %v4852_v43  ;;  %2436 = vmatpush1.bf16.msra.mxu1 %v4853_v62 }
 0x6b3   : > { %2499 = vmatprep.subr.bf16.mxu0 %v4854_v22  ;;  %2540 = vmatprep.subr.bf16.mxu1 %v4855_v7  ;;  %v2889_v22 = vld [vmem:[%s3498_s24 + $0x18] sm:$0xff] }
 0x748   : > { %v2174_v29 = vpop.f32.mrb[48].mxu0  ;;  %v2215_v35 = vpop.f32.mrb[48].mxu1 }
 0x749   : > { %v2222_v24 = vadd.f32 %v2174_v29, %v2135_v37  ;;  %v2176_v11 = vpop.f32.mrb[49].mxu0  ;;  %v2217_v21 = vpop.f32.mrb[49].mxu1  ;;  %v2224_v36 = vadd.f32 %v2215_v35, %v2137_v33 }
 0x74a   : > { %v2223_v34 = vadd.f32 %v2176_v11, %v2136_v42  ;;  %v2178_v5 = vpop.f32.mrb[50].mxu0  ;;  %v2219_v10 = vpop.f32.mrb[50].mxu1  ;;  %v2225_v51 = vadd.f32 %v2217_v21, %v2138_v38  ;;  %v2258_v11 = vunpack.c.h.bf16 %v2889_v22 }
 0x74b   : > { %v2884_v23 = vmul.f32 -1.442695, %v2222_v24  ;;  %v2179_v57 = vpop.f32.mrb[51].mxu0  ;;  %v2220_v2 = vpop.f32.mrb[51].mxu1  ;;  %v2886_v41 = vmul.f32 -1.442695, %v2224_v36 }
 0x74c   : > { %v2885_v25 = vmul.f32 -1.442695, %v2223_v34  ;;  %v3355_v36 = vld [vmem:[#allocation6] ss:$16 sps:$4 sm:$0xff]  }
 0x74d   : > { %3218 = vpow2.f32 %v2884_v23 }
 0x74e   : > { %3220 = vpow2.f32 %v2885_v25 }
 0x74f   : > { %3222 = vtanh.f32 %v2225_v51  ;;  %v3356_v51 = vld [vmem:[#allocation6 + $0x8] ss:$16 sps:$4 sm:$0xff]  }
 0x750   : > { %3224 = vpow2.f32 %v2886_v41  ;;  %v3357_v41 = vld [vmem:[#allocation6 + $0x24] ss:$16 sps:$4 sm:$0xff]  }
 0x757   : > { %v3219_v0 = vpop.eup %3218 }
 0x758   : > { %v2235_v53 = vadd.f32 1.0, %v3219_v0  ;;  %v3221_v6 = vpop.eup %3220  ;;  %v3358_v0 = vld [vmem:[#allocation6 + $0x2c] ss:$16 sps:$4 sm:$0xff]  }
 0x759   : > { %v2236_v45 = vadd.f32 1.0, %v3221_v6  ;;  %v3223_v12 = vpop.eup %3222  ;;  %v3360_v6 = vld [vmem:[#allocation6 + $0x44] ss:$16 sps:$4 sm:$0xff]  }
 0x75a   : > { %3226 = vrcp.f32 %v2235_v53  ;;  %v3225_v8 = vpop.eup %3224  ;;  %v3359_v53 = vld [vmem:[#allocation6 + $0x20] ss:$16 sps:$4 sm:$0xff]  }
 0x75b   : > { %3228 = vrcp.f32 %v2236_v45  ;;  %v2237_v27 = vadd.f32 1.0, %v3225_v8 }
 0x75d   : > { %3230 = vrcp.f32 %v2237_v27 }
 0x764   : > { %v3227_v56 = vpop.eup %3226 }
 0x765   : > { %v2246_v60 = vmul.f32 %v3227_v56, %v3223_v12  ;;  %v3229_v40 = vpop.eup %3228  ;;  %v3362_v56 = vld [vmem:[#allocation6 + $0x64] ss:$16 sps:$4 sm:$0xff]  }
 0x766   : > { %v2245_v19 = vmul.f32 %v3229_v40, %v4476_v28  ;;  %v2257_v28 = vunpack.c.l.bf16 %v2889_v22  ;;  %v3363_v40 = vld [vmem:[#allocation6 + $0x60] ss:$16 sps:$4 sm:$0xff]  }
 0x767   : > { %v3231_v4 = vpop.eup %3230 }
 0x768   : > { %v2294_v59 = vpop.f32.mrb[52].mxu0  ;;  %v2335_v26 = vpop.f32.mrb[52].mxu1  ;;  %v4576_v63 = vadd.f32 %v2246_v60, %v2245_v19 }
 0x769   : > { %v2342_v44 = vadd.f32 %v2294_v59, %v2255_v52  ;;  %v2296_v43 = vpop.f32.mrb[53].mxu0  ;;  %v2337_v62 = vpop.f32.mrb[53].mxu1  ;;  %v2344_v21 = vadd.f32 %v2335_v26, %v2257_v28  ;;  %v2492_v28 = vld [vmem:[%s3498_s24] sm:$0xff] }
 0x76a   : > { %v2343_v7 = vadd.f32 %v2296_v43, %v2256_v20  ;;  %v2298_v30 = vpop.f32.mrb[54].mxu0  ;;  %v2339_v37 = vpop.f32.mrb[54].mxu1  ;;  %3232 = vtanh.f32 %v4576_v63  ;;  %v2345_v34 = vadd.f32 %v2337_v62, %v2258_v11 }
 0x76b   : > { %v2890_v42 = vmul.f32 -1.442695, %v2342_v44  ;;  %v2299_v29 = vpop.f32.mrb[55].mxu0  ;;  %v2340_v35 = vpop.f32.mrb[55].mxu1  ;;  %v2892_v10 = vmul.f32 -1.442695, %v2344_v21 }
 0x76c   : > { %v2891_v24 = vmul.f32 -1.442695, %v2343_v7 }
 0x76d   : > { %3234 = vpow2.f32 %v2890_v42 }
 0x76e   : > { %3236 = vpow2.f32 %v2891_v24 }
 0x76f   : > { %3238 = vtanh.f32 %v2345_v34  ;;  %v2494_v34 = vunpack.c.l.bf16 %v2492_v28 }
 0x770   : > { %3240 = vpow2.f32 %v2892_v10 }
 0x774   : > { %v3233_v5 = vpop.eup %3232 }
 0x775   : > { %v2249_v23 = vmul.f32 %v3233_v5, %v3231_v4 }
 0x777   : > { %v3235_v57 = vpop.eup %3234  ;;  %2887 = vst [vmem:[%s3503_s27 + $0x30] sm:$0xff] %v2249_v23  ;;  %v2379_v25 = vpack.c.bf16 %v2249_v23, %v2249_v23  ;;  %v2495_v23 = vunpack.c.h.bf16 %v2492_v28 }
 0x778   : > { %v2355_v2 = vadd.f32 1.0, %v3235_v57  ;;  %v3237_v33 = vpop.eup %3236 }
 0x779   : > { %v2356_v38 = vadd.f32 1.0, %v3237_v33  ;;  %2413 = vmatmul.mubr.bf16.vlgmr.msra.gmra.mrb[56].mxu0 %v2379_v25  ;;  %2454 = vmatmul.mubr.bf16.vlgmr.msra.gmra.mrb[56].mxu1 %v2379_v25  ;;  %v3239_v45 = vpop.eup %3238 }
 0x77a   : > { %3242 = vrcp.f32 %v2355_v2  ;;  %2500 = vmatpush1.bf16.msra.mxu0 %v3355_v36  ;;  %2541 = vmatpush1.bf16.msra.mxu1 %v3356_v51  ;;  %v3241_v12 = vpop.eup %3240 }
 0x77b   : > { %3244 = vrcp.f32 %v2356_v38  ;;  %2501 = vmatprep.subr.bf16.mxu0 %v3357_v41  ;;  %2542 = vmatprep.subr.bf16.mxu1 %v3358_v0  ;;  %v2357_v52 = vadd.f32 1.0, %v3241_v12  ;;  %v2493_v41 = vld [vmem:[%s3498_s24 + $0x8] sm:$0xff] }
 0x77c   : > { %2531 = vmatprep.mubr.bf16.mxu0 %v4747_v61  ;;  %2572 = vmatprep.mubr.bf16.mxu1 %v4747_v61 }
 0x77d   : > { %3246 = vrcp.f32 %v2357_v52 }
 0x77e   : > { %2502 = vmatpush1.bf16.msra.mxu0 %v3359_v53  ;;  %2543 = vmatpush1.bf16.msra.mxu1 %v4288_v48 }
 0x77f   : > { %2503 = vmatprep.subr.bf16.mxu0 %v3360_v6  ;;  %2544 = vmatprep.subr.bf16.mxu1 %v4292_v58  ;;  %v3364_v58 = vld [vmem:[#allocation6 + $0x84] ss:$16 sps:$4 sm:$0xff]  }
 0x782   : > { %2504 = vmatpush1.bf16.msra.mxu0 %v3361_v3  ;;  %2545 = vmatpush1.bf16.msra.mxu1 %v4296_v1  ;;  %v3365_v1 = vld [vmem:[#allocation6 + $0x80] ss:$16 sps:$4 sm:$0xff]  }
 0x783   : > { %2505 = vmatprep.subr.bf16.mxu0 %v3362_v56  ;;  %2546 = vmatprep.subr.bf16.mxu1 %v4300_v39  ;;  %v3366_v39 = vld [vmem:[#allocation6 + $0xa4] ss:$16 sps:$4 sm:$0xff]   ;;  %v2497_v56 = vunpack.c.h.bf16 %v2493_v41 }
 0x784   : > { %v3243_v8 = vpop.eup %3242 }
 0x785   : > { %v2366_v61 = vmul.f32 %v3243_v8, %v3239_v45  ;;  %v3245_v60 = vpop.eup %3244 }
 0x786   : > { %v2365_v48 = vmul.f32 %v3245_v60, %v4500_v31  ;;  %2506 = vmatpush1.bf16.msra.mxu0 %v3363_v40  ;;  %2547 = vmatpush1.bf16.msra.mxu1 %v4305_v55 }
 0x787   : > { %2507 = vmatprep.subr.bf16.mxu0 %v3364_v58  ;;  %2548 = vmatprep.subr.bf16.mxu1 %v4309_v18  ;;  %v3247_v55 = vpop.eup %3246 }
 0x788   : > { %v4590_v27 = vadd.f32 %v2366_v61, %v2365_v48 }
 0x78a   : > { %3248 = vtanh.f32 %v4590_v27  ;;  %2508 = vmatpush1.bf16.msra.mxu0 %v3365_v1  ;;  %2549 = vmatpush1.bf16.msra.mxu1 %v4316_v50 }
 0x78b   : > { %2509 = vmatprep.subr.bf16.mxu0 %v3366_v39  ;;  %2550 = vmatprep.subr.bf16.mxu1 %v4320_v32 }
 0x78e   : > { %2510 = vmatpush1.bf16.msra.mxu0 %v4323_v14  ;;  %2551 = vmatpush1.bf16.msra.mxu1 %v4326_v16  ;;  %v2894_v14 = vld [vmem:[%s3493_s20 + $0x70] sm:$0xff] }
 0x78f   : > { %2511 = vmatprep.subr.bf16.mxu0 %v4329_v46  ;;  %2552 = vmatprep.subr.bf16.mxu1 %v4332_v13  ;;  %v2375_v16 = vunpack.c.l.bf16 %v2894_v14  ;;  %v2376_v46 = vunpack.c.h.bf16 %v2894_v14 }
 0x792   : > { %2512 = vmatpush1.bf16.msra.mxu0 %v4335_v49  ;;  %2553 = vmatpush1.bf16.msra.mxu1 %v4817_v15 }
 0x793   : > { %2513 = vmatprep.subr.bf16.mxu0 %v4341_v17  ;;  %2554 = vmatprep.subr.bf16.mxu1 %v4344_v9  ;;  %v2895_v9 = vld [vmem:[%s3493_s20 + $0x78] sm:$0xff] }
 0x794   : > { %v3249_v18 = vpop.eup %3248  ;;  %v2377_v43 = vunpack.c.l.bf16 %v2895_v9  ;;  %v2378_v62 = vunpack.c.h.bf16 %v2895_v9 }
 0x795   : > { %v2369_v50 = vmul.f32 %v3249_v18, %v3247_v55 }
 0x796   : > { %2514 = vmatpush1.bf16.msra.mxu0 %v4347_v47  ;;  %2555 = vmatpush1.bf16.msra.mxu1 %v4350_v54 }
 0x797   : > { %2893 = vst [vmem:[%s3508_s6 + $0x8] sm:$0xff] %v2369_v50  ;;  %v2498_v32 = vpack.c.bf16 %v2369_v50, %v2369_v50 }
 0x799   : > { %2532 = vmatmul.mubr.bf16.vlgmr.msra.gmra.mrb[60].mxu0 %v2498_v32  ;;  %2573 = vmatmul.mubr.bf16.vlgmr.msra.gmra.mrb[60].mxu1 %v2498_v32 }
 0x84c   : > { %v2414_v13 = vpop.f32.mrb[56].mxu0  ;;  %v2455_v49 = vpop.f32.mrb[56].mxu1 }
 0x84d   : > { %v2462_v15 = vadd.f32 %v2414_v13, %v2375_v16  ;;  %v2416_v17 = vpop.f32.mrb[57].mxu0  ;;  %v2457_v31 = vpop.f32.mrb[57].mxu1  ;;  %v2464_v22 = vadd.f32 %v2455_v49, %v2377_v43 }
 0x84e   : > { %v2463_v20 = vadd.f32 %v2416_v17, %v2376_v46  ;;  %v2418_v19 = vpop.f32.mrb[58].mxu0  ;;  %v2459_v59 = vpop.f32.mrb[58].mxu1  ;;  %v2465_v7 = vadd.f32 %v2457_v31, %v2378_v62 }
 0x84f   : > { %v2896_v26 = vmul.f32 -1.442695, %v2462_v15  ;;  %v2419_v47 = vpop.f32.mrb[59].mxu0  ;;  %v2460_v44 = vpop.f32.mrb[59].mxu1  ;;  %v2898_v30 = vmul.f32 -1.442695, %v2464_v22 }
 0x850   : > { %v2897_v54 = vmul.f32 -1.442695, %v2463_v20 }
 0x851   : > { %3250 = vpow2.f32 %v2896_v26 }
 0x852   : > { %3252 = vpow2.f32 %v2897_v54 }
 0x853   : > { %3254 = vtanh.f32 %v2465_v7 }
 0x854   : > { %3256 = vpow2.f32 %v2898_v30 }
 0x85b   : > { %v3251_v37 = vpop.eup %3250 }
 0x85c   : > { %v2475_v42 = vadd.f32 1.0, %v3251_v37  ;;  %v3253_v29 = vpop.eup %3252 }
 0x85d   : > { %v2476_v35 = vadd.f32 1.0, %v3253_v29  ;;  %v3255_v24 = vpop.eup %3254 }
 0x85e   : > { %3258 = vrcp.f32 %v2475_v42  ;;  %v3257_v11 = vpop.eup %3256 }
 0x85f   : > { %3260 = vrcp.f32 %v2476_v35  ;;  %v2477_v10 = vadd.f32 1.0, %v3257_v11 }
 0x861   : > { %3262 = vrcp.f32 %v2477_v10 }
 0x868   : > { %v3259_v21 = vpop.eup %3258 }
 0x869   : > { %v2486_v4 = vmul.f32 %v3259_v21, %v3255_v24  ;;  %v3261_v5 = vpop.eup %3260 }
 0x86a   : > { %v2485_v57 = vmul.f32 %v3261_v5, %v4576_v63  ;;  %v2496_v63 = vunpack.c.l.bf16 %v2493_v41 }
 0x86b   : > { %v3263_v60 = vpop.eup %3262 }
 0x86c   : > { %v2533_v2 = vpop.f32.mrb[60].mxu0  ;;  %v2574_v25 = vpop.f32.mrb[60].mxu1  ;;  %v2487_v33 = vadd.f32 %v2486_v4, %v2485_v57 }
 0x86d   : > { %v2581_v38 = vadd.f32 %v2533_v2, %v2494_v34  ;;  %v2535_v36 = vpop.f32.mrb[61].mxu0  ;;  %v2576_v51 = vpop.f32.mrb[61].mxu1  ;;  %v2583_v61 = vadd.f32 %v2574_v25, %v2496_v63 }
 0x86e   : > { %v2582_v0 = vadd.f32 %v2535_v36, %v2495_v23  ;;  %v2537_v53 = vpop.f32.mrb[62].mxu0  ;;  %v2578_v6 = vpop.f32.mrb[62].mxu1  ;;  %3264 = vtanh.f32 %v2487_v33  ;;  %2611 = vst [vmem:[#allocation3] sm:$0xff] %v2487_v33  ;;  %v2584_v52 = vadd.f32 %v2576_v51, %v2497_v56 }
 0x86f   : > { %v2900_v45 = vmul.f32 -1.442695, %v2581_v38  ;;  %v2538_v12 = vpop.f32.mrb[63].mxu0  ;;  %v2579_v3 = vpop.f32.mrb[63].mxu1  ;;  %v2902_v40 = vmul.f32 -1.442695, %v2583_v61 }
 0x870   : > { %v2901_v8 = vmul.f32 -1.442695, %v2582_v0 }
 0x871   : > { %3266 = vpow2.f32 %v2900_v45 }
 0x872   : > { %3268 = vpow2.f32 %v2901_v8 }
 0x873   : > { %3270 = vtanh.f32 %v2584_v52 }
 0x874   : > { %3272 = vpow2.f32 %v2902_v40 }
 0x878   : > { %v3265_v48 = vpop.eup %3264 }
 0x879   : > { %v2489_v58 = vmul.f32 %v3265_v48, %v3263_v60 }
 0x87b   : > { %v3267_v1 = vpop.eup %3266  ;;  %2899 = vst [vmem:[%s3503_s27 + $0x38] sm:$0xff] %v2489_v58  ;;  %2610 = vst [vmem:[#allocation2] sm:$0xff] %v2489_v58 }
 0x87c   : > { %v2594_v39 = vadd.f32 1.0, %v3267_v1  ;;  %v3269_v55 = vpop.eup %3268 }
 0x87d   : > { %v2595_v18 = vadd.f32 1.0, %v3269_v55  ;;  %v3271_v50 = vpop.eup %3270 }
 0x87e   : > { %3274 = vrcp.f32 %v2594_v39  ;;  %v3273_v32 = vpop.eup %3272 }
 0x87f   : > { %3276 = vrcp.f32 %v2595_v18  ;;  %v2596_v13 = vadd.f32 1.0, %v3273_v32 }
 0x881   : > { %3278 = vrcp.f32 %v2596_v13 }
 0x888   : > { %v3275_v14 = vpop.eup %3274 }
 0x889   : > { %v2605_v16 = vmul.f32 %v3275_v14, %v3271_v50  ;;  %v3277_v46 = vpop.eup %3276 }
 0x88a   : > { %v2604_v49 = vmul.f32 %v3277_v46, %v4590_v27 }
 0x88b   : > { %v3279_v17 = vpop.eup %3278 }
 0x88c   : > { %v2606_v15 = vadd.f32 %v2605_v16, %v2604_v49 }
 0x88e   : > { %3280 = vtanh.f32 %v2606_v15  ;;  %2613 = vst [vmem:[#allocation5] sm:$0xff] %v2606_v15 }
 0x898   : > { %v3281_v31 = vpop.eup %3280 }
 0x899   : > { %v2608_v9 = vmul.f32 %v3281_v31, %v3279_v17 }
 0x89b   : > { %2609 = vst [vmem:[%s3508_s6] sm:$0xff] %v2608_v9  ;;  %2612 = vst [vmem:[#allocation4] sm:$0xff] %v2608_v9 }
 0x89c PF: > { %s17_s18 = sadd.s32 1, %s3405_s18  }
 0x89d   : > { %p14_p6 = scmp.ge.s32.totalorder %s17_s18, 4  }
 0x89f   :  { %16 = sbr.rel (!%p14_p6) target bundleno = 1 (0x1), region = 118 }
 0x8a6   :  { %2656 = vsyncpa [#allocation7], 1 }
 0x8a7   :  { %2658 = vsyncpa [#allocation7 + $0x1], 1 }

// kernel: rnn_encoder_forward.3
= control target key start
LH: loop header
LB: loop body
LE: loop exit
PB: predicated region body
PF: predicated region fallthrough
CT: control target
= control target key end

     0   :  { %s3458_s24 = smov 0   ;;  %s4873_s0 = inlined_call_operand.vmem [shape: bf16[16,8,512], index: 0, kind: input, shape index: {}]   ;;  %s4874_s1 = inlined_call_operand.vmem [shape: bf16[16,8,512], index: 1, kind: input, shape index: {}]   ;;  %s4875_s2 = inlined_call_operand.vmem [shape: bf16[128,512], index: 2, kind: input, shape index: {}]   ;;  %s4876_s3 = inlined_call_operand.vmem [shape: bf16[128,512], index: 3, kind: input, shape index: {}]   ;;  %s4877_s4 = inlined_call_operand.vmem [shape: f32[1,8,128], index: 4, kind: input, shape index: {}]   ;;  %s4878_s5 = inlined_call_operand.vmem [shape: f32[1,8,128], index: 5, kind: input, shape index: {}]   ;;  %s4879_s6 = inlined_call_operand.vmem [shape: f32[16,8,128], index: 6, kind: output, shape index: {0}]   ;;  %s4880_s7 = inlined_call_operand.vmem [shape: f32[16,8,128], index: 7, kind: output, shape index: {1}]  }
   0x1 LB: > { %s2776_s25 = sadd.s32 4294967295, %s3414_s24   ;;  %p2780_p0 = scmp.ge.s32.totalorder %s3414_s24, 1  ;;  %s3414_s24 = sphi %s3458_s24, %s18_s24  }
   0x2   : > { %p260_p1 = scmp.lt.s32.totalorder %s3414_s24, 3 }
   0x4   : > { %p261_p2 = pnand %p2780_p0, %p260_p1 }
   0x6   : > { %264 = sbr.rel (%p261_p2) target bundleno = 2175 (0x87f), region = 44 }
   0xd   : > { %s2781_s26 = sshll.u32 %s2776_s25, 3  ;;  %s313_s27 = ssub.s32 1, %s2776_s25 }
   0xe   : > { %p307_p3 = scmp.lt.s32.totalorder %s2781_s26, 15  ;;  %s2784_s28 = sshll.u32 %s313_s27, 3 }
   0xf   : > { %p315_p4 = scmp.lt.s32.totalorder %s2784_s28, 15  ;;  %p2791_p5 = scmp.ne.s32.totalorder %s2776_s25, 0 }
  0x10   : > { %s5103_s26 = smov (!%p307_p3, %s2781_s26), 15  ;;  %v3416_v0 = vmov (!%p2791_p5), 0.0  }
  0x11   : > { %s5105_s28 = smov (!%p315_p4, %s2784_s28), 15  ;;  %s2948_s29 = sshll.u32 %s5103_s26, 4  ;;  %341 = vst [vmem:[#allocation2] sm:$0xff] (!%p2791_p5), %v3416_v0  ;;  %342 = vst [vmem:[#allocation3] sm:$0xff] (!%p2791_p5), %v3416_v0 }
  0x12   : > { %s2788_s30 = sshll.u32 %s5103_s26, 3  ;;  %s3469_s10 = scalar_lea.vmem %s4873_s0, %s2948_s29  ;;  %343 = vst [vmem:[#allocation4] sm:$0xff] (!%p2791_p5), %v3416_v0  ;;  %344 = vst [vmem:[#allocation5] sm:$0xff] (!%p2791_p5), %v3416_v0 }
  0x13   : > { %s2949_s11 = sshll.u32 %s5105_s28, 4  ;;  %s3479_s17 = scalar_lea.vmem %s4879_s6, %s2788_s30 }
  0x14   : > { %s3474_s14 = scalar_lea.vmem %s4874_s1, %s2949_s11  ;;  %s2790_s18 = sshll.u32 %s5105_s28, 3 }
  0x15   : > { %s3484_s21 = scalar_lea.vmem %s4880_s7, %s2790_s18  ;;  %340 = sbr.rel (%p2791_p5) target bundleno = 28 (0x1c), region = 48 }
  0x1c PF: > { %v3489_v1 = vld [vmem:[%s4875_s2 + $0x4] ss:$16 sps:$4 sm:$0xff]   ;;  %v3494_v2 = vld [vmem:[%s4875_s2] ss:$16 sps:$4 sm:$0xff]   ;;  %v4881_v3 = vmov 0  }
  0x1d   : > { %614 = vmatprep.mubr.bf16.mxu0 %v4881_v3  ;;  %655 = vmatprep.mubr.bf16.mxu1 %v4881_v3  ;;  %v3502_v4 = vld [vmem:[%s4875_s2 + $0x24] ss:$16 sps:$4 sm:$0xff]   ;;  %v3508_v5 = vld [vmem:[%s4875_s2 + $0x20] ss:$16 sps:$4 sm:$0xff]   ;;  %v3519_v7 = vld [vmem:[%s4875_s2 + $0xc] ss:$16 sps:$4 sm:$0xff]  }
  0x1e   : > { %582 = vmatprep.subr.bf16.mxu0 %v3489_v1  ;;  %v3514_v6 = vld [vmem:[%s4875_s2 + $0x44] ss:$16 sps:$4 sm:$0xff]   ;;  %v3524_v8 = vld [vmem:[%s4875_s2 + $0x8] ss:$16 sps:$4 sm:$0xff]   ;;  %v3530_v9 = vld [vmem:[%s4875_s2 + $0x40] ss:$16 sps:$4 sm:$0xff]   ;;  %623 = vmatprep.subr.bf16.mxu1 %v3519_v7 }
  0x1f   : > { %583 = vmatpush1.bf16.msra.mxu0 %v3494_v2  ;;  %v3537_v10 = vld [vmem:[%s4875_s2 + $0x64] ss:$16 sps:$4 sm:$0xff]   ;;  %624 = vmatpush1.bf16.msra.mxu1 %v3524_v8  ;;  %v3543_v11 = vld [vmem:[%s4875_s2 + $0x2c] ss:$16 sps:$4 sm:$0xff]   ;;  %v3548_v12 = vld [vmem:[%s4875_s2 + $0x28] ss:$16 sps:$4 sm:$0xff]  }
  0x20   : > { %584 = vmatprep.subr.bf16.mxu0 %v3502_v4  ;;  %625 = vmatprep.subr.bf16.mxu1 %v3543_v11  ;;  %v3555_v13 = vld [vmem:[%s4875_s2 + $0x60] ss:$16 sps:$4 sm:$0xff]   ;;  %v3560_v14 = vld [vmem:[%s4875_s2 + $0x84] ss:$16 sps:$4 sm:$0xff]   ;;  %v3565_v15 = vld [vmem:[%s4875_s2 + $0x4c] ss:$16 sps:$4 sm:$0xff]  }
  0x21   : > { %4970 = vst [vmem:[#allocation6_spill] sm:$0xff] %v3560_v14  ;;  %v3572_v16 = vld [vmem:[%s4875_s2 + $0x48] ss:$16 sps:$4 sm:$0xff]   ;;  %v3578_v17 = vld [vmem:[%s4875_s2 + $0x6c] ss:$16 sps:$4 sm:$0xff]   ;;  %v411_v31 = vld [vmem:[#allocation2] sm:$0xff] }
  0x22   : > { %v3584_v18 = vld [vmem:[%s4875_s2 + $0x80] ss:$16 sps:$4 sm:$0xff]   ;;  %v3590_v19 = vld [vmem:[%s4875_s2 + $0xa4] ss:$16 sps:$4 sm:$0xff]   ;;  %v3596_v20 = vld [vmem:[%s4875_s2 + $0x68] ss:$16 sps:$4 sm:$0xff]   ;;  %v421_v35 = vpack.c.bf16 %v411_v31, %v411_v31 }
  0x23   : > { %585 = vmatpush1.bf16.msra.mxu0 %v3508_v5  ;;  %626 = vmatpush1.bf16.msra.mxu1 %v3548_v12  ;;  %4971 = vst [vmem:[#allocation7_spill] sm:$0xff] %v3584_v18  ;;  %4972 = vst [vmem:[#allocation8_spill] sm:$0xff] %v3590_v19  ;;  %v3602_v21 = vld [vmem:[%s4875_s2 + $0x8c] ss:$16 sps:$4 sm:$0xff]   ;;  %v3608_v22 = vld [vmem:[%s4875_s2 + $0xa0] ss:$16 sps:$4 sm:$0xff]  }
  0x24   : > { %586 = vmatprep.subr.bf16.mxu0 %v3514_v6  ;;  %627 = vmatprep.subr.bf16.mxu1 %v3565_v15  ;;  %4973 = vst [vmem:[#allocation9_spill] sm:$0xff] %v3596_v20  ;;  %4974 = vst [vmem:[#allocation10_spill] sm:$0xff] %v3602_v21  ;;  %v3613_v23 = vld [vmem:[%s4875_s2 + $0xc4] ss:$16 sps:$4 sm:$0xff]   ;;  %v3620_v24 = vld [vmem:[%s4875_s2 + $0x88] ss:$16 sps:$4 sm:$0xff]  }
  0x25   : > { %4975 = vst [vmem:[#allocation11_spill] sm:$0xff] %v3608_v22  ;;  %4976 = vst [vmem:[#allocation12_spill] sm:$0xff] %v3613_v23  ;;  %v3626_v25 = vld [vmem:[%s4875_s2 + $0xac] ss:$16 sps:$4 sm:$0xff]   ;;  %v3631_v26 = vld [vmem:[%s4875_s2 + $0xc0] ss:$16 sps:$4 sm:$0xff]  }
  0x26   : > { %4977 = vst [vmem:[#allocation13_spill] sm:$0xff] %v3620_v24  ;;  %4978 = vst [vmem:[#allocation14_spill] sm:$0xff] %v3626_v25  ;;  %v3637_v27 = vld [vmem:[%s4875_s2 + $0xe4] ss:$16 sps:$4 sm:$0xff]   ;;  %v3644_v28 = vld [vmem:[%s4875_s2 + $0xa8] ss:$16 sps:$4 sm:$0xff]  }
  0x27   : > { %587 = vmatpush1.bf16.msra.mxu0 %v3530_v9  ;;  %628 = vmatpush1.bf16.msra.mxu1 %v3572_v16  ;;  %4979 = vst [vmem:[#allocation15_spill] sm:$0xff] %v3631_v26  ;;  %4980 = vst [vmem:[#allocation16_spill] sm:$0xff] %v3637_v27  ;;  %v3650_v29 = vld [vmem:[%s4875_s2 + $0xcc] ss:$16 sps:$4 sm:$0xff]   ;;  %v3655_v30 = vld [vmem:[%s4875_s2 + $0xe0] ss:$16 sps:$4 sm:$0xff]  }
  0x28   : > { %588 = vmatprep.subr.bf16.mxu0 %v3537_v10  ;;  %629 = vmatprep.subr.bf16.mxu1 %v3578_v17  ;;  %4981 = vst [vmem:[#allocation17_spill] sm:$0xff] %v3644_v28  ;;  %4982 = vst [vmem:[#allocation18_spill] sm:$0xff] %v3650_v29  ;;  %v3661_v32 = vld [vmem:[%s4876_s3 + $0x4] ss:$16 sps:$4 sm:$0xff]   ;;  %v3668_v33 = vld [vmem:[%s4875_s2 + $0xc8] ss:$16 sps:$4 sm:$0xff]  }
  0x29   : > { %4983 = vst [vmem:[#allocation19_spill] sm:$0xff] %v3655_v30  ;;  %4984 = vst [vmem:[#allocation20_spill] sm:$0xff] %v3661_v32  ;;  %v3674_v34 = vld [vmem:[%s4875_s2 + $0xec] ss:$16 sps:$4 sm:$0xff]   ;;  %v3679_v36 = vld [vmem:[%s4876_s3] ss:$16 sps:$4 sm:$0xff]  }
  0x2a   : > { %4985 = vst [vmem:[#allocation21_spill] sm:$0xff] %v3668_v33  ;;  %4986 = vst [vmem:[#allocation22_spill] sm:$0xff] %v3674_v34  ;;  %v3685_v37 = vld [vmem:[%s4876_s3 + $0x24] ss:$16 sps:$4 sm:$0xff]   ;;  %v3692_v38 = vld [vmem:[%s4875_s2 + $0xe8] ss:$16 sps:$4 sm:$0xff]  }
  0x2b   : > { %589 = vmatpush1.bf16.msra.mxu0 %v3555_v13  ;;  %630 = vmatpush1.bf16.msra.mxu1 %v3596_v20  ;;  %4987 = vst [vmem:[#allocation23_spill] sm:$0xff] %v3692_v38  ;;  %v3698_v39 = vld [vmem:[%s4876_s3 + $0xc] ss:$16 sps:$4 sm:$0xff]   ;;  %v3704_v40 = vld [vmem:[%s4876_s3 + $0x20] ss:$16 sps:$4 sm:$0xff]  }
  0x2c   : > { %590 = vmatprep.subr.bf16.mxu0 %v3560_v14  ;;  %631 = vmatprep.subr.bf16.mxu1 %v3602_v21  ;;  %4988 = vst [vmem:[#allocation24_spill] sm:$0xff] %v3698_v39  ;;  %v3709_v41 = vld [vmem:[%s4876_s3 + $0x44] ss:$16 sps:$4 sm:$0xff]   ;;  %v3717_v42 = vld [vmem:[%s4876_s3 + $0x8] ss:$16 sps:$4 sm:$0xff]  }
  0x2d   : > { %v3723_v43 = vld [vmem:[%s4876_s3 + $0x2c] ss:$16 sps:$4 sm:$0xff]   ;;  %v3729_v44 = vld [vmem:[%s4876_s3 + $0x40] ss:$16 sps:$4 sm:$0xff]   ;;  %v3735_v45 = vld [vmem:[%s4876_s3 + $0x64] ss:$16 sps:$4 sm:$0xff]  }
  0x2e   : > { %v3741_v46 = vld [vmem:[%s4876_s3 + $0x28] ss:$16 sps:$4 sm:$0xff]   ;;  %v3747_v47 = vld [vmem:[%s4876_s3 + $0x4c] ss:$16 sps:$4 sm:$0xff]   ;;  %v3754_v48 = vld [vmem:[%s4876_s3 + $0x60] ss:$16 sps:$4 sm:$0xff]  }
  0x2f   : > { %591 = vmatpush1.bf16.msra.mxu0 %v3584_v18  ;;  %632 = vmatpush1.bf16.msra.mxu1 %v3620_v24  ;;  %v3760_v49 = vld [vmem:[%s4876_s3 + $0x84] ss:$16 sps:$4 sm:$0xff]   ;;  %v3766_v50 = vld [vmem:[%s4876_s3 + $0x48] ss:$16 sps:$4 sm:$0xff]   ;;  %v3772_v51 = vld [vmem:[%s4876_s3 + $0x6c] ss:$16 sps:$4 sm:$0xff]  }
  0x30   : > { %592 = vmatprep.subr.bf16.mxu0 %v3590_v19  ;;  %633 = vmatprep.subr.bf16.mxu1 %v3626_v25  ;;  %v3778_v52 = vld [vmem:[%s4876_s3 + $0x80] ss:$16 sps:$4 sm:$0xff]   ;;  %v3784_v53 = vld [vmem:[%s4876_s3 + $0xa4] ss:$16 sps:$4 sm:$0xff]   ;;  %v3790_v54 = vld [vmem:[%s4876_s3 + $0x68] ss:$16 sps:$4 sm:$0xff]  }
  0x31   : > { %v3796_v55 = vld [vmem:[%s4876_s3 + $0x8c] ss:$16 sps:$4 sm:$0xff]   ;;  %v3802_v56 = vld [vmem:[%s4876_s3 + $0xa0] ss:$16 sps:$4 sm:$0xff]   ;;  %v3808_v57 = vld [vmem:[%s4876_s3 + $0xc4] ss:$16 sps:$4 sm:$0xff]  }
  0x32   : > { %v3814_v58 = vld [vmem:[%s4876_s3 + $0x88] ss:$16 sps:$4 sm:$0xff]   ;;  %v3820_v59 = vld [vmem:[%s4876_s3 + $0xac] ss:$16 sps:$4 sm:$0xff]   ;;  %v3826_v60 = vld [vmem:[%s4876_s3 + $0xc0] ss:$16 sps:$4 sm:$0xff]  }
  0x33   : > { %593 = vmatpush1.bf16.msra.mxu0 %v3608_v22  ;;  %634 = vmatpush1.bf16.msra.mxu1 %v3644_v28  ;;  %4989 = vst [vmem:[#allocation25_spill] sm:$0xff] %v3826_v60  ;;  %v3832_v61 = vld [vmem:[%s4876_s3 + $0xe4] ss:$16 sps:$4 sm:$0xff]   ;;  %v3838_v62 = vld [vmem:[%s4876_s3 + $0xa8] ss:$16 sps:$4 sm:$0xff]  }
  0x34   : > { %594 = vmatprep.subr.bf16.mxu0 %v3613_v23  ;;  %635 = vmatprep.subr.bf16.mxu1 %v3650_v29  ;;  %4990 = vst [vmem:[#allocation26_spill] sm:$0xff] %v3832_v61  ;;  %v3844_v63 = vld [vmem:[%s4876_s3 + $0xcc] ss:$16 sps:$4 sm:$0xff]   ;;  %v3850_v0 = vld [vmem:[%s4876_s3 + $0xe0] ss:$16 sps:$4 sm:$0xff]  }
  0x35   : > { %4991 = vst [vmem:[#allocation27_spill] sm:$0xff] %v3844_v63  ;;  %v413_v31 = vld [vmem:[#allocation4] sm:$0xff] }
  0x37   : > { %595 = vmatpush1.bf16.msra.mxu0 %v3631_v26  ;;  %636 = vmatpush1.bf16.msra.mxu1 %v3668_v33 }
  0x38   : > { %596 = vmatprep.subr.bf16.mxu0 %v3637_v27  ;;  %637 = vmatprep.subr.bf16.mxu1 %v3674_v34 }
  0x3b   : > { %597 = vmatpush1.bf16.msra.mxu0 %v3655_v30  ;;  %638 = vmatpush1.bf16.msra.mxu1 %v3692_v38 }
  0x3c   : > { %862 = vmatprep.subr.bf16.mxu0 %v3661_v32  ;;  %903 = vmatprep.subr.bf16.mxu1 %v3698_v39 }
  0x3e   : > { %615 = vmatmul.mubr.bf16.vlgmr.msra.gmra.mrb[0].mxu0 %v421_v35  ;;  %656 = vmatmul.mubr.bf16.vlgmr.msra.gmra.mrb[0].mxu1 %v421_v35  ;;  %v3857_v35 = vld [vmem:[%s4876_s3 + $0xc8] ss:$16 sps:$4 sm:$0xff]  }
  0x3f   : > { %863 = vmatpush1.bf16.msra.mxu0 %v3679_v36  ;;  %894 = vmatprep.mubr.bf16.mxu0 %v4881_v3 }
  0x40   : > { %864 = vmatprep.subr.bf16.mxu0 %v3685_v37  ;;  %904 = vmatpush1.bf16.msra.mxu1 %v3717_v42 }
  0x41   : > { %905 = vmatprep.subr.bf16.mxu1 %v3723_v43  ;;  %935 = vmatprep.mubr.bf16.mxu1 %v4881_v3  ;;  %v3863_v3 = vld [vmem:[%s4876_s3 + $0xec] ss:$16 sps:$4 sm:$0xff]  }
  0x43   : > { %865 = vmatpush1.bf16.msra.mxu0 %v3704_v40 }
  0x44   : > { %866 = vmatprep.subr.bf16.mxu0 %v3709_v41  ;;  %906 = vmatpush1.bf16.msra.mxu1 %v3741_v46 }
  0x45   : > { %907 = vmatprep.subr.bf16.mxu1 %v3747_v47 }
  0x47   : > { %867 = vmatpush1.bf16.msra.mxu0 %v3729_v44 }
  0x48   : > { %868 = vmatprep.subr.bf16.mxu0 %v3735_v45  ;;  %908 = vmatpush1.bf16.msra.mxu1 %v3766_v50 }
  0x49   : > { %909 = vmatprep.subr.bf16.mxu1 %v3772_v51 }
  0x4b   : > { %869 = vmatpush1.bf16.msra.mxu0 %v3754_v48 }
  0x4c   : > { %870 = vmatprep.subr.bf16.mxu0 %v3760_v49  ;;  %910 = vmatpush1.bf16.msra.mxu1 %v3790_v54 }
  0x4d   : > { %911 = vmatprep.subr.bf16.mxu1 %v3796_v55 }
  0x4f   : > { %871 = vmatpush1.bf16.msra.mxu0 %v3778_v52 }
  0x50   : > { %872 = vmatprep.subr.bf16.mxu0 %v3784_v53  ;;  %912 = vmatpush1.bf16.msra.mxu1 %v3814_v58 }
  0x51   : > { %913 = vmatprep.subr.bf16.mxu1 %v3820_v59 }
  0x53   : > { %873 = vmatpush1.bf16.msra.mxu0 %v3802_v56 }
  0x54   : > { %874 = vmatprep.subr.bf16.mxu0 %v3808_v57  ;;  %914 = vmatpush1.bf16.msra.mxu1 %v3838_v62 }
  0x55   : > { %915 = vmatprep.subr.bf16.mxu1 %v3844_v63  ;;  %v4992_v63 = vmov 0  }
  0x57   : > { %875 = vmatpush1.bf16.msra.mxu0 %v3826_v60  ;;  %v701_v60 = vpack.c.bf16 %v413_v31, %v413_v31 }
  0x58   : > { %876 = vmatprep.subr.bf16.mxu0 %v3832_v61  ;;  %916 = vmatpush1.bf16.msra.mxu1 %v3857_v35  ;;  %v3870_v61 = vld [vmem:[%s4876_s3 + $0xe8] ss:$16 sps:$4 sm:$0xff]  }
  0x59   : > { %917 = vmatprep.subr.bf16.mxu1 %v3863_v3 }
  0x5b   : > { %877 = vmatpush1.bf16.msra.mxu0 %v3850_v0 }
  0x5c   : > { %983 = vmatprep.subr.bf16.mxu0 %v3489_v1  ;;  %918 = vmatpush1.bf16.msra.mxu1 %v3870_v61 }
  0x5d   : > { %1024 = vmatprep.subr.bf16.mxu1 %v3519_v7 }
  0x5e   : > { %895 = vmatmul.mubr.bf16.vlgmr.msra.gmra.mrb[4].mxu0 %v701_v60 }
  0x5f   : > { %984 = vmatpush1.bf16.msra.mxu0 %v3494_v2  ;;  %1015 = vmatprep.mubr.bf16.mxu0 %v4992_v63 }
  0x60   : > { %985 = vmatprep.subr.bf16.mxu0 %v3502_v4  ;;  %936 = vmatmul.mubr.bf16.vlgmr.msra.gmra.mrb[4].mxu1 %v701_v60  ;;  %v415_v60 = vld [vmem:[%s3469_s10] sm:$0xff] }
  0x61   : > { %1025 = vmatpush1.bf16.msra.mxu1 %v3524_v8  ;;  %1056 = vmatprep.mubr.bf16.mxu1 %v4992_v63  ;;  %v417_v31 = vunpack.c.l.bf16 %v415_v60 }
  0x62   : > { %1026 = vmatprep.subr.bf16.mxu1 %v3543_v11 }
  0x63   : > { %986 = vmatpush1.bf16.msra.mxu0 %v3508_v5 }
  0x64   : > { %987 = vmatprep.subr.bf16.mxu0 %v3514_v6 }
  0x65   : > { %1027 = vmatpush1.bf16.msra.mxu1 %v3548_v12 }
  0x66   : > { %1028 = vmatprep.subr.bf16.mxu1 %v3565_v15 }
  0x67   : > { %988 = vmatpush1.bf16.msra.mxu0 %v3530_v9 }
  0x68   : > { %989 = vmatprep.subr.bf16.mxu0 %v3537_v10 }
  0x69   : > { %1029 = vmatpush1.bf16.msra.mxu1 %v3572_v16 }
  0x6a   : > { %1030 = vmatprep.subr.bf16.mxu1 %v3578_v17 }
  0x6b   : > { %990 = vmatpush1.bf16.msra.mxu0 %v3555_v13 }
  0x6c   : > { %991 = vmatprep.subr.bf16.mxu0 %v3560_v14 }
  0x6d   : > { %1031 = vmatpush1.bf16.msra.mxu1 %v3596_v20 }
  0x6e   : > { %1032 = vmatprep.subr.bf16.mxu1 %v3602_v21 }
  0x6f   : > { %992 = vmatpush1.bf16.msra.mxu0 %v3584_v18 }
  0x70   : > { %993 = vmatprep.subr.bf16.mxu0 %v3590_v19 }
  0x71   : > { %1033 = vmatpush1.bf16.msra.mxu1 %v3620_v24 }
  0x72   : > { %1034 = vmatprep.subr.bf16.mxu1 %v3626_v25 }
  0x73   : > { %994 = vmatpush1.bf16.msra.mxu0 %v3608_v22 }
  0x74   : > { %995 = vmatprep.subr.bf16.mxu0 %v3613_v23 }
  0x75   : > { %1035 = vmatpush1.bf16.msra.mxu1 %v3644_v28  ;;  %v416_v28 = vld [vmem:[%s3469_s10 + $0x8] sm:$0xff] }
  0x76   : > { %1036 = vmatprep.subr.bf16.mxu1 %v3650_v29  ;;  %v420_v18 = vunpack.c.h.bf16 %v416_v28 }
  0x77   : > { %996 = vmatpush1.bf16.msra.mxu0 %v3631_v26  ;;  %v418_v26 = vunpack.c.h.bf16 %v415_v60 }
  0x78   : > { %997 = vmatprep.subr.bf16.mxu0 %v3637_v27 }
  0x79   : > { %1037 = vmatpush1.bf16.msra.mxu1 %v3668_v33  ;;  %v419_v33 = vunpack.c.l.bf16 %v416_v28 }
  0x7a   : > { %1038 = vmatprep.subr.bf16.mxu1 %v3674_v34 }
  0x7b   : > { %998 = vmatpush1.bf16.msra.mxu0 %v3655_v30 }
  0x7c   : > { %1104 = vmatprep.subr.bf16.mxu0 %v3661_v32 }
  0x7d   : > { %1039 = vmatpush1.bf16.msra.mxu1 %v3692_v38 }
  0x7e   : > { %1145 = vmatprep.subr.bf16.mxu1 %v3698_v39 }
 0x111   : > { %v616_v23 = vpop.f32.mrb[0].mxu0  ;;  %v657_v32 = vpop.f32.mrb[0].mxu1 }
 0x112   : > { %v664_v27 = vadd.f32 %v616_v23, %v417_v31  ;;  %v618_v22 = vpop.f32.mrb[1].mxu0  ;;  %v659_v34 = vpop.f32.mrb[1].mxu1  ;;  %v666_v38 = vadd.f32 %v657_v32, %v419_v33 }
 0x113   : > { %v665_v29 = vadd.f32 %v618_v22, %v418_v26  ;;  %v620_v25 = vpop.f32.mrb[2].mxu0  ;;  %v661_v39 = vpop.f32.mrb[2].mxu1  ;;  %v667_v14 = vadd.f32 %v659_v34, %v420_v18 }
 0x114   : > { %v2824_v30 = vmul.f32 -1.442695, %v664_v27  ;;  %v621_v19 = vpop.f32.mrb[3].mxu0  ;;  %v662_v21 = vpop.f32.mrb[3].mxu1  ;;  %v2826_v60 = vmul.f32 -1.442695, %v666_v38 }
 0x115   : > { %v2825_v24 = vmul.f32 -1.442695, %v665_v29  ;;  %v412_v27 = vld [vmem:[#allocation3] sm:$0xff] }
 0x116   : > { %3056 = vpow2.f32 %v2824_v30 }
 0x117   : > { %3058 = vpow2.f32 %v2825_v24  ;;  %v2827_v24 = vld [vmem:[%s3474_s14 + $0x70] sm:$0xff] }
 0x118   : > { %3060 = vpow2.f32 %v2826_v60  ;;  %v697_v21 = vunpack.c.l.bf16 %v2827_v24  ;;  %v698_v18 = vunpack.c.h.bf16 %v2827_v24 }
 0x119   : > { %3062 = vtanh.f32 %v667_v14  ;;  %v2828_v14 = vld [vmem:[%s3474_s14 + $0x78] sm:$0xff] }
 0x120   : > { %v3057_v20 = vpop.eup %3056 }
 0x121   : > { %v3059_v23 = vpop.eup %3058  ;;  %v677_v22 = vadd.f32 1.0, %v3057_v20 }
 0x122   : > { %v678_v25 = vadd.f32 1.0, %v3059_v23  ;;  %v3061_v19 = vpop.eup %3060 }
 0x123   : > { %3064 = vrcp.f32 %v677_v22  ;;  %v3063_v26 = vpop.eup %3062  ;;  %v679_v30 = vadd.f32 1.0, %v3061_v19 }
 0x124   : > { %3066 = vrcp.f32 %v678_v25  ;;  %v699_v25 = vunpack.c.l.bf16 %v2828_v14 }
 0x125   : > { %3068 = vrcp.f32 %v679_v30  ;;  %v700_v30 = vunpack.c.h.bf16 %v2828_v14 }
 0x12d   : > { %v3065_v29 = vpop.eup %3064 }
 0x12e   : > { %v3067_v32 = vpop.eup %3066  ;;  %v688_v28 = vmul.f32 %v3065_v29, %v3063_v26 }
 0x12f   : > { %v687_v33 = vmul.f32 %v3067_v32, %v412_v27 }
 0x131   : > { %v3913_v34 = vadd.f32 %v688_v28, %v687_v33  ;;  %v896_v20 = vpop.f32.mrb[4].mxu0  ;;  %v3069_v28 = vpop.eup %3068 }
 0x132   : > { %v944_v38 = vadd.f32 %v896_v20, %v697_v21  ;;  %v898_v39 = vpop.f32.mrb[5].mxu0 }
 0x133   : > { %3070 = vtanh.f32 %v3913_v34  ;;  %v945_v31 = vadd.f32 %v898_v39, %v698_v18  ;;  %v900_v60 = vpop.f32.mrb[6].mxu0  ;;  %v937_v26 = vpop.f32.mrb[4].mxu1  ;;  %v3920_v18 = vld [vmem:[%s4877_s4] sm:$0xff] }
 0x134   : > { %v2861_v23 = vmul.f32 -1.442695, %v944_v38  ;;  %v901_v22 = vpop.f32.mrb[7].mxu0  ;;  %v939_v27 = vpop.f32.mrb[5].mxu1  ;;  %v946_v24 = vadd.f32 %v937_v26, %v699_v25  ;;  %v414_v26 = vld [vmem:[#allocation5] sm:$0xff] }
 0x135   : > { %v2862_v19 = vmul.f32 -1.442695, %v945_v31  ;;  %v941_v29 = vpop.f32.mrb[6].mxu1  ;;  %v947_v20 = vadd.f32 %v939_v27, %v700_v30 }
 0x136   : > { %3072 = vpow2.f32 %v2861_v23  ;;  %v942_v32 = vpop.f32.mrb[7].mxu1  ;;  %v2863_v21 = vmul.f32 -1.442695, %v946_v24 }
 0x137   : > { %3074 = vpow2.f32 %v2862_v19 }
 0x138   : > { %3076 = vpow2.f32 %v2863_v21  ;;  %v4993_v21 = vld [vmem:[#allocation27_spill] sm:$0xff] }
 0x139   : > { %3078 = vtanh.f32 %v947_v20  ;;  %v4994_v20 = vld [vmem:[#allocation25_spill] sm:$0xff] }
 0x13d   : > { %v3071_v33 = vpop.eup %3070 }
 0x13e   : > { %v691_v38 = vmul.f32 %v3071_v33, %v3069_v28 }
 0x140   : > { %v3073_v39 = vpop.eup %3072  ;;  %v692_v31 = vmul.f32 %v691_v38, %v3920_v18  ;;  %v982_v60 = vpack.c.bf16 %v691_v38, %v691_v38  ;;  %v4995_v38 = vld [vmem:[#allocation26_spill] sm:$0xff] }
 0x141   : > { %v3075_v23 = vpop.eup %3074  ;;  %v957_v22 = vadd.f32 1.0, %v3073_v39 }
 0x142   : > { %v958_v14 = vadd.f32 1.0, %v3075_v23  ;;  %693 = vst [vmem:[%s3479_s17] sm:$0xff] %v692_v31  ;;  %1016 = vmatmul.mubr.bf16.vlgmr.msra.gmra.mrb[8].mxu0 %v982_v60  ;;  %1057 = vmatmul.mubr.bf16.vlgmr.msra.gmra.mrb[8].mxu1 %v982_v60  ;;  %v3077_v25 = vpop.eup %3076  ;;  %v3960_v31 = vld [vmem:[%s4878_s5] sm:$0xff] }
 0x143   : > { %3080 = vrcp.f32 %v957_v22  ;;  %1105 = vmatpush1.bf16.msra.mxu0 %v3679_v36  ;;  %1146 = vmatpush1.bf16.msra.mxu1 %v3717_v42  ;;  %v3079_v19 = vpop.eup %3078  ;;  %v959_v24 = vadd.f32 1.0, %v3077_v25  ;;  %v5009_v25 = vld [vmem:[#allocation16_spill] sm:$0xff] }
 0x144   : > { %3082 = vrcp.f32 %v958_v14  ;;  %1106 = vmatprep.subr.bf16.mxu0 %v3685_v37  ;;  %1147 = vmatprep.subr.bf16.mxu1 %v3723_v43  ;;  %v5008_v14 = vld [vmem:[#allocation21_spill] sm:$0xff] }
 0x145   : > { %1136 = vmatprep.mubr.bf16.mxu0 %v4992_v63  ;;  %1177 = vmatprep.mubr.bf16.mxu1 %v4992_v63  ;;  %3084 = vrcp.f32 %v959_v24  ;;  %v5013_v24 = vld [vmem:[#allocation20_spill] sm:$0xff] }
 0x147   : > { %1107 = vmatpush1.bf16.msra.mxu0 %v3704_v40  ;;  %1148 = vmatpush1.bf16.msra.mxu1 %v3741_v46 }
 0x148   : > { %1108 = vmatprep.subr.bf16.mxu0 %v3709_v41  ;;  %1149 = vmatprep.subr.bf16.mxu1 %v3747_v47 }
 0x14b   : > { %1109 = vmatpush1.bf16.msra.mxu0 %v3729_v44  ;;  %1150 = vmatpush1.bf16.msra.mxu1 %v3766_v50 }
 0x14c   : > { %1110 = vmatprep.subr.bf16.mxu0 %v3735_v45  ;;  %1151 = vmatprep.subr.bf16.mxu1 %v3772_v51 }
 0x14d   : > { %v3081_v27 = vpop.eup %3080 }
 0x14e   : > { %v3083_v29 = vpop.eup %3082  ;;  %v968_v30 = vmul.f32 %v3081_v27, %v3079_v19  ;;  %v5010_v19 = vld [vmem:[#allocation22_spill] sm:$0xff]  ;;  %v5012_v27 = vld [vmem:[#allocation23_spill] sm:$0xff] }
 0x14f   : > { %v967_v32 = vmul.f32 %v3083_v29, %v414_v26  ;;  %1111 = vmatpush1.bf16.msra.mxu0 %v3754_v48  ;;  %1152 = vmatpush1.bf16.msra.mxu1 %v3790_v54  ;;  %v3085_v33 = vpop.eup %3084  ;;  %v5011_v26 = vld [vmem:[#allocation19_spill] sm:$0xff]  ;;  %v5014_v29 = vld [vmem:[#allocation24_spill] sm:$0xff] }
 0x150   : > { %1112 = vmatprep.subr.bf16.mxu0 %v3760_v49  ;;  %1153 = vmatprep.subr.bf16.mxu1 %v3796_v55 }
 0x151   : > { %v3942_v28 = vadd.f32 %v968_v30, %v967_v32  ;;  %v2865_v30 = vld [vmem:[%s3469_s10 + $0x10] sm:$0xff] }
 0x152   : > { %v978_v32 = vunpack.c.l.bf16 %v2865_v30 }
 0x153   : > { %3086 = vtanh.f32 %v3942_v28  ;;  %1113 = vmatpush1.bf16.msra.mxu0 %v3778_v52  ;;  %1154 = vmatpush1.bf16.msra.mxu1 %v3814_v58 }
 0x154   : > { %1114 = vmatprep.subr.bf16.mxu0 %v3784_v53  ;;  %1155 = vmatprep.subr.bf16.mxu1 %v3820_v59 }
 0x157   : > { %1115 = vmatpush1.bf16.msra.mxu0 %v3802_v56  ;;  %1156 = vmatpush1.bf16.msra.mxu1 %v3838_v62 }
 0x158   : > { %1116 = vmatprep.subr.bf16.mxu0 %v3808_v57  ;;  %1157 = vmatprep.subr.bf16.mxu1 %v4993_v21 }
 0x15b   : > { %1117 = vmatpush1.bf16.msra.mxu0 %v4994_v20  ;;  %1158 = vmatpush1.bf16.msra.mxu1 %v3857_v35 }
 0x15c   : > { %1118 = vmatprep.subr.bf16.mxu0 %v4995_v38  ;;  %1159 = vmatprep.subr.bf16.mxu1 %v3863_v3 }
 0x15d   : > { %v3087_v39 = vpop.eup %3086 }
 0x15e   : > { %v971_v60 = vmul.f32 %v3087_v39, %v3085_v33  ;;  %v979_v33 = vunpack.c.h.bf16 %v2865_v30 }
 0x15f   : > { %1119 = vmatpush1.bf16.msra.mxu0 %v3850_v0  ;;  %1160 = vmatpush1.bf16.msra.mxu1 %v3870_v61 }
 0x160   : > { %v972_v23 = vmul.f32 %v971_v60, %v3960_v31  ;;  %v1103_v22 = vpack.c.bf16 %v971_v60, %v971_v60  ;;  %1225 = vmatprep.subr.bf16.mxu0 %v3489_v1  ;;  %1266 = vmatprep.subr.bf16.mxu1 %v3519_v7  ;;  %v4996_v1 = vld [vmem:[#allocation9_spill] sm:$0xff]  ;;  %v5001_v7 = vld [vmem:[#allocation8_spill] sm:$0xff] }
 0x162   : > { %2864 = vst [vmem:[%s3484_s21 + $0x38] sm:$0xff] %v972_v23  ;;  %1137 = vmatmul.mubr.bf16.vlgmr.msra.gmra.mrb[12].mxu0 %v1103_v22  ;;  %1178 = vmatmul.mubr.bf16.vlgmr.msra.gmra.mrb[12].mxu1 %v1103_v22 }
 0x163   : > { %1226 = vmatpush1.bf16.msra.mxu0 %v3494_v2  ;;  %1267 = vmatpush1.bf16.msra.mxu1 %v3524_v8  ;;  %v4997_v2 = vld [vmem:[#allocation6_spill] sm:$0xff] }
 0x164   : > { %1227 = vmatprep.subr.bf16.mxu0 %v3502_v4  ;;  %1268 = vmatprep.subr.bf16.mxu1 %v3543_v11  ;;  %v4998_v4 = vld [vmem:[#allocation10_spill] sm:$0xff]  ;;  %v5005_v11 = vld [vmem:[#allocation12_spill] sm:$0xff] }
 0x165   : > { %1257 = vmatprep.mubr.bf16.mxu0 %v4992_v63  ;;  %1298 = vmatprep.mubr.bf16.mxu1 %v4992_v63  ;;  %v5002_v8 = vld [vmem:[#allocation14_spill] sm:$0xff] }
 0x167   : > { %1228 = vmatpush1.bf16.msra.mxu0 %v3508_v5  ;;  %1269 = vmatpush1.bf16.msra.mxu1 %v3548_v12  ;;  %v4999_v5 = vld [vmem:[#allocation7_spill] sm:$0xff]  ;;  %v5006_v12 = vld [vmem:[#allocation18_spill] sm:$0xff] }
 0x168   : > { %1229 = vmatprep.subr.bf16.mxu0 %v3514_v6  ;;  %1270 = vmatprep.subr.bf16.mxu1 %v3565_v15  ;;  %v5000_v6 = vld [vmem:[#allocation13_spill] sm:$0xff] }
 0x16b   : > { %1230 = vmatpush1.bf16.msra.mxu0 %v3530_v9  ;;  %1271 = vmatpush1.bf16.msra.mxu1 %v3572_v16  ;;  %v5003_v9 = vld [vmem:[#allocation11_spill] sm:$0xff] }
 0x16c   : > { %1231 = vmatprep.subr.bf16.mxu0 %v3537_v10  ;;  %1272 = vmatprep.subr.bf16.mxu1 %v3578_v17  ;;  %v5004_v10 = vld [vmem:[#allocation17_spill] sm:$0xff] }
 0x16f   : > { %1232 = vmatpush1.bf16.msra.mxu0 %v3555_v13  ;;  %1273 = vmatpush1.bf16.msra.mxu1 %v4996_v1  ;;  %v5007_v13 = vld [vmem:[#allocation15_spill] sm:$0xff] }
 0x170   : > { %1233 = vmatprep.subr.bf16.mxu0 %v4997_v2  ;;  %1274 = vmatprep.subr.bf16.mxu1 %v4998_v4 }
 0x173   : > { %1234 = vmatpush1.bf16.msra.mxu0 %v4999_v5  ;;  %1275 = vmatpush1.bf16.msra.mxu1 %v5000_v6 }
 0x174   : > { %1235 = vmatprep.subr.bf16.mxu0 %v5001_v7  ;;  %1276 = vmatprep.subr.bf16.mxu1 %v5002_v8 }
 0x177   : > { %1236 = vmatpush1.bf16.msra.mxu0 %v5003_v9  ;;  %1277 = vmatpush1.bf16.msra.mxu1 %v5004_v10 }
 0x178   : > { %1237 = vmatprep.subr.bf16.mxu0 %v5005_v11  ;;  %1278 = vmatprep.subr.bf16.mxu1 %v5006_v12 }
 0x17b   : > { %1238 = vmatpush1.bf16.msra.mxu0 %v5007_v13  ;;  %1279 = vmatpush1.bf16.msra.mxu1 %v5008_v14  ;;  %v2866_v14 = vld [vmem:[%s3469_s10 + $0x18] sm:$0xff] }
 0x17c   : > { %1239 = vmatprep.subr.bf16.mxu0 %v5009_v25  ;;  %1280 = vmatprep.subr.bf16.mxu1 %v5010_v19 }
 0x17f   : > { %1240 = vmatpush1.bf16.msra.mxu0 %v5011_v26  ;;  %1281 = vmatpush1.bf16.msra.mxu1 %v5012_v27 }
 0x180   : > { %1346 = vmatprep.subr.bf16.mxu0 %v5013_v24  ;;  %1387 = vmatprep.subr.bf16.mxu1 %v5014_v29  ;;  %v980_v24 = vunpack.c.l.bf16 %v2866_v14  ;;  %v981_v29 = vunpack.c.h.bf16 %v2866_v14 }
 0x215   : > { %v1017_v39 = vpop.f32.mrb[8].mxu0  ;;  %v1058_v60 = vpop.f32.mrb[8].mxu1 }
 0x216   : > { %v1065_v23 = vadd.f32 %v1017_v39, %v978_v32  ;;  %v1019_v22 = vpop.f32.mrb[9].mxu0  ;;  %v1060_v2 = vpop.f32.mrb[9].mxu1  ;;  %v1067_v10 = vadd.f32 %v1058_v60, %v980_v24 }
 0x217   : > { %v1066_v25 = vadd.f32 %v1019_v22, %v979_v33  ;;  %v1021_v13 = vpop.f32.mrb[10].mxu0  ;;  %v1062_v19 = vpop.f32.mrb[10].mxu1  ;;  %v1068_v30 = vadd.f32 %v1060_v2, %v981_v29  ;;  %v2872_v2 = vld [vmem:[%s3474_s14 + $0x68] sm:$0xff] }
 0x218   : > { %v2867_v12 = vmul.f32 -1.442695, %v1065_v23  ;;  %v1022_v26 = vpop.f32.mrb[11].mxu0  ;;  %v1063_v11 = vpop.f32.mrb[11].mxu1  ;;  %v2869_v9 = vmul.f32 -1.442695, %v1067_v10 }
 0x219   : > { %v2868_v27 = vmul.f32 -1.442695, %v1066_v25  ;;  %v2871_v26 = vld [vmem:[%s3474_s14 + $0x60] sm:$0xff] }
 0x21a   : > { %3088 = vpow2.f32 %v2867_v12  ;;  %v1099_v33 = vunpack.c.l.bf16 %v2871_v26  ;;  %v1100_v24 = vunpack.c.h.bf16 %v2871_v26 }
 0x21b   : > { %3090 = vpow2.f32 %v2868_v27 }
 0x21c   : > { %3092 = vtanh.f32 %v1068_v30 }
 0x21d   : > { %3094 = vpow2.f32 %v2869_v9 }
 0x224   : > { %v3089_v8 = vpop.eup %3088 }
 0x225   : > { %v1078_v32 = vadd.f32 1.0, %v3089_v8  ;;  %v3091_v39 = vpop.eup %3090 }
 0x226   : > { %v1079_v13 = vadd.f32 1.0, %v3091_v39  ;;  %v3093_v19 = vpop.eup %3092 }
 0x227   : > { %3096 = vrcp.f32 %v1078_v32  ;;  %v3095_v11 = vpop.eup %3094 }
 0x228   : > { %3098 = vrcp.f32 %v1079_v13  ;;  %v1080_v14 = vadd.f32 1.0, %v3095_v11 }
 0x22a   : > { %3100 = vrcp.f32 %v1080_v14 }
 0x231   : > { %v3097_v12 = vpop.eup %3096 }
 0x232   : > { %v1089_v25 = vmul.f32 %v3097_v12, %v3093_v19  ;;  %v3099_v27 = vpop.eup %3098  ;;  %v1102_v12 = vunpack.c.h.bf16 %v2872_v2 }
 0x233   : > { %v1088_v10 = vmul.f32 %v3099_v27, %v3913_v34  ;;  %v1101_v34 = vunpack.c.l.bf16 %v2872_v2  ;;  %v4097_v2 = vld [vmem:[%s4875_s2 + $0x28] ss:$16 sps:$4 sm:$0xff]  }
 0x235   : > { %v1138_v29 = vpop.f32.mrb[12].mxu0  ;;  %v1179_v8 = vpop.f32.mrb[12].mxu1  ;;  %v4006_v60 = vadd.f32 %v1089_v25, %v1088_v10 }
 0x236   : > { %v1186_v9 = vadd.f32 %v1138_v29, %v1099_v33  ;;  %v1140_v23 = vpop.f32.mrb[13].mxu0  ;;  %v1181_v22 = vpop.f32.mrb[13].mxu1  ;;  %v1188_v25 = vadd.f32 %v1179_v8, %v1101_v34  ;;  %v5022_v34 = vld [vmem:[#allocation12_spill] sm:$0xff] }
 0x237   : > { %v1187_v30 = vadd.f32 %v1140_v23, %v1100_v24  ;;  %v1142_v32 = vpop.f32.mrb[14].mxu0  ;;  %v1183_v39 = vpop.f32.mrb[14].mxu1  ;;  %3102 = vtanh.f32 %v4006_v60  ;;  %v1189_v27 = vadd.f32 %v1181_v22, %v1102_v12  ;;  %v4091_v22 = vld [vmem:[%s4875_s2 + $0x20] ss:$16 sps:$4 sm:$0xff]  }
 0x238   : > { %v2873_v13 = vmul.f32 -1.442695, %v1186_v9  ;;  %v1143_v19 = vpop.f32.mrb[15].mxu0  ;;  %v1184_v11 = vpop.f32.mrb[15].mxu1  ;;  %v2875_v14 = vmul.f32 -1.442695, %v1188_v25 }
 0x239   : > { %v2874_v26 = vmul.f32 -1.442695, %v1187_v30  ;;  %v3101_v33 = vpop.eup %3100  ;;  %v4110_v19 = vld [vmem:[%s4875_s2 + $0x40] ss:$16 sps:$4 sm:$0xff]   ;;  %v4117_v11 = vld [vmem:[%s4875_s2 + $0x64] ss:$16 sps:$4 sm:$0xff]  }
 0x23a   : > { %3104 = vpow2.f32 %v2873_v13  ;;  %v4103_v13 = vld [vmem:[%s4875_s2 + $0x44] ss:$16 sps:$4 sm:$0xff]   ;;  %5015 = vst [vmem:[#allocation27_spill] sm:$0xff] %v4110_v19  ;;  %5016 = vst [vmem:[#allocation25_spill] sm:$0xff] %v4117_v11  ;;  %v5024_v25 = vld [vmem:[#allocation15_spill] sm:$0xff] }
 0x23b   : > { %3106 = vpow2.f32 %v2874_v26  ;;  %v5020_v26 = vld [vmem:[#allocation11_spill] sm:$0xff]  ;;  %v5023_v12 = vld [vmem:[#allocation18_spill] sm:$0xff] }
 0x23c   : > { %3108 = vtanh.f32 %v1189_v27  ;;  %v5030_v27 = vld [vmem:[#allocation20_spill] sm:$0xff] }
 0x23d   : > { %3110 = vpow2.f32 %v2875_v14  ;;  %v2877_v14 = vld [vmem:[%s3469_s10 + $0x20] sm:$0xff] }
 0x241   : > { %v3103_v10 = vpop.eup %3102 }
 0x242   : > { %v1092_v29 = vmul.f32 %v3103_v10, %v3101_v33  ;;  %v5029_v33 = vld [vmem:[#allocation23_spill] sm:$0xff]  ;;  %v5031_v10 = vld [vmem:[#allocation24_spill] sm:$0xff] }
 0x244   : > { %v3105_v24 = vpop.eup %3104  ;;  %v1093_v32 = vmul.f32 %v1092_v29, %v3920_v18  ;;  %v1224_v9 = vpack.c.bf16 %v1092_v29, %v1092_v29  ;;  %v1220_v29 = vunpack.c.l.bf16 %v2877_v14 }
 0x245   : > { %v1199_v23 = vadd.f32 1.0, %v3105_v24  ;;  %v3107_v39 = vpop.eup %3106  ;;  %v1221_v24 = vunpack.c.h.bf16 %v2877_v14 }
 0x246   : > { %v1200_v30 = vadd.f32 1.0, %v3107_v39  ;;  %2870 = vst [vmem:[%s3479_s17 + $0x8] sm:$0xff] %v1093_v32  ;;  %1258 = vmatmul.mubr.bf16.vlgmr.msra.gmra.mrb[16].mxu0 %v1224_v9  ;;  %1299 = vmatmul.mubr.bf16.vlgmr.msra.gmra.mrb[16].mxu1 %v1224_v9 }
 0x247   : > { %3112 = vrcp.f32 %v1199_v23  ;;  %1347 = vmatpush1.bf16.msra.mxu0 %v3679_v36  ;;  %1388 = vmatpush1.bf16.msra.mxu1 %v3717_v42  ;;  %v3109_v36 = vpop.eup %3108 }
 0x248   : > { %3114 = vrcp.f32 %v1200_v30  ;;  %1348 = vmatprep.subr.bf16.mxu0 %v3685_v37  ;;  %1389 = vmatprep.subr.bf16.mxu1 %v3723_v43  ;;  %v3111_v8 = vpop.eup %3110 }
 0x249   : > { %1378 = vmatprep.mubr.bf16.mxu0 %v4992_v63  ;;  %1419 = vmatprep.mubr.bf16.mxu1 %v4992_v63 }
 0x24b   : > { %1349 = vmatpush1.bf16.msra.mxu0 %v3704_v40  ;;  %1390 = vmatpush1.bf16.msra.mxu1 %v3741_v46  ;;  %v1201_v40 = vadd.f32 1.0, %v3111_v8 }
 0x24c   : > { %1350 = vmatprep.subr.bf16.mxu0 %v3709_v41  ;;  %1391 = vmatprep.subr.bf16.mxu1 %v3747_v47 }
 0x24d   : > { %3116 = vrcp.f32 %v1201_v40 }
 0x24f   : > { %1351 = vmatpush1.bf16.msra.mxu0 %v3729_v44  ;;  %1392 = vmatpush1.bf16.msra.mxu1 %v3766_v50 }
 0x250   : > { %1352 = vmatprep.subr.bf16.mxu0 %v3735_v45  ;;  %1393 = vmatprep.subr.bf16.mxu1 %v3772_v51 }
 0x251   : > { %v3113_v37 = vpop.eup %3112 }
 0x252   : > { %v1210_v42 = vmul.f32 %v3113_v37, %v3109_v36  ;;  %v3115_v43 = vpop.eup %3114  ;;  %v2878_v36 = vld [vmem:[%s3469_s10 + $0x28] sm:$0xff] }
 0x253   : > { %v1209_v46 = vmul.f32 %v3115_v43, %v3942_v28  ;;  %1353 = vmatpush1.bf16.msra.mxu0 %v3754_v48  ;;  %1394 = vmatpush1.bf16.msra.mxu1 %v3790_v54  ;;  %v4077_v28 = vld [vmem:[%s4875_s2 + $0x24] ss:$16 sps:$4 sm:$0xff]  }
 0x254   : > { %1354 = vmatprep.subr.bf16.mxu0 %v3760_v49  ;;  %1395 = vmatprep.subr.bf16.mxu1 %v3796_v55 }
 0x255   : > { %v4031_v41 = vadd.f32 %v1210_v42, %v1209_v46 }
 0x257   : > { %3118 = vtanh.f32 %v4031_v41  ;;  %1355 = vmatpush1.bf16.msra.mxu0 %v3778_v52  ;;  %1396 = vmatpush1.bf16.msra.mxu1 %v3814_v58  ;;  %v3117_v44 = vpop.eup %3116  ;;  %v4052_v52 = vld [vmem:[%s4875_s2 + $0x4] ss:$16 sps:$4 sm:$0xff]  }
 0x258   : > { %1356 = vmatprep.subr.bf16.mxu0 %v3784_v53  ;;  %1397 = vmatprep.subr.bf16.mxu1 %v3820_v59  ;;  %v4058_v53 = vld [vmem:[%s4875_s2 + $0xc] ss:$16 sps:$4 sm:$0xff]  }
 0x25b   : > { %1357 = vmatpush1.bf16.msra.mxu0 %v3802_v56  ;;  %1398 = vmatpush1.bf16.msra.mxu1 %v3838_v62  ;;  %v4065_v56 = vld [vmem:[%s4875_s2] ss:$16 sps:$4 sm:$0xff]  }
 0x25c   : > { %1358 = vmatprep.subr.bf16.mxu0 %v3808_v57  ;;  %1399 = vmatprep.subr.bf16.mxu1 %v4993_v21  ;;  %v4071_v57 = vld [vmem:[%s4875_s2 + $0x8] ss:$16 sps:$4 sm:$0xff]  }
 0x25f   : > { %1359 = vmatpush1.bf16.msra.mxu0 %v4994_v20  ;;  %1400 = vmatpush1.bf16.msra.mxu1 %v3857_v35 }
 0x260   : > { %1360 = vmatprep.subr.bf16.mxu0 %v4995_v38  ;;  %1401 = vmatprep.subr.bf16.mxu1 %v3863_v3  ;;  %v4083_v38 = vld [vmem:[%s4875_s2 + $0x2c] ss:$16 sps:$4 sm:$0xff]  }
 0x261   : > { %v3119_v45 = vpop.eup %3118 }
 0x262   : > { %v1213_v47 = vmul.f32 %v3119_v45, %v3117_v44  ;;  %v1222_v45 = vunpack.c.l.bf16 %v2878_v36 }
 0x263   : > { %1361 = vmatpush1.bf16.msra.mxu0 %v3850_v0  ;;  %1402 = vmatpush1.bf16.msra.mxu1 %v3870_v61 }
 0x264   : > { %v1214_v48 = vmul.f32 %v1213_v47, %v3960_v31  ;;  %v1345_v49 = vpack.c.bf16 %v1213_v47, %v1213_v47  ;;  %1467 = vmatprep.subr.bf16.mxu0 %v4052_v52  ;;  %1508 = vmatprep.subr.bf16.mxu1 %v4058_v53  ;;  %v1223_v47 = vunpack.c.h.bf16 %v2878_v36  ;;  %v2884_v36 = vld [vmem:[%s3474_s14 + $0x58] sm:$0xff] }
 0x266   : > { %2876 = vst [vmem:[%s3484_s21 + $0x30] sm:$0xff] %v1214_v48  ;;  %1379 = vmatmul.mubr.bf16.vlgmr.msra.gmra.mrb[20].mxu0 %v1345_v49  ;;  %1420 = vmatmul.mubr.bf16.vlgmr.msra.gmra.mrb[20].mxu1 %v1345_v49 }
 0x267   : > { %1468 = vmatpush1.bf16.msra.mxu0 %v4065_v56  ;;  %1509 = vmatpush1.bf16.msra.mxu1 %v4071_v57 }
 0x268   : > { %1469 = vmatprep.subr.bf16.mxu0 %v4077_v28  ;;  %1510 = vmatprep.subr.bf16.mxu1 %v4083_v38 }
 0x269   : > { %1499 = vmatprep.mubr.bf16.mxu0 %v4992_v63  ;;  %1540 = vmatprep.mubr.bf16.mxu1 %v4992_v63 }
 0x26b   : > { %1470 = vmatpush1.bf16.msra.mxu0 %v4091_v22  ;;  %1511 = vmatpush1.bf16.msra.mxu1 %v4097_v2 }
 0x26c   : > { %1471 = vmatprep.subr.bf16.mxu0 %v4103_v13  ;;  %1512 = vmatprep.subr.bf16.mxu1 %v3565_v15  ;;  %v4124_v15 = vld [vmem:[%s4875_s2 + $0x60] ss:$16 sps:$4 sm:$0xff]  }
 0x26d   : > { %5017 = vst [vmem:[#allocation26_spill] sm:$0xff] %v4124_v15 }
 0x26f   : > { %1472 = vmatpush1.bf16.msra.mxu0 %v4110_v19  ;;  %1513 = vmatpush1.bf16.msra.mxu1 %v3572_v16  ;;  %v4131_v16 = vld [vmem:[%s4875_s2 + $0x84] ss:$16 sps:$4 sm:$0xff]  }
 0x270   : > { %1473 = vmatprep.subr.bf16.mxu0 %v4117_v11  ;;  %1514 = vmatprep.subr.bf16.mxu1 %v3578_v17  ;;  %5018 = vst [vmem:[#allocation9_spill] sm:$0xff] %v4131_v16  ;;  %v5019_v17 = vld [vmem:[#allocation14_spill] sm:$0xff] }
 0x273   : > { %1474 = vmatpush1.bf16.msra.mxu0 %v4124_v15  ;;  %1515 = vmatpush1.bf16.msra.mxu1 %v4996_v1  ;;  %v5021_v1 = vld [vmem:[#allocation17_spill] sm:$0xff] }
 0x274   : > { %1475 = vmatprep.subr.bf16.mxu0 %v4131_v16  ;;  %1516 = vmatprep.subr.bf16.mxu1 %v4998_v4  ;;  %v5025_v4 = vld [vmem:[#allocation21_spill] sm:$0xff] }
 0x277   : > { %1476 = vmatpush1.bf16.msra.mxu0 %v4999_v5  ;;  %1517 = vmatpush1.bf16.msra.mxu1 %v5000_v6  ;;  %v5026_v5 = vld [vmem:[#allocation16_spill] sm:$0xff]  ;;  %v5027_v6 = vld [vmem:[#allocation22_spill] sm:$0xff] }
 0x278   : > { %1477 = vmatprep.subr.bf16.mxu0 %v5001_v7  ;;  %1518 = vmatprep.subr.bf16.mxu1 %v5019_v17  ;;  %v5028_v7 = vld [vmem:[#allocation19_spill] sm:$0xff] }
 0x27b   : > { %1478 = vmatpush1.bf16.msra.mxu0 %v5020_v26  ;;  %1519 = vmatpush1.bf16.msra.mxu1 %v5021_v1 }
 0x27c   : > { %1479 = vmatprep.subr.bf16.mxu0 %v5022_v34  ;;  %1520 = vmatprep.subr.bf16.mxu1 %v5023_v12 }
 0x27f   : > { %1480 = vmatpush1.bf16.msra.mxu0 %v5024_v25  ;;  %1521 = vmatpush1.bf16.msra.mxu1 %v5025_v4  ;;  %v2883_v4 = vld [vmem:[%s3474_s14 + $0x50] sm:$0xff] }
 0x280   : > { %1481 = vmatprep.subr.bf16.mxu0 %v5026_v5  ;;  %1522 = vmatprep.subr.bf16.mxu1 %v5027_v6  ;;  %v1342_v14 = vunpack.c.h.bf16 %v2883_v4 }
 0x283   : > { %1482 = vmatpush1.bf16.msra.mxu0 %v5028_v7  ;;  %1523 = vmatpush1.bf16.msra.mxu1 %v5029_v33  ;;  %v1341_v33 = vunpack.c.l.bf16 %v2883_v4 }
 0x284   : > { %1588 = vmatprep.subr.bf16.mxu0 %v5030_v27  ;;  %1629 = vmatprep.subr.bf16.mxu1 %v5031_v10 }
 0x319   : > { %v1259_v23 = vpop.f32.mrb[16].mxu0  ;;  %v1300_v32 = vpop.f32.mrb[16].mxu1 }
 0x31a   : > { %v1307_v9 = vadd.f32 %v1259_v23, %v1220_v29  ;;  %v1261_v39 = vpop.f32.mrb[17].mxu0  ;;  %v1302_v30 = vpop.f32.mrb[17].mxu1  ;;  %v1309_v48 = vadd.f32 %v1300_v32, %v1222_v45  ;;  %v1344_v45 = vunpack.c.h.bf16 %v2884_v36 }
 0x31b   : > { %v1308_v8 = vadd.f32 %v1261_v39, %v1221_v24  ;;  %v1263_v37 = vpop.f32.mrb[18].mxu0  ;;  %v1304_v42 = vpop.f32.mrb[18].mxu1  ;;  %v1310_v49 = vadd.f32 %v1302_v30, %v1223_v47 }
 0x31c   : > { %v2879_v43 = vmul.f32 -1.442695, %v1307_v9  ;;  %v1264_v40 = vpop.f32.mrb[19].mxu0  ;;  %v1305_v46 = vpop.f32.mrb[19].mxu1  ;;  %v2881_v17 = vmul.f32 -1.442695, %v1309_v48 }
 0x31d   : > { %v2880_v44 = vmul.f32 -1.442695, %v1308_v8 }
 0x31e   : > { %3120 = vpow2.f32 %v2879_v43 }
 0x31f   : > { %3122 = vpow2.f32 %v2880_v44 }
 0x320   : > { %3124 = vtanh.f32 %v1310_v49 }
 0x321   : > { %3126 = vpow2.f32 %v2881_v17 }
 0x328   : > { %v3121_v26 = vpop.eup %3120 }
 0x329   : > { %v1320_v1 = vadd.f32 1.0, %v3121_v26  ;;  %v3123_v34 = vpop.eup %3122 }
 0x32a   : > { %v1321_v12 = vadd.f32 1.0, %v3123_v34  ;;  %v3125_v25 = vpop.eup %3124 }
 0x32b   : > { %3128 = vrcp.f32 %v1320_v1  ;;  %v3127_v5 = vpop.eup %3126 }
 0x32c   : > { %3130 = vrcp.f32 %v1321_v12  ;;  %v1322_v10 = vadd.f32 1.0, %v3127_v5 }
 0x32e   : > { %3132 = vrcp.f32 %v1322_v10  ;;  %v4182_v10 = vld [vmem:[%s4876_s3 + $0x2c] ss:$16 sps:$4 sm:$0xff]  }
 0x335   : > { %v3129_v6 = vpop.eup %3128 }
 0x336   : > { %v1331_v7 = vmul.f32 %v3129_v6, %v3125_v25  ;;  %v3131_v27 = vpop.eup %3130 }
 0x337   : > { %v1330_v29 = vmul.f32 %v3131_v27, %v4006_v60  ;;  %v1343_v60 = vunpack.c.l.bf16 %v2884_v36  ;;  %v4176_v27 = vld [vmem:[%s4876_s3 + $0x24] ss:$16 sps:$4 sm:$0xff]  }
 0x338   : > { %v3133_v48 = vpop.eup %3132 }
 0x339   : > { %v1380_v24 = vpop.f32.mrb[20].mxu0  ;;  %v1421_v23 = vpop.f32.mrb[20].mxu1  ;;  %v4155_v32 = vadd.f32 %v1331_v7, %v1330_v29  ;;  %v4164_v7 = vld [vmem:[%s4876_s3] ss:$16 sps:$4 sm:$0xff]   ;;  %v4196_v29 = vld [vmem:[%s4876_s3 + $0x28] ss:$16 sps:$4 sm:$0xff]  }
 0x33a   : > { %v1428_v9 = vadd.f32 %v1380_v24, %v1341_v33  ;;  %v1382_v39 = vpop.f32.mrb[21].mxu0  ;;  %v1423_v30 = vpop.f32.mrb[21].mxu1  ;;  %v1430_v47 = vadd.f32 %v1421_v23, %v1343_v60  ;;  %v4170_v33 = vld [vmem:[%s4876_s3 + $0x8] ss:$16 sps:$4 sm:$0xff]   ;;  %v4202_v24 = vld [vmem:[%s4876_s3 + $0x44] ss:$16 sps:$4 sm:$0xff]  }
 0x33b   : > { %v1429_v8 = vadd.f32 %v1382_v39, %v1342_v14  ;;  %v1384_v37 = vpop.f32.mrb[22].mxu0  ;;  %v1425_v42 = vpop.f32.mrb[22].mxu1  ;;  %3134 = vtanh.f32 %v4155_v32  ;;  %v1431_v49 = vadd.f32 %v1423_v30, %v1344_v45  ;;  %v4190_v14 = vld [vmem:[%s4876_s3 + $0x20] ss:$16 sps:$4 sm:$0xff]   ;;  %v4208_v23 = vld [vmem:[%s4876_s3 + $0x4c] ss:$16 sps:$4 sm:$0xff]  }
 0x33c   : > { %v2885_v43 = vmul.f32 -1.442695, %v1428_v9  ;;  %v1385_v40 = vpop.f32.mrb[23].mxu0  ;;  %v1426_v46 = vpop.f32.mrb[23].mxu1  ;;  %v2887_v26 = vmul.f32 -1.442695, %v1430_v47 }
 0x33d   : > { %v2886_v44 = vmul.f32 -1.442695, %v1429_v8  ;;  %v4214_v30 = vld [vmem:[%s4876_s3 + $0x40] ss:$16 sps:$4 sm:$0xff]   ;;  %v4221_v8 = vld [vmem:[%s4876_s3 + $0x64] ss:$16 sps:$4 sm:$0xff]  }
 0x33e   : > { %3136 = vpow2.f32 %v2885_v43  ;;  %v4229_v46 = vld [vmem:[%s4876_s3 + $0x60] ss:$16 sps:$4 sm:$0xff]   ;;  %v4326_v45 = vld [vmem:[%s4875_s2 + $0x8c] ss:$16 sps:$4 sm:$0xff]  }
 0x33f   : > { %3138 = vpow2.f32 %v2886_v44  ;;  %v4276_v44 = vld [vmem:[%s4876_s3 + $0xe4] ss:$16 sps:$4 sm:$0xff]   ;;  %5035 = vst [vmem:[#allocation13_spill] sm:$0xff] %v4326_v45  ;;  %v4332_v47 = vld [vmem:[%s4875_s2 + $0x80] ss:$16 sps:$4 sm:$0xff]  }
 0x340   : > { %3140 = vtanh.f32 %v1431_v49  ;;  %5036 = vst [vmem:[#allocation8_spill] sm:$0xff] %v4332_v47  ;;  %v4344_v49 = vld [vmem:[%s4875_s2 + $0xa4] ss:$16 sps:$4 sm:$0xff]  }
 0x341   : > { %3142 = vpow2.f32 %v2887_v26  ;;  %5038 = vst [vmem:[#allocation11_spill] sm:$0xff] %v4344_v49  ;;  %v4356_v26 = vld [vmem:[%s4875_s2 + $0xa0] ss:$16 sps:$4 sm:$0xff]  }
 0x342   : > { %5040 = vst [vmem:[#allocation12_spill] sm:$0xff] %v4356_v26 }
 0x345   : > { %v3135_v17 = vpop.eup %3134 }
 0x346   : > { %v1334_v1 = vmul.f32 %v3135_v17, %v3133_v48  ;;  %v4338_v48 = vld [vmem:[%s4875_s2 + $0x88] ss:$16 sps:$4 sm:$0xff]   ;;  %v4350_v17 = vld [vmem:[%s4875_s2 + $0xac] ss:$16 sps:$4 sm:$0xff]  }
 0x347   : > { %5037 = vst [vmem:[#allocation14_spill] sm:$0xff] %v4338_v48  ;;  %5039 = vst [vmem:[#allocation17_spill] sm:$0xff] %v4350_v17 }
 0x348   : > { %v3137_v34 = vpop.eup %3136  ;;  %v1335_v25 = vmul.f32 %v1334_v1, %v3920_v18  ;;  %v1466_v4 = vpack.c.bf16 %v1334_v1, %v1334_v1  ;;  %v4362_v1 = vld [vmem:[%s4875_s2 + $0xa8] ss:$16 sps:$4 sm:$0xff]  }
 0x349   : > { %v1441_v12 = vadd.f32 1.0, %v3137_v34  ;;  %v3139_v5 = vpop.eup %3138  ;;  %5041 = vst [vmem:[#allocation18_spill] sm:$0xff] %v4362_v1  ;;  %v4368_v34 = vld [vmem:[%s4875_s2 + $0xc4] ss:$16 sps:$4 sm:$0xff]  }
 0x34a   : > { %v1442_v6 = vadd.f32 1.0, %v3139_v5  ;;  %2882 = vst [vmem:[%s3479_s17 + $0x10] sm:$0xff] %v1335_v25  ;;  %1500 = vmatmul.mubr.bf16.vlgmr.msra.gmra.mrb[24].mxu0 %v1466_v4  ;;  %1541 = vmatmul.mubr.bf16.vlgmr.msra.gmra.mrb[24].mxu1 %v1466_v4  ;;  %v3141_v9 = vpop.eup %3140  ;;  %5042 = vst [vmem:[#allocation15_spill] sm:$0xff] %v4368_v34  ;;  %v4380_v25 = vld [vmem:[%s4875_s2 + $0xc0] ss:$16 sps:$4 sm:$0xff]  }
 0x34b   : > { %3144 = vrcp.f32 %v1441_v12  ;;  %1589 = vmatpush1.bf16.msra.mxu0 %v4164_v7  ;;  %1630 = vmatpush1.bf16.msra.mxu1 %v4170_v33  ;;  %v3143_v39 = vpop.eup %3142  ;;  %v4374_v12 = vld [vmem:[%s4875_s2 + $0xcc] ss:$16 sps:$4 sm:$0xff]   ;;  %5044 = vst [vmem:[#allocation16_spill] sm:$0xff] %v4380_v25  ;;  %v4386_v4 = vld [vmem:[%s4875_s2 + $0xc8] ss:$16 sps:$4 sm:$0xff]  }
 0x34c   : > { %3146 = vrcp.f32 %v1442_v6  ;;  %1590 = vmatprep.subr.bf16.mxu0 %v4176_v27  ;;  %1631 = vmatprep.subr.bf16.mxu1 %v4182_v10  ;;  %v1443_v43 = vadd.f32 1.0, %v3143_v39  ;;  %5043 = vst [vmem:[#allocation21_spill] sm:$0xff] %v4374_v12  ;;  %5045 = vst [vmem:[#allocation22_spill] sm:$0xff] %v4386_v4  ;;  %v4392_v5 = vld [vmem:[%s4875_s2 + $0xe4] ss:$16 sps:$4 sm:$0xff]  }
 0x34d   : > { %1620 = vmatprep.mubr.bf16.mxu0 %v4992_v63  ;;  %1661 = vmatprep.mubr.bf16.mxu1 %v4992_v63  ;;  %5046 = vst [vmem:[#allocation19_spill] sm:$0xff] %v4392_v5  ;;  %v4398_v6 = vld [vmem:[%s4875_s2 + $0xec] ss:$16 sps:$4 sm:$0xff]   ;;  %v4410_v39 = vld [vmem:[%s4875_s2 + $0xe8] ss:$16 sps:$4 sm:$0xff]  }
 0x34e   : > { %3148 = vrcp.f32 %v1443_v43  ;;  %5047 = vst [vmem:[#allocation23_spill] sm:$0xff] %v4398_v6  ;;  %5049 = vst [vmem:[#allocation24_spill] sm:$0xff] %v4410_v39 }
 0x34f   : > { %1591 = vmatpush1.bf16.msra.mxu0 %v4190_v14  ;;  %1632 = vmatpush1.bf16.msra.mxu1 %v4196_v29 }
 0x350   : > { %1592 = vmatprep.subr.bf16.mxu0 %v4202_v24  ;;  %1633 = vmatprep.subr.bf16.mxu1 %v4208_v23 }
 0x353   : > { %1593 = vmatpush1.bf16.msra.mxu0 %v4214_v30  ;;  %1634 = vmatpush1.bf16.msra.mxu1 %v3766_v50  ;;  %v4236_v50 = vld [vmem:[%s4876_s3 + $0x84] ss:$16 sps:$4 sm:$0xff]  }
 0x354   : > { %1594 = vmatprep.subr.bf16.mxu0 %v4221_v8  ;;  %1635 = vmatprep.subr.bf16.mxu1 %v3772_v51 }
 0x355   : > { %v3145_v36 = vpop.eup %3144 }
 0x356   : > { %v1452_v37 = vmul.f32 %v3145_v36, %v3141_v9  ;;  %v3147_v42 = vpop.eup %3146  ;;  %v4404_v9 = vld [vmem:[%s4875_s2 + $0xe0] ss:$16 sps:$4 sm:$0xff]   ;;  %v4416_v36 = vld [vmem:[%s4876_s3 + $0x4] ss:$16 sps:$4 sm:$0xff]  }
 0x357   : > { %v1451_v40 = vmul.f32 %v3147_v42, %v4031_v41  ;;  %1595 = vmatpush1.bf16.msra.mxu0 %v4229_v46  ;;  %1636 = vmatpush1.bf16.msra.mxu1 %v3790_v54  ;;  %v4246_v41 = vld [vmem:[%s4876_s3 + $0x80] ss:$16 sps:$4 sm:$0xff]   ;;  %v4253_v54 = vld [vmem:[%s4876_s3 + $0xa4] ss:$16 sps:$4 sm:$0xff]   ;;  %5048 = vst [vmem:[#allocation20_spill] sm:$0xff] %v4404_v9  ;;  %5050 = vst [vmem:[#allocation28_spill] sm:$0xff] %v4416_v36 }
 0x358   : > { %1596 = vmatprep.subr.bf16.mxu0 %v4236_v50  ;;  %1637 = vmatprep.subr.bf16.mxu1 %v3796_v55  ;;  %v4260_v55 = vld [vmem:[%s4876_s3 + $0xa0] ss:$16 sps:$4 sm:$0xff]  }
 0x359   : > { %v4240_v51 = vadd.f32 %v1452_v37, %v1451_v40  ;;  %v4422_v37 = vld [vmem:[%s4876_s3 + $0xc] ss:$16 sps:$4 sm:$0xff]   ;;  %v2889_v42 = vld [vmem:[%s3469_s10 + $0x30] sm:$0xff] }
 0x35a   : > { %5051 = vst [vmem:[#allocation29_spill] sm:$0xff] %v4422_v37  ;;  %v1462_v43 = vunpack.c.l.bf16 %v2889_v42  ;;  %v1463_v40 = vunpack.c.h.bf16 %v2889_v42 }
 0x35b   : > { %3150 = vtanh.f32 %v4240_v51  ;;  %1597 = vmatpush1.bf16.msra.mxu0 %v4246_v41  ;;  %1638 = vmatpush1.bf16.msra.mxu1 %v3814_v58  ;;  %v4267_v58 = vld [vmem:[%s4876_s3 + $0xc4] ss:$16 sps:$4 sm:$0xff]  }
 0x35c   : > { %1598 = vmatprep.subr.bf16.mxu0 %v4253_v54  ;;  %1639 = vmatprep.subr.bf16.mxu1 %v3820_v59  ;;  %v3149_v59 = vpop.eup %3148 }
 0x35f   : > { %1599 = vmatpush1.bf16.msra.mxu0 %v4260_v55  ;;  %1640 = vmatpush1.bf16.msra.mxu1 %v3838_v62 }
 0x360   : > { %1600 = vmatprep.subr.bf16.mxu0 %v4267_v58  ;;  %1641 = vmatprep.subr.bf16.mxu1 %v4993_v21 }
 0x363   : > { %1601 = vmatpush1.bf16.msra.mxu0 %v4994_v20  ;;  %1642 = vmatpush1.bf16.msra.mxu1 %v3857_v35  ;;  %v4319_v35 = vld [vmem:[%s4875_s2 + $0x68] ss:$16 sps:$4 sm:$0xff]  }
 0x364   : > { %1602 = vmatprep.subr.bf16.mxu0 %v4276_v44  ;;  %1643 = vmatprep.subr.bf16.mxu1 %v3863_v3  ;;  %v4298_v3 = vld [vmem:[%s4875_s2 + $0x4c] ss:$16 sps:$4 sm:$0xff]   ;;  %5034 = vst [vmem:[#allocation7_spill] sm:$0xff] %v4319_v35 }
 0x365   : > { %v3151_v62 = vpop.eup %3150 }
 0x366   : > { %v1455_v60 = vmul.f32 %v3151_v62, %v3149_v59 }
 0x367   : > { %1603 = vmatpush1.bf16.msra.mxu0 %v3850_v0  ;;  %1644 = vmatpush1.bf16.msra.mxu1 %v3870_v61  ;;  %v4305_v61 = vld [vmem:[%s4875_s2 + $0x48] ss:$16 sps:$4 sm:$0xff]   ;;  %v4312_v0 = vld [vmem:[%s4875_s2 + $0x6c] ss:$16 sps:$4 sm:$0xff]  }
 0x368   : > { %v1456_v21 = vmul.f32 %v1455_v60, %v3960_v31  ;;  %v1587_v20 = vpack.c.bf16 %v1455_v60, %v1455_v60  ;;  %1709 = vmatprep.subr.bf16.mxu0 %v4052_v52  ;;  %1750 = vmatprep.subr.bf16.mxu1 %v4058_v53  ;;  %5032 = vst [vmem:[#allocation6_spill] sm:$0xff] %v4305_v61  ;;  %5033 = vst [vmem:[#allocation10_spill] sm:$0xff] %v4312_v0 }
 0x36a   : > { %2888 = vst [vmem:[%s3484_s21 + $0x28] sm:$0xff] %v1456_v21  ;;  %1621 = vmatmul.mubr.bf16.vlgmr.msra.gmra.mrb[28].mxu0 %v1587_v20  ;;  %1662 = vmatmul.mubr.bf16.vlgmr.msra.gmra.mrb[28].mxu1 %v1587_v20 }
 0x36b   : > { %1710 = vmatpush1.bf16.msra.mxu0 %v4065_v56  ;;  %1751 = vmatpush1.bf16.msra.mxu1 %v4071_v57 }
 0x36c   : > { %1711 = vmatprep.subr.bf16.mxu0 %v4077_v28  ;;  %1752 = vmatprep.subr.bf16.mxu1 %v4083_v38 }
 0x36d   : > { %1741 = vmatprep.mubr.bf16.mxu0 %v4992_v63  ;;  %1782 = vmatprep.mubr.bf16.mxu1 %v4992_v63 }
 0x36f   : > { %1712 = vmatpush1.bf16.msra.mxu0 %v4091_v22  ;;  %1753 = vmatpush1.bf16.msra.mxu1 %v4097_v2 }
 0x370   : > { %1713 = vmatprep.subr.bf16.mxu0 %v4103_v13  ;;  %1754 = vmatprep.subr.bf16.mxu1 %v4298_v3 }
 0x373   : > { %1714 = vmatpush1.bf16.msra.mxu0 %v4110_v19  ;;  %1755 = vmatpush1.bf16.msra.mxu1 %v4305_v61 }
 0x374   : > { %1715 = vmatprep.subr.bf16.mxu0 %v4117_v11  ;;  %1756 = vmatprep.subr.bf16.mxu1 %v4312_v0 }
 0x377   : > { %1716 = vmatpush1.bf16.msra.mxu0 %v4124_v15  ;;  %1757 = vmatpush1.bf16.msra.mxu1 %v4319_v35 }
 0x378   : > { %1717 = vmatprep.subr.bf16.mxu0 %v4131_v16  ;;  %1758 = vmatprep.subr.bf16.mxu1 %v4326_v45 }
 0x37b   : > { %1718 = vmatpush1.bf16.msra.mxu0 %v4332_v47  ;;  %1759 = vmatpush1.bf16.msra.mxu1 %v4338_v48 }
 0x37c   : > { %1719 = vmatprep.subr.bf16.mxu0 %v4344_v49  ;;  %1760 = vmatprep.subr.bf16.mxu1 %v4350_v17 }
 0x37f   : > { %1720 = vmatpush1.bf16.msra.mxu0 %v4356_v26  ;;  %1761 = vmatpush1.bf16.msra.mxu1 %v4362_v1 }
 0x380   : > { %1721 = vmatprep.subr.bf16.mxu0 %v4368_v34  ;;  %1762 = vmatprep.subr.bf16.mxu1 %v4374_v12 }
 0x383   : > { %1722 = vmatpush1.bf16.msra.mxu0 %v4380_v25  ;;  %1763 = vmatpush1.bf16.msra.mxu1 %v4386_v4 }
 0x384   : > { %1723 = vmatprep.subr.bf16.mxu0 %v4392_v5  ;;  %1764 = vmatprep.subr.bf16.mxu1 %v4398_v6 }
 0x387   : > { %1724 = vmatpush1.bf16.msra.mxu0 %v4404_v9  ;;  %1765 = vmatpush1.bf16.msra.mxu1 %v4410_v39  ;;  %v2890_v39 = vld [vmem:[%s3469_s10 + $0x38] sm:$0xff] }
 0x388   : > { %1830 = vmatprep.subr.bf16.mxu0 %v4416_v36  ;;  %1871 = vmatprep.subr.bf16.mxu1 %v4422_v37  ;;  %v1464_v34 = vunpack.c.l.bf16 %v2890_v39  ;;  %v1465_v37 = vunpack.c.h.bf16 %v2890_v39 }
 0x41d   : > { %v1501_v59 = vpop.f32.mrb[24].mxu0  ;;  %v1542_v62 = vpop.f32.mrb[24].mxu1 }
 0x41e   : > { %v1549_v60 = vadd.f32 %v1501_v59, %v1462_v43  ;;  %v1503_v21 = vpop.f32.mrb[25].mxu0  ;;  %v1544_v20 = vpop.f32.mrb[25].mxu1  ;;  %v1551_v1 = vadd.f32 %v1542_v62, %v1464_v34 }
 0x41f   : > { %v1550_v9 = vadd.f32 %v1503_v21, %v1463_v40  ;;  %v1505_v6 = vpop.f32.mrb[26].mxu0  ;;  %v1546_v5 = vpop.f32.mrb[26].mxu1  ;;  %v1552_v42 = vadd.f32 %v1544_v20, %v1465_v37  ;;  %v2896_v20 = vld [vmem:[%s3474_s14 + $0x48] sm:$0xff] }
 0x420   : > { %v2891_v36 = vmul.f32 -1.442695, %v1549_v60  ;;  %v1506_v4 = vpop.f32.mrb[27].mxu0  ;;  %v1547_v25 = vpop.f32.mrb[27].mxu1  ;;  %v2893_v26 = vmul.f32 -1.442695, %v1551_v1 }
 0x421   : > { %v2892_v12 = vmul.f32 -1.442695, %v1550_v9  ;;  %v2895_v4 = vld [vmem:[%s3474_s14 + $0x40] sm:$0xff] }
 0x422   : > { %3152 = vpow2.f32 %v2891_v36  ;;  %v1583_v40 = vunpack.c.l.bf16 %v2895_v4  ;;  %v1584_v34 = vunpack.c.h.bf16 %v2895_v4 }
 0x423   : > { %3154 = vpow2.f32 %v2892_v12 }
 0x424   : > { %3156 = vtanh.f32 %v1552_v42 }
 0x425   : > { %3158 = vpow2.f32 %v2893_v26 }
 0x42c   : > { %v3153_v17 = vpop.eup %3152 }
 0x42d   : > { %v1562_v43 = vadd.f32 1.0, %v3153_v17  ;;  %v3155_v59 = vpop.eup %3154 }
 0x42e   : > { %v1563_v6 = vadd.f32 1.0, %v3155_v59  ;;  %v3157_v5 = vpop.eup %3156 }
 0x42f   : > { %3160 = vrcp.f32 %v1562_v43  ;;  %v3159_v25 = vpop.eup %3158 }
 0x430   : > { %3162 = vrcp.f32 %v1563_v6  ;;  %v1564_v39 = vadd.f32 1.0, %v3159_v25 }
 0x432   : > { %3164 = vrcp.f32 %v1564_v39 }
 0x439   : > { %v3161_v9 = vpop.eup %3160 }
 0x43a   : > { %v1573_v36 = vmul.f32 %v3161_v9, %v3157_v5  ;;  %v3163_v12 = vpop.eup %3162  ;;  %v1586_v9 = vunpack.c.h.bf16 %v2896_v20 }
 0x43b   : > { %v1572_v1 = vmul.f32 %v3163_v12, %v4155_v32  ;;  %v1585_v32 = vunpack.c.l.bf16 %v2896_v20 }
 0x43d   : > { %v1622_v37 = vpop.f32.mrb[28].mxu0  ;;  %v1663_v17 = vpop.f32.mrb[28].mxu1  ;;  %v4429_v62 = vadd.f32 %v1573_v36, %v1572_v1 }
 0x43e   : > { %v1670_v26 = vadd.f32 %v1622_v37, %v1583_v40  ;;  %v1624_v60 = vpop.f32.mrb[29].mxu0  ;;  %v1665_v21 = vpop.f32.mrb[29].mxu1  ;;  %v1672_v36 = vadd.f32 %v1663_v17, %v1585_v32 }
 0x43f   : > { %v1671_v42 = vadd.f32 %v1624_v60, %v1584_v34  ;;  %v1626_v43 = vpop.f32.mrb[30].mxu0  ;;  %v1667_v59 = vpop.f32.mrb[30].mxu1  ;;  %3166 = vtanh.f32 %v4429_v62  ;;  %v1673_v12 = vadd.f32 %v1665_v21, %v1586_v9  ;;  %v4449_v21 = vld [vmem:[%s4876_s3 + $0x48] ss:$16 sps:$4 sm:$0xff]  }
 0x440   : > { %v2897_v6 = vmul.f32 -1.442695, %v1670_v26  ;;  %v1627_v5 = vpop.f32.mrb[31].mxu0  ;;  %v1668_v25 = vpop.f32.mrb[31].mxu1  ;;  %v2899_v39 = vmul.f32 -1.442695, %v1672_v36 }
 0x441   : > { %v2898_v4 = vmul.f32 -1.442695, %v1671_v42  ;;  %v3165_v40 = vpop.eup %3164  ;;  %v4464_v9 = vld [vmem:[%s4876_s3 + $0x68] ss:$16 sps:$4 sm:$0xff]   ;;  %v4471_v36 = vld [vmem:[%s4876_s3 + $0x8c] ss:$16 sps:$4 sm:$0xff]  }
 0x442   : > { %3168 = vpow2.f32 %v2897_v6  ;;  %v4456_v6 = vld [vmem:[%s4876_s3 + $0x6c] ss:$16 sps:$4 sm:$0xff]  }
 0x443   : > { %3170 = vpow2.f32 %v2898_v4 }
 0x444   : > { %3172 = vtanh.f32 %v1673_v12  ;;  %v4488_v12 = vld [vmem:[%s4876_s3 + $0xac] ss:$16 sps:$4 sm:$0xff]  }
 0x445   : > { %3174 = vpow2.f32 %v2899_v39  ;;  %v4502_v39 = vld [vmem:[%s4876_s3 + $0xcc] ss:$16 sps:$4 sm:$0xff]  }
 0x449   : > { %v3167_v1 = vpop.eup %3166 }
 0x44a   : > { %v1576_v37 = vmul.f32 %v3167_v1, %v3165_v40  ;;  %v4495_v1 = vld [vmem:[%s4876_s3 + $0xa8] ss:$16 sps:$4 sm:$0xff]  }
 0x44c   : > { %v3169_v34 = vpop.eup %3168  ;;  %v1577_v43 = vmul.f32 %v1576_v37, %v3920_v18  ;;  %v1708_v26 = vpack.c.bf16 %v1576_v37, %v1576_v37  ;;  %v4508_v37 = vld [vmem:[%s4876_s3 + $0xc0] ss:$16 sps:$4 sm:$0xff]  }
 0x44d   : > { %v1683_v60 = vadd.f32 1.0, %v3169_v34  ;;  %v3171_v59 = vpop.eup %3170  ;;  %v4514_v34 = vld [vmem:[%s4876_s3 + $0xc8] ss:$16 sps:$4 sm:$0xff]  }
 0x44e   : > { %v1684_v42 = vadd.f32 1.0, %v3171_v59  ;;  %2894 = vst [vmem:[%s3479_s17 + $0x18] sm:$0xff] %v1577_v43  ;;  %1742 = vmatmul.mubr.bf16.vlgmr.msra.gmra.mrb[32].mxu0 %v1708_v26  ;;  %1783 = vmatmul.mubr.bf16.vlgmr.msra.gmra.mrb[32].mxu1 %v1708_v26  ;;  %v3173_v18 = vpop.eup %3172  ;;  %v4521_v43 = vld [vmem:[%s4876_s3 + $0xec] ss:$16 sps:$4 sm:$0xff]  }
 0x44f   : > { %3176 = vrcp.f32 %v1683_v60  ;;  %1831 = vmatpush1.bf16.msra.mxu0 %v4164_v7  ;;  %1872 = vmatpush1.bf16.msra.mxu1 %v4170_v33  ;;  %v3175_v17 = vpop.eup %3174 }
 0x450   : > { %3178 = vrcp.f32 %v1684_v42  ;;  %1832 = vmatprep.subr.bf16.mxu0 %v4176_v27  ;;  %1873 = vmatprep.subr.bf16.mxu1 %v4182_v10  ;;  %v1685_v4 = vadd.f32 1.0, %v3175_v17  ;;  %v4527_v42 = vld [vmem:[%s4876_s3 + $0xe0] ss:$16 sps:$4 sm:$0xff]  }
 0x451   : > { %1862 = vmatprep.mubr.bf16.mxu0 %v4992_v63  ;;  %1903 = vmatprep.mubr.bf16.mxu1 %v4992_v63 }
 0x452   : > { %3180 = vrcp.f32 %v1685_v4  ;;  %v5055_v4 = vld [vmem:[#allocation15_spill] sm:$0xff] }
 0x453   : > { %1833 = vmatpush1.bf16.msra.mxu0 %v4190_v14  ;;  %1874 = vmatpush1.bf16.msra.mxu1 %v4196_v29 }
 0x454   : > { %1834 = vmatprep.subr.bf16.mxu0 %v4202_v24  ;;  %1875 = vmatprep.subr.bf16.mxu1 %v4208_v23 }
 0x457   : > { %1835 = vmatpush1.bf16.msra.mxu0 %v4214_v30  ;;  %1876 = vmatpush1.bf16.msra.mxu1 %v4449_v21 }
 0x458   : > { %1836 = vmatprep.subr.bf16.mxu0 %v4221_v8  ;;  %1877 = vmatprep.subr.bf16.mxu1 %v4456_v6 }
 0x459   : > { %v3177_v20 = vpop.eup %3176 }
 0x45a   : > { %v1694_v5 = vmul.f32 %v3177_v20, %v3173_v18  ;;  %v3179_v25 = vpop.eup %3178  ;;  %v4533_v18 = vld [vmem:[%s4876_s3 + $0xe8] ss:$16 sps:$4 sm:$0xff]  }
 0x45b   : > { %v1693_v32 = vmul.f32 %v3179_v25, %v4240_v51  ;;  %1837 = vmatpush1.bf16.msra.mxu0 %v4229_v46  ;;  %1878 = vmatpush1.bf16.msra.mxu1 %v4464_v9  ;;  %v4481_v51 = vld [vmem:[%s4876_s3 + $0x88] ss:$16 sps:$4 sm:$0xff]   ;;  %v5054_v25 = vld [vmem:[#allocation18_spill] sm:$0xff] }
 0x45c   : > { %1838 = vmatprep.subr.bf16.mxu0 %v4236_v50  ;;  %1879 = vmatprep.subr.bf16.mxu1 %v4471_v36  ;;  %v3181_v60 = vpop.eup %3180 }
 0x45d   : > { %v4474_v40 = vadd.f32 %v1694_v5, %v1693_v32  ;;  %v5053_v5 = vld [vmem:[#allocation12_spill] sm:$0xff]  ;;  %v5056_v32 = vld [vmem:[#allocation21_spill] sm:$0xff] }
 0x45f   : > { %3182 = vtanh.f32 %v4474_v40  ;;  %1839 = vmatpush1.bf16.msra.mxu0 %v4246_v41  ;;  %1880 = vmatpush1.bf16.msra.mxu1 %v4481_v51 }
 0x460   : > { %1840 = vmatprep.subr.bf16.mxu0 %v4253_v54  ;;  %1881 = vmatprep.subr.bf16.mxu1 %v4488_v12 }
 0x463   : > { %1841 = vmatpush1.bf16.msra.mxu0 %v4260_v55  ;;  %1882 = vmatpush1.bf16.msra.mxu1 %v4495_v1 }
 0x464   : > { %1842 = vmatprep.subr.bf16.mxu0 %v4267_v58  ;;  %1883 = vmatprep.subr.bf16.mxu1 %v4502_v39 }
 0x467   : > { %1843 = vmatpush1.bf16.msra.mxu0 %v4508_v37  ;;  %1884 = vmatpush1.bf16.msra.mxu1 %v4514_v34 }
 0x468   : > { %1844 = vmatprep.subr.bf16.mxu0 %v4276_v44  ;;  %1885 = vmatprep.subr.bf16.mxu1 %v4521_v43 }
 0x469   : > { %v3183_v26 = vpop.eup %3182 }
 0x46a   : > { %v1697_v59 = vmul.f32 %v3183_v26, %v3181_v60  ;;  %v5057_v60 = vld [vmem:[#allocation16_spill] sm:$0xff]  ;;  %v5058_v26 = vld [vmem:[#allocation22_spill] sm:$0xff] }
 0x46b   : > { %1845 = vmatpush1.bf16.msra.mxu0 %v4527_v42  ;;  %1886 = vmatpush1.bf16.msra.mxu1 %v4533_v18 }
 0x46c   : > { %v1698_v17 = vmul.f32 %v1697_v59, %v3960_v31  ;;  %v1829_v20 = vpack.c.bf16 %v1697_v59, %v1697_v59  ;;  %1951 = vmatprep.subr.bf16.mxu0 %v4052_v52  ;;  %1992 = vmatprep.subr.bf16.mxu1 %v4058_v53  ;;  %v5052_v31 = vld [vmem:[#allocation17_spill] sm:$0xff]  ;;  %v5059_v59 = vld [vmem:[#allocation19_spill] sm:$0xff] }
 0x46e   : > { %2900 = vst [vmem:[%s3484_s21 + $0x20] sm:$0xff] %v1698_v17  ;;  %1863 = vmatmul.mubr.bf16.vlgmr.msra.gmra.mrb[36].mxu0 %v1829_v20  ;;  %1904 = vmatmul.mubr.bf16.vlgmr.msra.gmra.mrb[36].mxu1 %v1829_v20  ;;  %v5060_v17 = vld [vmem:[#allocation23_spill] sm:$0xff]  ;;  %v5061_v20 = vld [vmem:[#allocation20_spill] sm:$0xff] }
 0x46f   : > { %1952 = vmatpush1.bf16.msra.mxu0 %v4065_v56  ;;  %1993 = vmatpush1.bf16.msra.mxu1 %v4071_v57 }
 0x470   : > { %1953 = vmatprep.subr.bf16.mxu0 %v4077_v28  ;;  %1994 = vmatprep.subr.bf16.mxu1 %v4083_v38 }
 0x471   : > { %1983 = vmatprep.mubr.bf16.mxu0 %v4992_v63  ;;  %2024 = vmatprep.mubr.bf16.mxu1 %v4992_v63 }
 0x473   : > { %1954 = vmatpush1.bf16.msra.mxu0 %v4091_v22  ;;  %1995 = vmatpush1.bf16.msra.mxu1 %v4097_v2 }
 0x474   : > { %1955 = vmatprep.subr.bf16.mxu0 %v4103_v13  ;;  %1996 = vmatprep.subr.bf16.mxu1 %v4298_v3 }
 0x477   : > { %1956 = vmatpush1.bf16.msra.mxu0 %v4110_v19  ;;  %1997 = vmatpush1.bf16.msra.mxu1 %v4305_v61 }
 0x478   : > { %1957 = vmatprep.subr.bf16.mxu0 %v4117_v11  ;;  %1998 = vmatprep.subr.bf16.mxu1 %v4312_v0 }
 0x47b   : > { %1958 = vmatpush1.bf16.msra.mxu0 %v4124_v15  ;;  %1999 = vmatpush1.bf16.msra.mxu1 %v4319_v35 }
 0x47c   : > { %1959 = vmatprep.subr.bf16.mxu0 %v4131_v16  ;;  %2000 = vmatprep.subr.bf16.mxu1 %v4326_v45  ;;  %v2902_v16 = vld [vmem:[%s3469_s10 + $0x48] sm:$0xff] }
 0x47f   : > { %1960 = vmatpush1.bf16.msra.mxu0 %v4332_v47  ;;  %2001 = vmatpush1.bf16.msra.mxu1 %v4338_v48 }
 0x480   : > { %1961 = vmatprep.subr.bf16.mxu0 %v4344_v49  ;;  %2002 = vmatprep.subr.bf16.mxu1 %v5052_v31  ;;  %v5062_v31 = vld [vmem:[#allocation24_spill] sm:$0xff] }
 0x483   : > { %1962 = vmatpush1.bf16.msra.mxu0 %v5053_v5  ;;  %2003 = vmatpush1.bf16.msra.mxu1 %v5054_v25  ;;  %v5063_v5 = vld [vmem:[#allocation28_spill] sm:$0xff]  ;;  %v5064_v25 = vld [vmem:[#allocation29_spill] sm:$0xff] }
 0x484   : > { %1963 = vmatprep.subr.bf16.mxu0 %v5055_v4  ;;  %2004 = vmatprep.subr.bf16.mxu1 %v5056_v32  ;;  %v2901_v4 = vld [vmem:[%s3469_s10 + $0x40] sm:$0xff] }
 0x485   : > { %v1704_v49 = vunpack.c.l.bf16 %v2901_v4  ;;  %v1705_v32 = vunpack.c.h.bf16 %v2901_v4 }
 0x487   : > { %1964 = vmatpush1.bf16.msra.mxu0 %v5057_v60  ;;  %2005 = vmatpush1.bf16.msra.mxu1 %v5058_v26 }
 0x488   : > { %1965 = vmatprep.subr.bf16.mxu0 %v5059_v59  ;;  %2006 = vmatprep.subr.bf16.mxu1 %v5060_v17 }
 0x48b   : > { %1966 = vmatpush1.bf16.msra.mxu0 %v5061_v20  ;;  %2007 = vmatpush1.bf16.msra.mxu1 %v5062_v31 }
 0x48c   : > { %2072 = vmatprep.subr.bf16.mxu0 %v5063_v5  ;;  %2113 = vmatprep.subr.bf16.mxu1 %v5064_v25  ;;  %v1706_v5 = vunpack.c.l.bf16 %v2902_v16  ;;  %v1707_v25 = vunpack.c.h.bf16 %v2902_v16 }
 0x521   : > { %v1743_v48 = vpop.f32.mrb[32].mxu0  ;;  %v1784_v60 = vpop.f32.mrb[32].mxu1 }
 0x522   : > { %v1791_v47 = vadd.f32 %v1743_v48, %v1704_v49  ;;  %v1745_v45 = vpop.f32.mrb[33].mxu0  ;;  %v1786_v26 = vpop.f32.mrb[33].mxu1  ;;  %v1793_v11 = vadd.f32 %v1784_v60, %v1706_v5 }
 0x523   : > { %v1792_v59 = vadd.f32 %v1745_v45, %v1705_v32  ;;  %v1747_v35 = vpop.f32.mrb[34].mxu0  ;;  %v1788_v17 = vpop.f32.mrb[34].mxu1  ;;  %v1794_v4 = vadd.f32 %v1786_v26, %v1707_v25 }
 0x524   : > { %v2903_v15 = vmul.f32 -1.442695, %v1791_v47  ;;  %v1748_v20 = vpop.f32.mrb[35].mxu0  ;;  %v1789_v0 = vpop.f32.mrb[35].mxu1  ;;  %v2905_v61 = vmul.f32 -1.442695, %v1793_v11 }
 0x525   : > { %v2904_v31 = vmul.f32 -1.442695, %v1792_v59  ;;  %v2907_v47 = vld [vmem:[%s3474_s14 + $0x30] sm:$0xff]  ;;  %v2908_v20 = vld [vmem:[%s3474_s14 + $0x38] sm:$0xff] }
 0x526   : > { %3184 = vpow2.f32 %v2903_v15  ;;  %v1825_v59 = vunpack.c.l.bf16 %v2907_v47  ;;  %v1826_v5 = vunpack.c.h.bf16 %v2907_v47 }
 0x527   : > { %3186 = vpow2.f32 %v2904_v31 }
 0x528   : > { %3188 = vtanh.f32 %v1794_v4 }
 0x529   : > { %3190 = vpow2.f32 %v2905_v61 }
 0x530   : > { %v3185_v19 = vpop.eup %3184 }
 0x531   : > { %v1804_v48 = vadd.f32 1.0, %v3185_v19  ;;  %v3187_v49 = vpop.eup %3186 }
 0x532   : > { %v1805_v35 = vadd.f32 1.0, %v3187_v49  ;;  %v3189_v45 = vpop.eup %3188 }
 0x533   : > { %3192 = vrcp.f32 %v1804_v48  ;;  %v3191_v0 = vpop.eup %3190 }
 0x534   : > { %3194 = vrcp.f32 %v1805_v35  ;;  %v1806_v16 = vadd.f32 1.0, %v3191_v0 }
 0x536   : > { %3196 = vrcp.f32 %v1806_v16 }
 0x53d   : > { %v3193_v15 = vpop.eup %3192 }
 0x53e   : > { %v1815_v32 = vmul.f32 %v3193_v15, %v3189_v45  ;;  %v3195_v31 = vpop.eup %3194  ;;  %v1828_v15 = vunpack.c.h.bf16 %v2908_v20 }
 0x53f   : > { %v1814_v11 = vmul.f32 %v3195_v31, %v4429_v62  ;;  %v1827_v62 = vunpack.c.l.bf16 %v2908_v20 }
 0x541   : > { %v1864_v25 = vpop.f32.mrb[36].mxu0  ;;  %v1905_v19 = vpop.f32.mrb[36].mxu1  ;;  %v4578_v60 = vadd.f32 %v1815_v32, %v1814_v11 }
 0x542   : > { %v1912_v61 = vadd.f32 %v1864_v25, %v1825_v59  ;;  %v1866_v26 = vpop.f32.mrb[37].mxu0  ;;  %v1907_v17 = vpop.f32.mrb[37].mxu1  ;;  %v1914_v32 = vadd.f32 %v1905_v19, %v1827_v62 }
 0x543   : > { %v1913_v4 = vadd.f32 %v1866_v26, %v1826_v5  ;;  %v1868_v48 = vpop.f32.mrb[38].mxu0  ;;  %v1909_v49 = vpop.f32.mrb[38].mxu1  ;;  %3198 = vtanh.f32 %v4578_v60  ;;  %v1915_v31 = vadd.f32 %v1907_v17, %v1828_v15 }
 0x544   : > { %v2909_v35 = vmul.f32 -1.442695, %v1912_v61  ;;  %v1869_v45 = vpop.f32.mrb[39].mxu0  ;;  %v1910_v0 = vpop.f32.mrb[39].mxu1  ;;  %v2911_v16 = vmul.f32 -1.442695, %v1914_v32 }
 0x545   : > { %v2910_v47 = vmul.f32 -1.442695, %v1913_v4  ;;  %v3197_v59 = vpop.eup %3196  ;;  %v4585_v61 = vld [vmem:[%s4877_s4] sm:$0xff] }
 0x546   : > { %3200 = vpow2.f32 %v2909_v35 }
 0x547   : > { %3202 = vpow2.f32 %v2910_v47 }
 0x548   : > { %3204 = vtanh.f32 %v1915_v31  ;;  %v4628_v31 = vld [vmem:[%s4878_s5] sm:$0xff] }
 0x549   : > { %3206 = vpow2.f32 %v2911_v16 }
 0x54d   : > { %v3199_v11 = vpop.eup %3198 }
 0x54e   : > { %v1818_v25 = vmul.f32 %v3199_v11, %v3197_v59 }
 0x550   : > { %v3201_v5 = vpop.eup %3200  ;;  %v1819_v4 = vmul.f32 %v4585_v61, %v1818_v25  ;;  %v1950_v48 = vpack.c.bf16 %v1818_v25, %v1818_v25  ;;  %v5071_v25 = vld [vmem:[#allocation9_spill] sm:$0xff] }
 0x551   : > { %v1925_v26 = vadd.f32 1.0, %v3201_v5  ;;  %v3203_v49 = vpop.eup %3202  ;;  %v5075_v5 = vld [vmem:[#allocation11_spill] sm:$0xff] }
 0x552   : > { %v1926_v19 = vadd.f32 1.0, %v3203_v49  ;;  %2906 = vst [vmem:[%s3479_s17 + $0x20] sm:$0xff] %v1819_v4  ;;  %1984 = vmatmul.mubr.bf16.vlgmr.msra.gmra.mrb[40].mxu0 %v1950_v48  ;;  %2025 = vmatmul.mubr.bf16.vlgmr.msra.gmra.mrb[40].mxu1 %v1950_v48  ;;  %v3205_v17 = vpop.eup %3204  ;;  %v5077_v4 = vld [vmem:[#allocation12_spill] sm:$0xff]  ;;  %v5078_v48 = vld [vmem:[#allocation18_spill] sm:$0xff]  ;;  %v5079_v49 = vld [vmem:[#allocation15_spill] sm:$0xff] }
 0x553   : > { %3208 = vrcp.f32 %v1925_v26  ;;  %2073 = vmatpush1.bf16.msra.mxu0 %v4164_v7  ;;  %2114 = vmatpush1.bf16.msra.mxu1 %v4170_v33  ;;  %v3207_v20 = vpop.eup %3206  ;;  %v5076_v26 = vld [vmem:[#allocation17_spill] sm:$0xff] }
 0x554   : > { %3210 = vrcp.f32 %v1926_v19  ;;  %2074 = vmatprep.subr.bf16.mxu0 %v4176_v27  ;;  %2115 = vmatprep.subr.bf16.mxu1 %v4182_v10  ;;  %v1927_v47 = vadd.f32 1.0, %v3207_v20  ;;  %v5080_v19 = vld [vmem:[#allocation21_spill] sm:$0xff]  ;;  %v5082_v20 = vld [vmem:[#allocation22_spill] sm:$0xff] }
 0x555   : > { %2104 = vmatprep.mubr.bf16.mxu0 %v4992_v63  ;;  %2145 = vmatprep.mubr.bf16.mxu1 %v4992_v63 }
 0x556   : > { %3212 = vrcp.f32 %v1927_v47  ;;  %v5086_v47 = vld [vmem:[#allocation24_spill] sm:$0xff] }
 0x557   : > { %2075 = vmatpush1.bf16.msra.mxu0 %v4190_v14  ;;  %2116 = vmatpush1.bf16.msra.mxu1 %v4196_v29 }
 0x558   : > { %2076 = vmatprep.subr.bf16.mxu0 %v4202_v24  ;;  %2117 = vmatprep.subr.bf16.mxu1 %v4208_v23 }
 0x55b   : > { %2077 = vmatpush1.bf16.msra.mxu0 %v4214_v30  ;;  %2118 = vmatpush1.bf16.msra.mxu1 %v4449_v21 }
 0x55c   : > { %2078 = vmatprep.subr.bf16.mxu0 %v4221_v8  ;;  %2119 = vmatprep.subr.bf16.mxu1 %v4456_v6 }
 0x55d   : > { %v3209_v35 = vpop.eup %3208 }
 0x55e   : > { %v1936_v45 = vmul.f32 %v3209_v35, %v3205_v17  ;;  %v3211_v0 = vpop.eup %3210  ;;  %v5081_v17 = vld [vmem:[#allocation16_spill] sm:$0xff]  ;;  %v5083_v35 = vld [vmem:[#allocation19_spill] sm:$0xff] }
 0x55f   : > { %v1935_v62 = vmul.f32 %v3211_v0, %v4474_v40  ;;  %2079 = vmatpush1.bf16.msra.mxu0 %v4229_v46  ;;  %2120 = vmatpush1.bf16.msra.mxu1 %v4464_v9  ;;  %v5085_v0 = vld [vmem:[#allocation20_spill] sm:$0xff] }
 0x560   : > { %2080 = vmatprep.subr.bf16.mxu0 %v4236_v50  ;;  %2121 = vmatprep.subr.bf16.mxu1 %v4471_v36  ;;  %v3213_v40 = vpop.eup %3212 }
 0x561   : > { %v4608_v15 = vadd.f32 %v1936_v45, %v1935_v62  ;;  %v5084_v45 = vld [vmem:[#allocation23_spill] sm:$0xff]  ;;  %v5087_v62 = vld [vmem:[#allocation28_spill] sm:$0xff] }
 0x563   : > { %3214 = vtanh.f32 %v4608_v15  ;;  %2081 = vmatpush1.bf16.msra.mxu0 %v4246_v41  ;;  %2122 = vmatpush1.bf16.msra.mxu1 %v4481_v51 }
 0x564   : > { %2082 = vmatprep.subr.bf16.mxu0 %v4253_v54  ;;  %2123 = vmatprep.subr.bf16.mxu1 %v4488_v12 }
 0x567   : > { %2083 = vmatpush1.bf16.msra.mxu0 %v4260_v55  ;;  %2124 = vmatpush1.bf16.msra.mxu1 %v4495_v1 }
 0x568   : > { %2084 = vmatprep.subr.bf16.mxu0 %v4267_v58  ;;  %2125 = vmatprep.subr.bf16.mxu1 %v4502_v39 }
 0x56b   : > { %2085 = vmatpush1.bf16.msra.mxu0 %v4508_v37  ;;  %2126 = vmatpush1.bf16.msra.mxu1 %v4514_v34 }
 0x56c   : > { %2086 = vmatprep.subr.bf16.mxu0 %v4276_v44  ;;  %2127 = vmatprep.subr.bf16.mxu1 %v4521_v43 }
 0x56d   : > { %v3215_v32 = vpop.eup %3214 }
 0x56e   : > { %v1939_v59 = vmul.f32 %v3215_v32, %v3213_v40  ;;  %v5088_v40 = vld [vmem:[#allocation29_spill] sm:$0xff]  ;;  %v2913_v32 = vld [vmem:[%s3469_s10 + $0x50] sm:$0xff] }
 0x56f   : > { %2087 = vmatpush1.bf16.msra.mxu0 %v4527_v42  ;;  %2128 = vmatpush1.bf16.msra.mxu1 %v4533_v18 }
 0x570   : > { %v1940_v11 = vmul.f32 %v4628_v31, %v1939_v59  ;;  %v2071_v16 = vpack.c.bf16 %v1939_v59, %v1939_v59  ;;  %2193 = vmatprep.subr.bf16.mxu0 %v4052_v52  ;;  %2234 = vmatprep.subr.bf16.mxu1 %v4058_v53  ;;  %v5065_v52 = vld [vmem:[#allocation27_spill] sm:$0xff]  ;;  %v5066_v53 = vld [vmem:[#allocation6_spill] sm:$0xff]  ;;  %v1946_v59 = vunpack.c.l.bf16 %v2913_v32 }
 0x572   : > { %2912 = vst [vmem:[%s3484_s21 + $0x18] sm:$0xff] %v1940_v11  ;;  %2105 = vmatmul.mubr.bf16.vlgmr.msra.gmra.mrb[44].mxu0 %v2071_v16  ;;  %2146 = vmatmul.mubr.bf16.vlgmr.msra.gmra.mrb[44].mxu1 %v2071_v16  ;;  %v1947_v11 = vunpack.c.h.bf16 %v2913_v32 }
 0x573   : > { %2194 = vmatpush1.bf16.msra.mxu0 %v4065_v56  ;;  %2235 = vmatpush1.bf16.msra.mxu1 %v4071_v57  ;;  %v5067_v56 = vld [vmem:[#allocation25_spill] sm:$0xff]  ;;  %v5068_v57 = vld [vmem:[#allocation10_spill] sm:$0xff] }
 0x574   : > { %2195 = vmatprep.subr.bf16.mxu0 %v4077_v28  ;;  %2236 = vmatprep.subr.bf16.mxu1 %v4083_v38  ;;  %v5069_v28 = vld [vmem:[#allocation26_spill] sm:$0xff]  ;;  %v5070_v38 = vld [vmem:[#allocation7_spill] sm:$0xff] }
 0x575   : > { %2225 = vmatprep.mubr.bf16.mxu0 %v4992_v63  ;;  %2266 = vmatprep.mubr.bf16.mxu1 %v4992_v63 }
 0x577   : > { %2196 = vmatpush1.bf16.msra.mxu0 %v4091_v22  ;;  %2237 = vmatpush1.bf16.msra.mxu1 %v4097_v2  ;;  %v5072_v22 = vld [vmem:[#allocation13_spill] sm:$0xff]  ;;  %v5073_v2 = vld [vmem:[#allocation8_spill] sm:$0xff] }
 0x578   : > { %2197 = vmatprep.subr.bf16.mxu0 %v4103_v13  ;;  %2238 = vmatprep.subr.bf16.mxu1 %v4298_v3  ;;  %v5074_v13 = vld [vmem:[#allocation14_spill] sm:$0xff] }
 0x57b   : > { %2198 = vmatpush1.bf16.msra.mxu0 %v5065_v52  ;;  %2239 = vmatpush1.bf16.msra.mxu1 %v5066_v53 }
 0x57c   : > { %2199 = vmatprep.subr.bf16.mxu0 %v5067_v56  ;;  %2240 = vmatprep.subr.bf16.mxu1 %v5068_v57 }
 0x57f   : > { %2200 = vmatpush1.bf16.msra.mxu0 %v5069_v28  ;;  %2241 = vmatpush1.bf16.msra.mxu1 %v5070_v38 }
 0x580   : > { %2201 = vmatprep.subr.bf16.mxu0 %v5071_v25  ;;  %2242 = vmatprep.subr.bf16.mxu1 %v5072_v22 }
 0x583   : > { %2202 = vmatpush1.bf16.msra.mxu0 %v5073_v2  ;;  %2243 = vmatpush1.bf16.msra.mxu1 %v5074_v13 }
 0x584   : > { %2203 = vmatprep.subr.bf16.mxu0 %v5075_v5  ;;  %2244 = vmatprep.subr.bf16.mxu1 %v5076_v26 }
 0x587   : > { %2204 = vmatpush1.bf16.msra.mxu0 %v5077_v4  ;;  %2245 = vmatpush1.bf16.msra.mxu1 %v5078_v48 }
 0x588   : > { %2205 = vmatprep.subr.bf16.mxu0 %v5079_v49  ;;  %2246 = vmatprep.subr.bf16.mxu1 %v5080_v19 }
 0x58b   : > { %2206 = vmatpush1.bf16.msra.mxu0 %v5081_v17  ;;  %2247 = vmatpush1.bf16.msra.mxu1 %v5082_v20  ;;  %v2914_v20 = vld [vmem:[%s3469_s10 + $0x58] sm:$0xff] }
 0x58c   : > { %2207 = vmatprep.subr.bf16.mxu0 %v5083_v35  ;;  %2248 = vmatprep.subr.bf16.mxu1 %v5084_v45 }
 0x58f   : > { %2208 = vmatpush1.bf16.msra.mxu0 %v5085_v0  ;;  %2249 = vmatpush1.bf16.msra.mxu1 %v5086_v47 }
 0x590   : > { %2314 = vmatprep.subr.bf16.mxu0 %v5087_v62  ;;  %2355 = vmatprep.subr.bf16.mxu1 %v5088_v40  ;;  %v1948_v62 = vunpack.c.l.bf16 %v2914_v20  ;;  %v1949_v40 = vunpack.c.h.bf16 %v2914_v20 }
 0x625   : > { %v1985_v16 = vpop.f32.mrb[40].mxu0  ;;  %v2026_v52 = vpop.f32.mrb[40].mxu1 }
 0x626   : > { %v2033_v56 = vadd.f32 %v1985_v16, %v1946_v59  ;;  %v1987_v28 = vpop.f32.mrb[41].mxu0  ;;  %v2028_v25 = vpop.f32.mrb[41].mxu1  ;;  %v2035_v48 = vadd.f32 %v2026_v52, %v1948_v62 }
 0x627   : > { %v2034_v35 = vadd.f32 %v1987_v28, %v1947_v11  ;;  %v1989_v17 = vpop.f32.mrb[42].mxu0  ;;  %v2030_v45 = vpop.f32.mrb[42].mxu1  ;;  %v2036_v32 = vadd.f32 %v2028_v25, %v1949_v40  ;;  %v2920_v25 = vld [vmem:[%s3474_s14 + $0x28] sm:$0xff] }
 0x628   : > { %v2915_v19 = vmul.f32 -1.442695, %v2033_v56  ;;  %v1990_v0 = vpop.f32.mrb[43].mxu0  ;;  %v2031_v49 = vpop.f32.mrb[43].mxu1  ;;  %v2917_v4 = vmul.f32 -1.442695, %v2035_v48 }
 0x629   : > { %v2916_v47 = vmul.f32 -1.442695, %v2034_v35  ;;  %v2919_v0 = vld [vmem:[%s3474_s14 + $0x20] sm:$0xff] }
 0x62a   : > { %3216 = vpow2.f32 %v2915_v19  ;;  %v2067_v11 = vunpack.c.l.bf16 %v2919_v0  ;;  %v2068_v62 = vunpack.c.h.bf16 %v2919_v0 }
 0x62b   : > { %3218 = vpow2.f32 %v2916_v47 }
 0x62c   : > { %3220 = vtanh.f32 %v2036_v32 }
 0x62d   : > { %3222 = vpow2.f32 %v2917_v4 }
 0x634   : > { %v3217_v26 = vpop.eup %3216 }
 0x635   : > { %v2046_v59 = vadd.f32 1.0, %v3217_v26  ;;  %v3219_v16 = vpop.eup %3218 }
 0x636   : > { %v2047_v17 = vadd.f32 1.0, %v3219_v16  ;;  %v3221_v45 = vpop.eup %3220 }
 0x637   : > { %3224 = vrcp.f32 %v2046_v59  ;;  %v3223_v49 = vpop.eup %3222 }
 0x638   : > { %3226 = vrcp.f32 %v2047_v17  ;;  %v2048_v20 = vadd.f32 1.0, %v3223_v49 }
 0x63a   : > { %3228 = vrcp.f32 %v2048_v20 }
 0x641   : > { %v3225_v19 = vpop.eup %3224 }
 0x642   : > { %v2057_v35 = vmul.f32 %v3225_v19, %v3221_v45  ;;  %v3227_v47 = vpop.eup %3226  ;;  %v2070_v19 = vunpack.c.h.bf16 %v2920_v25 }
 0x643   : > { %v2056_v48 = vmul.f32 %v3227_v47, %v4578_v60  ;;  %v2069_v60 = vunpack.c.l.bf16 %v2920_v25  ;;  %v3385_v25 = vld [vmem:[%s4875_s2 + $0x28] ss:$16 sps:$4 sm:$0xff]  }
 0x645   : > { %v2106_v40 = vpop.f32.mrb[44].mxu0  ;;  %v2147_v26 = vpop.f32.mrb[44].mxu1  ;;  %v4672_v52 = vadd.f32 %v2057_v35, %v2056_v48 }
 0x646   : > { %v2154_v4 = vadd.f32 %v2106_v40, %v2067_v11  ;;  %v2108_v56 = vpop.f32.mrb[45].mxu0  ;;  %v2149_v28 = vpop.f32.mrb[45].mxu1  ;;  %v2156_v35 = vadd.f32 %v2147_v26, %v2069_v60  ;;  %v5091_v60 = vld [vmem:[#allocation18_spill] sm:$0xff] }
 0x647   : > { %v2155_v32 = vadd.f32 %v2108_v56, %v2068_v62  ;;  %v2110_v59 = vpop.f32.mrb[46].mxu0  ;;  %v2151_v16 = vpop.f32.mrb[46].mxu1  ;;  %3230 = vtanh.f32 %v4672_v52  ;;  %v2157_v47 = vadd.f32 %v2149_v28, %v2070_v19  ;;  %v3384_v28 = vld [vmem:[%s4875_s2 + $0x20] ss:$16 sps:$4 sm:$0xff]   ;;  %v5093_v19 = vld [vmem:[#allocation21_spill] sm:$0xff] }
 0x648   : > { %v2921_v17 = vmul.f32 -1.442695, %v2154_v4  ;;  %v2111_v45 = vpop.f32.mrb[47].mxu0  ;;  %v2152_v49 = vpop.f32.mrb[47].mxu1  ;;  %v2923_v20 = vmul.f32 -1.442695, %v2156_v35 }
 0x649   : > { %v2922_v0 = vmul.f32 -1.442695, %v2155_v32  ;;  %v3229_v11 = vpop.eup %3228  ;;  %v3387_v45 = vld [vmem:[%s4875_s2 + $0x40] ss:$16 sps:$4 sm:$0xff]   ;;  %v3388_v49 = vld [vmem:[%s4875_s2 + $0x64] ss:$16 sps:$4 sm:$0xff]  }
 0x64a   : > { %3232 = vpow2.f32 %v2921_v17  ;;  %v3386_v17 = vld [vmem:[%s4875_s2 + $0x44] ss:$16 sps:$4 sm:$0xff]  }
 0x64b   : > { %3234 = vpow2.f32 %v2922_v0  ;;  %v3389_v0 = vld [vmem:[%s4875_s2 + $0x60] ss:$16 sps:$4 sm:$0xff]  }
 0x64c   : > { %3236 = vtanh.f32 %v2157_v47  ;;  %v5094_v35 = vld [vmem:[#allocation16_spill] sm:$0xff] }
 0x64d   : > { %3238 = vpow2.f32 %v2923_v20  ;;  %v5100_v47 = vld [vmem:[#allocation28_spill] sm:$0xff]  ;;  %v2925_v20 = vld [vmem:[%s3469_s10 + $0x60] sm:$0xff] }
 0x651   : > { %v3231_v48 = vpop.eup %3230 }
 0x652   : > { %v2060_v40 = vmul.f32 %v3231_v48, %v3229_v11  ;;  %v5099_v11 = vld [vmem:[#allocation24_spill] sm:$0xff]  ;;  %v5101_v48 = vld [vmem:[#allocation29_spill] sm:$0xff] }
 0x654   : > { %v3233_v62 = vpop.eup %3232  ;;  %v2061_v59 = vmul.f32 %v4585_v61, %v2060_v40  ;;  %v2192_v4 = vpack.c.bf16 %v2060_v40, %v2060_v40  ;;  %v2188_v40 = vunpack.c.l.bf16 %v2925_v20 }
 0x655   : > { %v2167_v56 = vadd.f32 1.0, %v3233_v62  ;;  %v3235_v16 = vpop.eup %3234  ;;  %v2189_v62 = vunpack.c.h.bf16 %v2925_v20 }
 0x656   : > { %v2168_v32 = vadd.f32 1.0, %v3235_v16  ;;  %2918 = vst [vmem:[%s3479_s17 + $0x28] sm:$0xff] %v2061_v59  ;;  %2226 = vmatmul.mubr.bf16.vlgmr.msra.gmra.mrb[48].mxu0 %v2192_v4  ;;  %2267 = vmatmul.mubr.bf16.vlgmr.msra.gmra.mrb[48].mxu1 %v2192_v4 }
 0x657   : > { %3240 = vrcp.f32 %v2167_v56  ;;  %2315 = vmatpush1.bf16.msra.mxu0 %v4164_v7  ;;  %2356 = vmatpush1.bf16.msra.mxu1 %v4170_v33  ;;  %v3237_v7 = vpop.eup %3236 }
 0x658   : > { %3242 = vrcp.f32 %v2168_v32  ;;  %2316 = vmatprep.subr.bf16.mxu0 %v4176_v27  ;;  %2357 = vmatprep.subr.bf16.mxu1 %v4182_v10  ;;  %v3239_v26 = vpop.eup %3238 }
 0x659   : > { %2346 = vmatprep.mubr.bf16.mxu0 %v4992_v63  ;;  %2387 = vmatprep.mubr.bf16.mxu1 %v4992_v63 }
 0x65b   : > { %2317 = vmatpush1.bf16.msra.mxu0 %v4190_v14  ;;  %2358 = vmatpush1.bf16.msra.mxu1 %v4196_v29  ;;  %v2169_v14 = vadd.f32 1.0, %v3239_v26 }
 0x65c   : > { %2318 = vmatprep.subr.bf16.mxu0 %v4202_v24  ;;  %2359 = vmatprep.subr.bf16.mxu1 %v4208_v23 }
 0x65d   : > { %3244 = vrcp.f32 %v2169_v14 }
 0x65f   : > { %2319 = vmatpush1.bf16.msra.mxu0 %v4214_v30  ;;  %2360 = vmatpush1.bf16.msra.mxu1 %v4449_v21 }
 0x660   : > { %2320 = vmatprep.subr.bf16.mxu0 %v4221_v8  ;;  %2361 = vmatprep.subr.bf16.mxu1 %v4456_v6 }
 0x661   : > { %v3241_v33 = vpop.eup %3240 }
 0x662   : > { %v2178_v27 = vmul.f32 %v3241_v33, %v3237_v7  ;;  %v3243_v10 = vpop.eup %3242  ;;  %v2926_v7 = vld [vmem:[%s3469_s10 + $0x68] sm:$0xff] }
 0x663   : > { %v2177_v29 = vmul.f32 %v3243_v10, %v4608_v15  ;;  %2321 = vmatpush1.bf16.msra.mxu0 %v4229_v46  ;;  %2362 = vmatpush1.bf16.msra.mxu1 %v4464_v9  ;;  %v3383_v15 = vld [vmem:[%s4875_s2 + $0x2c] ss:$16 sps:$4 sm:$0xff]  }
 0x664   : > { %2322 = vmatprep.subr.bf16.mxu0 %v4236_v50  ;;  %2363 = vmatprep.subr.bf16.mxu1 %v4471_v36 }
 0x665   : > { %v4697_v24 = vadd.f32 %v2178_v27, %v2177_v29 }
 0x667   : > { %3246 = vtanh.f32 %v4697_v24  ;;  %2323 = vmatpush1.bf16.msra.mxu0 %v4246_v41  ;;  %2364 = vmatpush1.bf16.msra.mxu1 %v4481_v51  ;;  %v3245_v23 = vpop.eup %3244  ;;  %v3378_v41 = vld [vmem:[%s4875_s2 + $0x4] ss:$16 sps:$4 sm:$0xff]  }
 0x668   : > { %2324 = vmatprep.subr.bf16.mxu0 %v4253_v54  ;;  %2365 = vmatprep.subr.bf16.mxu1 %v4488_v12  ;;  %v3379_v54 = vld [vmem:[%s4875_s2 + $0xc] ss:$16 sps:$4 sm:$0xff]  }
 0x66b   : > { %2325 = vmatpush1.bf16.msra.mxu0 %v4260_v55  ;;  %2366 = vmatpush1.bf16.msra.mxu1 %v4495_v1  ;;  %v3380_v55 = vld [vmem:[%s4875_s2] ss:$16 sps:$4 sm:$0xff]  }
 0x66c   : > { %2326 = vmatprep.subr.bf16.mxu0 %v4267_v58  ;;  %2367 = vmatprep.subr.bf16.mxu1 %v4502_v39  ;;  %v3381_v58 = vld [vmem:[%s4875_s2 + $0x8] ss:$16 sps:$4 sm:$0xff]  }
 0x66f   : > { %2327 = vmatpush1.bf16.msra.mxu0 %v4508_v37  ;;  %2368 = vmatpush1.bf16.msra.mxu1 %v4514_v34 }
 0x670   : > { %2328 = vmatprep.subr.bf16.mxu0 %v4276_v44  ;;  %2369 = vmatprep.subr.bf16.mxu1 %v4521_v43  ;;  %v3382_v44 = vld [vmem:[%s4875_s2 + $0x24] ss:$16 sps:$4 sm:$0xff]  }
 0x671   : > { %v3247_v30 = vpop.eup %3246 }
 0x672   : > { %v2181_v8 = vmul.f32 %v3247_v30, %v3245_v23  ;;  %v2190_v30 = vunpack.c.l.bf16 %v2926_v7 }
 0x673   : > { %2329 = vmatpush1.bf16.msra.mxu0 %v4527_v42  ;;  %2370 = vmatpush1.bf16.msra.mxu1 %v4533_v18 }
 0x674   : > { %v2182_v46 = vmul.f32 %v4628_v31, %v2181_v8  ;;  %v2313_v50 = vpack.c.bf16 %v2181_v8, %v2181_v8  ;;  %2435 = vmatprep.subr.bf16.mxu0 %v3378_v41  ;;  %2476 = vmatprep.subr.bf16.mxu1 %v3379_v54  ;;  %v2191_v8 = vunpack.c.h.bf16 %v2926_v7 }
 0x676   : > { %2924 = vst [vmem:[%s3484_s21 + $0x10] sm:$0xff] %v2182_v46  ;;  %2347 = vmatmul.mubr.bf16.vlgmr.msra.gmra.mrb[52].mxu0 %v2313_v50  ;;  %2388 = vmatmul.mubr.bf16.vlgmr.msra.gmra.mrb[52].mxu1 %v2313_v50 }
 0x677   : > { %2436 = vmatpush1.bf16.msra.mxu0 %v3380_v55  ;;  %2477 = vmatpush1.bf16.msra.mxu1 %v3381_v58 }
 0x678   : > { %2437 = vmatprep.subr.bf16.mxu0 %v3382_v44  ;;  %2478 = vmatprep.subr.bf16.mxu1 %v3383_v15 }
 0x679   : > { %2467 = vmatprep.mubr.bf16.mxu0 %v4992_v63  ;;  %2508 = vmatprep.mubr.bf16.mxu1 %v4992_v63 }
 0x67b   : > { %2438 = vmatpush1.bf16.msra.mxu0 %v3384_v28  ;;  %2479 = vmatpush1.bf16.msra.mxu1 %v3385_v25  ;;  %v2931_v28 = vld [vmem:[%s3474_s14 + $0x10] sm:$0xff] }
 0x67c   : > { %2439 = vmatprep.subr.bf16.mxu0 %v3386_v17  ;;  %2480 = vmatprep.subr.bf16.mxu1 %v4298_v3  ;;  %v3390_v3 = vld [vmem:[%s4875_s2 + $0x84] ss:$16 sps:$4 sm:$0xff]  }
 0x67f   : > { %2440 = vmatpush1.bf16.msra.mxu0 %v3387_v45  ;;  %2481 = vmatpush1.bf16.msra.mxu1 %v5066_v53  ;;  %v5089_v53 = vld [vmem:[#allocation17_spill] sm:$0xff] }
 0x680   : > { %2441 = vmatprep.subr.bf16.mxu0 %v3388_v49  ;;  %2482 = vmatprep.subr.bf16.mxu1 %v5068_v57  ;;  %v5090_v57 = vld [vmem:[#allocation12_spill] sm:$0xff]  ;;  %v2309_v49 = vunpack.c.l.bf16 %v2931_v28 }
 0x683   : > { %2442 = vmatpush1.bf16.msra.mxu0 %v3389_v0  ;;  %2483 = vmatpush1.bf16.msra.mxu1 %v5070_v38  ;;  %v5092_v38 = vld [vmem:[#allocation15_spill] sm:$0xff] }
 0x684   : > { %2443 = vmatprep.subr.bf16.mxu0 %v3390_v3  ;;  %2484 = vmatprep.subr.bf16.mxu1 %v5072_v22  ;;  %v5095_v22 = vld [vmem:[#allocation22_spill] sm:$0xff] }
 0x687   : > { %2444 = vmatpush1.bf16.msra.mxu0 %v5073_v2  ;;  %2485 = vmatpush1.bf16.msra.mxu1 %v5074_v13  ;;  %v5096_v2 = vld [vmem:[#allocation19_spill] sm:$0xff] }
 0x688   : > { %2445 = vmatprep.subr.bf16.mxu0 %v5075_v5  ;;  %2486 = vmatprep.subr.bf16.mxu1 %v5089_v53  ;;  %v5097_v13 = vld [vmem:[#allocation23_spill] sm:$0xff]  ;;  %v5098_v5 = vld [vmem:[#allocation20_spill] sm:$0xff]  ;;  %v2310_v53 = vunpack.c.h.bf16 %v2931_v28 }
 0x68b   : > { %2446 = vmatpush1.bf16.msra.mxu0 %v5090_v57  ;;  %2487 = vmatpush1.bf16.msra.mxu1 %v5091_v60 }
 0x68c   : > { %2447 = vmatprep.subr.bf16.mxu0 %v5092_v38  ;;  %2488 = vmatprep.subr.bf16.mxu1 %v5093_v19 }
 0x68f   : > { %2448 = vmatpush1.bf16.msra.mxu0 %v5094_v35  ;;  %2489 = vmatpush1.bf16.msra.mxu1 %v5095_v22 }
 0x690   : > { %2449 = vmatprep.subr.bf16.mxu0 %v5096_v2  ;;  %2490 = vmatprep.subr.bf16.mxu1 %v5097_v13  ;;  %v2932_v13 = vld [vmem:[%s3474_s14 + $0x18] sm:$0xff] }
 0x693   : > { %2450 = vmatpush1.bf16.msra.mxu0 %v5098_v5  ;;  %2491 = vmatpush1.bf16.msra.mxu1 %v5099_v11 }
 0x694   : > { %2555 = vmatprep.subr.bf16.mxu0 %v5100_v47  ;;  %2596 = vmatprep.subr.bf16.mxu1 %v5101_v48 }
 0x729   : > { %v2227_v56 = vpop.f32.mrb[48].mxu0  ;;  %v2268_v59 = vpop.f32.mrb[48].mxu1 }
 0x72a   : > { %v2275_v4 = vadd.f32 %v2227_v56, %v2188_v40  ;;  %v2229_v16 = vpop.f32.mrb[49].mxu0  ;;  %v2270_v32 = vpop.f32.mrb[49].mxu1  ;;  %v2277_v46 = vadd.f32 %v2268_v59, %v2190_v30  ;;  %v2312_v56 = vunpack.c.h.bf16 %v2932_v13  ;;  %v3391_v30 = vld [vmem:[%s4876_s3] ss:$16 sps:$4 sm:$0xff]  }
 0x72b   : > { %v2276_v26 = vadd.f32 %v2229_v16, %v2189_v62  ;;  %v2231_v33 = vpop.f32.mrb[50].mxu0  ;;  %v2272_v27 = vpop.f32.mrb[50].mxu1  ;;  %v2278_v50 = vadd.f32 %v2270_v32, %v2191_v8  ;;  %v3392_v8 = vld [vmem:[%s4876_s3 + $0x8] ss:$16 sps:$4 sm:$0xff]  }
 0x72c   : > { %v2927_v10 = vmul.f32 -1.442695, %v2275_v4  ;;  %v2232_v14 = vpop.f32.mrb[51].mxu0  ;;  %v2273_v29 = vpop.f32.mrb[51].mxu1  ;;  %v2929_v41 = vmul.f32 -1.442695, %v2277_v46 }
 0x72d   : > { %v2928_v23 = vmul.f32 -1.442695, %v2276_v26  ;;  %v3393_v46 = vld [vmem:[%s4876_s3 + $0x24] ss:$16 sps:$4 sm:$0xff]  }
 0x72e   : > { %3248 = vpow2.f32 %v2927_v10 }
 0x72f   : > { %3250 = vpow2.f32 %v2928_v23 }
 0x730   : > { %3252 = vtanh.f32 %v2278_v50  ;;  %v3394_v50 = vld [vmem:[%s4876_s3 + $0x2c] ss:$16 sps:$4 sm:$0xff]  }
 0x731   : > { %3254 = vpow2.f32 %v2929_v41  ;;  %v3395_v41 = vld [vmem:[%s4876_s3 + $0x20] ss:$16 sps:$4 sm:$0xff]  }
 0x738   : > { %v3249_v54 = vpop.eup %3248 }
 0x739   : > { %v2288_v55 = vadd.f32 1.0, %v3249_v54  ;;  %v3251_v58 = vpop.eup %3250  ;;  %v3396_v54 = vld [vmem:[%s4876_s3 + $0x28] ss:$16 sps:$4 sm:$0xff]  }
 0x73a   : > { %v2289_v44 = vadd.f32 1.0, %v3251_v58  ;;  %v3253_v15 = vpop.eup %3252  ;;  %v3398_v58 = vld [vmem:[%s4876_s3 + $0x4c] ss:$16 sps:$4 sm:$0xff]  }
 0x73b   : > { %3256 = vrcp.f32 %v2288_v55  ;;  %v3255_v25 = vpop.eup %3254  ;;  %v3397_v55 = vld [vmem:[%s4876_s3 + $0x44] ss:$16 sps:$4 sm:$0xff]  }
 0x73c   : > { %3258 = vrcp.f32 %v2289_v44  ;;  %v2290_v3 = vadd.f32 1.0, %v3255_v25  ;;  %v3400_v25 = vld [vmem:[%s4876_s3 + $0x64] ss:$16 sps:$4 sm:$0xff]  }
 0x73e   : > { %3260 = vrcp.f32 %v2290_v3  ;;  %v3401_v3 = vld [vmem:[%s4876_s3 + $0x60] ss:$16 sps:$4 sm:$0xff]  }
 0x745   : > { %v3257_v17 = vpop.eup %3256 }
 0x746   : > { %v2299_v45 = vmul.f32 %v3257_v17, %v3253_v15  ;;  %v3259_v0 = vpop.eup %3258  ;;  %v3399_v15 = vld [vmem:[%s4876_s3 + $0x40] ss:$16 sps:$4 sm:$0xff]  }
 0x747   : > { %v2298_v57 = vmul.f32 %v3259_v0, %v4672_v52  ;;  %v2311_v52 = vunpack.c.l.bf16 %v2932_v13 }
 0x748   : > { %v3261_v4 = vpop.eup %3260 }
 0x749   : > { %v2348_v60 = vpop.f32.mrb[52].mxu0  ;;  %v2389_v38 = vpop.f32.mrb[52].mxu1  ;;  %v4782_v19 = vadd.f32 %v2299_v45, %v2298_v57 }
 0x74a   : > { %v2396_v35 = vadd.f32 %v2348_v60, %v2309_v49  ;;  %v2350_v22 = vpop.f32.mrb[53].mxu0  ;;  %v2391_v2 = vpop.f32.mrb[53].mxu1  ;;  %v2398_v59 = vadd.f32 %v2389_v38, %v2311_v52 }
 0x74b   : > { %v2397_v5 = vadd.f32 %v2350_v22, %v2310_v53  ;;  %v2352_v11 = vpop.f32.mrb[54].mxu0  ;;  %v2393_v47 = vpop.f32.mrb[54].mxu1  ;;  %3262 = vtanh.f32 %v4782_v19  ;;  %v2399_v16 = vadd.f32 %v2391_v2, %v2312_v56  ;;  %v3406_v53 = vld [vmem:[%s4876_s3 + $0xc4] ss:$16 sps:$4 sm:$0xff]  }
 0x74c   : > { %v2933_v48 = vmul.f32 -1.442695, %v2396_v35  ;;  %v2353_v20 = vpop.f32.mrb[55].mxu0  ;;  %v2394_v40 = vpop.f32.mrb[55].mxu1  ;;  %v2935_v7 = vmul.f32 -1.442695, %v2398_v59 }
 0x74d   : > { %v2934_v62 = vmul.f32 -1.442695, %v2397_v5  ;;  %v2938_v5 = vld [vmem:[%s3469_s10 + $0x78] sm:$0xff] }
 0x74e   : > { %3264 = vpow2.f32 %v2933_v48  ;;  %v2433_v52 = vunpack.c.h.bf16 %v2938_v5 }
 0x74f   : > { %3266 = vpow2.f32 %v2934_v62  ;;  %v2432_v62 = vunpack.c.l.bf16 %v2938_v5 }
 0x750   : > { %3268 = vtanh.f32 %v2399_v16 }
 0x751   : > { %3270 = vpow2.f32 %v2935_v7 }
 0x755   : > { %v3263_v32 = vpop.eup %3262 }
 0x756   : > { %v2302_v26 = vmul.f32 %v3263_v32, %v3261_v4 }
 0x758   : > { %v3265_v33 = vpop.eup %3264  ;;  %v2303_v10 = vmul.f32 %v4585_v61, %v2302_v26  ;;  %v2434_v14 = vpack.c.bf16 %v2302_v26, %v2302_v26 }
 0x759   : > { %v2409_v27 = vadd.f32 1.0, %v3265_v33  ;;  %v3267_v29 = vpop.eup %3266 }
 0x75a   : > { %v2410_v23 = vadd.f32 1.0, %v3267_v29  ;;  %2930 = vst [vmem:[%s3479_s17 + $0x30] sm:$0xff] %v2303_v10  ;;  %2468 = vmatmul.mubr.bf16.vlgmr.msra.gmra.mrb[56].mxu0 %v2434_v14  ;;  %2509 = vmatmul.mubr.bf16.vlgmr.msra.gmra.mrb[56].mxu1 %v2434_v14 }
 0x75b   : > { %3272 = vrcp.f32 %v2409_v27  ;;  %2556 = vmatpush1.bf16.msra.mxu0 %v3391_v30  ;;  %2597 = vmatpush1.bf16.msra.mxu1 %v3392_v8  ;;  %v2548_v27 = vld [vmem:[%s3474_s14] sm:$0xff] }
 0x75c   : > { %3274 = vrcp.f32 %v2410_v23  ;;  %2557 = vmatprep.subr.bf16.mxu0 %v3393_v46  ;;  %2598 = vmatprep.subr.bf16.mxu1 %v3394_v50  ;;  %v2550_v23 = vunpack.c.l.bf16 %v2548_v27  ;;  %v2551_v46 = vunpack.c.h.bf16 %v2548_v27 }
 0x75d   : > { %2587 = vmatprep.mubr.bf16.mxu0 %v4992_v63  ;;  %2628 = vmatprep.mubr.bf16.mxu1 %v4992_v63  ;;  %v3269_v63 = vpop.eup %3268 }
 0x75e   : > { %v3271_v44 = vpop.eup %3270 }
 0x75f   : > { %2558 = vmatpush1.bf16.msra.mxu0 %v3395_v41  ;;  %2599 = vmatpush1.bf16.msra.mxu1 %v3396_v54  ;;  %v2411_v49 = vadd.f32 1.0, %v3271_v44 }
 0x760   : > { %2559 = vmatprep.subr.bf16.mxu0 %v3397_v55  ;;  %2600 = vmatprep.subr.bf16.mxu1 %v3398_v58 }
 0x761   : > { %3276 = vrcp.f32 %v2411_v49 }
 0x763   : > { %2560 = vmatpush1.bf16.msra.mxu0 %v3399_v15  ;;  %2601 = vmatpush1.bf16.msra.mxu1 %v4449_v21  ;;  %v3402_v21 = vld [vmem:[%s4876_s3 + $0x84] ss:$16 sps:$4 sm:$0xff]   ;;  %v2549_v15 = vld [vmem:[%s3474_s14 + $0x8] sm:$0xff] }
 0x764   : > { %2561 = vmatprep.subr.bf16.mxu0 %v3400_v25  ;;  %2602 = vmatprep.subr.bf16.mxu1 %v4456_v6 }
 0x765   : > { %v3273_v28 = vpop.eup %3272 }
 0x766   : > { %v2420_v17 = vmul.f32 %v3273_v28, %v3269_v63  ;;  %v3275_v45 = vpop.eup %3274 }
 0x767   : > { %v2419_v0 = vmul.f32 %v3275_v45, %v4697_v24  ;;  %2562 = vmatpush1.bf16.msra.mxu0 %v3401_v3  ;;  %2603 = vmatpush1.bf16.msra.mxu1 %v4464_v9  ;;  %v3403_v24 = vld [vmem:[%s4876_s3 + $0x80] ss:$16 sps:$4 sm:$0xff]   ;;  %v3404_v9 = vld [vmem:[%s4876_s3 + $0xa4] ss:$16 sps:$4 sm:$0xff]  }
 0x768   : > { %2563 = vmatprep.subr.bf16.mxu0 %v3402_v21  ;;  %2604 = vmatprep.subr.bf16.mxu1 %v4471_v36  ;;  %v3405_v36 = vld [vmem:[%s4876_s3 + $0xa0] ss:$16 sps:$4 sm:$0xff]   ;;  %v2552_v21 = vunpack.c.l.bf16 %v2549_v15 }
 0x769   : > { %v4831_v6 = vadd.f32 %v2420_v17, %v2419_v0 }
 0x76b   : > { %3278 = vtanh.f32 %v4831_v6  ;;  %2564 = vmatpush1.bf16.msra.mxu0 %v3403_v24  ;;  %2605 = vmatpush1.bf16.msra.mxu1 %v4481_v51  ;;  %v3277_v51 = vpop.eup %3276 }
 0x76c   : > { %2565 = vmatprep.subr.bf16.mxu0 %v3404_v9  ;;  %2606 = vmatprep.subr.bf16.mxu1 %v4488_v12  ;;  %v3407_v12 = vld [vmem:[%s4876_s3 + $0xe4] ss:$16 sps:$4 sm:$0xff]  }
 0x76f   : > { %2566 = vmatpush1.bf16.msra.mxu0 %v3405_v36  ;;  %2607 = vmatpush1.bf16.msra.mxu1 %v4495_v1 }
 0x770   : > { %2567 = vmatprep.subr.bf16.mxu0 %v3406_v53  ;;  %2608 = vmatprep.subr.bf16.mxu1 %v4502_v39 }
 0x773   : > { %2568 = vmatpush1.bf16.msra.mxu0 %v4508_v37  ;;  %2609 = vmatpush1.bf16.msra.mxu1 %v4514_v34  ;;  %v2937_v34 = vld [vmem:[%s3469_s10 + $0x70] sm:$0xff] }
 0x774   : > { %2569 = vmatprep.subr.bf16.mxu0 %v3407_v12  ;;  %2610 = vmatprep.subr.bf16.mxu1 %v4521_v43  ;;  %v2430_v60 = vunpack.c.l.bf16 %v2937_v34  ;;  %v2431_v38 = vunpack.c.h.bf16 %v2937_v34 }
 0x775   : > { %v3279_v1 = vpop.eup %3278 }
 0x776   : > { %v2423_v57 = vmul.f32 %v3279_v1, %v3277_v51 }
 0x777   : > { %2570 = vmatpush1.bf16.msra.mxu0 %v4527_v42  ;;  %2611 = vmatpush1.bf16.msra.mxu1 %v4533_v18 }
 0x778   : > { %v2424_v39 = vmul.f32 %v4628_v31, %v2423_v57  ;;  %v2554_v37 = vpack.c.bf16 %v2423_v57, %v2423_v57 }
 0x77a   : > { %2936 = vst [vmem:[%s3484_s21 + $0x8] sm:$0xff] %v2424_v39  ;;  %2588 = vmatmul.mubr.bf16.vlgmr.msra.gmra.mrb[60].mxu0 %v2554_v37  ;;  %2629 = vmatmul.mubr.bf16.vlgmr.msra.gmra.mrb[60].mxu1 %v2554_v37 }
 0x82d   : > { %v2469_v35 = vpop.f32.mrb[56].mxu0  ;;  %v2510_v22 = vpop.f32.mrb[56].mxu1 }
 0x82e   : > { %v2517_v2 = vadd.f32 %v2469_v35, %v2430_v60  ;;  %v2471_v43 = vpop.f32.mrb[57].mxu0  ;;  %v2512_v13 = vpop.f32.mrb[57].mxu1  ;;  %v2519_v56 = vadd.f32 %v2510_v22, %v2432_v62 }
 0x82f   : > { %v2518_v11 = vadd.f32 %v2471_v43, %v2431_v38  ;;  %v2473_v47 = vpop.f32.mrb[58].mxu0  ;;  %v2514_v42 = vpop.f32.mrb[58].mxu1  ;;  %v2520_v59 = vadd.f32 %v2512_v13, %v2433_v52 }
 0x830   : > { %v2939_v48 = vmul.f32 -1.442695, %v2517_v2  ;;  %v2474_v18 = vpop.f32.mrb[59].mxu0  ;;  %v2515_v20 = vpop.f32.mrb[59].mxu1  ;;  %v2941_v4 = vmul.f32 -1.442695, %v2519_v56 }
 0x831   : > { %v2940_v40 = vmul.f32 -1.442695, %v2518_v11 }
 0x832   : > { %3280 = vpow2.f32 %v2939_v48 }
 0x833   : > { %3282 = vpow2.f32 %v2940_v40 }
 0x834   : > { %3284 = vtanh.f32 %v2520_v59 }
 0x835   : > { %3286 = vpow2.f32 %v2941_v4 }
 0x83c   : > { %v3281_v16 = vpop.eup %3280 }
 0x83d   : > { %v2530_v32 = vadd.f32 1.0, %v3281_v16  ;;  %v3283_v7 = vpop.eup %3282 }
 0x83e   : > { %v2531_v26 = vadd.f32 1.0, %v3283_v7  ;;  %v3285_v33 = vpop.eup %3284 }
 0x83f   : > { %3288 = vrcp.f32 %v2530_v32  ;;  %v3287_v10 = vpop.eup %3286 }
 0x840   : > { %3290 = vrcp.f32 %v2531_v26  ;;  %v2532_v8 = vadd.f32 1.0, %v3287_v10 }
 0x842   : > { %3292 = vrcp.f32 %v2532_v8 }
 0x849   : > { %v3289_v14 = vpop.eup %3288 }
 0x84a   : > { %v2541_v29 = vmul.f32 %v3289_v14, %v3285_v33  ;;  %v3291_v30 = vpop.eup %3290 }
 0x84b   : > { %v2540_v50 = vmul.f32 %v3291_v30, %v4782_v19  ;;  %v2553_v19 = vunpack.c.h.bf16 %v2549_v15 }
 0x84c   : > { %v3293_v9 = vpop.eup %3292 }
 0x84d   : > { %v2589_v41 = vpop.f32.mrb[60].mxu0  ;;  %v2630_v54 = vpop.f32.mrb[60].mxu1  ;;  %v2542_v55 = vadd.f32 %v2541_v29, %v2540_v50 }
 0x84e   : > { %v2637_v58 = vadd.f32 %v2589_v41, %v2550_v23  ;;  %v2591_v63 = vpop.f32.mrb[61].mxu0  ;;  %v2632_v44 = vpop.f32.mrb[61].mxu1  ;;  %v2639_v24 = vadd.f32 %v2630_v54, %v2552_v21 }
 0x84f   : > { %v2638_v28 = vadd.f32 %v2591_v63, %v2551_v46  ;;  %v2593_v25 = vpop.f32.mrb[62].mxu0  ;;  %v2634_v17 = vpop.f32.mrb[62].mxu1  ;;  %3294 = vtanh.f32 %v2542_v55  ;;  %2668 = vst [vmem:[#allocation3] sm:$0xff] %v2542_v55  ;;  %v2640_v36 = vadd.f32 %v2632_v44, %v2553_v19 }
 0x850   : > { %v2943_v45 = vmul.f32 -1.442695, %v2637_v58  ;;  %v2594_v49 = vpop.f32.mrb[63].mxu0  ;;  %v2635_v0 = vpop.f32.mrb[63].mxu1  ;;  %v2945_v51 = vmul.f32 -1.442695, %v2639_v24 }
 0x851   : > { %v2944_v3 = vmul.f32 -1.442695, %v2638_v28 }
 0x852   : > { %3296 = vpow2.f32 %v2943_v45 }
 0x853   : > { %3298 = vpow2.f32 %v2944_v3 }
 0x854   : > { %3300 = vtanh.f32 %v2640_v36 }
 0x855   : > { %3302 = vpow2.f32 %v2945_v51 }
 0x859   : > { %v3295_v53 = vpop.eup %3294 }
 0x85a   : > { %v2544_v12 = vmul.f32 %v3295_v53, %v3293_v9 }
 0x85c   : > { %v3297_v1 = vpop.eup %3296  ;;  %v2545_v57 = vmul.f32 %v4585_v61, %v2544_v12  ;;  %2667 = vst [vmem:[#allocation2] sm:$0xff] %v2544_v12 }
 0x85d   : > { %v2650_v39 = vadd.f32 1.0, %v3297_v1  ;;  %v3299_v37 = vpop.eup %3298 }
 0x85e   : > { %2942 = vst [vmem:[%s3479_s17 + $0x38] sm:$0xff] %v2545_v57  ;;  %v2651_v34 = vadd.f32 1.0, %v3299_v37  ;;  %v3301_v60 = vpop.eup %3300 }
 0x85f   : > { %3304 = vrcp.f32 %v2650_v39  ;;  %v3303_v38 = vpop.eup %3302 }
 0x860   : > { %3306 = vrcp.f32 %v2651_v34  ;;  %v2652_v43 = vadd.f32 1.0, %v3303_v38 }
 0x862   : > { %3308 = vrcp.f32 %v2652_v43 }
 0x869   : > { %v3305_v35 = vpop.eup %3304 }
 0x86a   : > { %v2661_v22 = vmul.f32 %v3305_v35, %v3301_v60  ;;  %v3307_v2 = vpop.eup %3306 }
 0x86b   : > { %v2660_v13 = vmul.f32 %v3307_v2, %v4831_v6 }
 0x86c   : > { %v3309_v61 = vpop.eup %3308 }
 0x86d   : > { %v2662_v5 = vadd.f32 %v2661_v22, %v2660_v13 }
 0x86f   : > { %3310 = vtanh.f32 %v2662_v5  ;;  %2670 = vst [vmem:[#allocation5] sm:$0xff] %v2662_v5 }
 0x879   : > { %v3311_v11 = vpop.eup %3310 }
 0x87a   : > { %v2664_v47 = vmul.f32 %v3311_v11, %v3309_v61 }
 0x87c   : > { %v2665_v42 = vmul.f32 %v4628_v31, %v2664_v47  ;;  %2669 = vst [vmem:[#allocation4] sm:$0xff] %v2664_v47 }
 0x87e   : > { %2666 = vst [vmem:[%s3484_s21] sm:$0xff] %v2665_v42 }
 0x87f PF: > { %s18_s24 = sadd.s32 1, %s3414_s24  }
 0x880   : > { %p15_p6 = scmp.ge.s32.totalorder %s18_s24, 4  }
 0x882   :  { %17 = sbr.rel (!%p15_p6) target bundleno = 1 (0x1), region = 121 }

</bundles_post_ra>
